<compile_context>
chip_gen: v7x
topology: tpu7x:2x2x1
jax: 0.10.0
libtpu: 0.0.40
codegen_flags: <defaults>
</compile_context>

<pallas_src>
import math
from functools import partial

import jax
import jax.numpy as jnp
from jax.experimental import pallas as pl
from jax.experimental.pallas import tpu as pltpu

LN_EPS = 1e-5
SCALE = 30.0
BF16 = jnp.bfloat16
F32 = jnp.float32


# --------------------------------------------------------------------------
# generation-aware VMEM planning
# --------------------------------------------------------------------------
def _tpu_vmem_capacity_bytes():
    # v5e/v6e: 128 MiB, v7x: 64 MiB per TensorCore.  Fall back to the tightest
    # figure (v7x) when no TPU is attached (e.g. interpret mode on CPU).
    try:
        return int(pltpu.get_tpu_info().vmem_capacity_bytes)
    except Exception:
        return 64 << 20


_VMEM_CAP = _tpu_vmem_capacity_bytes()
# scoped VMEM limit for the kernels (leave headroom for compiler scratch).
_VMEM_LIMIT = int(max(min(_VMEM_CAP - (16 << 20), 96 << 20), 24 << 20))
# total per-kernel VMEM target used when choosing the row tile: double-buffered
# stream blocks + live f32 intermediates + (x2) weights must fit below this.
_KERNEL_VMEM_BUDGET = int(max(min(_VMEM_LIMIT - (16 << 20), 40 << 20), 12 << 20))

_CPARAMS = pltpu.CompilerParams(
    dimension_semantics=("parallel",),
    vmem_limit_bytes=_VMEM_LIMIT,
)


# --------------------------------------------------------------------------
# elementwise helpers (shared by kernels and the pure-JAX reference path)
# --------------------------------------------------------------------------
def _gelu(x):
    # tanh-approx GELU (== torch GELU(approximate='tanh'), |err| vs exact ~1e-3).
    # tanh written via a single EUP exp: lowers on every TPU generation and
    # keeps VALU pressure low.
    u = 0.7978845608028654 * (x + 0.044715 * x * x * x)
    t = 1.0 - 2.0 / (jnp.exp(2.0 * u) + 1.0)
    return 0.5 * x * (1.0 + t)


def _layernorm(x, gamma, beta):
    mu = jnp.mean(x, axis=-1, keepdims=True)
    var = jnp.mean(jnp.square(x - mu), axis=-1, keepdims=True)
    return (x - mu) * jax.lax.rsqrt(var + LN_EPS) * gamma + beta


def _mm(x, w):
    # bf16 x bf16 -> f32 MXU matmul (w is already bf16; x cast here if needed).
    return jnp.dot(x.astype(BF16), w, preferred_element_type=jnp.float32)


# --------------------------------------------------------------------------
# shared math: the Pallas kernels call these on VMEM tiles; the reference path
# calls them on the full (flattened) arrays, so the Pallas plumbing can be
# validated against numerically identical math.
# --------------------------------------------------------------------------
def _enc_node_math(h_V, h_en, mask_attend, mask_V,
                   W1s, W1en, b1, W2, b2, W3, b3, ln1g, ln1b,
                   Wi, bi, Wo, bo, ln2g, ln2b, *, scale):
    # h_V [TM,H] f32, h_en [TM*K,2H] bf16 ( [h_E || gather(h_V)] ),
    # mask_attend [TM,K] f32, mask_V [TM,1] f32
    TM, H = h_V.shape
    K = mask_attend.shape[1]
    pre = _mm(h_V, W1s) + b1                                   # self chunk, once/row
    m = _mm(h_en, W1en)                                        # single 2H-deep matmul
    m = _gelu(m.reshape(TM, K, H) + pre[:, None, :])
    m = _gelu(_mm(m.reshape(TM * K, H), W2) + b2)
    # mask + neighbor-sum BEFORE W3:
    #   sum_k m_k (A_k W3 + b3) == (sum_k m_k A_k) W3 + (sum_k m_k) b3
    m = m.reshape(TM, K, H) * mask_attend[:, :, None]
    msum = jnp.sum(mask_attend, axis=1, keepdims=True)         # [TM,1]
    dh = (_mm(jnp.sum(m, axis=1), W3) + msum * b3) * (1.0 / scale)
    x = _layernorm(h_V + dh, ln1g, ln1b)                       # dropout == identity
    ff = _gelu(_mm(x, Wi) + bi)
    ff = _mm(ff, Wo) + bo
    y = _layernorm(x + ff, ln2g, ln2b)
    return y * mask_V


def _enc_edge_math(h_V, h_en,
                   W11s, W11en, b11, W12, b12, W13, b13, ln3g, ln3b):
    # h_V [TM,H] f32, h_en [TM*K,2H] bf16 ( [h_E || gather(h_V_new)] )
    # returns updated h_E [TM*K,H] f32 (stored as bf16 by the kernel wrapper)
    TM, H = h_V.shape
    K = h_en.shape[0] // TM
    h_E = h_en[:, :H].astype(F32)                              # residual (f32 add)
    pre = _mm(h_V, W11s) + b11
    m = _mm(h_en, W11en)                                       # single 2H-deep matmul
    m = _gelu(m.reshape(TM, K, H) + pre[:, None, :]).reshape(TM * K, H)
    m = _gelu(_mm(m, W12) + b12)
    m = _mm(m, W13) + b13
    return _layernorm(h_E + m, ln3g, ln3b)


def _dec_node_math(h_V, h_in, nbr_mask, mask_V,
                   W1s, W1in, b1, W2, b2, W3, b3, ln1g, ln1b,
                   Wi, bi, Wo, bo, ln2g, ln2b, *, scale):
    # h_V [TM,H] f32,
    # h_in [TM*K,3H] bf16 == [mask_1D*h_E, mask_bw*gS, mask_bw*gV + mask_fw*gVenc]
    # nbr_mask [TM,K] f32 (1 for real neighbor slots; all-ones if K unpadded),
    # mask_V [TM,1] f32
    TM, H = h_V.shape
    K = nbr_mask.shape[1]
    pre = _mm(h_V, W1s) + b1
    m = _mm(h_in, W1in)                                        # single 3H-deep matmul
    m = _gelu(m.reshape(TM, K, H) + pre[:, None, :])
    m = _gelu(_mm(m.reshape(TM * K, H), W2) + b2)
    # DecLayer has mask_attend=None: with nbr_mask all ones this is the plain
    # neighbor sum + K*b3; padded slots (if any) are excluded.
    m = m.reshape(TM, K, H) * nbr_mask[:, :, None]
    nsum = jnp.sum(nbr_mask, axis=1, keepdims=True)
    dh = (_mm(jnp.sum(m, axis=1), W3) + nsum * b3) * (1.0 / scale)
    x = _layernorm(h_V + dh, ln1g, ln1b)
    ff = _gelu(_mm(x, Wi) + bi)
    ff = _mm(ff, Wo) + bo
    y = _layernorm(x + ff, ln2g, ln2b)
    return y * mask_V


def _logits_math(x, W, b):
    z = _mm(x, W) + b
    z = z - jnp.max(z, axis=-1, keepdims=True)
    e = jnp.exp(z)
    # exact division: rows must sum to 1 at f32 precision (approx reciprocal
    # previously broke the sum-to-1 check).
    return e / jnp.sum(e, axis=-1, keepdims=True)


# --------------------------------------------------------------------------
# Pallas kernel bodies
# --------------------------------------------------------------------------
def _enc_node_kernel(*refs, scale):
    o = refs[-1]
    o[...] = _enc_node_math(*[r[...] for r in refs[:-1]], scale=scale).astype(o.dtype)


def _enc_edge_kernel(*refs):
    o = refs[-1]
    o[...] = _enc_edge_math(*[r[...] for r in refs[:-1]]).astype(o.dtype)


def _dec_node_kernel(*refs, scale):
    o = refs[-1]
    o[...] = _dec_node_math(*[r[...] for r in refs[:-1]], scale=scale).astype(o.dtype)


def _linear_kernel(x_ref, W_ref, b_ref, o_ref):
    o_ref[...] = (_mm(x_ref[...], W_ref[...]) + b_ref[...]).astype(o_ref.dtype)


def _logits_kernel(x_ref, W_ref, b_ref, o_ref):
    # TODO(synk): pad the 21-wide output to 128 lanes (slice outside) if this
    # kernel ever shows up in traces (masked vst partial stores).
    o_ref[...] = _logits_math(x_ref[...], W_ref[...], b_ref[...])


# --------------------------------------------------------------------------
# tiling / spec helpers
# --------------------------------------------------------------------------
def _row_tile(M, stream_row_bytes, scratch_row_bytes=0, fixed_bytes=0,
              max_tile=1024, budget=None):
    """Pick a row tile TM dividing M (multiple of 8) so that
         2*TM*stream_row_bytes   (double-buffered input/output blocks)
       + TM*scratch_row_bytes    (live f32 intermediates inside the kernel)
       + 2*fixed_bytes           (default-double-buffered constant weights)
    fits the per-kernel VMEM budget; prefer an even grid with >= 4 steps
    (v7x megacore sharding of the 'parallel' row axis), then >= 2 steps."""
    budget = _KERNEL_VMEM_BUDGET if budget is None else budget
    cands = [t for t in range(8, min(M, max_tile) + 1, 8) if M % t == 0]
    if not cands:
        # TODO(synk): pad M (= B*N) to a tile-friendly multiple in the wrapper
        # instead of falling back to one full-size block for awkward sizes.
        return M
    avail = budget - 2 * fixed_bytes
    per_row = 2 * stream_row_bytes + scratch_row_bytes
    fit = [t for t in cands if t * per_row <= avail] or cands[:1]
    for ok in (lambda t: (M // t) >= 4 and (M // t) % 2 == 0,
               lambda t: (M // t) >= 2):
        pref = [t for t in fit if ok(t)]
        if pref:
            return max(pref)
    return max(fit)


def _full_spec(shape):
    nd = len(shape)
    # TODO(synk): mark these constant-index (weight) blocks single-buffered
    # (pipeline_mode=pl.Buffered(1)) to save one weight copy of VMEM per kernel
    # once that is safe for the auto-pipeline.
    return pl.BlockSpec(shape, lambda i, _nd=nd: (0,) * _nd)


def _weight_bytes(wargs):
    return sum(int(w.size) * w.dtype.itemsize for w in wargs)


# --------------------------------------------------------------------------
# Pallas wrappers
# --------------------------------------------------------------------------
def enc_node_update(h_V, h_en, mask_attend, mask_V, wargs, scale=SCALE):
    M, H = h_V.shape
    K = mask_attend.shape[1]
    stream = H * 4 + K * 2 * H * 2 + K * 4 + 4 + H * 4        # in+out bytes / row
    scratch = 3 * K * H * 4                                    # live f32 temps / row
    wbytes = _weight_bytes(wargs)
    TM = _row_tile(M, stream, scratch, wbytes)
    cost = pl.CostEstimate(
        flops=int(M * H * H * (6 * K + 20)),
        transcendentals=int(M * H * (2 * K + 5)),
        bytes_accessed=int(M * stream + wbytes))
    in_specs = [
        pl.BlockSpec((TM, H), lambda i: (i, 0)),
        pl.BlockSpec((TM * K, 2 * H), lambda i: (i, 0)),
        pl.BlockSpec((TM, K), lambda i: (i, 0)),
        pl.BlockSpec((TM, 1), lambda i: (i, 0)),
    ] + [_full_spec(w.shape) for w in wargs]
    return pl.pallas_call(
        partial(_enc_node_kernel, scale=scale),
        out_shape=jax.ShapeDtypeStruct((M, H), F32),
        grid=(M // TM,),
        in_specs=in_specs,
        out_specs=pl.BlockSpec((TM, H), lambda i: (i, 0)),
        compiler_params=_CPARAMS,
        cost_estimate=cost,
    )(h_V, h_en, mask_attend, mask_V, *wargs)


def enc_edge_update(h_V, h_en, wargs):
    M, H = h_V.shape
    MK = h_en.shape[0]
    K = MK // M
    stream = H * 4 + K * 2 * H * 2 + K * H * 2                 # bf16 output
    scratch = 3 * K * H * 4
    wbytes = _weight_bytes(wargs)
    TM = _row_tile(M, stream, scratch, wbytes)
    cost = pl.CostEstimate(
        flops=int(M * H * H * (8 * K + 2)),
        transcendentals=int(M * H * 2 * K),
        bytes_accessed=int(M * stream + wbytes))
    in_specs = [
        pl.BlockSpec((TM, H), lambda i: (i, 0)),
        pl.BlockSpec((TM * K, 2 * H), lambda i: (i, 0)),
    ] + [_full_spec(w.shape) for w in wargs]
    return pl.pallas_call(
        _enc_edge_kernel,
        out_shape=jax.ShapeDtypeStruct((MK, H), BF16),         # h_E stored bf16
        grid=(M // TM,),
        in_specs=in_specs,
        out_specs=pl.BlockSpec((TM * K, H), lambda i: (i, 0)),
        compiler_params=_CPARAMS,
        cost_estimate=cost,
    )(h_V, h_en, *wargs)


def dec_node_update(h_V, h_in, nbr_mask, mask_V, wargs, scale=SCALE):
    M, H = h_V.shape
    K = nbr_mask.shape[1]
    stream = H * 4 + K * 3 * H * 2 + K * 4 + 4 + H * 4
    scratch = 3 * K * H * 4
    wbytes = _weight_bytes(wargs)
    TM = _row_tile(M, stream, scratch, wbytes)
    cost = pl.CostEstimate(
        flops=int(M * H * H * (8 * K + 20)),
        transcendentals=int(M * H * (2 * K + 5)),
        bytes_accessed=int(M * stream + wbytes))
    in_specs = [
        pl.BlockSpec((TM, H), lambda i: (i, 0)),
        pl.BlockSpec((TM * K, 3 * H), lambda i: (i, 0)),
        pl.BlockSpec((TM, K), lambda i: (i, 0)),
        pl.BlockSpec((TM, 1), lambda i: (i, 0)),
    ] + [_full_spec(w.shape) for w in wargs]
    return pl.pallas_call(
        partial(_dec_node_kernel, scale=scale),
        out_shape=jax.ShapeDtypeStruct((M, H), F32),
        grid=(M // TM,),
        in_specs=in_specs,
        out_specs=pl.BlockSpec((TM, H), lambda i: (i, 0)),
        compiler_params=_CPARAMS,
        cost_estimate=cost,
    )(h_V, h_in, nbr_mask, mask_V, *wargs)


def linear(x, W, b, out_dtype=F32):
    M, Cin = x.shape
    Cout = W.shape[1]
    Wb = W.astype(BF16)
    stream = Cin * x.dtype.itemsize + Cout * jnp.dtype(out_dtype).itemsize
    TM = _row_tile(M, stream, 0, _weight_bytes((Wb, b)), max_tile=2048)
    return pl.pallas_call(
        _linear_kernel,
        out_shape=jax.ShapeDtypeStruct((M, Cout), out_dtype),
        grid=(M // TM,),
        in_specs=[pl.BlockSpec((TM, Cin), lambda i: (i, 0)),
                  _full_spec(Wb.shape), _full_spec(b.shape)],
        out_specs=pl.BlockSpec((TM, Cout), lambda i: (i, 0)),
        compiler_params=_CPARAMS,
    )(x, Wb, b)


def logits_softmax(x, W, b):
    M, H = x.shape
    L = W.shape[1]
    Wb = W.astype(BF16)
    TM = _row_tile(M, H * 4 + L * 4, 0, _weight_bytes((Wb, b)), max_tile=2048)
    return pl.pallas_call(
        _logits_kernel,
        out_shape=jax.ShapeDtypeStruct((M, L), F32),
        grid=(M // TM,),
        in_specs=[pl.BlockSpec((TM, H), lambda i: (i, 0)),
                  _full_spec(Wb.shape), _full_spec(b.shape)],
        out_specs=pl.BlockSpec((TM, L), lambda i: (i, 0)),
        compiler_params=_CPARAMS,
    )(x, Wb, b)


# --------------------------------------------------------------------------
# identical-math pure-JAX wrappers (validate the Pallas plumbing)
# --------------------------------------------------------------------------
def _ref_enc_node(h_V, h_en, mask_attend, mask_V, wargs, scale=SCALE):
    return _enc_node_math(h_V, h_en, mask_attend, mask_V, *wargs, scale=scale)


def _ref_enc_edge(h_V, h_en, wargs):
    return _enc_edge_math(h_V, h_en, *wargs).astype(BF16)


def _ref_dec_node(h_V, h_in, nbr_mask, mask_V, wargs, scale=SCALE):
    return _dec_node_math(h_V, h_in, nbr_mask, mask_V, *wargs, scale=scale)


def _ref_linear(x, W, b, out_dtype=F32):
    return (_mm(x, W.astype(BF16)) + b).astype(out_dtype)


def _ref_logits(x, W, b):
    return _logits_math(x, W.astype(BF16), b)


# --------------------------------------------------------------------------
# per-layer weight prep: self-row split + wide-contraction W1 block, bf16 cast
# --------------------------------------------------------------------------
def _enc_node_wargs(p, H):
    W1 = p['W1']                                   # [3H,H]: rows = [self, h_E, nbr]
    return (W1[:H].astype(BF16), W1[H:].astype(BF16),
            p['b1'], p['W2'].astype(BF16), p['b2'], p['W3'].astype(BF16), p['b3'],
            p['ln1_g'], p['ln1_b'],
            p['Wi'].astype(BF16), p['bi'], p['Wo'].astype(BF16), p['bo'],
            p['ln2_g'], p['ln2_b'])


def _enc_edge_wargs(p, H):
    W11 = p['W11']                                 # [3H,H]
    return (W11[:H].astype(BF16), W11[H:].astype(BF16),
            p['b11'], p['W12'].astype(BF16), p['b12'], p['W13'].astype(BF16),
            p['b13'], p['ln3_g'], p['ln3_b'])


def _dec_node_wargs(p, H):
    W1 = p['W1']                                   # [4H,H]: rows = [self, h_E, gS, nbr]
    return (W1[:H].astype(BF16), W1[H:].astype(BF16),
            p['b1'], p['W2'].astype(BF16), p['b2'], p['W3'].astype(BF16), p['b3'],
            p['ln1_g'], p['ln1_b'],
            p['Wi'].astype(BF16), p['bi'], p['Wo'].astype(BF16), p['bo'],
            p['ln2_g'], p['ln2_b'])


# --------------------------------------------------------------------------
# glue: gathers / concatenations (data-dependent indexing stays in JAX)
# --------------------------------------------------------------------------
def gather_nodes(nodes, neighbor_idx):
    # nodes [B,N,C], neighbor_idx [B,N,K] -> [B,N,K,C]
    B, N, C = nodes.shape
    K = neighbor_idx.shape[2]
    flat = neighbor_idx.reshape(B, N * K)
    g = jnp.take_along_axis(nodes, flat[:, :, None], axis=1)
    return g.reshape(B, N, K, C)


def cat_neighbors_nodes(h_nodes, h_neighbors, E_idx):
    return jnp.concatenate([h_neighbors, gather_nodes(h_nodes, E_idx)], axis=-1)


# --------------------------------------------------------------------------
# parameter init (deterministic, xavier-uniform like the torch module)
# --------------------------------------------------------------------------
def _xavier(key, fan_in, fan_out):
    a = math.sqrt(6.0 / (fan_in + fan_out))
    return jax.random.uniform(key, (fan_in, fan_out), F32, -a, a)


def _linear_params(key, fan_in, fan_out):
    kw, kb = jax.random.split(key)
    W = _xavier(kw, fan_in, fan_out)          # stored (in, out): y = x @ W + b
    bound = 1.0 / math.sqrt(fan_in)
    b = jax.random.uniform(kb, (1, fan_out), F32, -bound, bound)
    return W, b


def _init_enc_layer(key, H):
    ks = jax.random.split(key, 8)
    p = {}
    p['W1'], p['b1'] = _linear_params(ks[0], 3 * H, H)
    p['W2'], p['b2'] = _linear_params(ks[1], H, H)
    p['W3'], p['b3'] = _linear_params(ks[2], H, H)
    p['W11'], p['b11'] = _linear_params(ks[3], 3 * H, H)
    p['W12'], p['b12'] = _linear_params(ks[4], H, H)
    p['W13'], p['b13'] = _linear_params(ks[5], H, H)
    p['Wi'], p['bi'] = _linear_params(ks[6], H, 4 * H)
    p['Wo'], p['bo'] = _linear_params(ks[7], 4 * H, H)
    for n in ('ln1', 'ln2', 'ln3'):
        p[n + '_g'] = jnp.ones((1, H), F32)
        p[n + '_b'] = jnp.zeros((1, H), F32)
    return p


def _init_dec_layer(key, H):
    ks = jax.random.split(key, 5)
    p = {}
    p['W1'], p['b1'] = _linear_params(ks[0], 4 * H, H)
    p['W2'], p['b2'] = _linear_params(ks[1], H, H)
    p['W3'], p['b3'] = _linear_params(ks[2], H, H)
    p['Wi'], p['bi'] = _linear_params(ks[3], H, 4 * H)
    p['Wo'], p['bo'] = _linear_params(ks[4], 4 * H, H)
    for n in ('ln1', 'ln2'):
        p[n + '_g'] = jnp.ones((1, H), F32)
        p[n + '_b'] = jnp.zeros((1, H), F32)
    return p


def init_model(key, H, F, vocab=21, num_letters=21, n_enc=3, n_dec=3):
    keys = jax.random.split(key, 4 + n_enc + n_dec)
    params = {}
    params['W_e'], params['b_e'] = _linear_params(keys[0], F, H)
    a = math.sqrt(6.0 / (vocab + H))
    params['W_s'] = jax.random.uniform(keys[1], (vocab, H), F32, -a, a)
    params['W_out'], params['b_out'] = _linear_params(keys[2], H, num_letters)
    params['enc'] = [_init_enc_layer(keys[4 + i], H) for i in range(n_enc)]
    params['dec'] = [_init_dec_layer(keys[4 + n_enc + i], H) for i in range(n_dec)]
    return params


# --------------------------------------------------------------------------
# ProteinMPNN forward
# --------------------------------------------------------------------------
@partial(jax.jit, static_argnames=("use_pallas",))
def protein_mpnn_forward(params, X, S, mask, E_idx, order_key, use_pallas=True):
    B, N, K0, Fdim = X.shape
    H = params['W_e'].shape[1]
    M = B * N

    # --- pad K to a multiple of 8: the in-kernel (TM*K,H)<->(TM,K,H) reshapes
    # stay (8,128)-aligned views.  Padded slots are masked everywhere. ---
    K = max(8, ((K0 + 7) // 8) * 8)
    if K != K0:
        pad = K - K0
        X = jnp.pad(X, ((0, 0), (0, 0), (0, pad), (0, 0)))
        E_idx = jnp.pad(E_idx, ((0, 0), (0, 0), (0, pad)))
    nbr_valid = (jnp.arange(K) < K0).astype(F32)                  # [K]
    MK = M * K

    enc_node_fn = enc_node_update if use_pallas else _ref_enc_node
    enc_edge_fn = enc_edge_update if use_pallas else _ref_enc_edge
    dec_node_fn = dec_node_update if use_pallas else _ref_dec_node
    lin_fn = linear if use_pallas else _ref_linear
    out_fn = logits_softmax if use_pallas else _ref_logits

    # ----- edge embedding: h_E = W_e(X), stored bf16 between layers -----
    h_E4 = lin_fn(X.reshape(MK, Fdim), params['W_e'], params['b_e'],
                  out_dtype=BF16).reshape(B, N, K, H)
    h_V = jnp.zeros((B, N, H), F32)

    mask_attend = gather_nodes(mask[:, :, None], E_idx)[..., 0]   # [B,N,K]
    mask_attend = (mask[:, :, None] * mask_attend * nbr_valid).reshape(M, K)
    mV = mask.reshape(M, 1)

    # ----- encoder -----
    for lp in params['enc']:
        nwargs = _enc_node_wargs(lp, H)
        ewargs = _enc_edge_wargs(lp, H)
        # single [MK,2H] bf16 W1 operand: [h_E || gather(h_V)] (wide contraction)
        h_en = jnp.concatenate([h_E4, gather_nodes(h_V, E_idx).astype(BF16)],
                               axis=-1).reshape(MK, 2 * H)
        h_V = enc_node_fn(h_V.reshape(M, H), h_en, mask_attend, mV,
                          nwargs).reshape(B, N, H)
        h_en = jnp.concatenate([h_E4, gather_nodes(h_V, E_idx).astype(BF16)],
                               axis=-1).reshape(MK, 2 * H)
        h_E4 = enc_edge_fn(h_V.reshape(M, H), h_en, ewargs).reshape(B, N, K, H)

    # ----- decoder setup (plain-JAX glue; no 3H/4H concats beyond the single
    # bf16 W1 operand are built) -----
    h_S = params['W_s'][S]                                        # [B,N,H]
    gS = gather_nodes(h_S, E_idx)                                 # [B,N,K,H]
    gVenc = gather_nodes(h_V, E_idx)                              # encoder h_V gather

    chain_M = mask
    noise = jnp.abs(jax.random.normal(order_key, chain_M.shape))
    decoding_order = jnp.argsort((chain_M + 0.0001) * noise, axis=-1)
    P = jax.nn.one_hot(decoding_order, N, dtype=F32)
    lower = 1.0 - jnp.triu(jnp.ones((N, N), F32))
    order_mask_backward = jnp.einsum('ij,biq,bjp->bqp', lower, P, P)
    ma = jnp.take_along_axis(order_mask_backward, E_idx, axis=2)[..., None]
    mask_1D = mask.reshape(B, N, 1, 1)
    valid4 = nbr_valid.reshape(1, 1, K, 1)
    mask_bw = mask_1D * ma * valid4                               # [B,N,K,1]
    mask_fw = mask_1D * (1.0 - ma) * valid4

    # layer-invariant ES chunk of the decoder W1 operand:
    #   mask_bw*[h_E,gS] + mask_fw*[h_E,0] == [mask_1D*h_E, mask_bw*gS]
    es = jnp.concatenate([(mask_1D * valid4) * h_E4.astype(F32), mask_bw * gS],
                         axis=-1).astype(BF16)                    # [B,N,K,2H]
    venc_fw = (mask_fw * gVenc).astype(BF16)                      # [B,N,K,H]
    dec_nbr_mask = jnp.broadcast_to(nbr_valid[None, :], (M, K))   # [M,K] f32

    # ----- decoder -----
    for lp in params['dec']:
        dwargs = _dec_node_wargs(lp, H)
        # fused decoder masking of the per-layer neighbor chunk, done inside
        # the XLA gather fusion; single [MK,3H] bf16 operand -> 3H contraction.
        chunk = mask_bw * gather_nodes(h_V, E_idx) + venc_fw
        h_in = jnp.concatenate([es, chunk.astype(BF16)], axis=-1).reshape(MK, 3 * H)
        h_V = dec_node_fn(h_V.reshape(M, H), h_in, dec_nbr_mask, mV,
                          dwargs).reshape(B, N, H)

    probs = out_fn(h_V.reshape(M, H), params['W_out'], params['b_out'])
    return probs.reshape(B, N, -1)


# --------------------------------------------------------------------------
# straight f32 / exact-GELU port of the PyTorch module (semantics sanity ref)
# --------------------------------------------------------------------------
@jax.jit
def reference_forward_f32(params, X, S, mask, E_idx, order_key):
    B, N, K, Fdim = X.shape
    H = params['W_e'].shape[1]

    def gelu(x):
        return 0.5 * x * (1.0 + jax.lax.erf(x * 0.7071067811865476))

    def ln(x, g, b):
        mu = jnp.mean(x, -1, keepdims=True)
        var = jnp.mean(jnp.square(x - mu), -1, keepdims=True)
        return (x - mu) * jax.lax.rsqrt(var + LN_EPS) * g + b

    def lin(x, W, b):
        return jnp.dot(x, W) + b

    def node_layer(p, h_V, h_E_in, mask_V, mask_attend, scale=SCALE):
        hexp = jnp.broadcast_to(h_V[:, :, None, :], h_E_in.shape[:3] + (H,))
        h_EV = jnp.concatenate([hexp, h_E_in], -1)
        m = lin(gelu(lin(gelu(lin(h_EV, p['W1'], p['b1'])),
                         p['W2'], p['b2'])), p['W3'], p['b3'])
        if mask_attend is not None:
            m = mask_attend[..., None] * m
        dh = jnp.sum(m, -2) / scale
        h_V = ln(h_V + dh, p['ln1_g'], p['ln1_b'])
        ff = lin(gelu(lin(h_V, p['Wi'], p['bi'])), p['Wo'], p['bo'])
        h_V = ln(h_V + ff, p['ln2_g'], p['ln2_b'])
        if mask_V is not None:
            h_V = mask_V[..., None] * h_V
        return h_V

    def edge_layer(p, h_V, h_E):
        h_EV = cat_neighbors_nodes(h_V, h_E, E_idx)
        hexp = jnp.broadcast_to(h_V[:, :, None, :], h_EV.shape[:3] + (H,))
        h_EV = jnp.concatenate([hexp, h_EV], -1)
        m = lin(gelu(lin(gelu(lin(h_EV, p['W11'], p['b11'])),
                         p['W12'], p['b12'])), p['W13'], p['b13'])
        return ln(h_E + m, p['ln3_g'], p['ln3_b'])

    h_E = lin(X, params['W_e'], params['b_e'])
    h_V = jnp.zeros((B, N, H), F32)
    mask_attend = gather_nodes(mask[:, :, None], E_idx)[..., 0]
    mask_attend = mask[:, :, None] * mask_attend
    for p in params['enc']:
        h_EV_in = cat_neighbors_nodes(h_V, h_E, E_idx)
        h_V = node_layer(p, h_V, h_EV_in, mask, mask_attend)
        h_E = edge_layer(p, h_V, h_E)

    h_S = params['W_s'][S]
    h_ES = cat_neighbors_nodes(h_S, h_E, E_idx)
    h_EX_encoder = cat_neighbors_nodes(jnp.zeros_like(h_S), h_E, E_idx)
    h_EXV_encoder = cat_neighbors_nodes(h_V, h_EX_encoder, E_idx)
    noise = jnp.abs(jax.random.normal(order_key, mask.shape))
    decoding_order = jnp.argsort((mask + 0.0001) * noise, axis=-1)
    P = jax.nn.one_hot(decoding_order, N, dtype=F32)
    lower = 1.0 - jnp.triu(jnp.ones((N, N), F32))
    omb = jnp.einsum('ij,biq,bjp->bqp', lower, P, P)
    ma = jnp.take_along_axis(omb, E_idx, axis=2)[..., None]
    mask_1D = mask.reshape(B, N, 1, 1)
    mask_bw = mask_1D * ma
    mask_fw = mask_1D * (1.0 - ma)
    h_EXV_encoder_fw = mask_fw * h_EXV_encoder
    for p in params['dec']:
        h_ESV = cat_neighbors_nodes(h_V, h_ES, E_idx)
        h_ESV = mask_bw * h_ESV + h_EXV_encoder_fw
        h_V = node_layer(p, h_V, h_ESV, mask, None)
    logits = lin(h_V, params['W_out'], params['b_out'])
    z = logits - jnp.max(logits, -1, keepdims=True)
    e = jnp.exp(z)
    return e / jnp.sum(e, -1, keepdims=True)


# --------------------------------------------------------------------------
if __name__ == "__main__":
    B, N, K = 2, 32, 8            # batch, residues, neighbors
    H, F = 32, 24                 # hidden_dim, edge_features (small test sizes;
                                  # real ProteinMPNN uses H=128 which is lane-dense)
    vocab, num_letters = 21, 21
    n_enc, n_dec = 3, 3

    root = jax.random.PRNGKey(0)
    k_param, k_x, k_s, k_idx, k_order = jax.random.split(root, 5)

    params = init_model(k_param, H, F, vocab, num_letters, n_enc, n_dec)

    X = jax.random.normal(k_x, (B, N, K, F), F32)
    S = jax.random.randint(k_s, (B, N), 0, vocab, dtype=jnp.int32)
    E_idx = jax.random.randint(k_idx, (B, N, K), 0, N, dtype=jnp.int32)
    mask = jnp.ones((B, N), F32).at[1, N - 3:].set(0.0)

    out = protein_mpnn_forward(params, X, S, mask, E_idx, k_order, use_pallas=True)
    out = jax.block_until_ready(out)

    ref = protein_mpnn_forward(params, X, S, mask, E_idx, k_order, use_pallas=False)
    ref = jax.block_until_ready(ref)

    ref_f32 = jax.block_until_ready(
        reference_forward_f32(params, X, S, mask, E_idx, k_order))

    assert out.shape == (B, N, num_letters), out.shape
    assert bool(jnp.all(jnp.isfinite(out)))
    # exact softmax division in the logits kernel -> rows sum to 1 at f32 precision
    assert bool(jnp.allclose(jnp.sum(out, axis=-1), 1.0, atol=1e-4))
    # Pallas plumbing vs. identical-math pure-JAX path.
    assert bool(jnp.allclose(out, ref, atol=2e-3, rtol=2e-3)), \
        float(jnp.max(jnp.abs(out - ref)))
    # End-to-end semantics vs. a straight f32 / exact-GELU port of the module
    # (differences: bf16 matmul operands + bf16 h_E storage, tanh-GELU,
    #  restructured-but-equivalent algebra).
    assert bool(jnp.allclose(out, ref_f32, atol=8e-2)), \
        float(jnp.max(jnp.abs(out - ref_f32)))
    print("KERNEL_OK")
</pallas_src>

<mosaic_0001>
module attributes {stable_mosaic.version = 11 : i64} {
  func.func @_linear_kernel(%arg0: i32, %arg1: memref<128x24xf32, #tpu.memory_space<vmem>>, %arg2: memref<24x32xbf16, #tpu.memory_space<vmem>>, %arg3: memref<1x32xf32, #tpu.memory_space<vmem>>, %arg4: memref<128x32xbf16, #tpu.memory_space<vmem>>) attributes {dimension_semantics = [#tpu.dimension_semantics<parallel>], iteration_bounds = array<i64: 4>, scalar_prefetch = 0 : i64, scratch_operands = 0 : i64, tpu.core_type = #tpu.core_type<tc>, window_params = [{transform_indices = @transform_0, window_bounds = array<i64: 128, 24>}, {pipeline_mode = #tpu.pipeline_mode<synchronous>, transform_indices = @transform_1, window_bounds = array<i64: 24, 32>}, {pipeline_mode = #tpu.pipeline_mode<synchronous>, transform_indices = @transform_2, window_bounds = array<i64: 1, 32>}, {transform_indices = @transform_3, window_bounds = array<i64: 128, 32>}]} {
    %c0 = arith.constant 0 : index
    %c0_0 = arith.constant 0 : index
    %0 = vector.load %arg1[%c0, %c0_0] : memref<128x24xf32, #tpu.memory_space<vmem>>, vector<128x24xf32>
    %c0_1 = arith.constant 0 : index
    %c0_2 = arith.constant 0 : index
    %1 = vector.load %arg2[%c0_1, %c0_2] : memref<24x32xbf16, #tpu.memory_space<vmem>>, vector<24x32xbf16>
    %2 = arith.truncf %0 : vector<128x24xf32> to vector<128x24xbf16>
    %cst = arith.constant dense<0.000000e+00> : vector<128x32xf32>
    %3 = tpu.matmul %2, %1, %cst {dimension_numbers = #tpu.dot_dimension_numbers<[1], [0], [0], [1], [0, 0, 1, 1], [], []>} : vector<128x24xbf16>, vector<24x32xbf16>, vector<128x32xf32> -> vector<128x32xf32>
    %c0_3 = arith.constant 0 : index
    %c0_4 = arith.constant 0 : index
    %4 = vector.load %arg3[%c0_3, %c0_4] : memref<1x32xf32, #tpu.memory_space<vmem>>, vector<1x32xf32>
    %5 = vector.broadcast %4 : vector<1x32xf32> to vector<128x32xf32>
    %6 = arith.addf %3, %5 : vector<128x32xf32>
    %7 = arith.truncf %6 : vector<128x32xf32> to vector<128x32xbf16>
    %c0_5 = arith.constant 0 : index
    %c0_6 = arith.constant 0 : index
    %8 = vector.load %arg4[%c0_5, %c0_6] : memref<128x32xbf16, #tpu.memory_space<vmem>>, vector<128x32xbf16>
    tpu.vector_store %arg4[%c0_5, %c0_6], %7 {strides = array<i32>} : memref<128x32xbf16, #tpu.memory_space<vmem>>, vector<128x32xbf16>,
    return
  }
  func.func @transform_0(%arg0: i32) -> (i32, i32) {
    %c0_i32 = arith.constant 0 : i32
    %c0_i32_0 = arith.constant 0 : i32
    return %arg0, %c0_i32 : i32, i32
  }
  func.func @transform_1(%arg0: i32) -> (i32, i32) {
    %c0_i32 = arith.constant 0 : i32
    %c0_i32_0 = arith.constant 0 : i32
    %c0_i32_1 = arith.constant 0 : i32
    return %c0_i32, %c0_i32_0 : i32, i32
  }
  func.func @transform_2(%arg0: i32) -> (i32, i32) {
    %c0_i32 = arith.constant 0 : i32
    %c0_i32_0 = arith.constant 0 : i32
    %c0_i32_1 = arith.constant 0 : i32
    return %c0_i32, %c0_i32_0 : i32, i32
  }
  func.func @transform_3(%arg0: i32) -> (i32, i32) {
    %c0_i32 = arith.constant 0 : i32
    %c0_i32_0 = arith.constant 0 : i32
    return %arg0, %c0_i32 : i32, i32
  }
}

module attributes {stable_mosaic.version = 11 : i64} {
  func.func @_enc_node_kernel(%arg0: i32, %arg1: memref<16x32xf32, #tpu.memory_space<vmem>>, %arg2: memref<128x64xbf16, #tpu.memory_space<vmem>>, %arg3: memref<16x8xf32, #tpu.memory_space<vmem>>, %arg4: memref<16x1xf32, #tpu.memory_space<vmem>>, %arg5: memref<32x32xbf16, #tpu.memory_space<vmem>>, %arg6: memref<64x32xbf16, #tpu.memory_space<vmem>>, %arg7: memref<1x32xf32, #tpu.memory_space<vmem>>, %arg8: memref<32x32xbf16, #tpu.memory_space<vmem>>, %arg9: memref<1x32xf32, #tpu.memory_space<vmem>>, %arg10: memref<32x32xbf16, #tpu.memory_space<vmem>>, %arg11: memref<1x32xf32, #tpu.memory_space<vmem>>, %arg12: memref<1x32xf32, #tpu.memory_space<vmem>>, %arg13: memref<1x32xf32, #tpu.memory_space<vmem>>, %arg14: memref<32x128xbf16, #tpu.memory_space<vmem>>, %arg15: memref<1x128xf32, #tpu.memory_space<vmem>>, %arg16: memref<128x32xbf16, #tpu.memory_space<vmem>>, %arg17: memref<1x32xf32, #tpu.memory_space<vmem>>, %arg18: memref<1x32xf32, #tpu.memory_space<vmem>>, %arg19: memref<1x32xf32, #tpu.memory_space<vmem>>, %arg20: memref<16x32xf32, #tpu.memory_space<vmem>>) attributes {dimension_semantics = [#tpu.dimension_semantics<parallel>], iteration_bounds = array<i64: 4>, scalar_prefetch = 0 : i64, scratch_operands = 0 : i64, tpu.core_type = #tpu.core_type<tc>, window_params = [{transform_indices = @transform_0, window_bounds = array<i64: 16, 32>}, {transform_indices = @transform_1, window_bounds = array<i64: 128, 64>}, {transform_indices = @transform_2, window_bounds = array<i64: 16, 8>}, {transform_indices = @transform_3, window_bounds = array<i64: 16, 1>}, {pipeline_mode = #tpu.pipeline_mode<synchronous>, transform_indices = @transform_4, window_bounds = array<i64: 32, 32>}, {pipeline_mode = #tpu.pipeline_mode<synchronous>, transform_indices = @transform_5, window_bounds = array<i64: 64, 32>}, {pipeline_mode = #tpu.pipeline_mode<synchronous>, transform_indices = @transform_6, window_bounds = array<i64: 1, 32>}, {pipeline_mode = #tpu.pipeline_mode<synchronous>, transform_indices = @transform_7, window_bounds = array<i64: 32, 32>}, {pipeline_mode = #tpu.pipeline_mode<synchronous>, transform_indices = @transform_8, window_bounds = array<i64: 1, 32>}, {pipeline_mode = #tpu.pipeline_mode<synchronous>, transform_indices = @transform_9, window_bounds = array<i64: 32, 32>}, {pipeline_mode = #tpu.pipeline_mode<synchronous>, transform_indices = @transform_10, window_bounds = array<i64: 1, 32>}, {pipeline_mode = #tpu.pipeline_mode<synchronous>, transform_indices = @transform_11, window_bounds = array<i64: 1, 32>}, {pipeline_mode = #tpu.pipeline_mode<synchronous>, transform_indices = @transform_12, window_bounds = array<i64: 1, 32>}, {pipeline_mode = #tpu.pipeline_mode<synchronous>, transform_indices = @transform_13, window_bounds = array<i64: 32, 128>}, {pipeline_mode = #tpu.pipeline_mode<synchronous>, transform_indices = @transform_14, window_bounds = array<i64: 1, 128>}, {pipeline_mode = #tpu.pipeline_mode<synchronous>, transform_indices = @transform_15, window_bounds = array<i64: 128, 32>}, {pipeline_mode = #tpu.pipeline_mode<synchronous>, transform_indices = @transform_16, window_bounds = array<i64: 1, 32>}, {pipeline_mode = #tpu.pipeline_mode<synchronous>, transform_indices = @transform_17, window_bounds = array<i64: 1, 32>}, {pipeline_mode = #tpu.pipeline_mode<synchronous>, transform_indices = @transform_18, window_bounds = array<i64: 1, 32>}, {transform_indices = @transform_19, window_bounds = array<i64: 16, 32>}]} {
    %c0 = arith.constant 0 : index
    %c0_0 = arith.constant 0 : index
    %0 = vector.load %arg1[%c0, %c0_0] : memref<16x32xf32, #tpu.memory_space<vmem>>, vector<16x32xf32>
    %c0_1 = arith.constant 0 : index
    %c0_2 = arith.constant 0 : index
    %1 = vector.load %arg2[%c0_1, %c0_2] : memref<128x64xbf16, #tpu.memory_space<vmem>>, vector<128x64xbf16>
    %c0_3 = arith.constant 0 : index
    %c0_4 = arith.constant 0 : index
    %2 = vector.load %arg3[%c0_3, %c0_4] : memref<16x8xf32, #tpu.memory_space<vmem>>, vector<16x8xf32>
    %c0_5 = arith.constant 0 : index
    %c0_6 = arith.constant 0 : index
    %3 = vector.load %arg4[%c0_5, %c0_6] : memref<16x1xf32, #tpu.memory_space<vmem>>, vector<16x1xf32>
    %c0_7 = arith.constant 0 : index
    %c0_8 = arith.constant 0 : index
    %4 = vector.load %arg5[%c0_7, %c0_8] : memref<32x32xbf16, #tpu.memory_space<vmem>>, vector<32x32xbf16>
    %c0_9 = arith.constant 0 : index
    %c0_10 = arith.constant 0 : index
    %5 = vector.load %arg6[%c0_9, %c0_10] : memref<64x32xbf16, #tpu.memory_space<vmem>>, vector<64x32xbf16>
    %c0_11 = arith.constant 0 : index
    %c0_12 = arith.constant 0 : index
    %6 = vector.load %arg7[%c0_11, %c0_12] : memref<1x32xf32, #tpu.memory_space<vmem>>, vector<1x32xf32>
    %c0_13 = arith.constant 0 : index
    %c0_14 = arith.constant 0 : index
    %7 = vector.load %arg8[%c0_13, %c0_14] : memref<32x32xbf16, #tpu.memory_space<vmem>>, vector<32x32xbf16>
    %c0_15 = arith.constant 0 : index
    %c0_16 = arith.constant 0 : index
    %8 = vector.load %arg9[%c0_15, %c0_16] : memref<1x32xf32, #tpu.memory_space<vmem>>, vector<1x32xf32>
    %c0_17 = arith.constant 0 : index
    %c0_18 = arith.constant 0 : index
    %9 = vector.load %arg10[%c0_17, %c0_18] : memref<32x32xbf16, #tpu.memory_space<vmem>>, vector<32x32xbf16>
    %c0_19 = arith.constant 0 : index
    %c0_20 = arith.constant 0 : index
    %10 = vector.load %arg11[%c0_19, %c0_20] : memref<1x32xf32, #tpu.memory_space<vmem>>, vector<1x32xf32>
    %c0_21 = arith.constant 0 : index
    %c0_22 = arith.constant 0 : index
    %11 = vector.load %arg12[%c0_21, %c0_22] : memref<1x32xf32, #tpu.memory_space<vmem>>, vector<1x32xf32>
    %c0_23 = arith.constant 0 : index
    %c0_24 = arith.constant 0 : index
    %12 = vector.load %arg13[%c0_23, %c0_24] : memref<1x32xf32, #tpu.memory_space<vmem>>, vector<1x32xf32>
    %c0_25 = arith.constant 0 : index
    %c0_26 = arith.constant 0 : index
    %13 = vector.load %arg14[%c0_25, %c0_26] : memref<32x128xbf16, #tpu.memory_space<vmem>>, vector<32x128xbf16>
    %c0_27 = arith.constant 0 : index
    %c0_28 = arith.constant 0 : index
    %14 = vector.load %arg15[%c0_27, %c0_28] : memref<1x128xf32, #tpu.memory_space<vmem>>, vector<1x128xf32>
    %c0_29 = arith.constant 0 : index
    %c0_30 = arith.constant 0 : index
    %15 = vector.load %arg16[%c0_29, %c0_30] : memref<128x32xbf16, #tpu.memory_space<vmem>>, vector<128x32xbf16>
    %c0_31 = arith.constant 0 : index
    %c0_32 = arith.constant 0 : index
    %16 = vector.load %arg17[%c0_31, %c0_32] : memref<1x32xf32, #tpu.memory_space<vmem>>, vector<1x32xf32>
    %c0_33 = arith.constant 0 : index
    %c0_34 = arith.constant 0 : index
    %17 = vector.load %arg18[%c0_33, %c0_34] : memref<1x32xf32, #tpu.memory_space<vmem>>, vector<1x32xf32>
    %c0_35 = arith.constant 0 : index
    %c0_36 = arith.constant 0 : index
    %18 = vector.load %arg19[%c0_35, %c0_36] : memref<1x32xf32, #tpu.memory_space<vmem>>, vector<1x32xf32>
    %19 = arith.truncf %0 : vector<16x32xf32> to vector<16x32xbf16>
    %cst = arith.constant dense<0.000000e+00> : vector<16x32xf32>
    %20 = tpu.matmul %19, %4, %cst {dimension_numbers = #tpu.dot_dimension_numbers<[1], [0], [0], [1], [0, 0, 1, 1], [], []>} : vector<16x32xbf16>, vector<32x32xbf16>, vector<16x32xf32> -> vector<16x32xf32>
    %21 = vector.broadcast %6 : vector<1x32xf32> to vector<16x32xf32>
    %22 = arith.addf %20, %21 : vector<16x32xf32>
    %cst_37 = arith.constant dense<0.000000e+00> : vector<128x32xf32>
    %23 = tpu.matmul %1, %5, %cst_37 {dimension_numbers = #tpu.dot_dimension_numbers<[1], [0], [0], [1], [0, 0, 1, 1], [], []>} : vector<128x64xbf16>, vector<64x32xbf16>, vector<128x32xf32> -> vector<128x32xf32>
    %24 = vector.shape_cast %23 : vector<128x32xf32> to vector<16x8x32xf32>
    %25 = vector.shape_cast %22 : vector<16x32xf32> to vector<16x1x32xf32>
    %26 = vector.broadcast %25 : vector<16x1x32xf32> to vector<16x8x32xf32>
    %27 = arith.addf %24, %26 : vector<16x8x32xf32>
    %cst_38 = arith.constant 4.471500e-02 : f32
    %28 = vector.broadcast %cst_38 : f32 to vector<16x8x32xf32>
    %29 = arith.mulf %28, %27 : vector<16x8x32xf32>
    %30 = arith.mulf %29, %27 : vector<16x8x32xf32>
    %31 = arith.mulf %30, %27 : vector<16x8x32xf32>
    %32 = arith.addf %27, %31 : vector<16x8x32xf32>
    %cst_39 = arith.constant 0.797884583 : f32
    %33 = vector.broadcast %cst_39 : f32 to vector<16x8x32xf32>
    %34 = arith.mulf %33, %32 : vector<16x8x32xf32>
    %cst_40 = arith.constant 2.000000e+00 : f32
    %35 = vector.broadcast %cst_40 : f32 to vector<16x8x32xf32>
    %36 = arith.mulf %35, %34 : vector<16x8x32xf32>
    %37 = math.exp %36 : vector<16x8x32xf32>
    %cst_41 = arith.constant 1.000000e+00 : f32
    %38 = vector.broadcast %cst_41 : f32 to vector<16x8x32xf32>
    %39 = arith.addf %37, %38 : vector<16x8x32xf32>
    %cst_42 = arith.constant 2.000000e+00 : f32
    %40 = vector.broadcast %cst_42 : f32 to vector<16x8x32xf32>
    %41 = arith.divf %40, %39 : vector<16x8x32xf32>
    %cst_43 = arith.constant 1.000000e+00 : f32
    %42 = vector.broadcast %cst_43 : f32 to vector<16x8x32xf32>
    %43 = arith.subf %42, %41 : vector<16x8x32xf32>
    %cst_44 = arith.constant 5.000000e-01 : f32
    %44 = vector.broadcast %cst_44 : f32 to vector<16x8x32xf32>
    %45 = arith.mulf %44, %27 : vector<16x8x32xf32>
    %cst_45 = arith.constant 1.000000e+00 : f32
    %46 = vector.broadcast %cst_45 : f32 to vector<16x8x32xf32>
    %47 = arith.addf %46, %43 : vector<16x8x32xf32>
    %48 = arith.mulf %45, %47 : vector<16x8x32xf32>
    %49 = vector.shape_cast %48 : vector<16x8x32xf32> to vector<128x32xf32>
    %50 = arith.truncf %49 : vector<128x32xf32> to vector<128x32xbf16>
    %cst_46 = arith.constant dense<0.000000e+00> : vector<128x32xf32>
    %51 = tpu.matmul %50, %7, %cst_46 {dimension_numbers = #tpu.dot_dimension_numbers<[1], [0], [0], [1], [0, 0, 1, 1], [], []>} : vector<128x32xbf16>, vector<32x32xbf16>, vector<128x32xf32> -> vector<128x32xf32>
    %52 = vector.broadcast %8 : vector<1x32xf32> to vector<128x32xf32>
    %53 = arith.addf %51, %52 : vector<128x32xf32>
    %cst_47 = arith.constant 4.471500e-02 : f32
    %54 = vector.broadcast %cst_47 : f32 to vector<128x32xf32>
    %55 = arith.mulf %54, %53 : vector<128x32xf32>
    %56 = arith.mulf %55, %53 : vector<128x32xf32>
    %57 = arith.mulf %56, %53 : vector<128x32xf32>
    %58 = arith.addf %53, %57 : vector<128x32xf32>
    %cst_48 = arith.constant 0.797884583 : f32
    %59 = vector.broadcast %cst_48 : f32 to vector<128x32xf32>
    %60 = arith.mulf %59, %58 : vector<128x32xf32>
    %cst_49 = arith.constant 2.000000e+00 : f32
    %61 = vector.broadcast %cst_49 : f32 to vector<128x32xf32>
    %62 = arith.mulf %61, %60 : vector<128x32xf32>
    %63 = math.exp %62 : vector<128x32xf32>
    %cst_50 = arith.constant 1.000000e+00 : f32
    %64 = vector.broadcast %cst_50 : f32 to vector<128x32xf32>
    %65 = arith.addf %63, %64 : vector<128x32xf32>
    %cst_51 = arith.constant 2.000000e+00 : f32
    %66 = vector.broadcast %cst_51 : f32 to vector<128x32xf32>
    %67 = arith.divf %66, %65 : vector<128x32xf32>
    %cst_52 = arith.constant 1.000000e+00 : f32
    %68 = vector.broadcast %cst_52 : f32 to vector<128x32xf32>
    %69 = arith.subf %68, %67 : vector<128x32xf32>
    %cst_53 = arith.constant 5.000000e-01 : f32
    %70 = vector.broadcast %cst_53 : f32 to vector<128x32xf32>
    %71 = arith.mulf %70, %53 : vector<128x32xf32>
    %cst_54 = arith.constant 1.000000e+00 : f32
    %72 = vector.broadcast %cst_54 : f32 to vector<128x32xf32>
    %73 = arith.addf %72, %69 : vector<128x32xf32>
    %74 = arith.mulf %71, %73 : vector<128x32xf32>
    %75 = vector.shape_cast %74 : vector<128x32xf32> to vector<16x8x32xf32>
    %76 = vector.shape_cast %2 : vector<16x8xf32> to vector<16x8x1xf32>
    %77 = vector.broadcast %76 : vector<16x8x1xf32> to vector<16x8x32xf32>
    %78 = arith.mulf %75, %77 : vector<16x8x32xf32>
    %cst_55 = arith.constant dense<0.000000e+00> : vector<16xf32>
    %79 = vector.multi_reduction <add>, %2, %cst_55 [1] : vector<16x8xf32> to vector<16xf32>
    %80 = vector.shape_cast %79 : vector<16xf32> to vector<16x1xf32>
    %cst_56 = arith.constant dense<0.000000e+00> : vector<16x32xf32>
    %81 = vector.multi_reduction <add>, %78, %cst_56 [1] : vector<16x8x32xf32> to vector<16x32xf32>
    %82 = arith.truncf %81 : vector<16x32xf32> to vector<16x32xbf16>
    %cst_57 = arith.constant dense<0.000000e+00> : vector<16x32xf32>
    %83 = tpu.matmul %82, %9, %cst_57 {dimension_numbers = #tpu.dot_dimension_numbers<[1], [0], [0], [1], [0, 0, 1, 1], [], []>} : vector<16x32xbf16>, vector<32x32xbf16>, vector<16x32xf32> -> vector<16x32xf32>
    %84 = vector.broadcast %80 : vector<16x1xf32> to vector<16x32xf32>
    %85 = vector.broadcast %10 : vector<1x32xf32> to vector<16x32xf32>
    %86 = arith.mulf %84, %85 : vector<16x32xf32>
    %87 = arith.addf %83, %86 : vector<16x32xf32>
    %cst_58 = arith.constant 0.0333333351 : f32
    %88 = vector.broadcast %cst_58 : f32 to vector<16x32xf32>
    %89 = arith.mulf %87, %88 : vector<16x32xf32>
    %90 = arith.addf %0, %89 : vector<16x32xf32>
    %cst_59 = arith.constant dense<0.000000e+00> : vector<16xf32>
    %91 = vector.multi_reduction <add>, %90, %cst_59 [1] : vector<16x32xf32> to vector<16xf32>
    %92 = vector.shape_cast %91 : vector<16xf32> to vector<16x1xf32>
    %cst_60 = arith.constant 3.200000e+01 : f32
    %93 = vector.broadcast %cst_60 : f32 to vector<16x1xf32>
    %94 = arith.divf %92, %93 : vector<16x1xf32>
    %95 = vector.broadcast %94 : vector<16x1xf32> to vector<16x32xf32>
    %96 = arith.subf %90, %95 : vector<16x32xf32>
    %97 = arith.mulf %96, %96 : vector<16x32xf32>
    %cst_61 = arith.constant dense<0.000000e+00> : vector<16xf32>
    %98 = vector.multi_reduction <add>, %97, %cst_61 [1] : vector<16x32xf32> to vector<16xf32>
    %99 = vector.shape_cast %98 : vector<16xf32> to vector<16x1xf32>
    %cst_62 = arith.constant 3.200000e+01 : f32
    %100 = vector.broadcast %cst_62 : f32 to vector<16x1xf32>
    %101 = arith.divf %99, %100 : vector<16x1xf32>
    %102 = vector.broadcast %94 : vector<16x1xf32> to vector<16x32xf32>
    %103 = arith.subf %90, %102 : vector<16x32xf32>
    %cst_63 = arith.constant 9.99999974E-6 : f32
    %104 = vector.broadcast %cst_63 : f32 to vector<16x1xf32>
    %105 = arith.addf %101, %104 : vector<16x1xf32>
    %106 = math.rsqrt %105 : vector<16x1xf32>
    %107 = vector.broadcast %106 : vector<16x1xf32> to vector<16x32xf32>
    %108 = arith.mulf %103, %107 : vector<16x32xf32>
    %109 = vector.broadcast %11 : vector<1x32xf32> to vector<16x32xf32>
    %110 = arith.mulf %108, %109 : vector<16x32xf32>
    %111 = vector.broadcast %12 : vector<1x32xf32> to vector<16x32xf32>
    %112 = arith.addf %110, %111 : vector<16x32xf32>
    %113 = arith.truncf %112 : vector<16x32xf32> to vector<16x32xbf16>
    %cst_64 = arith.constant dense<0.000000e+00> : vector<16x128xf32>
    %114 = tpu.matmul %113, %13, %cst_64 {dimension_numbers = #tpu.dot_dimension_numbers<[1], [0], [0], [1], [0, 0, 1, 1], [], []>} : vector<16x32xbf16>, vector<32x128xbf16>, vector<16x128xf32> -> vector<16x128xf32>
    %115 = vector.broadcast %14 : vector<1x128xf32> to vector<16x128xf32>
    %116 = arith.addf %114, %115 : vector<16x128xf32>
    %cst_65 = arith.constant 4.471500e-02 : f32
    %117 = vector.broadcast %cst_65 : f32 to vector<16x128xf32>
    %118 = arith.mulf %117, %116 : vector<16x128xf32>
    %119 = arith.mulf %118, %116 : vector<16x128xf32>
    %120 = arith.mulf %119, %116 : vector<16x128xf32>
    %121 = arith.addf %116, %120 : vector<16x128xf32>
    %cst_66 = arith.constant 0.797884583 : f32
    %122 = vector.broadcast %cst_66 : f32 to vector<16x128xf32>
    %123 = arith.mulf %122, %121 : vector<16x128xf32>
    %cst_67 = arith.constant 2.000000e+00 : f32
    %124 = vector.broadcast %cst_67 : f32 to vector<16x128xf32>
    %125 = arith.mulf %124, %123 : vector<16x128xf32>
    %126 = math.exp %125 : vector<16x128xf32>
    %cst_68 = arith.constant 1.000000e+00 : f32
    %127 = vector.broadcast %cst_68 : f32 to vector<16x128xf32>
    %128 = arith.addf %126, %127 : vector<16x128xf32>
    %cst_69 = arith.constant 2.000000e+00 : f32
    %129 = vector.broadcast %cst_69 : f32 to vector<16x128xf32>
    %130 = arith.divf %129, %128 : vector<16x128xf32>
    %cst_70 = arith.constant 1.000000e+00 : f32
    %131 = vector.broadcast %cst_70 : f32 to vector<16x128xf32>
    %132 = arith.subf %131, %130 : vector<16x128xf32>
    %cst_71 = arith.constant 5.000000e-01 : f32
    %133 = vector.broadcast %cst_71 : f32 to vector<16x128xf32>
    %134 = arith.mulf %133, %116 : vector<16x128xf32>
    %cst_72 = arith.constant 1.000000e+00 : f32
    %135 = vector.broadcast %cst_72 : f32 to vector<16x128xf32>
    %136 = arith.addf %135, %132 : vector<16x128xf32>
    %137 = arith.mulf %134, %136 : vector<16x128xf32>
    %138 = arith.truncf %137 : vector<16x128xf32> to vector<16x128xbf16>
    %cst_73 = arith.constant dense<0.000000e+00> : vector<16x32xf32>
    %139 = tpu.matmul %138, %15, %cst_73 {dimension_numbers = #tpu.dot_dimension_numbers<[1], [0], [0], [1], [0, 0, 1, 1], [], []>} : vector<16x128xbf16>, vector<128x32xbf16>, vector<16x32xf32> -> vector<16x32xf32>
    %140 = vector.broadcast %16 : vector<1x32xf32> to vector<16x32xf32>
    %141 = arith.addf %139, %140 : vector<16x32xf32>
    %142 = arith.addf %112, %141 : vector<16x32xf32>
    %cst_74 = arith.constant dense<0.000000e+00> : vector<16xf32>
    %143 = vector.multi_reduction <add>, %142, %cst_74 [1] : vector<16x32xf32> to vector<16xf32>
    %144 = vector.shape_cast %143 : vector<16xf32> to vector<16x1xf32>
    %cst_75 = arith.constant 3.200000e+01 : f32
    %145 = vector.broadcast %cst_75 : f32 to vector<16x1xf32>
    %146 = arith.divf %144, %145 : vector<16x1xf32>
    %147 = vector.broadcast %146 : vector<16x1xf32> to vector<16x32xf32>
    %148 = arith.subf %142, %147 : vector<16x32xf32>
    %149 = arith.mulf %148, %148 : vector<16x32xf32>
    %cst_76 = arith.constant dense<0.000000e+00> : vector<16xf32>
    %150 = vector.multi_reduction <add>, %149, %cst_76 [1] : vector<16x32xf32> to vector<16xf32>
    %151 = vector.shape_cast %150 : vector<16xf32> to vector<16x1xf32>
    %cst_77 = arith.constant 3.200000e+01 : f32
    %152 = vector.broadcast %cst_77 : f32 to vector<16x1xf32>
    %153 = arith.divf %151, %152 : vector<16x1xf32>
    %154 = vector.broadcast %146 : vector<16x1xf32> to vector<16x32xf32>
    %155 = arith.subf %142, %154 : vector<16x32xf32>
    %cst_78 = arith.constant 9.99999974E-6 : f32
    %156 = vector.broadcast %cst_78 : f32 to vector<16x1xf32>
    %157 = arith.addf %153, %156 : vector<16x1xf32>
    %158 = math.rsqrt %157 : vector<16x1xf32>
    %159 = vector.broadcast %158 : vector<16x1xf32> to vector<16x32xf32>
    %160 = arith.mulf %155, %159 : vector<16x32xf32>
    %161 = vector.broadcast %17 : vector<1x32xf32> to vector<16x32xf32>
    %162 = arith.mulf %160, %161 : vector<16x32xf32>
    %163 = vector.broadcast %18 : vector<1x32xf32> to vector<16x32xf32>
    %164 = arith.addf %162, %163 : vector<16x32xf32>
    %165 = vector.broadcast %3 : vector<16x1xf32> to vector<16x32xf32>
    %166 = arith.mulf %164, %165 : vector<16x32xf32>
    %c0_79 = arith.constant 0 : index
    %c0_80 = arith.constant 0 : index
    %167 = vector.load %arg20[%c0_79, %c0_80] : memref<16x32xf32, #tpu.memory_space<vmem>>, vector<16x32xf32>
    tpu.vector_store %arg20[%c0_79, %c0_80], %166 {strides = array<i32>} : memref<16x32xf32, #tpu.memory_space<vmem>>, vector<16x32xf32>,
    return
  }
  func.func @transform_0(%arg0: i32) -> (i32, i32) {
    %c0_i32 = arith.constant 0 : i32
    %c0_i32_0 = arith.constant 0 : i32
    return %arg0, %c0_i32 : i32, i32
  }
  func.func @transform_1(%arg0: i32) -> (i32, i32) {
    %c0_i32 = arith.constant 0 : i32
    %c0_i32_0 = arith.constant 0 : i32
    return %arg0, %c0_i32 : i32, i32
  }
  func.func @transform_2(%arg0: i32) -> (i32, i32) {
    %c0_i32 = arith.constant 0 : i32
    %c0_i32_0 = arith.constant 0 : i32
    return %arg0, %c0_i32 : i32, i32
  }
  func.func @transform_3(%arg0: i32) -> (i32, i32) {
    %c0_i32 = arith.constant 0 : i32
    %c0_i32_0 = arith.constant 0 : i32
    return %arg0, %c0_i32 : i32, i32
  }
  func.func @transform_4(%arg0: i32) -> (i32, i32) {
    %c0_i32 = arith.constant 0 : i32
    %c0_i32_0 = arith.constant 0 : i32
    %c0_i32_1 = arith.constant 0 : i32
    return %c0_i32, %c0_i32_0 : i32, i32
  }
  func.func @transform_5(%arg0: i32) -> (i32, i32) {
    %c0_i32 = arith.constant 0 : i32
    %c0_i32_0 = arith.constant 0 : i32
    %c0_i32_1 = arith.constant 0 : i32
    return %c0_i32, %c0_i32_0 : i32, i32
  }
  func.func @transform_6(%arg0: i32) -> (i32, i32) {
    %c0_i32 = arith.constant 0 : i32
    %c0_i32_0 = arith.constant 0 : i32
    %c0_i32_1 = arith.constant 0 : i32
    return %c0_i32, %c0_i32_0 : i32, i32
  }
  func.func @transform_7(%arg0: i32) -> (i32, i32) {
    %c0_i32 = arith.constant 0 : i32
    %c0_i32_0 = arith.constant 0 : i32
    %c0_i32_1 = arith.constant 0 : i32
    return %c0_i32, %c0_i32_0 : i32, i32
  }
  func.func @transform_8(%arg0: i32) -> (i32, i32) {
    %c0_i32 = arith.constant 0 : i32
    %c0_i32_0 = arith.constant 0 : i32
    %c0_i32_1 = arith.constant 0 : i32
    return %c0_i32, %c0_i32_0 : i32, i32
  }
  func.func @transform_9(%arg0: i32) -> (i32, i32) {
    %c0_i32 = arith.constant 0 : i32
    %c0_i32_0 = arith.constant 0 : i32
    %c0_i32_1 = arith.constant 0 : i32
    return %c0_i32, %c0_i32_0 : i32, i32
  }
  func.func @transform_10(%arg0: i32) -> (i32, i32) {
    %c0_i32 = arith.constant 0 : i32
    %c0_i32_0 = arith.constant 0 : i32
    %c0_i32_1 = arith.constant 0 : i32
    return %c0_i32, %c0_i32_0 : i32, i32
  }
  func.func @transform_11(%arg0: i32) -> (i32, i32) {
    %c0_i32 = arith.constant 0 : i32
    %c0_i32_0 = arith.constant 0 : i32
    %c0_i32_1 = arith.constant 0 : i32
    return %c0_i32, %c0_i32_0 : i32, i32
  }
  func.func @transform_12(%arg0: i32) -> (i32, i32) {
    %c0_i32 = arith.constant 0 : i32
    %c0_i32_0 = arith.constant 0 : i32
    %c0_i32_1 = arith.constant 0 : i32
    return %c0_i32, %c0_i32_0 : i32, i32
  }
  func.func @transform_13(%arg0: i32) -> (i32, i32) {
    %c0_i32 = arith.constant 0 : i32
    %c0_i32_0 = arith.constant 0 : i32
    %c0_i32_1 = arith.constant 0 : i32
    return %c0_i32, %c0_i32_0 : i32, i32
  }
  func.func @transform_14(%arg0: i32) -> (i32, i32) {
    %c0_i32 = arith.constant 0 : i32
    %c0_i32_0 = arith.constant 0 : i32
    %c0_i32_1 = arith.constant 0 : i32
    return %c0_i32, %c0_i32_0 : i32, i32
  }
  func.func @transform_15(%arg0: i32) -> (i32, i32) {
    %c0_i32 = arith.constant 0 : i32
    %c0_i32_0 = arith.constant 0 : i32
    %c0_i32_1 = arith.constant 0 : i32
    return %c0_i32, %c0_i32_0 : i32, i32
  }
  func.func @transform_16(%arg0: i32) -> (i32, i32) {
    %c0_i32 = arith.constant 0 : i32
    %c0_i32_0 = arith.constant 0 : i32
    %c0_i32_1 = arith.constant 0 : i32
    return %c0_i32, %c0_i32_0 : i32, i32
  }
  func.func @transform_17(%arg0: i32) -> (i32, i32) {
    %c0_i32 = arith.constant 0 : i32
    %c0_i32_0 = arith.constant 0 : i32
    %c0_i32_1 = arith.constant 0 : i32
    return %c0_i32, %c0_i32_0 : i32, i32
  }
  func.func @transform_18(%arg0: i32) -> (i32, i32) {
    %c0_i32 = arith.constant 0 : i32
    %c0_i32_0 = arith.constant 0 : i32
    %c0_i32_1 = arith.constant 0 : i32
    return %c0_i32, %c0_i32_0 : i32, i32
  }
  func.func @transform_19(%arg0: i32) -> (i32, i32) {
    %c0_i32 = arith.constant 0 : i32
    %c0_i32_0 = arith.constant 0 : i32
    return %arg0, %c0_i32 : i32, i32
  }
}

module attributes {stable_mosaic.version = 11 : i64} {
  func.func @_enc_edge_kernel(%arg0: i32, %arg1: memref<16x32xf32, #tpu.memory_space<vmem>>, %arg2: memref<128x64xbf16, #tpu.memory_space<vmem>>, %arg3: memref<32x32xbf16, #tpu.memory_space<vmem>>, %arg4: memref<64x32xbf16, #tpu.memory_space<vmem>>, %arg5: memref<1x32xf32, #tpu.memory_space<vmem>>, %arg6: memref<32x32xbf16, #tpu.memory_space<vmem>>, %arg7: memref<1x32xf32, #tpu.memory_space<vmem>>, %arg8: memref<32x32xbf16, #tpu.memory_space<vmem>>, %arg9: memref<1x32xf32, #tpu.memory_space<vmem>>, %arg10: memref<1x32xf32, #tpu.memory_space<vmem>>, %arg11: memref<1x32xf32, #tpu.memory_space<vmem>>, %arg12: memref<128x32xbf16, #tpu.memory_space<vmem>>) attributes {dimension_semantics = [#tpu.dimension_semantics<parallel>], iteration_bounds = array<i64: 4>, scalar_prefetch = 0 : i64, scratch_operands = 0 : i64, tpu.core_type = #tpu.core_type<tc>, window_params = [{transform_indices = @transform_0, window_bounds = array<i64: 16, 32>}, {transform_indices = @transform_1, window_bounds = array<i64: 128, 64>}, {pipeline_mode = #tpu.pipeline_mode<synchronous>, transform_indices = @transform_2, window_bounds = array<i64: 32, 32>}, {pipeline_mode = #tpu.pipeline_mode<synchronous>, transform_indices = @transform_3, window_bounds = array<i64: 64, 32>}, {pipeline_mode = #tpu.pipeline_mode<synchronous>, transform_indices = @transform_4, window_bounds = array<i64: 1, 32>}, {pipeline_mode = #tpu.pipeline_mode<synchronous>, transform_indices = @transform_5, window_bounds = array<i64: 32, 32>}, {pipeline_mode = #tpu.pipeline_mode<synchronous>, transform_indices = @transform_6, window_bounds = array<i64: 1, 32>}, {pipeline_mode = #tpu.pipeline_mode<synchronous>, transform_indices = @transform_7, window_bounds = array<i64: 32, 32>}, {pipeline_mode = #tpu.pipeline_mode<synchronous>, transform_indices = @transform_8, window_bounds = array<i64: 1, 32>}, {pipeline_mode = #tpu.pipeline_mode<synchronous>, transform_indices = @transform_9, window_bounds = array<i64: 1, 32>}, {pipeline_mode = #tpu.pipeline_mode<synchronous>, transform_indices = @transform_10, window_bounds = array<i64: 1, 32>}, {transform_indices = @transform_11, window_bounds = array<i64: 128, 32>}]} {
    %c0 = arith.constant 0 : index
    %c0_0 = arith.constant 0 : index
    %0 = vector.load %arg1[%c0, %c0_0] : memref<16x32xf32, #tpu.memory_space<vmem>>, vector<16x32xf32>
    %c0_1 = arith.constant 0 : index
    %c0_2 = arith.constant 0 : index
    %1 = vector.load %arg2[%c0_1, %c0_2] : memref<128x64xbf16, #tpu.memory_space<vmem>>, vector<128x64xbf16>
    %c0_3 = arith.constant 0 : index
    %c0_4 = arith.constant 0 : index
    %2 = vector.load %arg3[%c0_3, %c0_4] : memref<32x32xbf16, #tpu.memory_space<vmem>>, vector<32x32xbf16>
    %c0_5 = arith.constant 0 : index
    %c0_6 = arith.constant 0 : index
    %3 = vector.load %arg4[%c0_5, %c0_6] : memref<64x32xbf16, #tpu.memory_space<vmem>>, vector<64x32xbf16>
    %c0_7 = arith.constant 0 : index
    %c0_8 = arith.constant 0 : index
    %4 = vector.load %arg5[%c0_7, %c0_8] : memref<1x32xf32, #tpu.memory_space<vmem>>, vector<1x32xf32>
    %c0_9 = arith.constant 0 : index
    %c0_10 = arith.constant 0 : index
    %5 = vector.load %arg6[%c0_9, %c0_10] : memref<32x32xbf16, #tpu.memory_space<vmem>>, vector<32x32xbf16>
    %c0_11 = arith.constant 0 : index
    %c0_12 = arith.constant 0 : index
    %6 = vector.load %arg7[%c0_11, %c0_12] : memref<1x32xf32, #tpu.memory_space<vmem>>, vector<1x32xf32>
    %c0_13 = arith.constant 0 : index
    %c0_14 = arith.constant 0 : index
    %7 = vector.load %arg8[%c0_13, %c0_14] : memref<32x32xbf16, #tpu.memory_space<vmem>>, vector<32x32xbf16>
    %c0_15 = arith.constant 0 : index
    %c0_16 = arith.constant 0 : index
    %8 = vector.load %arg9[%c0_15, %c0_16] : memref<1x32xf32, #tpu.memory_space<vmem>>, vector<1x32xf32>
    %c0_17 = arith.constant 0 : index
    %c0_18 = arith.constant 0 : index
    %9 = vector.load %arg10[%c0_17, %c0_18] : memref<1x32xf32, #tpu.memory_space<vmem>>, vector<1x32xf32>
    %c0_19 = arith.constant 0 : index
    %c0_20 = arith.constant 0 : index
    %10 = vector.load %arg11[%c0_19, %c0_20] : memref<1x32xf32, #tpu.memory_space<vmem>>, vector<1x32xf32>
    %11 = vector.extract_strided_slice %1 {offsets = [0, 0], sizes = [128, 32], strides = [1, 1]} : vector<128x64xbf16> to vector<128x32xbf16>
    %12 = arith.extf %11 : vector<128x32xbf16> to vector<128x32xf32>
    %13 = arith.truncf %0 : vector<16x32xf32> to vector<16x32xbf16>
    %cst = arith.constant dense<0.000000e+00> : vector<16x32xf32>
    %14 = tpu.matmul %13, %2, %cst {dimension_numbers = #tpu.dot_dimension_numbers<[1], [0], [0], [1], [0, 0, 1, 1], [], []>} : vector<16x32xbf16>, vector<32x32xbf16>, vector<16x32xf32> -> vector<16x32xf32>
    %15 = vector.broadcast %4 : vector<1x32xf32> to vector<16x32xf32>
    %16 = arith.addf %14, %15 : vector<16x32xf32>
    %cst_21 = arith.constant dense<0.000000e+00> : vector<128x32xf32>
    %17 = tpu.matmul %1, %3, %cst_21 {dimension_numbers = #tpu.dot_dimension_numbers<[1], [0], [0], [1], [0, 0, 1, 1], [], []>} : vector<128x64xbf16>, vector<64x32xbf16>, vector<128x32xf32> -> vector<128x32xf32>
    %18 = vector.shape_cast %17 : vector<128x32xf32> to vector<16x8x32xf32>
    %19 = vector.shape_cast %16 : vector<16x32xf32> to vector<16x1x32xf32>
    %20 = vector.broadcast %19 : vector<16x1x32xf32> to vector<16x8x32xf32>
    %21 = arith.addf %18, %20 : vector<16x8x32xf32>
    %cst_22 = arith.constant 4.471500e-02 : f32
    %22 = vector.broadcast %cst_22 : f32 to vector<16x8x32xf32>
    %23 = arith.mulf %22, %21 : vector<16x8x32xf32>
    %24 = arith.mulf %23, %21 : vector<16x8x32xf32>
    %25 = arith.mulf %24, %21 : vector<16x8x32xf32>
    %26 = arith.addf %21, %25 : vector<16x8x32xf32>
    %cst_23 = arith.constant 0.797884583 : f32
    %27 = vector.broadcast %cst_23 : f32 to vector<16x8x32xf32>
    %28 = arith.mulf %27, %26 : vector<16x8x32xf32>
    %cst_24 = arith.constant 2.000000e+00 : f32
    %29 = vector.broadcast %cst_24 : f32 to vector<16x8x32xf32>
    %30 = arith.mulf %29, %28 : vector<16x8x32xf32>
    %31 = math.exp %30 : vector<16x8x32xf32>
    %cst_25 = arith.constant 1.000000e+00 : f32
    %32 = vector.broadcast %cst_25 : f32 to vector<16x8x32xf32>
    %33 = arith.addf %31, %32 : vector<16x8x32xf32>
    %cst_26 = arith.constant 2.000000e+00 : f32
    %34 = vector.broadcast %cst_26 : f32 to vector<16x8x32xf32>
    %35 = arith.divf %34, %33 : vector<16x8x32xf32>
    %cst_27 = arith.constant 1.000000e+00 : f32
    %36 = vector.broadcast %cst_27 : f32 to vector<16x8x32xf32>
    %37 = arith.subf %36, %35 : vector<16x8x32xf32>
    %cst_28 = arith.constant 5.000000e-01 : f32
    %38 = vector.broadcast %cst_28 : f32 to vector<16x8x32xf32>
    %39 = arith.mulf %38, %21 : vector<16x8x32xf32>
    %cst_29 = arith.constant 1.000000e+00 : f32
    %40 = vector.broadcast %cst_29 : f32 to vector<16x8x32xf32>
    %41 = arith.addf %40, %37 : vector<16x8x32xf32>
    %42 = arith.mulf %39, %41 : vector<16x8x32xf32>
    %43 = vector.shape_cast %42 : vector<16x8x32xf32> to vector<128x32xf32>
    %44 = arith.truncf %43 : vector<128x32xf32> to vector<128x32xbf16>
    %cst_30 = arith.constant dense<0.000000e+00> : vector<128x32xf32>
    %45 = tpu.matmul %44, %5, %cst_30 {dimension_numbers = #tpu.dot_dimension_numbers<[1], [0], [0], [1], [0, 0, 1, 1], [], []>} : vector<128x32xbf16>, vector<32x32xbf16>, vector<128x32xf32> -> vector<128x32xf32>
    %46 = vector.broadcast %6 : vector<1x32xf32> to vector<128x32xf32>
    %47 = arith.addf %45, %46 : vector<128x32xf32>
    %cst_31 = arith.constant 4.471500e-02 : f32
    %48 = vector.broadcast %cst_31 : f32 to vector<128x32xf32>
    %49 = arith.mulf %48, %47 : vector<128x32xf32>
    %50 = arith.mulf %49, %47 : vector<128x32xf32>
    %51 = arith.mulf %50, %47 : vector<128x32xf32>
    %52 = arith.addf %47, %51 : vector<128x32xf32>
    %cst_32 = arith.constant 0.797884583 : f32
    %53 = vector.broadcast %cst_32 : f32 to vector<128x32xf32>
    %54 = arith.mulf %53, %52 : vector<128x32xf32>
    %cst_33 = arith.constant 2.000000e+00 : f32
    %55 = vector.broadcast %cst_33 : f32 to vector<128x32xf32>
    %56 = arith.mulf %55, %54 : vector<128x32xf32>
    %57 = math.exp %56 : vector<128x32xf32>
    %cst_34 = arith.constant 1.000000e+00 : f32
    %58 = vector.broadcast %cst_34 : f32 to vector<128x32xf32>
    %59 = arith.addf %57, %58 : vector<128x32xf32>
    %cst_35 = arith.constant 2.000000e+00 : f32
    %60 = vector.broadcast %cst_35 : f32 to vector<128x32xf32>
    %61 = arith.divf %60, %59 : vector<128x32xf32>
    %cst_36 = arith.constant 1.000000e+00 : f32
    %62 = vector.broadcast %cst_36 : f32 to vector<128x32xf32>
    %63 = arith.subf %62, %61 : vector<128x32xf32>
    %cst_37 = arith.constant 5.000000e-01 : f32
    %64 = vector.broadcast %cst_37 : f32 to vector<128x32xf32>
    %65 = arith.mulf %64, %47 : vector<128x32xf32>
    %cst_38 = arith.constant 1.000000e+00 : f32
    %66 = vector.broadcast %cst_38 : f32 to vector<128x32xf32>
    %67 = arith.addf %66, %63 : vector<128x32xf32>
    %68 = arith.mulf %65, %67 : vector<128x32xf32>
    %69 = arith.truncf %68 : vector<128x32xf32> to vector<128x32xbf16>
    %cst_39 = arith.constant dense<0.000000e+00> : vector<128x32xf32>
    %70 = tpu.matmul %69, %7, %cst_39 {dimension_numbers = #tpu.dot_dimension_numbers<[1], [0], [0], [1], [0, 0, 1, 1], [], []>} : vector<128x32xbf16>, vector<32x32xbf16>, vector<128x32xf32> -> vector<128x32xf32>
    %71 = vector.broadcast %8 : vector<1x32xf32> to vector<128x32xf32>
    %72 = arith.addf %70, %71 : vector<128x32xf32>
    %73 = arith.addf %12, %72 : vector<128x32xf32>
    %cst_40 = arith.constant dense<0.000000e+00> : vector<128xf32>
    %74 = vector.multi_reduction <add>, %73, %cst_40 [1] : vector<128x32xf32> to vector<128xf32>
    %75 = vector.shape_cast %74 : vector<128xf32> to vector<128x1xf32>
    %cst_41 = arith.constant 3.200000e+01 : f32
    %76 = vector.broadcast %cst_41 : f32 to vector<128x1xf32>
    %77 = arith.divf %75, %76 : vector<128x1xf32>
    %78 = vector.broadcast %77 : vector<128x1xf32> to vector<128x32xf32>
    %79 = arith.subf %73, %78 : vector<128x32xf32>
    %80 = arith.mulf %79, %79 : vector<128x32xf32>
    %cst_42 = arith.constant dense<0.000000e+00> : vector<128xf32>
    %81 = vector.multi_reduction <add>, %80, %cst_42 [1] : vector<128x32xf32> to vector<128xf32>
    %82 = vector.shape_cast %81 : vector<128xf32> to vector<128x1xf32>
    %cst_43 = arith.constant 3.200000e+01 : f32
    %83 = vector.broadcast %cst_43 : f32 to vector<128x1xf32>
    %84 = arith.divf %82, %83 : vector<128x1xf32>
    %85 = vector.broadcast %77 : vector<128x1xf32> to vector<128x32xf32>
    %86 = arith.subf %73, %85 : vector<128x32xf32>
    %cst_44 = arith.constant 9.99999974E-6 : f32
    %87 = vector.broadcast %cst_44 : f32 to vector<128x1xf32>
    %88 = arith.addf %84, %87 : vector<128x1xf32>
    %89 = math.rsqrt %88 : vector<128x1xf32>
    %90 = vector.broadcast %89 : vector<128x1xf32> to vector<128x32xf32>
    %91 = arith.mulf %86, %90 : vector<128x32xf32>
    %92 = vector.broadcast %9 : vector<1x32xf32> to vector<128x32xf32>
    %93 = arith.mulf %91, %92 : vector<128x32xf32>
    %94 = vector.broadcast %10 : vector<1x32xf32> to vector<128x32xf32>
    %95 = arith.addf %93, %94 : vector<128x32xf32>
    %96 = arith.truncf %95 : vector<128x32xf32> to vector<128x32xbf16>
    %c0_45 = arith.constant 0 : index
    %c0_46 = arith.constant 0 : index
    %97 = vector.load %arg12[%c0_45, %c0_46] : memref<128x32xbf16, #tpu.memory_space<vmem>>, vector<128x32xbf16>
    tpu.vector_store %arg12[%c0_45, %c0_46], %96 {strides = array<i32>} : memref<128x32xbf16, #tpu.memory_space<vmem>>, vector<128x32xbf16>,
    return
  }
  func.func @transform_0(%arg0: i32) -> (i32, i32) {
    %c0_i32 = arith.constant 0 : i32
    %c0_i32_0 = arith.constant 0 : i32
    return %arg0, %c0_i32 : i32, i32
  }
  func.func @transform_1(%arg0: i32) -> (i32, i32) {
    %c0_i32 = arith.constant 0 : i32
    %c0_i32_0 = arith.constant 0 : i32
    return %arg0, %c0_i32 : i32, i32
  }
  func.func @transform_2(%arg0: i32) -> (i32, i32) {
    %c0_i32 = arith.constant 0 : i32
    %c0_i32_0 = arith.constant 0 : i32
    %c0_i32_1 = arith.constant 0 : i32
    return %c0_i32, %c0_i32_0 : i32, i32
  }
  func.func @transform_3(%arg0: i32) -> (i32, i32) {
    %c0_i32 = arith.constant 0 : i32
    %c0_i32_0 = arith.constant 0 : i32
    %c0_i32_1 = arith.constant 0 : i32
    return %c0_i32, %c0_i32_0 : i32, i32
  }
  func.func @transform_4(%arg0: i32) -> (i32, i32) {
    %c0_i32 = arith.constant 0 : i32
    %c0_i32_0 = arith.constant 0 : i32
    %c0_i32_1 = arith.constant 0 : i32
    return %c0_i32, %c0_i32_0 : i32, i32
  }
  func.func @transform_5(%arg0: i32) -> (i32, i32) {
    %c0_i32 = arith.constant 0 : i32
    %c0_i32_0 = arith.constant 0 : i32
    %c0_i32_1 = arith.constant 0 : i32
    return %c0_i32, %c0_i32_0 : i32, i32
  }
  func.func @transform_6(%arg0: i32) -> (i32, i32) {
    %c0_i32 = arith.constant 0 : i32
    %c0_i32_0 = arith.constant 0 : i32
    %c0_i32_1 = arith.constant 0 : i32
    return %c0_i32, %c0_i32_0 : i32, i32
  }
  func.func @transform_7(%arg0: i32) -> (i32, i32) {
    %c0_i32 = arith.constant 0 : i32
    %c0_i32_0 = arith.constant 0 : i32
    %c0_i32_1 = arith.constant 0 : i32
    return %c0_i32, %c0_i32_0 : i32, i32
  }
  func.func @transform_8(%arg0: i32) -> (i32, i32) {
    %c0_i32 = arith.constant 0 : i32
    %c0_i32_0 = arith.constant 0 : i32
    %c0_i32_1 = arith.constant 0 : i32
    return %c0_i32, %c0_i32_0 : i32, i32
  }
  func.func @transform_9(%arg0: i32) -> (i32, i32) {
    %c0_i32 = arith.constant 0 : i32
    %c0_i32_0 = arith.constant 0 : i32
    %c0_i32_1 = arith.constant 0 : i32
    return %c0_i32, %c0_i32_0 : i32, i32
  }
  func.func @transform_10(%arg0: i32) -> (i32, i32) {
    %c0_i32 = arith.constant 0 : i32
    %c0_i32_0 = arith.constant 0 : i32
    %c0_i32_1 = arith.constant 0 : i32
    return %c0_i32, %c0_i32_0 : i32, i32
  }
  func.func @transform_11(%arg0: i32) -> (i32, i32) {
    %c0_i32 = arith.constant 0 : i32
    %c0_i32_0 = arith.constant 0 : i32
    return %arg0, %c0_i32 : i32, i32
  }
}

module attributes {stable_mosaic.version = 11 : i64} {
  func.func @_dec_node_kernel(%arg0: i32, %arg1: memref<16x32xf32, #tpu.memory_space<vmem>>, %arg2: memref<128x96xbf16, #tpu.memory_space<vmem>>, %arg3: memref<16x8xf32, #tpu.memory_space<vmem>>, %arg4: memref<16x1xf32, #tpu.memory_space<vmem>>, %arg5: memref<32x32xbf16, #tpu.memory_space<vmem>>, %arg6: memref<96x32xbf16, #tpu.memory_space<vmem>>, %arg7: memref<1x32xf32, #tpu.memory_space<vmem>>, %arg8: memref<32x32xbf16, #tpu.memory_space<vmem>>, %arg9: memref<1x32xf32, #tpu.memory_space<vmem>>, %arg10: memref<32x32xbf16, #tpu.memory_space<vmem>>, %arg11: memref<1x32xf32, #tpu.memory_space<vmem>>, %arg12: memref<1x32xf32, #tpu.memory_space<vmem>>, %arg13: memref<1x32xf32, #tpu.memory_space<vmem>>, %arg14: memref<32x128xbf16, #tpu.memory_space<vmem>>, %arg15: memref<1x128xf32, #tpu.memory_space<vmem>>, %arg16: memref<128x32xbf16, #tpu.memory_space<vmem>>, %arg17: memref<1x32xf32, #tpu.memory_space<vmem>>, %arg18: memref<1x32xf32, #tpu.memory_space<vmem>>, %arg19: memref<1x32xf32, #tpu.memory_space<vmem>>, %arg20: memref<16x32xf32, #tpu.memory_space<vmem>>) attributes {dimension_semantics = [#tpu.dimension_semantics<parallel>], iteration_bounds = array<i64: 4>, scalar_prefetch = 0 : i64, scratch_operands = 0 : i64, tpu.core_type = #tpu.core_type<tc>, window_params = [{transform_indices = @transform_0, window_bounds = array<i64: 16, 32>}, {transform_indices = @transform_1, window_bounds = array<i64: 128, 96>}, {transform_indices = @transform_2, window_bounds = array<i64: 16, 8>}, {transform_indices = @transform_3, window_bounds = array<i64: 16, 1>}, {pipeline_mode = #tpu.pipeline_mode<synchronous>, transform_indices = @transform_4, window_bounds = array<i64: 32, 32>}, {pipeline_mode = #tpu.pipeline_mode<synchronous>, transform_indices = @transform_5, window_bounds = array<i64: 96, 32>}, {pipeline_mode = #tpu.pipeline_mode<synchronous>, transform_indices = @transform_6, window_bounds = array<i64: 1, 32>}, {pipeline_mode = #tpu.pipeline_mode<synchronous>, transform_indices = @transform_7, window_bounds = array<i64: 32, 32>}, {pipeline_mode = #tpu.pipeline_mode<synchronous>, transform_indices = @transform_8, window_bounds = array<i64: 1, 32>}, {pipeline_mode = #tpu.pipeline_mode<synchronous>, transform_indices = @transform_9, window_bounds = array<i64: 32, 32>}, {pipeline_mode = #tpu.pipeline_mode<synchronous>, transform_indices = @transform_10, window_bounds = array<i64: 1, 32>}, {pipeline_mode = #tpu.pipeline_mode<synchronous>, transform_indices = @transform_11, window_bounds = array<i64: 1, 32>}, {pipeline_mode = #tpu.pipeline_mode<synchronous>, transform_indices = @transform_12, window_bounds = array<i64: 1, 32>}, {pipeline_mode = #tpu.pipeline_mode<synchronous>, transform_indices = @transform_13, window_bounds = array<i64: 32, 128>}, {pipeline_mode = #tpu.pipeline_mode<synchronous>, transform_indices = @transform_14, window_bounds = array<i64: 1, 128>}, {pipeline_mode = #tpu.pipeline_mode<synchronous>, transform_indices = @transform_15, window_bounds = array<i64: 128, 32>}, {pipeline_mode = #tpu.pipeline_mode<synchronous>, transform_indices = @transform_16, window_bounds = array<i64: 1, 32>}, {pipeline_mode = #tpu.pipeline_mode<synchronous>, transform_indices = @transform_17, window_bounds = array<i64: 1, 32>}, {pipeline_mode = #tpu.pipeline_mode<synchronous>, transform_indices = @transform_18, window_bounds = array<i64: 1, 32>}, {transform_indices = @transform_19, window_bounds = array<i64: 16, 32>}]} {
    %c0 = arith.constant 0 : index
    %c0_0 = arith.constant 0 : index
    %0 = vector.load %arg1[%c0, %c0_0] : memref<16x32xf32, #tpu.memory_space<vmem>>, vector<16x32xf32>
    %c0_1 = arith.constant 0 : index
    %c0_2 = arith.constant 0 : index
    %1 = vector.load %arg2[%c0_1, %c0_2] : memref<128x96xbf16, #tpu.memory_space<vmem>>, vector<128x96xbf16>
    %c0_3 = arith.constant 0 : index
    %c0_4 = arith.constant 0 : index
    %2 = vector.load %arg3[%c0_3, %c0_4] : memref<16x8xf32, #tpu.memory_space<vmem>>, vector<16x8xf32>
    %c0_5 = arith.constant 0 : index
    %c0_6 = arith.constant 0 : index
    %3 = vector.load %arg4[%c0_5, %c0_6] : memref<16x1xf32, #tpu.memory_space<vmem>>, vector<16x1xf32>
    %c0_7 = arith.constant 0 : index
    %c0_8 = arith.constant 0 : index
    %4 = vector.load %arg5[%c0_7, %c0_8] : memref<32x32xbf16, #tpu.memory_space<vmem>>, vector<32x32xbf16>
    %c0_9 = arith.constant 0 : index
    %c0_10 = arith.constant 0 : index
    %5 = vector.load %arg6[%c0_9, %c0_10] : memref<96x32xbf16, #tpu.memory_space<vmem>>, vector<96x32xbf16>
    %c0_11 = arith.constant 0 : index
    %c0_12 = arith.constant 0 : index
    %6 = vector.load %arg7[%c0_11, %c0_12] : memref<1x32xf32, #tpu.memory_space<vmem>>, vector<1x32xf32>
    %c0_13 = arith.constant 0 : index
    %c0_14 = arith.constant 0 : index
    %7 = vector.load %arg8[%c0_13, %c0_14] : memref<32x32xbf16, #tpu.memory_space<vmem>>, vector<32x32xbf16>
    %c0_15 = arith.constant 0 : index
    %c0_16 = arith.constant 0 : index
    %8 = vector.load %arg9[%c0_15, %c0_16] : memref<1x32xf32, #tpu.memory_space<vmem>>, vector<1x32xf32>
    %c0_17 = arith.constant 0 : index
    %c0_18 = arith.constant 0 : index
    %9 = vector.load %arg10[%c0_17, %c0_18] : memref<32x32xbf16, #tpu.memory_space<vmem>>, vector<32x32xbf16>
    %c0_19 = arith.constant 0 : index
    %c0_20 = arith.constant 0 : index
    %10 = vector.load %arg11[%c0_19, %c0_20] : memref<1x32xf32, #tpu.memory_space<vmem>>, vector<1x32xf32>
    %c0_21 = arith.constant 0 : index
    %c0_22 = arith.constant 0 : index
    %11 = vector.load %arg12[%c0_21, %c0_22] : memref<1x32xf32, #tpu.memory_space<vmem>>, vector<1x32xf32>
    %c0_23 = arith.constant 0 : index
    %c0_24 = arith.constant 0 : index
    %12 = vector.load %arg13[%c0_23, %c0_24] : memref<1x32xf32, #tpu.memory_space<vmem>>, vector<1x32xf32>
    %c0_25 = arith.constant 0 : index
    %c0_26 = arith.constant 0 : index
    %13 = vector.load %arg14[%c0_25, %c0_26] : memref<32x128xbf16, #tpu.memory_space<vmem>>, vector<32x128xbf16>
    %c0_27 = arith.constant 0 : index
    %c0_28 = arith.constant 0 : index
    %14 = vector.load %arg15[%c0_27, %c0_28] : memref<1x128xf32, #tpu.memory_space<vmem>>, vector<1x128xf32>
    %c0_29 = arith.constant 0 : index
    %c0_30 = arith.constant 0 : index
    %15 = vector.load %arg16[%c0_29, %c0_30] : memref<128x32xbf16, #tpu.memory_space<vmem>>, vector<128x32xbf16>
    %c0_31 = arith.constant 0 : index
    %c0_32 = arith.constant 0 : index
    %16 = vector.load %arg17[%c0_31, %c0_32] : memref<1x32xf32, #tpu.memory_space<vmem>>, vector<1x32xf32>
    %c0_33 = arith.constant 0 : index
    %c0_34 = arith.constant 0 : index
    %17 = vector.load %arg18[%c0_33, %c0_34] : memref<1x32xf32, #tpu.memory_space<vmem>>, vector<1x32xf32>
    %c0_35 = arith.constant 0 : index
    %c0_36 = arith.constant 0 : index
    %18 = vector.load %arg19[%c0_35, %c0_36] : memref<1x32xf32, #tpu.memory_space<vmem>>, vector<1x32xf32>
    %19 = arith.truncf %0 : vector<16x32xf32> to vector<16x32xbf16>
    %cst = arith.constant dense<0.000000e+00> : vector<16x32xf32>
    %20 = tpu.matmul %19, %4, %cst {dimension_numbers = #tpu.dot_dimension_numbers<[1], [0], [0], [1], [0, 0, 1, 1], [], []>} : vector<16x32xbf16>, vector<32x32xbf16>, vector<16x32xf32> -> vector<16x32xf32>
    %21 = vector.broadcast %6 : vector<1x32xf32> to vector<16x32xf32>
    %22 = arith.addf %20, %21 : vector<16x32xf32>
    %cst_37 = arith.constant dense<0.000000e+00> : vector<128x32xf32>
    %23 = tpu.matmul %1, %5, %cst_37 {dimension_numbers = #tpu.dot_dimension_numbers<[1], [0], [0], [1], [0, 0, 1, 1], [], []>} : vector<128x96xbf16>, vector<96x32xbf16>, vector<128x32xf32> -> vector<128x32xf32>
    %24 = vector.shape_cast %23 : vector<128x32xf32> to vector<16x8x32xf32>
    %25 = vector.shape_cast %22 : vector<16x32xf32> to vector<16x1x32xf32>
    %26 = vector.broadcast %25 : vector<16x1x32xf32> to vector<16x8x32xf32>
    %27 = arith.addf %24, %26 : vector<16x8x32xf32>
    %cst_38 = arith.constant 4.471500e-02 : f32
    %28 = vector.broadcast %cst_38 : f32 to vector<16x8x32xf32>
    %29 = arith.mulf %28, %27 : vector<16x8x32xf32>
    %30 = arith.mulf %29, %27 : vector<16x8x32xf32>
    %31 = arith.mulf %30, %27 : vector<16x8x32xf32>
    %32 = arith.addf %27, %31 : vector<16x8x32xf32>
    %cst_39 = arith.constant 0.797884583 : f32
    %33 = vector.broadcast %cst_39 : f32 to vector<16x8x32xf32>
    %34 = arith.mulf %33, %32 : vector<16x8x32xf32>
    %cst_40 = arith.constant 2.000000e+00 : f32
    %35 = vector.broadcast %cst_40 : f32 to vector<16x8x32xf32>
    %36 = arith.mulf %35, %34 : vector<16x8x32xf32>
    %37 = math.exp %36 : vector<16x8x32xf32>
    %cst_41 = arith.constant 1.000000e+00 : f32
    %38 = vector.broadcast %cst_41 : f32 to vector<16x8x32xf32>
    %39 = arith.addf %37, %38 : vector<16x8x32xf32>
    %cst_42 = arith.constant 2.000000e+00 : f32
    %40 = vector.broadcast %cst_42 : f32 to vector<16x8x32xf32>
    %41 = arith.divf %40, %39 : vector<16x8x32xf32>
    %cst_43 = arith.constant 1.000000e+00 : f32
    %42 = vector.broadcast %cst_43 : f32 to vector<16x8x32xf32>
    %43 = arith.subf %42, %41 : vector<16x8x32xf32>
    %cst_44 = arith.constant 5.000000e-01 : f32
    %44 = vector.broadcast %cst_44 : f32 to vector<16x8x32xf32>
    %45 = arith.mulf %44, %27 : vector<16x8x32xf32>
    %cst_45 = arith.constant 1.000000e+00 : f32
    %46 = vector.broadcast %cst_45 : f32 to vector<16x8x32xf32>
    %47 = arith.addf %46, %43 : vector<16x8x32xf32>
    %48 = arith.mulf %45, %47 : vector<16x8x32xf32>
    %49 = vector.shape_cast %48 : vector<16x8x32xf32> to vector<128x32xf32>
    %50 = arith.truncf %49 : vector<128x32xf32> to vector<128x32xbf16>
    %cst_46 = arith.constant dense<0.000000e+00> : vector<128x32xf32>
    %51 = tpu.matmul %50, %7, %cst_46 {dimension_numbers = #tpu.dot_dimension_numbers<[1], [0], [0], [1], [0, 0, 1, 1], [], []>} : vector<128x32xbf16>, vector<32x32xbf16>, vector<128x32xf32> -> vector<128x32xf32>
    %52 = vector.broadcast %8 : vector<1x32xf32> to vector<128x32xf32>
    %53 = arith.addf %51, %52 : vector<128x32xf32>
    %cst_47 = arith.constant 4.471500e-02 : f32
    %54 = vector.broadcast %cst_47 : f32 to vector<128x32xf32>
    %55 = arith.mulf %54, %53 : vector<128x32xf32>
    %56 = arith.mulf %55, %53 : vector<128x32xf32>
    %57 = arith.mulf %56, %53 : vector<128x32xf32>
    %58 = arith.addf %53, %57 : vector<128x32xf32>
    %cst_48 = arith.constant 0.797884583 : f32
    %59 = vector.broadcast %cst_48 : f32 to vector<128x32xf32>
    %60 = arith.mulf %59, %58 : vector<128x32xf32>
    %cst_49 = arith.constant 2.000000e+00 : f32
    %61 = vector.broadcast %cst_49 : f32 to vector<128x32xf32>
    %62 = arith.mulf %61, %60 : vector<128x32xf32>
    %63 = math.exp %62 : vector<128x32xf32>
    %cst_50 = arith.constant 1.000000e+00 : f32
    %64 = vector.broadcast %cst_50 : f32 to vector<128x32xf32>
    %65 = arith.addf %63, %64 : vector<128x32xf32>
    %cst_51 = arith.constant 2.000000e+00 : f32
    %66 = vector.broadcast %cst_51 : f32 to vector<128x32xf32>
    %67 = arith.divf %66, %65 : vector<128x32xf32>
    %cst_52 = arith.constant 1.000000e+00 : f32
    %68 = vector.broadcast %cst_52 : f32 to vector<128x32xf32>
    %69 = arith.subf %68, %67 : vector<128x32xf32>
    %cst_53 = arith.constant 5.000000e-01 : f32
    %70 = vector.broadcast %cst_53 : f32 to vector<128x32xf32>
    %71 = arith.mulf %70, %53 : vector<128x32xf32>
    %cst_54 = arith.constant 1.000000e+00 : f32
    %72 = vector.broadcast %cst_54 : f32 to vector<128x32xf32>
    %73 = arith.addf %72, %69 : vector<128x32xf32>
    %74 = arith.mulf %71, %73 : vector<128x32xf32>
    %75 = vector.shape_cast %74 : vector<128x32xf32> to vector<16x8x32xf32>
    %76 = vector.shape_cast %2 : vector<16x8xf32> to vector<16x8x1xf32>
    %77 = vector.broadcast %76 : vector<16x8x1xf32> to vector<16x8x32xf32>
    %78 = arith.mulf %75, %77 : vector<16x8x32xf32>
    %cst_55 = arith.constant dense<0.000000e+00> : vector<16xf32>
    %79 = vector.multi_reduction <add>, %2, %cst_55 [1] : vector<16x8xf32> to vector<16xf32>
    %80 = vector.shape_cast %79 : vector<16xf32> to vector<16x1xf32>
    %cst_56 = arith.constant dense<0.000000e+00> : vector<16x32xf32>
    %81 = vector.multi_reduction <add>, %78, %cst_56 [1] : vector<16x8x32xf32> to vector<16x32xf32>
    %82 = arith.truncf %81 : vector<16x32xf32> to vector<16x32xbf16>
    %cst_57 = arith.constant dense<0.000000e+00> : vector<16x32xf32>
    %83 = tpu.matmul %82, %9, %cst_57 {dimension_numbers = #tpu.dot_dimension_numbers<[1], [0], [0], [1], [0, 0, 1, 1], [], []>} : vector<16x32xbf16>, vector<32x32xbf16>, vector<16x32xf32> -> vector<16x32xf32>
    %84 = vector.broadcast %80 : vector<16x1xf32> to vector<16x32xf32>
    %85 = vector.broadcast %10 : vector<1x32xf32> to vector<16x32xf32>
    %86 = arith.mulf %84, %85 : vector<16x32xf32>
    %87 = arith.addf %83, %86 : vector<16x32xf32>
    %cst_58 = arith.constant 0.0333333351 : f32
    %88 = vector.broadcast %cst_58 : f32 to vector<16x32xf32>
    %89 = arith.mulf %87, %88 : vector<16x32xf32>
    %90 = arith.addf %0, %89 : vector<16x32xf32>
    %cst_59 = arith.constant dense<0.000000e+00> : vector<16xf32>
    %91 = vector.multi_reduction <add>, %90, %cst_59 [1] : vector<16x32xf32> to vector<16xf32>
    %92 = vector.shape_cast %91 : vector<16xf32> to vector<16x1xf32>
    %cst_60 = arith.constant 3.200000e+01 : f32
    %93 = vector.broadcast %cst_60 : f32 to vector<16x1xf32>
    %94 = arith.divf %92, %93 : vector<16x1xf32>
    %95 = vector.broadcast %94 : vector<16x1xf32> to vector<16x32xf32>
    %96 = arith.subf %90, %95 : vector<16x32xf32>
    %97 = arith.mulf %96, %96 : vector<16x32xf32>
    %cst_61 = arith.constant dense<0.000000e+00> : vector<16xf32>
    %98 = vector.multi_reduction <add>, %97, %cst_61 [1] : vector<16x32xf32> to vector<16xf32>
    %99 = vector.shape_cast %98 : vector<16xf32> to vector<16x1xf32>
    %cst_62 = arith.constant 3.200000e+01 : f32
    %100 = vector.broadcast %cst_62 : f32 to vector<16x1xf32>
    %101 = arith.divf %99, %100 : vector<16x1xf32>
    %102 = vector.broadcast %94 : vector<16x1xf32> to vector<16x32xf32>
    %103 = arith.subf %90, %102 : vector<16x32xf32>
    %cst_63 = arith.constant 9.99999974E-6 : f32
    %104 = vector.broadcast %cst_63 : f32 to vector<16x1xf32>
    %105 = arith.addf %101, %104 : vector<16x1xf32>
    %106 = math.rsqrt %105 : vector<16x1xf32>
    %107 = vector.broadcast %106 : vector<16x1xf32> to vector<16x32xf32>
    %108 = arith.mulf %103, %107 : vector<16x32xf32>
    %109 = vector.broadcast %11 : vector<1x32xf32> to vector<16x32xf32>
    %110 = arith.mulf %108, %109 : vector<16x32xf32>
    %111 = vector.broadcast %12 : vector<1x32xf32> to vector<16x32xf32>
    %112 = arith.addf %110, %111 : vector<16x32xf32>
    %113 = arith.truncf %112 : vector<16x32xf32> to vector<16x32xbf16>
    %cst_64 = arith.constant dense<0.000000e+00> : vector<16x128xf32>
    %114 = tpu.matmul %113, %13, %cst_64 {dimension_numbers = #tpu.dot_dimension_numbers<[1], [0], [0], [1], [0, 0, 1, 1], [], []>} : vector<16x32xbf16>, vector<32x128xbf16>, vector<16x128xf32> -> vector<16x128xf32>
    %115 = vector.broadcast %14 : vector<1x128xf32> to vector<16x128xf32>
    %116 = arith.addf %114, %115 : vector<16x128xf32>
    %cst_65 = arith.constant 4.471500e-02 : f32
    %117 = vector.broadcast %cst_65 : f32 to vector<16x128xf32>
    %118 = arith.mulf %117, %116 : vector<16x128xf32>
    %119 = arith.mulf %118, %116 : vector<16x128xf32>
    %120 = arith.mulf %119, %116 : vector<16x128xf32>
    %121 = arith.addf %116, %120 : vector<16x128xf32>
    %cst_66 = arith.constant 0.797884583 : f32
    %122 = vector.broadcast %cst_66 : f32 to vector<16x128xf32>
    %123 = arith.mulf %122, %121 : vector<16x128xf32>
    %cst_67 = arith.constant 2.000000e+00 : f32
    %124 = vector.broadcast %cst_67 : f32 to vector<16x128xf32>
    %125 = arith.mulf %124, %123 : vector<16x128xf32>
    %126 = math.exp %125 : vector<16x128xf32>
    %cst_68 = arith.constant 1.000000e+00 : f32
    %127 = vector.broadcast %cst_68 : f32 to vector<16x128xf32>
    %128 = arith.addf %126, %127 : vector<16x128xf32>
    %cst_69 = arith.constant 2.000000e+00 : f32
    %129 = vector.broadcast %cst_69 : f32 to vector<16x128xf32>
    %130 = arith.divf %129, %128 : vector<16x128xf32>
    %cst_70 = arith.constant 1.000000e+00 : f32
    %131 = vector.broadcast %cst_70 : f32 to vector<16x128xf32>
    %132 = arith.subf %131, %130 : vector<16x128xf32>
    %cst_71 = arith.constant 5.000000e-01 : f32
    %133 = vector.broadcast %cst_71 : f32 to vector<16x128xf32>
    %134 = arith.mulf %133, %116 : vector<16x128xf32>
    %cst_72 = arith.constant 1.000000e+00 : f32
    %135 = vector.broadcast %cst_72 : f32 to vector<16x128xf32>
    %136 = arith.addf %135, %132 : vector<16x128xf32>
    %137 = arith.mulf %134, %136 : vector<16x128xf32>
    %138 = arith.truncf %137 : vector<16x128xf32> to vector<16x128xbf16>
    %cst_73 = arith.constant dense<0.000000e+00> : vector<16x32xf32>
    %139 = tpu.matmul %138, %15, %cst_73 {dimension_numbers = #tpu.dot_dimension_numbers<[1], [0], [0], [1], [0, 0, 1, 1], [], []>} : vector<16x128xbf16>, vector<128x32xbf16>, vector<16x32xf32> -> vector<16x32xf32>
    %140 = vector.broadcast %16 : vector<1x32xf32> to vector<16x32xf32>
    %141 = arith.addf %139, %140 : vector<16x32xf32>
    %142 = arith.addf %112, %141 : vector<16x32xf32>
    %cst_74 = arith.constant dense<0.000000e+00> : vector<16xf32>
    %143 = vector.multi_reduction <add>, %142, %cst_74 [1] : vector<16x32xf32> to vector<16xf32>
    %144 = vector.shape_cast %143 : vector<16xf32> to vector<16x1xf32>
    %cst_75 = arith.constant 3.200000e+01 : f32
    %145 = vector.broadcast %cst_75 : f32 to vector<16x1xf32>
    %146 = arith.divf %144, %145 : vector<16x1xf32>
    %147 = vector.broadcast %146 : vector<16x1xf32> to vector<16x32xf32>
    %148 = arith.subf %142, %147 : vector<16x32xf32>
    %149 = arith.mulf %148, %148 : vector<16x32xf32>
    %cst_76 = arith.constant dense<0.000000e+00> : vector<16xf32>
    %150 = vector.multi_reduction <add>, %149, %cst_76 [1] : vector<16x32xf32> to vector<16xf32>
    %151 = vector.shape_cast %150 : vector<16xf32> to vector<16x1xf32>
    %cst_77 = arith.constant 3.200000e+01 : f32
    %152 = vector.broadcast %cst_77 : f32 to vector<16x1xf32>
    %153 = arith.divf %151, %152 : vector<16x1xf32>
    %154 = vector.broadcast %146 : vector<16x1xf32> to vector<16x32xf32>
    %155 = arith.subf %142, %154 : vector<16x32xf32>
    %cst_78 = arith.constant 9.99999974E-6 : f32
    %156 = vector.broadcast %cst_78 : f32 to vector<16x1xf32>
    %157 = arith.addf %153, %156 : vector<16x1xf32>
    %158 = math.rsqrt %157 : vector<16x1xf32>
    %159 = vector.broadcast %158 : vector<16x1xf32> to vector<16x32xf32>
    %160 = arith.mulf %155, %159 : vector<16x32xf32>
    %161 = vector.broadcast %17 : vector<1x32xf32> to vector<16x32xf32>
    %162 = arith.mulf %160, %161 : vector<16x32xf32>
    %163 = vector.broadcast %18 : vector<1x32xf32> to vector<16x32xf32>
    %164 = arith.addf %162, %163 : vector<16x32xf32>
    %165 = vector.broadcast %3 : vector<16x1xf32> to vector<16x32xf32>
    %166 = arith.mulf %164, %165 : vector<16x32xf32>
    %c0_79 = arith.constant 0 : index
    %c0_80 = arith.constant 0 : index
    %167 = vector.load %arg20[%c0_79, %c0_80] : memref<16x32xf32, #tpu.memory_space<vmem>>, vector<16x32xf32>
    tpu.vector_store %arg20[%c0_79, %c0_80], %166 {strides = array<i32>} : memref<16x32xf32, #tpu.memory_space<vmem>>, vector<16x32xf32>,
    return
  }
  func.func @transform_0(%arg0: i32) -> (i32, i32) {
    %c0_i32 = arith.constant 0 : i32
    %c0_i32_0 = arith.constant 0 : i32
    return %arg0, %c0_i32 : i32, i32
  }
  func.func @transform_1(%arg0: i32) -> (i32, i32) {
    %c0_i32 = arith.constant 0 : i32
    %c0_i32_0 = arith.constant 0 : i32
    return %arg0, %c0_i32 : i32, i32
  }
  func.func @transform_2(%arg0: i32) -> (i32, i32) {
    %c0_i32 = arith.constant 0 : i32
    %c0_i32_0 = arith.constant 0 : i32
    return %arg0, %c0_i32 : i32, i32
  }
  func.func @transform_3(%arg0: i32) -> (i32, i32) {
    %c0_i32 = arith.constant 0 : i32
    %c0_i32_0 = arith.constant 0 : i32
    return %arg0, %c0_i32 : i32, i32
  }
  func.func @transform_4(%arg0: i32) -> (i32, i32) {
    %c0_i32 = arith.constant 0 : i32
    %c0_i32_0 = arith.constant 0 : i32
    %c0_i32_1 = arith.constant 0 : i32
    return %c0_i32, %c0_i32_0 : i32, i32
  }
  func.func @transform_5(%arg0: i32) -> (i32, i32) {
    %c0_i32 = arith.constant 0 : i32
    %c0_i32_0 = arith.constant 0 : i32
    %c0_i32_1 = arith.constant 0 : i32
    return %c0_i32, %c0_i32_0 : i32, i32
  }
  func.func @transform_6(%arg0: i32) -> (i32, i32) {
    %c0_i32 = arith.constant 0 : i32
    %c0_i32_0 = arith.constant 0 : i32
    %c0_i32_1 = arith.constant 0 : i32
    return %c0_i32, %c0_i32_0 : i32, i32
  }
  func.func @transform_7(%arg0: i32) -> (i32, i32) {
    %c0_i32 = arith.constant 0 : i32
    %c0_i32_0 = arith.constant 0 : i32
    %c0_i32_1 = arith.constant 0 : i32
    return %c0_i32, %c0_i32_0 : i32, i32
  }
  func.func @transform_8(%arg0: i32) -> (i32, i32) {
    %c0_i32 = arith.constant 0 : i32
    %c0_i32_0 = arith.constant 0 : i32
    %c0_i32_1 = arith.constant 0 : i32
    return %c0_i32, %c0_i32_0 : i32, i32
  }
  func.func @transform_9(%arg0: i32) -> (i32, i32) {
    %c0_i32 = arith.constant 0 : i32
    %c0_i32_0 = arith.constant 0 : i32
    %c0_i32_1 = arith.constant 0 : i32
    return %c0_i32, %c0_i32_0 : i32, i32
  }
  func.func @transform_10(%arg0: i32) -> (i32, i32) {
    %c0_i32 = arith.constant 0 : i32
    %c0_i32_0 = arith.constant 0 : i32
    %c0_i32_1 = arith.constant 0 : i32
    return %c0_i32, %c0_i32_0 : i32, i32
  }
  func.func @transform_11(%arg0: i32) -> (i32, i32) {
    %c0_i32 = arith.constant 0 : i32
    %c0_i32_0 = arith.constant 0 : i32
    %c0_i32_1 = arith.constant 0 : i32
    return %c0_i32, %c0_i32_0 : i32, i32
  }
  func.func @transform_12(%arg0: i32) -> (i32, i32) {
    %c0_i32 = arith.constant 0 : i32
    %c0_i32_0 = arith.constant 0 : i32
    %c0_i32_1 = arith.constant 0 : i32
    return %c0_i32, %c0_i32_0 : i32, i32
  }
  func.func @transform_13(%arg0: i32) -> (i32, i32) {
    %c0_i32 = arith.constant 0 : i32
    %c0_i32_0 = arith.constant 0 : i32
    %c0_i32_1 = arith.constant 0 : i32
    return %c0_i32, %c0_i32_0 : i32, i32
  }
  func.func @transform_14(%arg0: i32) -> (i32, i32) {
    %c0_i32 = arith.constant 0 : i32
    %c0_i32_0 = arith.constant 0 : i32
    %c0_i32_1 = arith.constant 0 : i32
    return %c0_i32, %c0_i32_0 : i32, i32
  }
  func.func @transform_15(%arg0: i32) -> (i32, i32) {
    %c0_i32 = arith.constant 0 : i32
    %c0_i32_0 = arith.constant 0 : i32
    %c0_i32_1 = arith.constant 0 : i32
    return %c0_i32, %c0_i32_0 : i32, i32
  }
  func.func @transform_16(%arg0: i32) -> (i32, i32) {
    %c0_i32 = arith.constant 0 : i32
    %c0_i32_0 = arith.constant 0 : i32
    %c0_i32_1 = arith.constant 0 : i32
    return %c0_i32, %c0_i32_0 : i32, i32
  }
  func.func @transform_17(%arg0: i32) -> (i32, i32) {
    %c0_i32 = arith.constant 0 : i32
    %c0_i32_0 = arith.constant 0 : i32
    %c0_i32_1 = arith.constant 0 : i32
    return %c0_i32, %c0_i32_0 : i32, i32
  }
  func.func @transform_18(%arg0: i32) -> (i32, i32) {
    %c0_i32 = arith.constant 0 : i32
    %c0_i32_0 = arith.constant 0 : i32
    %c0_i32_1 = arith.constant 0 : i32
    return %c0_i32, %c0_i32_0 : i32, i32
  }
  func.func @transform_19(%arg0: i32) -> (i32, i32) {
    %c0_i32 = arith.constant 0 : i32
    %c0_i32_0 = arith.constant 0 : i32
    return %arg0, %c0_i32 : i32, i32
  }
}

module attributes {stable_mosaic.version = 11 : i64} {
  func.func @_logits_kernel(%arg0: i32, %arg1: memref<16x32xf32, #tpu.memory_space<vmem>>, %arg2: memref<32x21xbf16, #tpu.memory_space<vmem>>, %arg3: memref<1x21xf32, #tpu.memory_space<vmem>>, %arg4: memref<16x21xf32, #tpu.memory_space<vmem>>) attributes {dimension_semantics = [#tpu.dimension_semantics<parallel>], iteration_bounds = array<i64: 4>, scalar_prefetch = 0 : i64, scratch_operands = 0 : i64, tpu.core_type = #tpu.core_type<tc>, window_params = [{transform_indices = @transform_0, window_bounds = array<i64: 16, 32>}, {pipeline_mode = #tpu.pipeline_mode<synchronous>, transform_indices = @transform_1, window_bounds = array<i64: 32, 21>}, {pipeline_mode = #tpu.pipeline_mode<synchronous>, transform_indices = @transform_2, window_bounds = array<i64: 1, 21>}, {transform_indices = @transform_3, window_bounds = array<i64: 16, 21>}]} {
    %c0 = arith.constant 0 : index
    %c0_0 = arith.constant 0 : index
    %0 = vector.load %arg1[%c0, %c0_0] : memref<16x32xf32, #tpu.memory_space<vmem>>, vector<16x32xf32>
    %c0_1 = arith.constant 0 : index
    %c0_2 = arith.constant 0 : index
    %1 = vector.load %arg2[%c0_1, %c0_2] : memref<32x21xbf16, #tpu.memory_space<vmem>>, vector<32x21xbf16>
    %c0_3 = arith.constant 0 : index
    %c0_4 = arith.constant 0 : index
    %2 = vector.load %arg3[%c0_3, %c0_4] : memref<1x21xf32, #tpu.memory_space<vmem>>, vector<1x21xf32>
    %3 = arith.truncf %0 : vector<16x32xf32> to vector<16x32xbf16>
    %cst = arith.constant dense<0.000000e+00> : vector<16x21xf32>
    %4 = tpu.matmul %3, %1, %cst {dimension_numbers = #tpu.dot_dimension_numbers<[1], [0], [0], [1], [0, 0, 1, 1], [], []>} : vector<16x32xbf16>, vector<32x21xbf16>, vector<16x21xf32> -> vector<16x21xf32>
    %5 = vector.broadcast %2 : vector<1x21xf32> to vector<16x21xf32>
    %6 = arith.addf %4, %5 : vector<16x21xf32>
    %cst_5 = arith.constant dense<0xFF800000> : vector<16xf32>
    %7 = vector.multi_reduction <maximumf>, %6, %cst_5 [1] : vector<16x21xf32> to vector<16xf32>
    %8 = vector.shape_cast %7 : vector<16xf32> to vector<16x1xf32>
    %9 = vector.broadcast %8 : vector<16x1xf32> to vector<16x21xf32>
    %10 = arith.subf %6, %9 : vector<16x21xf32>
    %11 = math.exp %10 : vector<16x21xf32>
    %cst_6 = arith.constant dense<0.000000e+00> : vector<16xf32>
    %12 = vector.multi_reduction <add>, %11, %cst_6 [1] : vector<16x21xf32> to vector<16xf32>
    %13 = vector.shape_cast %12 : vector<16xf32> to vector<16x1xf32>
    %14 = vector.broadcast %13 : vector<16x1xf32> to vector<16x21xf32>
    %15 = arith.divf %11, %14 : vector<16x21xf32>
    %c0_7 = arith.constant 0 : index
    %c0_8 = arith.constant 0 : index
    %16 = vector.load %arg4[%c0_7, %c0_8] : memref<16x21xf32, #tpu.memory_space<vmem>>, vector<16x21xf32>
    tpu.vector_store %arg4[%c0_7, %c0_8], %15 {strides = array<i32>} : memref<16x21xf32, #tpu.memory_space<vmem>>, vector<16x21xf32>,
    return
  }
  func.func @transform_0(%arg0: i32) -> (i32, i32) {
    %c0_i32 = arith.constant 0 : i32
    %c0_i32_0 = arith.constant 0 : i32
    return %arg0, %c0_i32 : i32, i32
  }
  func.func @transform_1(%arg0: i32) -> (i32, i32) {
    %c0_i32 = arith.constant 0 : i32
    %c0_i32_0 = arith.constant 0 : i32
    %c0_i32_1 = arith.constant 0 : i32
    return %c0_i32, %c0_i32_0 : i32, i32
  }
  func.func @transform_2(%arg0: i32) -> (i32, i32) {
    %c0_i32 = arith.constant 0 : i32
    %c0_i32_0 = arith.constant 0 : i32
    %c0_i32_1 = arith.constant 0 : i32
    return %c0_i32, %c0_i32_0 : i32, i32
  }
  func.func @transform_3(%arg0: i32) -> (i32, i32) {
    %c0_i32 = arith.constant 0 : i32
    %c0_i32_0 = arith.constant 0 : i32
    return %arg0, %c0_i32 : i32, i32
  }
}

</mosaic_0001>

<bundles_post_ra>
// kernel: protein_mpnn_forward.11
= control target key start
LH: loop header
LB: loop body
LE: loop exit
PB: predicated region body
PF: predicated region fallthrough
CT: control target
= control target key end

     0   :  { %s609_s12 = smov 0   ;;  %s681_s0 = inlined_call_operand.vmem [shape: f32[512,24], index: 0, kind: input, shape index: {}]   ;;  %s682_s1 = inlined_call_operand.vmem [shape: bf16[24,32], index: 1, kind: input, shape index: {}]   ;;  %s683_s2 = inlined_call_operand.vmem [shape: f32[1,32], index: 2, kind: input, shape index: {}]   ;;  %s684_s3 = inlined_call_operand.vmem [shape: bf16[512,32], index: 3, kind: output, shape index: {}]  }
   0x1 LB: > { %s481_s13 = sadd.s32 4294967295, %s587_s12   ;;  %p485_p0 = scmp.ge.s32.totalorder %s587_s12, 1  ;;  %s587_s12 = sphi %s609_s12, %s13_s12  }
   0x2   : > { %p138_p1 = scmp.lt.s32.totalorder %s587_s12, 5 }
   0x4   : > { %p139_p2 = pnand %p485_p0, %p138_p1 }
   0x5   : > { %v579_v0 = vld [vmem:[%s682_s1] sm:$0xff] (!%p139_p2)   ;;  %v580_v1 = vld [vmem:[%s682_s1 + $0x8] ss:$0 sps:$4 sm:$0xff] (!%p139_p2)   ;;  %vm243_vm0 = vcmask (!%p139_p2), 1043456   ;;  %s486_s18 = sshll.u32 (!%p139_p2), %s481_s13, 4  ;;  %vm218_vm1 = vcmask (!%p139_p2), 195584  }
   0x6   : > { %142 = sbr.rel (%p139_p2) target bundleno = 249 (0xf9), region = 32  ;;  %545 = vmatprep.subr.bf16.mxu0 (!%p139_p2), %v579_v0  ;;  %565 = vmatprep.subr.bf16.mxu1 (!%p139_p2), %v579_v0  ;;  %p163_p3 = scmp.lt.s32.totalorder (!%p139_p2), %s486_s18, 63  ;;  %v245_v2 = vsel (!%p139_p2), %vm243_vm0, %v580_v1, 0  ;;  %v490_v27 = vld [vmem:[%s683_s2] ss:$0 sm:$0xff] (!%p139_p2)  ;;  %vm408_vm2 = vcmask (!%p139_p2), 257024  }
   0x7   : > { %546 = vmatpush3.bf16.msra.mxu0 (!%p139_p2), %v579_v0  ;;  %567 = vmatpush3.bf16.msra.mxu1 (!%p139_p2), %v579_v0 }
   0x8   : > { %569 = vmatprep.subr.msk.bf16.mxu0 (!%p139_p2), %vm243_vm0, %v580_v1  ;;  %570 = vmatprep.subr.msk.bf16.mxu1 (!%p139_p2), %vm243_vm0, %v580_v1 }
   0xb   : > { %548 = vmatpush3.bf16.msra.mxu0 (!%p139_p2), %v245_v2  ;;  %568 = vmatpush3.bf16.msra.mxu1 (!%p139_p2), %v245_v2 }
   0xd   : > { %s686_s18 = smov (!%p163_p3, %s486_s18), 63 }
   0xe   : > { %s487_s19 = sshll.u32 %s686_s18, 3  ;;  %s489_s25 = sshll.u32 %s686_s18, 2 }
   0xf   : > { %s166_s22 = scalar_lea.vmem %s681_s0, %s487_s19  ;;  %s644_s28 = scalar_lea.vmem %s684_s3, %s489_s25 }
  0x10   : > { %v175_v3 = vld [vmem:[%s166_s22] sm:$0xff]  ;;  %v176_v4 = vld [vmem:[%s166_s22 + $0x8] sm:$0xff]  ;;  %v177_v8 = vld [vmem:[%s166_s22 + $0x10] sm:$0xff] }
  0x11   : > { %v183_v5 = vld [vmem:[%s166_s22 + $0x40] sm:$0xff]  ;;  %v194_v6 = vpack.c.bf16 %v176_v4, %v175_v3  ;;  %v184_v7 = vld [vmem:[%s166_s22 + $0x48] sm:$0xff]  ;;  %v178_v9 = vld [vmem:[%s166_s22 + $0x18] sm:$0xff] }
  0x12   : > { %v198_v10 = vpack.c.bf16 %v184_v7, %v183_v5  ;;  %v195_v11 = vpack.c.bf16 %v178_v9, %v177_v8  ;;  %v185_v12 = vld [vmem:[%s166_s22 + $0x50] sm:$0xff]  ;;  %v186_v13 = vld [vmem:[%s166_s22 + $0x58] sm:$0xff]  ;;  %v179_v14 = vld [vmem:[%s166_s22 + $0x20] sm:$0xff] }
  0x13   : > { %549 = vmatprep.mubr.msk.bf16.mxu0 %vm218_vm1, %v194_v6  ;;  %v199_v15 = vpack.c.bf16 %v186_v13, %v185_v12  ;;  %v180_v16 = vld [vmem:[%s166_s22 + $0x28] sm:$0xff]  ;;  %v187_v17 = vld [vmem:[%s166_s22 + $0x60] sm:$0xff]  ;;  %v181_v21 = vld [vmem:[%s166_s22 + $0x30] sm:$0xff] }
  0x14   : > { %v188_v18 = vld [vmem:[%s166_s22 + $0x68] sm:$0xff]  ;;  %557 = vmatprep.mubr.msk.bf16.mxu1 %vm218_vm1, %v198_v10  ;;  %550 = vmatmul.mubr.msk.bf16.vlgmr.msra.gmra.mrb[0].mxu0 %vm218_vm1, %v195_v11  ;;  %v196_v19 = vpack.c.bf16 %v180_v16, %v179_v14  ;;  %v182_v22 = vld [vmem:[%s166_s22 + $0x38] sm:$0xff]  ;;  %v189_v23 = vld [vmem:[%s166_s22 + $0x70] sm:$0xff] }
  0x15   : > { %v200_v20 = vpack.c.bf16 %v188_v18, %v187_v17  ;;  %558 = vmatmul.mubr.msk.bf16.vlgmr.msra.gmra.mrb[0].mxu1 %vm218_vm1, %v199_v15  ;;  %v190_v24 = vld [vmem:[%s166_s22 + $0x78] sm:$0xff]  ;;  %v197_v25 = vpack.c.bf16 %v182_v22, %v181_v21 }
  0x16   : > { %553 = vmatprep.mubr.msk.bf16.mxu0 %vm218_vm1, %v196_v19  ;;  %v201_v26 = vpack.c.bf16 %v190_v24, %v189_v23 }
  0x17   : > { %561 = vmatprep.mubr.msk.bf16.mxu1 %vm218_vm1, %v200_v20 }
  0x1c   : > { %554 = vmatmul.mubr.msk.bf16.gmra.mrb[4].mxu0 %vm218_vm1, %v197_v25 }
  0x1d   : > { %562 = vmatmul.mubr.msk.bf16.gmra.mrb[4].mxu1 %vm218_vm1, %v201_v26 }
  0xe7   : > { %v551_v28 = vpop.f32.mrb[0].mxu0 }
  0xe8   : > { %v290_v29 = vadd.f32 %v551_v28, %v490_v27  ;;  %v559_v30 = vpop.f32.mrb[0].mxu1  ;;  %v281_v31 = vpop.f32.mrb[1].mxu0 }
  0xe9   : > { %v322_v32 = vadd.f32 %v559_v30, %v490_v27  ;;  %v282_v33 = vadd.f32 %v490_v27, %v281_v31  ;;  %v313_v34 = vpop.f32.mrb[1].mxu1  ;;  %v552_v35 = vpop.f32.mrb[2].mxu0 }
  0xea   : > { %v521_v36 = vpack.c.bf16 %v290_v29, %v290_v29  ;;  %v314_v37 = vadd.f32 %v490_v27, %v313_v34  ;;  %v293_v38 = vadd.f32 %v552_v35, %v490_v27  ;;  %v560_v39 = vpop.f32.mrb[2].mxu1  ;;  %v284_v40 = vpop.f32.mrb[3].mxu0 }
  0xeb   : > { %v529_v41 = vpack.c.bf16 %v322_v32, %v322_v32  ;;  %v519_v42 = vpack.c.bf16 %v282_v33, %v282_v33  ;;  %v325_v43 = vadd.f32 %v560_v39, %v490_v27  ;;  %v285_v44 = vadd.f32 %v490_v27, %v284_v40  ;;  %v316_v45 = vpop.f32.mrb[3].mxu1 }
  0xec   : > { %411 = vst.msk [vmem:[%s644_s28 + $0x8] sm:$0xf] %vm408_vm2, %v521_v36  ;;  %v527_v46 = vpack.c.bf16 %v314_v37, %v314_v37  ;;  %v522_v47 = vpack.c.bf16 %v293_v38, %v293_v38  ;;  %v317_v48 = vadd.f32 %v490_v27, %v316_v45 }
  0xed   : > { %419 = vst.msk [vmem:[%s644_s28 + $0x28] sm:$0xf] %vm408_vm2, %v529_v41  ;;  %409 = vst.msk [vmem:[%s644_s28] sm:$0xf] %vm408_vm2, %v519_v42  ;;  %v530_v49 = vpack.c.bf16 %v325_v43, %v325_v43  ;;  %v520_v50 = vpack.c.bf16 %v285_v44, %v285_v44 }
  0xee   : > { %417 = vst.msk [vmem:[%s644_s28 + $0x20] sm:$0xf] %vm408_vm2, %v527_v46  ;;  %412 = vst.msk [vmem:[%s644_s28 + $0xc] sm:$0xf] %vm408_vm2, %v522_v47  ;;  %v528_v51 = vpack.c.bf16 %v317_v48, %v317_v48 }
  0xef   : > { %420 = vst.msk [vmem:[%s644_s28 + $0x2c] sm:$0xf] %vm408_vm2, %v530_v49  ;;  %410 = vst.msk [vmem:[%s644_s28 + $0x4] sm:$0xf] %vm408_vm2, %v520_v50  ;;  %v555_v52 = vpop.f32.mrb[4].mxu0 }
  0xf0   : > { %418 = vst.msk [vmem:[%s644_s28 + $0x24] sm:$0xf] %vm408_vm2, %v528_v51  ;;  %v306_v53 = vadd.f32 %v555_v52, %v490_v27  ;;  %v563_v54 = vpop.f32.mrb[4].mxu1  ;;  %v297_v55 = vpop.f32.mrb[5].mxu0 }
  0xf1   : > { %v338_v56 = vadd.f32 %v563_v54, %v490_v27  ;;  %v298_v57 = vadd.f32 %v490_v27, %v297_v55  ;;  %v329_v58 = vpop.f32.mrb[5].mxu1  ;;  %v556_v59 = vpop.f32.mrb[6].mxu0 }
  0xf2   : > { %v525_v60 = vpack.c.bf16 %v306_v53, %v306_v53  ;;  %v330_v61 = vadd.f32 %v490_v27, %v329_v58  ;;  %v309_v62 = vadd.f32 %v556_v59, %v490_v27  ;;  %v564_v63 = vpop.f32.mrb[6].mxu1  ;;  %v300_v0 = vpop.f32.mrb[7].mxu0 }
  0xf3   : > { %v533_v1 = vpack.c.bf16 %v338_v56, %v338_v56  ;;  %v523_v2 = vpack.c.bf16 %v298_v57, %v298_v57  ;;  %v341_v3 = vadd.f32 %v564_v63, %v490_v27  ;;  %v301_v4 = vadd.f32 %v490_v27, %v300_v0  ;;  %v332_v5 = vpop.f32.mrb[7].mxu1 }
  0xf4   : > { %415 = vst.msk [vmem:[%s644_s28 + $0x18] sm:$0xf] %vm408_vm2, %v525_v60  ;;  %v531_v6 = vpack.c.bf16 %v330_v61, %v330_v61  ;;  %v526_v7 = vpack.c.bf16 %v309_v62, %v309_v62  ;;  %v333_v8 = vadd.f32 %v490_v27, %v332_v5 }
  0xf5   : > { %423 = vst.msk [vmem:[%s644_s28 + $0x38] sm:$0xf] %vm408_vm2, %v533_v1  ;;  %413 = vst.msk [vmem:[%s644_s28 + $0x10] sm:$0xf] %vm408_vm2, %v523_v2  ;;  %v534_v9 = vpack.c.bf16 %v341_v3, %v341_v3  ;;  %v524_v10 = vpack.c.bf16 %v301_v4, %v301_v4 }
  0xf6   : > { %421 = vst.msk [vmem:[%s644_s28 + $0x30] sm:$0xf] %vm408_vm2, %v531_v6  ;;  %416 = vst.msk [vmem:[%s644_s28 + $0x1c] sm:$0xf] %vm408_vm2, %v526_v7  ;;  %v532_v11 = vpack.c.bf16 %v333_v8, %v333_v8 }
  0xf7   : > { %424 = vst.msk [vmem:[%s644_s28 + $0x3c] sm:$0xf] %vm408_vm2, %v534_v9  ;;  %414 = vst.msk [vmem:[%s644_s28 + $0x14] sm:$0xf] %vm408_vm2, %v524_v10 }
  0xf8   : > { %422 = vst.msk [vmem:[%s644_s28 + $0x34] sm:$0xf] %vm408_vm2, %v532_v11 }
  0xf9 PF: > { %s13_s12 = sadd.s32 1, %s587_s12  }
  0xfa   : > { %p10_p4 = scmp.ge.s32.totalorder %s13_s12, 6  }
  0xfc   :  { %12 = sbr.rel (!%p10_p4) target bundleno = 1 (0x1), region = 62 }

// kernel: protein_mpnn_forward.12
= control target key start
LH: loop header
LB: loop body
LE: loop exit
PB: predicated region body
PF: predicated region fallthrough
CT: control target
= control target key end

     0   :  { %s3624_s0 = inlined_call_operand.vmem [shape: f32[64,32], index: 0, kind: input, shape index: {}]   ;;  %s3625_s1 = inlined_call_operand.vmem [shape: bf16[512,64], index: 1, kind: input, shape index: {}]   ;;  %s3626_s2 = inlined_call_operand.vmem [shape: f32[64,8], index: 2, kind: input, shape index: {}]   ;;  %s3627_s3 = inlined_call_operand.vmem [shape: f32[64,1], index: 3, kind: input, shape index: {}]   ;;  %s3628_s4 = inlined_call_operand.vmem [shape: bf16[32,32], index: 4, kind: input, shape index: {}]   ;;  %s3629_s5 = inlined_call_operand.vmem [shape: bf16[64,32], index: 5, kind: input, shape index: {}]   ;;  %s3630_s6 = inlined_call_operand.vmem [shape: f32[1,32], index: 6, kind: input, shape index: {}]   ;;  %s3631_s7 = inlined_call_operand.vmem [shape: bf16[32,32], index: 7, kind: input, shape index: {}]   ;;  %s3632_s8 = inlined_call_operand.vmem [shape: f32[1,32], index: 8, kind: input, shape index: {}]   ;;  %s3633_s9 = inlined_call_operand.vmem [shape: bf16[32,32], index: 9, kind: input, shape index: {}]   ;;  %s3634_s10 = inlined_call_operand.vmem [shape: f32[1,32], index: 10, kind: input, shape index: {}]   ;;  %s3635_s11 = inlined_call_operand.vmem [shape: f32[1,32], index: 11, kind: input, shape index: {}]   ;;  %s3636_s12 = inlined_call_operand.vmem [shape: f32[1,32], index: 12, kind: input, shape index: {}]   ;;  %s3637_s13 = inlined_call_operand.vmem [shape: bf16[32,128], index: 13, kind: input, shape index: {}]   ;;  %s3638_s14 = inlined_call_operand.vmem [shape: f32[1,128], index: 14, kind: input, shape index: {}]   ;;  %s3639_s15 = inlined_call_operand.vmem [shape: bf16[128,32], index: 15, kind: input, shape index: {}]   ;;  %s3640_s16 = inlined_call_operand.vmem [shape: f32[1,32], index: 16, kind: input, shape index: {}]   ;;  %s3641_s17 = inlined_call_operand.vmem [shape: f32[1,32], index: 17, kind: input, shape index: {}]   ;;  %s3642_s18 = inlined_call_operand.vmem [shape: f32[1,32], index: 18, kind: input, shape index: {}]   ;;  %s3643_s19 = inlined_call_operand.vmem [shape: f32[64,32], index: 19, kind: output, shape index: {}]  }
   0x1   :  { %3644 = sst [smem:[#allocation2_spill]] %s3624_s0  ;;  %s3087_s0 = smov 0  }
   0x2   :  { %3645 = sst [smem:[#allocation3_spill]] %s3625_s1 }
   0x3   :  { %3646 = sst [smem:[#allocation4_spill]] %s3626_s2 }
   0x4   :  { %3647 = sst [smem:[#allocation5_spill]] %s3627_s3 }
   0x5 LB: > { %s2584_s30 = sadd.s32 4294967295, %s2981_s0   ;;  %p2588_p0 = scmp.ge.s32.totalorder %s2981_s0, 1  ;;  %s2981_s0 = sphi %s3087_s0, %s29_s0  }
   0x6   : > { %p571_p1 = scmp.lt.s32.totalorder %s2981_s0, 5 }
   0x8   : > { %p572_p2 = pnand %p2588_p0, %p571_p1 }
   0x9   : > { %v2799_v0 = vld [vmem:[%s3628_s4] sm:$0xff] (!%p572_p2)   ;;  %v2983_v1 = vmov (!%p572_p2), 0.0   ;;  %v2801_v3 = vld [vmem:[%s3628_s4 + $0x8] sm:$0xff] (!%p572_p2)   ;;  %vm2984_vm0 = vmmov (!%p572_p2), 0   ;;  %s2589_s24 = sshll.u32 (!%p572_p2), %s2584_s30, 1  ;;  %v2803_v5 = vld [vmem:[%s3629_s5 + $0x10] sm:$0xff] (!%p572_p2)   ;;  %v1000_v20 = vlaneseq (!%p572_p2) }
   0xa   : > { %575 = sbr.rel (%p572_p2) target bundleno = 2000 (0x7d0), region = 96  ;;  %2697 = vmatprep.subr.bf16.mxu0 (!%p572_p2), %v2983_v1  ;;  %v2800_v2 = vld [vmem:[%s3629_s5] sm:$0xff] (!%p572_p2)   ;;  %2701 = vmatprep.mubr.msk.bf16.mxu0 (!%p572_p2), %vm2984_vm0, %v2983_v1  ;;  %v2802_v4 = vld [vmem:[%s3629_s5 + $0x8] sm:$0xff] (!%p572_p2)   ;;  %p643_p3 = scmp.lt.s32.totalorder (!%p572_p2), %s2589_s24, 7  ;;  %vm763_vm1 = vcmask (!%p572_p2), 261120   ;;  %v2804_v8 = vld [vmem:[%s3629_s5 + $0x18] sm:$0xff] (!%p572_p2)  }
   0xb   : > { %2698 = vmatpush3.bf16.msra.mxu0 (!%p572_p2), %v2799_v0  ;;  %2705 = vmatprep.subr.bf16.mxu1 (!%p572_p2), %v2800_v2  ;;  %s2591_s28 = sshll.u32 (!%p572_p2), %s2584_s30, 4  ;;  %s3648_s1 = sld [smem:[#allocation2_spill]] (!%p572_p2)  ;;  %vm872_vm2 = vcmask (!%p572_p2), 523264   ;;  %v2813_v18 = vld [vmem:[%s3631_s7] sm:$0xff] (!%p572_p2)   ;;  %v2814_v19 = vld [vmem:[%s3631_s7 + $0x8] sm:$0xff] (!%p572_p2)   ;;  %v1001_v21 = vshrl.u32 (!%p572_p2), %v1000_v20, 7 }
   0xc   : > { %2699 = vmatprep.subr.bf16.mxu0 (!%p572_p2), %v2983_v1  ;;  %2706 = vmatpush3.bf16.msra.mxu1 (!%p572_p2), %v2800_v2  ;;  %p649_p4 = scmp.lt.s32.totalorder (!%p572_p2), %s2591_s28, 63  ;;  %s3649_s3 = sld [smem:[#allocation3_spill]] (!%p572_p2)  ;;  %v2985_v43 = vmov (!%p572_p2), 1966171168   ;;  %v2599_v51 = vld [vmem:[%s3630_s6] ss:$0 sm:$0xff] (!%p572_p2) }
   0xd   : > { %2707 = vmatprep.subr.bf16.mxu1 (!%p572_p2), %v2802_v4  ;;  %s3650_s23 = sld [smem:[#allocation4_spill]] (!%p572_p2)  ;;  %v3157_v24 = vsub.s32 (!%p572_p2), 0, %v1001_v21  ;;  %v1826_v26 = vsub.s32 (!%p572_p2), 1, %v1001_v21  ;;  %v1833_v29 = vsub.s32 (!%p572_p2), 2, %v1001_v21  ;;  %v1840_v32 = vsub.s32 (!%p572_p2), 3, %v1001_v21  ;;  %s3651_s25 = sld [smem:[#allocation5_spill]] (!%p572_p2) }
   0xe   : > { %v1847_v35 = vsub.s32 (!%p572_p2), 4, %v1001_v21  ;;  %v1854_v38 = vsub.s32 (!%p572_p2), 5, %v1001_v21  ;;  %v1861_v41 = vsub.s32 (!%p572_p2), 6, %v1001_v21  ;;  %v998_v44 = vunpack.c.l.s4 (!%p572_p2), %v2985_v43 }
   0xf   : > { %2700 = vmatpush3.bf16.msra.mxu0 (!%p572_p2), %v2801_v3  ;;  %v1868_v46 = vsub.s32 (!%p572_p2), 7, %v1001_v21  ;;  %vm2120_vm3 = vcmask (!%p572_p2), 1041409   ;;  %vm2122_vm4 = vcmask (!%p572_p2), 1042434   ;;  %vm2124_vm5 = vcmask (!%p572_p2), 1043459  }
  0x10   : > { %2708 = vmatpush3.bf16.msra.mxu1 (!%p572_p2), %v2802_v4  ;;  %2729 = vmatprep.subr.bf16.mxu0 (!%p572_p2), %v2813_v18  ;;  %v999_v48 = vunpack.c.0.s8 (!%p572_p2), %v998_v44  ;;  %vm2126_vm6 = vcmask (!%p572_p2), 1044484   ;;  %vm2128_vm7 = vcmask (!%p572_p2), 1045509   ;;  %vm2130_vm8 = vcmask (!%p572_p2), 1046534  }
  0x11   : > { %s3653_s24 = smov (!%p643_p3, %s2589_s24), 7  ;;  %2709 = vmatprep.subr.bf16.mxu1 %v2803_v5  ;;  %s3655_s28 = smov (!%p649_p4, %s2591_s28), 63  ;;  %vm1945_vm9 = vcmask 64512   ;;  %vm2132_vm10 = vcmask 1047559  }
  0x12   : > { %s3114_s29 = sshll.u32 %s3653_s24, 3  ;;  %s2592_s30 = sshll.u32 %s3655_s28, 2  ;;  %v3164_v52 = vsub.s32 %v999_v48, %v1001_v21 }
  0x13   : > { %s3120_s22 = scalar_lea.vmem %s3648_s1, %s3114_s29  ;;  %s652_s26 = scalar_lea.vmem %s3649_s3, %s2592_s30 }
  0x14   : > { %v673_v6 = vld [vmem:[%s3120_s22] sm:$0xff]  ;;  %v674_v7 = vld [vmem:[%s3120_s22 + $0x8] sm:$0xff]  ;;  %2710 = vmatpush3.bf16.msra.mxu1 %v2803_v5  ;;  %v2807_v12 = vld [vmem:[%s652_s26 + $0x10] sm:$0xff]   ;;  %s3153_s30 = scalar_lea.vmem %s3650_s23, %s3114_s29  ;;  %s664_s3 = scalar_lea.vmem %s3651_s25, %s3114_s29 }
  0x15   : > { %v744_v9 = vpack.c.bf16 %v674_v7, %v673_v6  ;;  %2711 = vmatprep.subr.bf16.mxu1 %v2804_v8  ;;  %v2805_v10 = vld [vmem:[%s652_s26] sm:$0xff]   ;;  %v2806_v11 = vld [vmem:[%s652_s26 + $0x8] sm:$0xff]   ;;  %v2808_v13 = vld [vmem:[%s652_s26 + $0x18] sm:$0xff]   ;;  %s670_s2 = scalar_lea.vmem %s3643_s19, %s3114_s29 }
  0x16   : > { %2713 = vmatprep.mubr.msk.bf16.mxu1 %vm872_vm2, %v2805_v10  ;;  %v2809_v14 = vld [vmem:[%s652_s26 + $0x20] sm:$0xff]   ;;  %v2810_v15 = vld [vmem:[%s652_s26 + $0x28] sm:$0xff]   ;;  %v2811_v16 = vld [vmem:[%s652_s26 + $0x30] sm:$0xff]  }
  0x17   : > { %2702 = vmatmul.mubr.msk.bf16.vlgmr.msra.gmra.mrb[0].mxu0 %vm763_vm1, %v744_v9  ;;  %v2812_v17 = vld [vmem:[%s652_s26 + $0x38] sm:$0xff]   ;;  %v691_v22 = vld [vmem:[%s3153_s30] sm:$0xff]  ;;  %v692_v23 = vld [vmem:[%s3153_s30 + $0x8] sm:$0xff] }
  0x18   : > { %2712 = vmatpush3.bf16.msra.mxu1 %v2804_v8  ;;  %2730 = vmatpush3.bf16.msra.mxu0 %v2813_v18  ;;  %v1820_v25 = vrot.slane %v691_v22, %v3157_v24  ;;  %v1876_v27 = vrot.slane %v692_v23, %v3157_v24  ;;  %v1827_v28 = vrot.slane %v691_v22, %v1826_v26 }
  0x19   : > { %2749 = vmatprep.subr.bf16.mxu1 %v2983_v1  ;;  %2731 = vmatprep.subr.bf16.mxu0 %v2814_v19  ;;  %v1883_v30 = vrot.slane %v692_v23, %v1826_v26  ;;  %v1834_v31 = vrot.slane %v691_v22, %v1833_v29  ;;  %v1890_v33 = vrot.slane %v692_v23, %v1833_v29 }
  0x1a   : > { %1822 = vbcast.lane.b32.xlu0 %v1820_v25, 256  ;;  %1878 = vbcast.lane.b32.xlu1 %v1876_v27, 256  ;;  %v1841_v34 = vrot.slane %v691_v22, %v1840_v32  ;;  %v1897_v36 = vrot.slane %v692_v23, %v1840_v32  ;;  %v1848_v37 = vrot.slane %v691_v22, %v1847_v35 }
  0x1b   : > { %2714 = vmatmul.mubr.msk.bf16.vlgmr.msra.gmra.mrb[0].mxu1 %vm872_vm2, %v2806_v11  ;;  %v1904_v39 = vrot.slane %v692_v23, %v1847_v35  ;;  %v1855_v40 = vrot.slane %v691_v22, %v1854_v38  ;;  %v1911_v42 = vrot.slane %v692_v23, %v1854_v38  ;;  %v1862_v45 = vrot.slane %v691_v22, %v1861_v41 }
  0x1c   : > { %2717 = vmatprep.mubr.msk.bf16.mxu1 %vm872_vm2, %v2807_v12  ;;  %2732 = vmatpush3.bf16.msra.mxu0 %v2814_v19  ;;  %v1918_v47 = vrot.slane %v692_v23, %v1861_v41  ;;  %v1869_v49 = vrot.slane %v691_v22, %v1868_v46  ;;  %v1925_v50 = vrot.slane %v692_v23, %v1868_v46 }
  0x1d   : > { %2765 = vmatprep.subr.bf16.mxu0 %v2983_v1 }
  0x1e   : > { %1829 = vbcast.lane.b32.xlu0 %v1827_v28, 256  ;;  %1885 = vbcast.lane.b32.xlu1 %v1883_v30, 256 }
  0x22   : > { %1836 = vbcast.lane.b32.xlu0 %v1834_v31, 256  ;;  %1892 = vbcast.lane.b32.xlu1 %v1890_v33, 256 }
  0x23   : > { %2718 = vmatmul.mubr.msk.bf16.gmra.mrb[4].mxu1 %vm872_vm2, %v2808_v13 }
  0x24   : > { %2721 = vmatprep.mubr.msk.bf16.mxu1 %vm872_vm2, %v2809_v14 }
  0x26   : > { %1843 = vbcast.lane.b32.xlu0 %v1841_v34, 256  ;;  %1899 = vbcast.lane.b32.xlu1 %v1897_v36, 256 }
  0x2a   : > { %1850 = vbcast.lane.b32.xlu0 %v1848_v37, 256  ;;  %1906 = vbcast.lane.b32.xlu1 %v1904_v39, 256 }
  0x2b   : > { %2722 = vmatmul.mubr.msk.bf16.gmra.mrb[8].mxu1 %vm872_vm2, %v2810_v15 }
  0x2c   : > { %2725 = vmatprep.mubr.msk.bf16.mxu1 %vm872_vm2, %v2811_v16 }
  0x2e   : > { %1857 = vbcast.lane.b32.xlu0 %v1855_v40, 256  ;;  %1913 = vbcast.lane.b32.xlu1 %v1911_v42, 256 }
  0x32   : > { %1864 = vbcast.lane.b32.xlu0 %v1862_v45, 256  ;;  %1920 = vbcast.lane.b32.xlu1 %v1918_v47, 256 }
  0x33   : > { %2726 = vmatmul.mubr.msk.bf16.gmra.mrb[12].mxu1 %vm872_vm2, %v2812_v17 }
  0x34   : > { %2753 = vmatprep.mubr.msk.bf16.mxu1 %vm2984_vm0, %v2983_v1 }
  0x36   : > { %1871 = vbcast.lane.b32.xlu0 %v1869_v49, 256  ;;  %1927 = vbcast.lane.b32.xlu1 %v1925_v50, 256 }
  0xea   : > { %v801_v53 = vpop.f32.mrb[0].mxu0 }
  0xeb   : > { %v802_v54 = vadd.f32 %v2599_v51, %v801_v53  ;;  %v2703_v55 = vpop.f32.mrb[1].mxu0 }
  0xec   : > { %v804_v56 = vpop.f32.mrb[2].mxu0 }
  0xed   : > { %v996_v57 = vcombine.high %v802_v54, %v802_v54  ;;  %v1003_v58 = vrot.slane %v802_v54, %v3164_v52  ;;  %v805_v59 = vadd.f32 %v2599_v51, %v804_v56  ;;  %v2704_v60 = vpop.f32.mrb[3].mxu0 }
  0xee   : > { %v2715_v5 = vpop.f32.mrb[0].mxu1 }
  0xef   : > { %v1010_v61 = vrot.slane %v996_v57, %v3164_v52  ;;  %v1011_v62 = vcombine.high %v1003_v58, %v1003_v58  ;;  %v1019_v63 = vrot.slane %v1003_v58, %v3164_v52  ;;  %v1045_v0 = vcombine.high %v805_v59, %v805_v59  ;;  %v931_v9 = vpop.f32.mrb[1].mxu1 }
  0xf0   : > { %v1052_v2 = vrot.slane %v805_v59, %v3164_v52  ;;  %v2716_v14 = vpop.f32.mrb[2].mxu1 }
  0xf1   : > { %v1012_v3 = vcombine.high %v1010_v61, %v1010_v61  ;;  %v3171_v4 = vrot.slane %v1045_v0, %v3164_v52  ;;  %v1041_v6 = vcombine.high %v1019_v63, %v1019_v63  ;;  %v1097_v7 = vrot.slane %v1019_v63, %v3157_v24  ;;  %v934_v18 = vpop.f32.mrb[3].mxu1 }
  0xf2   : > { %v3175_v8 = vrot.slane %v1052_v2, %v3164_v52  ;;  %v1033_v10 = vrot.slane %v1011_v62, %v3164_v52  ;;  %v1026_v11 = vrot.slane %v1010_v61, %v3164_v52  ;;  %v1060_v16 = vcombine.high %v1052_v2, %v1052_v2 }
  0xf3   : > { %v1105_v12 = vrot.slane %v1041_v6, %v3157_v24  ;;  %v3180_v13 = vadd.f32 %v1097_v7, %v931_v9  ;;  %v1040_v15 = vrot.slane %v1012_v3, %v3164_v52  ;;  %v1061_v21 = vcombine.high %v3171_v4, %v3171_v4 }
  0xf4   : > { %v1043_v17 = vcombine.high %v1033_v10, %v1033_v10  ;;  %v1101_v19 = vrot.slane %v1033_v10, %v3157_v24  ;;  %v1042_v20 = vcombine.high %v1026_v11, %v1026_v11  ;;  %v1113_v28 = vrot.slane %v1026_v11, %v3157_v24 }
  0xf5   : > { %v3186_v22 = vadd.f32 %v2715_v5, %v1105_v12  ;;  %v1190_v23 = vmul.f32 0.044715, %v3180_v13  ;;  %v1044_v25 = vcombine.high %v1040_v15, %v1040_v15  ;;  %v1090_v29 = vcombine.high %v3175_v8, %v3175_v8 }
  0xf6   : > { %v1109_v26 = vrot.slane %v1043_v17, %v3157_v24  ;;  %v3190_v27 = vadd.f32 %v1101_v19, %v934_v18  ;;  %v1121_v32 = vrot.slane %v1042_v20, %v3157_v24  ;;  %v1117_v33 = vrot.slane %v1040_v15, %v3157_v24  ;;  %v2719_v40 = vpop.f32.mrb[4].mxu1 }
  0xf7   : > { %v1192_v30 = vmul.f32 0.044715, %v3186_v22  ;;  %v1206_v31 = vmul.f32 %v1190_v23, %v3180_v13  ;;  %v1125_v36 = vrot.slane %v1044_v25, %v3157_v24  ;;  %v1137_v37 = vrot.slane %v1090_v29, %v3157_v24  ;;  %v947_v46 = vpop.f32.mrb[5].mxu1 }
  0xf8   : > { %v3199_v34 = vadd.f32 %v2716_v14, %v1109_v26  ;;  %v1191_v35 = vmul.f32 0.044715, %v3190_v27  ;;  %v1129_v41 = vrot.slane %v3175_v8, %v3157_v24  ;;  %v3209_v42 = vrot.slane %v1060_v16, %v3164_v52  ;;  %v2720_v51 = vpop.f32.mrb[6].mxu1 }
  0xf9   : > { %v1208_v38 = vmul.f32 %v1192_v30, %v3186_v22  ;;  %v1222_v39 = vmul.f32 %v1206_v31, %v3180_v13  ;;  %v3213_v45 = vadd.f32 %v2719_v40, %v1121_v32  ;;  %v3217_v47 = vrot.slane %v3171_v4, %v3164_v52  ;;  %v950_v58 = vpop.f32.mrb[7].mxu1 }
  0xfa   : > { %v1193_v43 = vmul.f32 0.044715, %v3199_v34  ;;  %v1207_v44 = vmul.f32 %v1191_v35, %v3190_v27  ;;  %v3221_v50 = vadd.f32 %v1113_v28, %v947_v46  ;;  %v1092_v53 = vcombine.high %v3209_v42, %v3209_v42 }
  0xfb   : > { %v1224_v48 = vmul.f32 %v1208_v38, %v3186_v22  ;;  %v1238_v49 = vadd.f32 %v1222_v39, %v3180_v13  ;;  %v1196_v56 = vmul.f32 0.044715, %v3213_v45  ;;  %v3228_v57 = vadd.f32 %v2720_v51, %v1125_v36 }
  0xfc   : > { %v1209_v54 = vmul.f32 %v1193_v43, %v3199_v34  ;;  %v1223_v55 = vmul.f32 %v1207_v44, %v3190_v27  ;;  %v1194_v61 = vmul.f32 0.044715, %v3221_v50  ;;  %v3232_v62 = vadd.f32 %v1117_v33, %v950_v58 }
  0xfd   : > { %v1240_v59 = vadd.f32 %v1224_v48, %v3186_v22  ;;  %v1254_v60 = vmul.f32 0.7978846, %v1238_v49  ;;  %v1212_v2 = vmul.f32 %v1196_v56, %v3213_v45  ;;  %v1197_v3 = vmul.f32 0.044715, %v3228_v57 }
  0xfe   : > { %v1225_v63 = vmul.f32 %v1209_v54, %v3199_v34  ;;  %v1239_v0 = vadd.f32 %v1223_v55, %v3190_v27  ;;  %v1210_v7 = vmul.f32 %v1194_v61, %v3221_v50  ;;  %v1195_v9 = vmul.f32 0.044715, %v3232_v62  ;;  %v2723_v19 = vpop.f32.mrb[8].mxu1 }
  0xff   : > { %v1256_v5 = vmul.f32 0.7978846, %v1240_v59  ;;  %v1270_v6 = vmul.f32 2.0, %v1254_v60  ;;  %v1228_v12 = vmul.f32 %v1212_v2, %v3213_v45  ;;  %v1213_v14 = vmul.f32 %v1197_v3, %v3228_v57  ;;  %v963_v28 = vpop.f32.mrb[9].mxu1 }
 0x100   : > { %v1241_v10 = vadd.f32 %v1225_v63, %v3199_v34  ;;  %v1255_v11 = vmul.f32 0.7978846, %v1239_v0  ;;  %v1226_v17 = vmul.f32 %v1210_v7, %v3221_v50  ;;  %v1211_v18 = vmul.f32 %v1195_v9, %v3232_v62  ;;  %v2724_v32 = vpop.f32.mrb[10].mxu1 }
 0x101   : > { %v1272_v15 = vmul.f32 2.0, %v1256_v5  ;;  %v1286_v16 = vmul.f32 1.442695, %v1270_v6  ;;  %v1244_v25 = vadd.f32 %v1228_v12, %v3213_v45  ;;  %v1229_v26 = vmul.f32 %v1213_v14, %v3228_v57  ;;  %v966_v39 = vpop.f32.mrb[11].mxu1 }
 0x102   : > { %v1257_v20 = vmul.f32 0.7978846, %v1241_v10  ;;  %v1271_v23 = vmul.f32 2.0, %v1255_v11  ;;  %v1242_v30 = vadd.f32 %v1226_v17, %v3221_v50  ;;  %v1227_v31 = vmul.f32 %v1211_v18, %v3232_v62 }
 0x103   : > { %v1290_v29 = vmul.f32 1.442695, %v1272_v15  ;;  %2827 = vpow2.f32 %v1286_v16  ;;  %v1260_v36 = vmul.f32 0.7978846, %v1244_v25  ;;  %v1245_v38 = vadd.f32 %v1229_v26, %v3228_v57 }
 0x104   : > { %v1273_v33 = vmul.f32 2.0, %v1257_v20  ;;  %v1288_v35 = vmul.f32 1.442695, %v1271_v23  ;;  %v1258_v40 = vmul.f32 0.7978846, %v1242_v30  ;;  %v1243_v43 = vadd.f32 %v1227_v31, %v3232_v62 }
 0x105   : > { %2829 = vpow2.f32 %v1290_v29  ;;  %v3251_v44 = vadd.f32 %v2723_v19, %v1137_v37  ;;  %v1276_v48 = vmul.f32 2.0, %v1260_v36  ;;  %v1261_v49 = vmul.f32 0.7978846, %v1245_v38 }
 0x106   : > { %v1292_v46 = vmul.f32 1.442695, %v1273_v33  ;;  %2831 = vpow2.f32 %v1288_v35  ;;  %v1274_v51 = vmul.f32 2.0, %v1258_v40  ;;  %v1259_v54 = vmul.f32 0.7978846, %v1243_v43  ;;  %v2727_v2 = vpop.f32.mrb[12].mxu1 }
 0x107   : > { %v1200_v55 = vmul.f32 0.044715, %v3251_v44  ;;  %v3257_v56 = vadd.f32 %v1129_v41, %v963_v28  ;;  %v1298_v58 = vmul.f32 1.442695, %v1276_v48  ;;  %v1277_v59 = vmul.f32 2.0, %v1261_v49  ;;  %v979_v41 = vpop.f32.mrb[13].mxu1 }
 0x108   : > { %2833 = vpow2.f32 %v1292_v46  ;;  %v1141_v60 = vrot.slane %v1092_v53, %v3157_v24  ;;  %v1294_v37 = vmul.f32 1.442695, %v1274_v51  ;;  %v1275_v61 = vmul.f32 2.0, %v1259_v54  ;;  %v2728_v9 = vpop.f32.mrb[14].mxu1 }
 0x109   : > { %v1216_v63 = vmul.f32 %v1200_v55, %v3251_v44  ;;  %v1198_v0 = vmul.f32 0.044715, %v3257_v56  ;;  %2835 = vpow2.f32 %v1298_v58  ;;  %v1300_v3 = vmul.f32 1.442695, %v1277_v59  ;;  %v982_v14 = vpop.f32.mrb[15].mxu1 }
 0x10a   : > { %v3262_v5 = vadd.f32 %v2724_v32, %v1141_v60  ;;  %v1133_v8 = vrot.slane %v3209_v42, %v3157_v24  ;;  %2837 = vpow2.f32 %v1294_v37  ;;  %v1296_v6 = vmul.f32 1.442695, %v1275_v61 }
 0x10b   : > { %v1232_v7 = vmul.f32 %v1216_v63, %v3251_v44  ;;  %v1214_v53 = vmul.f32 %v1198_v0, %v3257_v56  ;;  %2839 = vpow2.f32 %v1300_v3  ;;  %v1091_v12 = vcombine.high %v3217_v47, %v3217_v47 }
 0x10c   : > { %v1201_v10 = vmul.f32 0.044715, %v3262_v5  ;;  %v3269_v11 = vadd.f32 %v1133_v8, %v966_v39  ;;  %2841 = vpow2.f32 %v1296_v6  ;;  %v1145_v17 = vrot.slane %v3217_v47, %v3157_v24 }
 0x10d   : > { %v2828_v15 = vpop.eup %2827  ;;  %v1248_v42 = vadd.f32 %v1232_v7, %v3251_v44  ;;  %v1230_v16 = vmul.f32 %v1214_v53, %v3257_v56  ;;  %v1153_v20 = vrot.slane %v1091_v12, %v3157_v24  ;;  %v1089_v23 = vrot.slane %v1061_v21, %v3164_v52 }
 0x10e   : > { %v1217_v18 = vmul.f32 %v1201_v10, %v3262_v5  ;;  %v1199_v19 = vmul.f32 0.044715, %v3269_v11  ;;  %v3285_v29 = vadd.f32 %v1145_v17, %v979_v41  ;;  %v1318_v30 = vadd.f32 1.0, %v2828_v15 }
 0x10f   : > { %v2830_v25 = vpop.eup %2829  ;;  %v1264_v26 = vmul.f32 0.7978846, %v1248_v42  ;;  %v1246_v28 = vadd.f32 %v1230_v16, %v3257_v56  ;;  %v3289_v35 = vadd.f32 %v2727_v2, %v1153_v20  ;;  %v1093_v52 = vcombine.high %v1089_v23, %v1089_v23 }
 0x110   : > { %v2832_v31 = vpop.eup %2831  ;;  %v1320_v47 = vadd.f32 1.0, %v2830_v25  ;;  %v1233_v32 = vmul.f32 %v1217_v18, %v3262_v5  ;;  %v1215_v33 = vmul.f32 %v1199_v19, %v3269_v11  ;;  %v1202_v4 = vmul.f32 0.044715, %v3285_v29 }
 0x111   : > { %v1280_v36 = vmul.f32 2.0, %v1264_v26  ;;  %v1262_v38 = vmul.f32 0.7978846, %v1246_v28  ;;  %v1204_v43 = vmul.f32 0.044715, %v3289_v35  ;;  %v1157_v60 = vrot.slane %v1093_v52, %v3157_v24 }
 0x112   : > { %v2834_v21 = vpop.eup %2833  ;;  %2843 = vrcp.f32 %v1320_v47  ;;  %v1249_v39 = vadd.f32 %v1233_v32, %v3262_v5  ;;  %v1231_v40 = vmul.f32 %v1215_v33, %v3269_v11  ;;  %v1218_v51 = vmul.f32 %v1202_v4, %v3285_v29 }
 0x113   : > { %v1321_v46 = vadd.f32 1.0, %v2834_v21  ;;  %v1306_v48 = vmul.f32 1.442695, %v1280_v36  ;;  %v1278_v49 = vmul.f32 2.0, %v1262_v38  ;;  %v2836_v54 = vpop.eup %2835  ;;  %v1220_v59 = vmul.f32 %v1204_v43, %v3289_v35 }
 0x114   : > { %v1265_v55 = vmul.f32 0.7978846, %v1249_v39  ;;  %v1247_v58 = vadd.f32 %v1231_v40, %v3269_v11  ;;  %v2838_v37 = vpop.eup %2837  ;;  %v1234_v63 = vmul.f32 %v1218_v51, %v3285_v29  ;;  %v1149_v0 = vrot.slane %v1089_v23, %v3157_v24 }
 0x115   : > { %2845 = vrcp.f32 %v1321_v46  ;;  %v1302_v61 = vmul.f32 1.442695, %v1278_v49  ;;  %v2840_v2 = vpop.eup %2839  ;;  %v1236_v41 = vmul.f32 %v1220_v59, %v3289_v35  ;;  %v3303_v53 = vadd.f32 %v2728_v9, %v1157_v60 }
 0x116   : > { %2847 = vpow2.f32 %v1306_v48  ;;  %v1281_v3 = vmul.f32 2.0, %v1265_v55  ;;  %v1263_v8 = vmul.f32 0.7978846, %v1247_v58  ;;  %v2842_v6 = vpop.eup %2841  ;;  %v1250_v7 = vadd.f32 %v1234_v63, %v3285_v29 }
 0x117   : > { %2849 = vpow2.f32 %v1302_v61  ;;  %v3305_v10 = vadd.f32 %v1149_v0, %v982_v14  ;;  %v1252_v42 = vadd.f32 %v1236_v41, %v3289_v35  ;;  %v1319_v16 = vadd.f32 1.0, %v2832_v31 }
 0x118   : > { %v1308_v12 = vmul.f32 1.442695, %v1281_v3  ;;  %v1279_v15 = vmul.f32 2.0, %v1263_v8  ;;  %v1266_v24 = vmul.f32 0.7978846, %v1250_v7  ;;  %2851 = vrcp.f32 %v1318_v30 }
 0x119   : > { %v1205_v17 = vmul.f32 0.044715, %v3303_v53  ;;  %v1203_v18 = vmul.f32 0.044715, %v3305_v10  ;;  %v1268_v20 = vmul.f32 0.7978846, %v1252_v42 }
 0x11a   : > { %2853 = vpow2.f32 %v1308_v12  ;;  %v1304_v19 = vmul.f32 1.442695, %v1279_v15  ;;  %v1282_v23 = vmul.f32 2.0, %v1266_v24  ;;  %v1322_v28 = vadd.f32 1.0, %v2838_v37 }
 0x11b   : > { %v1221_v9 = vmul.f32 %v1205_v17, %v3303_v53  ;;  %v1219_v14 = vmul.f32 %v1203_v18, %v3305_v10  ;;  %2855 = vrcp.f32 %v1319_v16  ;;  %v1284_v26 = vmul.f32 2.0, %v1268_v20 }
 0x11c   : > { %v2844_v25 = vpop.eup %2843  ;;  %2857 = vpow2.f32 %v1304_v19  ;;  %v1310_v31 = vmul.f32 1.442695, %v1282_v23  ;;  %v1323_v36 = vadd.f32 1.0, %v2842_v6  ;;  %v1324_v43 = vadd.f32 1.0, %v2836_v54 }
 0x11d   : > { %v1237_v47 = vmul.f32 %v1221_v9, %v3303_v53  ;;  %v1235_v32 = vmul.f32 %v1219_v14, %v3305_v10  ;;  %v1339_v33 = vmul.f32 2.0, %v2844_v25  ;;  %v1314_v30 = vmul.f32 1.442695, %v1284_v26 }
 0x11e   : > { %2859 = vrcp.f32 %v1322_v28  ;;  %v1325_v58 = vadd.f32 1.0, %v2840_v2  ;;  %v1384_v60 = vmul.f32 0.5, %v3186_v22  ;;  %v1385_v37 = vmul.f32 0.5, %v3199_v34 }
 0x11f   : > { %v2846_v38 = vpop.eup %2845  ;;  %2861 = vpow2.f32 %v1310_v31  ;;  %v1253_v4 = vadd.f32 %v1237_v47, %v3303_v53  ;;  %v1251_v52 = vadd.f32 %v1235_v32, %v3305_v10  ;;  %v1368_v21 = vsub.f32 1.0, %v1339_v33 }
 0x120   : > { %v2848_v39 = vpop.eup %2847  ;;  %2863 = vpow2.f32 %v1314_v30  ;;  %v1341_v40 = vmul.f32 2.0, %v2846_v38  ;;  %v1382_v9 = vmul.f32 0.5, %v3180_v13  ;;  %v1383_v26 = vmul.f32 0.5, %v3190_v27 }
 0x121   : > { %v2850_v46 = vpop.eup %2849  ;;  %v1269_v48 = vmul.f32 0.7978846, %v1253_v4  ;;  %v1267_v49 = vmul.f32 0.7978846, %v1251_v52  ;;  %v1400_v51 = vadd.f32 1.0, %v1368_v21  ;;  %2865 = vrcp.f32 %v1323_v36 }
 0x122   : > { %v1369_v55 = vsub.f32 1.0, %v1341_v40  ;;  %2867 = vrcp.f32 %v1324_v43  ;;  %v2852_v59 = vpop.eup %2851  ;;  %v1326_v54 = vadd.f32 1.0, %v2850_v46  ;;  %v1328_v24 = vadd.f32 1.0, %v2848_v39 }
 0x123   : > { %v1285_v61 = vmul.f32 2.0, %v1269_v48  ;;  %v1283_v63 = vmul.f32 2.0, %v1267_v49  ;;  %v1335_v3 = vmul.f32 2.0, %v2852_v59  ;;  %2869 = vrcp.f32 %v1325_v58 }
 0x124   : > { %v2854_v0 = vpop.eup %2853  ;;  %v1401_v8 = vadd.f32 1.0, %v1369_v55  ;;  %v1416_v12 = vmul.f32 %v1400_v51, %v1384_v60  ;;  %2871 = vrcp.f32 %v1326_v54  ;;  %v1386_v48 = vmul.f32 0.5, %v3221_v50 }
 0x125   : > { %v2856_v41 = vpop.eup %2855  ;;  %v1316_v6 = vmul.f32 1.442695, %v1285_v61  ;;  %v1312_v7 = vmul.f32 1.442695, %v1283_v63  ;;  %v1366_v2 = vsub.f32 1.0, %v1335_v3  ;;  %v1329_v34 = vadd.f32 1.0, %v2854_v0 }
 0x126   : > { %v2858_v15 = vpop.eup %2857  ;;  %v1337_v42 = vmul.f32 2.0, %v2856_v41  ;;  %v1417_v16 = vmul.f32 %v1401_v8, %v1385_v37  ;;  %v1387_v49 = vmul.f32 0.5, %v3232_v62  ;;  %v1388_v0 = vmul.f32 0.5, %v3213_v45 }
 0x127   : > { %2873 = vpow2.f32 %v1316_v6  ;;  %v1327_v22 = vadd.f32 1.0, %v2858_v15  ;;  %v1398_v19 = vadd.f32 1.0, %v1366_v2  ;;  %v1389_v54 = vmul.f32 0.5, %v3228_v57 }
 0x128   : > { %v2860_v17 = vpop.eup %2859  ;;  %2875 = vpow2.f32 %v1312_v7  ;;  %v1367_v18 = vsub.f32 1.0, %v1337_v42  ;;  %v1431_v20 = vpack.c.bf16 %v1417_v16, %v1416_v12 }
 0x129   : > { %v2862_v23 = vpop.eup %2861  ;;  %v1343_v14 = vmul.f32 2.0, %v2860_v17  ;;  %2877 = vrcp.f32 %v1327_v22  ;;  %v1414_v30 = vmul.f32 %v1398_v19, %v1382_v9  ;;  %v1390_v19 = vmul.f32 0.5, %v3257_v56 }
 0x12a   : > { %v2864_v25 = vpop.eup %2863  ;;  %v1399_v28 = vadd.f32 1.0, %v1367_v18  ;;  %2879 = vrcp.f32 %v1328_v24  ;;  %v1330_v31 = vadd.f32 1.0, %v2862_v23 }
 0x12b   : > { %v2866_v47 = vpop.eup %2865  ;;  %v1370_v32 = vsub.f32 1.0, %v1343_v14  ;;  %2881 = vrcp.f32 %v1329_v34  ;;  %v1332_v4 = vadd.f32 1.0, %v2864_v25  ;;  %v1392_v14 = vmul.f32 0.5, %v3251_v44 }
 0x12c   : > { %v2868_v33 = vpop.eup %2867  ;;  %v1415_v36 = vmul.f32 %v1399_v28, %v1383_v26  ;;  %v1345_v38 = vmul.f32 2.0, %v2866_v47  ;;  %2883 = vrcp.f32 %v1330_v31  ;;  %v1393_v25 = vmul.f32 0.5, %v3262_v5 }
 0x12d   : > { %v1347_v52 = vmul.f32 2.0, %v2868_v33  ;;  %v2870_v21 = vpop.eup %2869  ;;  %v1402_v40 = vadd.f32 1.0, %v1370_v32  ;;  %2885 = vrcp.f32 %v1332_v4 }
 0x12e   : > { %v1430_v13 = vpack.c.bf16 %v1415_v36, %v1414_v30  ;;  %v1371_v39 = vsub.f32 1.0, %v1345_v38  ;;  %v1349_v43 = vmul.f32 2.0, %v2870_v21  ;;  %v2872_v46 = vpop.eup %2871 }
 0x12f   : > { %v1372_v27 = vsub.f32 1.0, %v1347_v52  ;;  %v1351_v60 = vmul.f32 2.0, %v2872_v46  ;;  %v1418_v61 = vmul.f32 %v1402_v40, %v1386_v48  ;;  %v1397_v46 = vmul.f32 0.5, %v3303_v53 }
 0x130   : > { %2733 = vmatprep.mubr.msk.bf16.mxu0 %vm763_vm1, %v1430_v13  ;;  %v1403_v51 = vadd.f32 1.0, %v1371_v39  ;;  %v1373_v58 = vsub.f32 1.0, %v1349_v43 }
 0x131   : > { %v2874_v55 = vpop.eup %2873  ;;  %2734 = vmatmul.mubr.msk.bf16.vlgmr.msra.gmra.mrb[4].mxu0 %vm763_vm1, %v1431_v20  ;;  %v1404_v59 = vadd.f32 1.0, %v1372_v27  ;;  %v1374_v50 = vsub.f32 1.0, %v1351_v60  ;;  %v1391_v20 = vmul.f32 0.5, %v3269_v11  ;;  %v1396_v27 = vmul.f32 0.5, %v3289_v35  ;;  %v3348_v35 = vld [vmem:[%s3632_s8] ss:$0 sm:$0xff] }
 0x132   : > { %v2876_v37 = vpop.eup %2875  ;;  %v1419_v63 = vmul.f32 %v1403_v51, %v1387_v49  ;;  %v1333_v3 = vadd.f32 1.0, %v2874_v55  ;;  %v1405_v41 = vadd.f32 1.0, %v1373_v58  ;;  %v1394_v49 = vmul.f32 0.5, %v3285_v29  ;;  %v2815_v29 = vld [vmem:[%s3633_s9] sm:$0xff]  }
 0x133   : > { %v2878_v8 = vpop.eup %2877  ;;  %v1331_v6 = vadd.f32 1.0, %v2876_v37  ;;  %v1420_v42 = vmul.f32 %v1404_v59, %v1388_v0  ;;  %v1406_v45 = vadd.f32 1.0, %v1374_v50  ;;  %v1395_v51 = vmul.f32 0.5, %v3305_v10  ;;  %2750 = vmatpush3.bf16.msra.mxu1 %v2815_v29 }
 0x134   : > { %v2880_v62 = vpop.eup %2879  ;;  %v1432_v7 = vpack.c.bf16 %v1419_v63, %v1418_v61  ;;  %v1353_v12 = vmul.f32 2.0, %v2878_v8  ;;  %2887 = vrcp.f32 %v1333_v3  ;;  %v1421_v2 = vmul.f32 %v1405_v41, %v1389_v54  ;;  %2751 = vmatprep.subr.bf16.mxu1 %v2983_v1 }
 0x135   : > { %v2882_v15 = vpop.eup %2881  ;;  %v1355_v16 = vmul.f32 2.0, %v2880_v62  ;;  %2889 = vrcp.f32 %v1331_v6  ;;  %v1422_v31 = vmul.f32 %v1406_v45, %v1390_v19 }
 0x136   : > { %2737 = vmatprep.mubr.msk.bf16.mxu0 %vm763_vm1, %v1432_v7  ;;  %v1375_v22 = vsub.f32 1.0, %v1353_v12  ;;  %v1357_v24 = vmul.f32 2.0, %v2882_v15  ;;  %v2884_v34 = vpop.eup %2883  ;;  %v1433_v17 = vpack.c.bf16 %v1421_v2, %v1420_v42 }
 0x137   : > { %v1376_v57 = vsub.f32 1.0, %v1355_v16  ;;  %v2886_v18 = vpop.eup %2885  ;;  %v1359_v33 = vmul.f32 2.0, %v2884_v34 }
 0x138   : > { %v1407_v23 = vadd.f32 1.0, %v1375_v22  ;;  %v1377_v9 = vsub.f32 1.0, %v1357_v24  ;;  %v1363_v28 = vmul.f32 2.0, %v2886_v18 }
 0x139   : > { %2738 = vmatmul.mubr.msk.bf16.gmra.mrb[8].mxu0 %vm763_vm1, %v1433_v17  ;;  %v1408_v26 = vadd.f32 1.0, %v1376_v57  ;;  %v1378_v52 = vsub.f32 1.0, %v1359_v33 }
 0x13a   : > { %v1423_v47 = vmul.f32 %v1407_v23, %v1391_v20  ;;  %v1409_v32 = vadd.f32 1.0, %v1377_v9  ;;  %v1380_v56 = vsub.f32 1.0, %v1363_v28 }
 0x13b   : > { %v1424_v36 = vmul.f32 %v1408_v26, %v1392_v14  ;;  %v1410_v43 = vadd.f32 1.0, %v1378_v52 }
 0x13c   : > { %v1434_v30 = vpack.c.bf16 %v1423_v47, %v1422_v31  ;;  %v1425_v38 = vmul.f32 %v1409_v32, %v1393_v25  ;;  %v1412_v39 = vadd.f32 1.0, %v1380_v56 }
 0x13d   : > { %v1426_v60 = vmul.f32 %v1410_v43, %v1394_v49 }
 0x13e   : > { %v2888_v4 = vpop.eup %2887  ;;  %2741 = vmatprep.mubr.msk.bf16.mxu0 %vm763_vm1, %v1434_v30  ;;  %v1435_v11 = vpack.c.bf16 %v1425_v38, %v1424_v36  ;;  %v1428_v58 = vmul.f32 %v1412_v39, %v1396_v27 }
 0x13f   : > { %v2890_v21 = vpop.eup %2889  ;;  %v1365_v13 = vmul.f32 2.0, %v2888_v4 }
 0x140   : > { %v1361_v44 = vmul.f32 2.0, %v2890_v21 }
 0x141   : > { %2742 = vmatmul.mubr.msk.bf16.gmra.mrb[12].mxu0 %vm763_vm1, %v1435_v11  ;;  %v1381_v5 = vsub.f32 1.0, %v1365_v13 }
 0x142   : > { %v1379_v40 = vsub.f32 1.0, %v1361_v44 }
 0x143   : > { %v1413_v48 = vadd.f32 1.0, %v1381_v5 }
 0x144   : > { %v1411_v55 = vadd.f32 1.0, %v1379_v40 }
 0x145   : > { %v1429_v59 = vmul.f32 %v1413_v48, %v1397_v46 }
 0x146   : > { %v1427_v37 = vmul.f32 %v1411_v55, %v1395_v51 }
 0x147   : > { %v1437_v61 = vpack.c.bf16 %v1429_v59, %v1428_v58 }
 0x148   : > { %v1436_v63 = vpack.c.bf16 %v1427_v37, %v1426_v60 }
 0x14a   : > { %2745 = vmatprep.mubr.msk.bf16.mxu0 %vm763_vm1, %v1436_v63 }
 0x14b   : > { %2746 = vmatmul.mubr.msk.bf16.gmra.mrb[16].mxu0 %vm763_vm1, %v1437_v61 }
 0x14c   : > { %2781 = vmatprep.mubr.msk.bf16.mxu0 %vm2984_vm0, %v2983_v1 }
 0x204   : > { %v2735_v53 = vpop.f32.mrb[4].mxu0 }
 0x205   : > { %v1523_v10 = vadd.f32 %v2735_v53, %v3348_v35  ;;  %v1514_v0 = vpop.f32.mrb[5].mxu0 }
 0x206   : > { %v1515_v3 = vadd.f32 %v3348_v35, %v1514_v0  ;;  %v2736_v8 = vpop.f32.mrb[6].mxu0 }
 0x207   : > { %v1579_v54 = vmul.f32 0.044715, %v1523_v10  ;;  %v1526_v41 = vadd.f32 %v2736_v8, %v3348_v35  ;;  %v1517_v50 = vpop.f32.mrb[7].mxu0  ;;  %v3358_v19 = vmul.f32 0.5, %v1523_v10 }
 0x208   : > { %v1577_v6 = vmul.f32 0.044715, %v1515_v3  ;;  %v1518_v62 = vadd.f32 %v3348_v35, %v1517_v50  ;;  %v3363_v25 = vmul.f32 0.5, %v1515_v3 }
 0x209   : > { %v1595_v7 = vmul.f32 %v1579_v54, %v1523_v10  ;;  %v1580_v12 = vmul.f32 0.044715, %v1526_v41  ;;  %v3378_v27 = vmul.f32 0.5, %v1526_v41 }
 0x20a   : > { %v1593_v15 = vmul.f32 %v1577_v6, %v1515_v3  ;;  %v1578_v42 = vmul.f32 0.044715, %v1518_v62  ;;  %v3386_v37 = vmul.f32 0.5, %v1518_v62 }
 0x20b   : > { %v1611_v2 = vmul.f32 %v1595_v7, %v1523_v10  ;;  %v1596_v16 = vmul.f32 %v1580_v12, %v1526_v41 }
 0x20c   : > { %v1609_v22 = vmul.f32 %v1593_v15, %v1515_v3  ;;  %v1594_v45 = vmul.f32 %v1578_v42, %v1518_v62  ;;  %v2739_v24 = vpop.f32.mrb[8].mxu0 }
 0x20d   : > { %v1627_v34 = vadd.f32 %v1611_v2, %v1523_v10  ;;  %v1612_v17 = vmul.f32 %v1596_v16, %v1526_v41  ;;  %v3356_v57 = vadd.f32 %v2739_v24, %v3348_v35  ;;  %v1530_v18 = vpop.f32.mrb[9].mxu0 }
 0x20e   : > { %v1625_v20 = vadd.f32 %v1609_v22, %v1515_v3  ;;  %v1610_v23 = vmul.f32 %v1594_v45, %v1518_v62  ;;  %v3361_v9 = vadd.f32 %v3348_v35, %v1530_v18  ;;  %v2740_v14 = vpop.f32.mrb[10].mxu0 }
 0x20f   : > { %v1628_v26 = vadd.f32 %v1612_v17, %v1526_v41  ;;  %v1583_v28 = vmul.f32 0.044715, %v3356_v57  ;;  %v3367_v31 = vadd.f32 %v2740_v14, %v3348_v35  ;;  %v1533_v47 = vpop.f32.mrb[11].mxu0  ;;  %v1643_v32 = vmul.f32 0.7978846, %v1627_v34  ;;  %v2816_v41 = vld [vmem:[%s3633_s9 + $0x8] sm:$0xff]  }
 0x210   : > { %v1626_v33 = vadd.f32 %v1610_v23, %v1518_v62  ;;  %v1581_v30 = vmul.f32 0.044715, %v3361_v9  ;;  %v3371_v36 = vadd.f32 %v3348_v35, %v1533_v47  ;;  %v1641_v38 = vmul.f32 0.7978846, %v1625_v20  ;;  %2752 = vmatpush3.bf16.msra.mxu1 %v2816_v41 }
 0x211   : > { %v1599_v56 = vmul.f32 %v1583_v28, %v3356_v57  ;;  %v1584_v4 = vmul.f32 0.044715, %v3367_v31  ;;  %v1659_v11 = vmul.f32 2.0, %v1643_v32  ;;  %v1644_v52 = vmul.f32 0.7978846, %v1628_v26  ;;  %2757 = vmatprep.subr.bf16.mxu1 %v2983_v1 }
 0x212   : > { %v1597_v21 = vmul.f32 %v1581_v30, %v3361_v9  ;;  %v1582_v13 = vmul.f32 0.044715, %v3371_v36  ;;  %v1657_v44 = vmul.f32 2.0, %v1641_v38  ;;  %v1642_v5 = vmul.f32 0.7978846, %v1626_v33 }
 0x213   : > { %v1600_v39 = vmul.f32 %v1584_v4, %v3367_v31  ;;  %v1677_v40 = vmul.f32 1.442695, %v1659_v11  ;;  %v1660_v43 = vmul.f32 2.0, %v1644_v52  ;;  %v1615_v58 = vmul.f32 %v1599_v56, %v3356_v57 }
 0x214   : > { %v1613_v46 = vmul.f32 %v1597_v21, %v3361_v9  ;;  %v1598_v48 = vmul.f32 %v1582_v13, %v3371_v36  ;;  %v2743_v49 = vpop.f32.mrb[12].mxu0  ;;  %v1673_v51 = vmul.f32 1.442695, %v1657_v44  ;;  %v1658_v55 = vmul.f32 2.0, %v1642_v5 }
 0x215   : > { %v3384_v59 = vadd.f32 %v2743_v49, %v3348_v35  ;;  %v1546_v60 = vpop.f32.mrb[13].mxu0  ;;  %2891 = vpow2.f32 %v1677_v40  ;;  %v1616_v10 = vmul.f32 %v1600_v39, %v3367_v31  ;;  %v1679_v7 = vmul.f32 1.442695, %v1660_v43 }
 0x216   : > { %v1629_v61 = vadd.f32 %v1613_v46, %v3361_v9  ;;  %v1614_v63 = vmul.f32 %v1598_v48, %v3371_v36  ;;  %v1547_v29 = vadd.f32 %v3348_v35, %v1546_v60  ;;  %v2744_v53 = vpop.f32.mrb[14].mxu0  ;;  %2893 = vpow2.f32 %v1673_v51 }
 0x217   : > { %v1587_v0 = vmul.f32 0.044715, %v3384_v59  ;;  %v3394_v3 = vadd.f32 %v2744_v53, %v3348_v35  ;;  %v1549_v8 = vpop.f32.mrb[15].mxu0  ;;  %v1675_v54 = vmul.f32 1.442695, %v1658_v55  ;;  %v1631_v12 = vadd.f32 %v1615_v58, %v3356_v57 }
 0x218   : > { %v1630_v50 = vadd.f32 %v1614_v63, %v3371_v36  ;;  %v1585_v6 = vmul.f32 0.044715, %v1547_v29  ;;  %v1550_v62 = vadd.f32 %v3348_v35, %v1549_v8  ;;  %v1645_v22 = vmul.f32 0.7978846, %v1629_v61 }
 0x219   : > { %v1603_v15 = vmul.f32 %v1587_v0, %v3384_v59  ;;  %v1588_v42 = vmul.f32 0.044715, %v3394_v3  ;;  %2895 = vpow2.f32 %v1675_v54  ;;  %v3406_v45 = vadd.f32 %v1616_v10, %v3367_v31 }
 0x21a   : > { %v1601_v2 = vmul.f32 %v1585_v6, %v1547_v29  ;;  %v1586_v16 = vmul.f32 0.044715, %v1550_v62  ;;  %2897 = vpow2.f32 %v1679_v7  ;;  %v3410_v17 = vmul.f32 0.5, %v1547_v29 }
 0x21b   : > { %v1619_v24 = vmul.f32 %v1603_v15, %v3384_v59  ;;  %v1604_v34 = vmul.f32 %v1588_v42, %v3394_v3  ;;  %v1661_v23 = vmul.f32 2.0, %v1645_v22  ;;  %v1646_v14 = vmul.f32 0.7978846, %v1630_v50  ;;  %v3443_v22 = vpop.permute.xlu0 %1822 }
 0x21c   : > { %v1617_v18 = vmul.f32 %v1601_v2, %v1547_v29  ;;  %v1602_v20 = vmul.f32 %v1586_v16, %v1550_v62  ;;  %v3415_v47 = vmul.f32 0.5, %v3361_v9  ;;  %v3417_v32 = vmul.f32 0.5, %v1550_v62 }
 0x21d   : > { %v1635_v26 = vadd.f32 %v1619_v24, %v3384_v59  ;;  %v1620_v28 = vmul.f32 %v1604_v34, %v3394_v3  ;;  %v1681_v56 = vmul.f32 1.442695, %v1661_v23  ;;  %v1662_v4 = vmul.f32 2.0, %v1646_v14 }
 0x21e   : > { %v1633_v33 = vadd.f32 %v1617_v18, %v1547_v29  ;;  %v1618_v30 = vmul.f32 %v1602_v20, %v1550_v62  ;;  %v2747_v38 = vpop.f32.mrb[16].mxu0  ;;  %v1647_v5 = vmul.f32 0.7978846, %v1631_v12  ;;  %v3446_v34 = vmul.f32 0.5, %v3371_v36 }
 0x21f   : > { %v2892_v11 = vpop.eup %2891  ;;  %v1636_v52 = vadd.f32 %v1620_v28, %v3394_v3  ;;  %v3421_v21 = vadd.f32 %v2747_v38, %v3348_v35  ;;  %v1562_v13 = vpop.f32.mrb[17].mxu0  ;;  %v1651_v44 = vmul.f32 0.7978846, %v1635_v26  ;;  %2899 = vpow2.f32 %v1681_v56 }
 0x220   : > { %v2894_v39 = vpop.eup %2893  ;;  %v1634_v40 = vadd.f32 %v1618_v30, %v1550_v62  ;;  %v3424_v9 = vadd.f32 %v3348_v35, %v1562_v13  ;;  %v2748_v43 = vpop.f32.mrb[18].mxu0  ;;  %v1707_v46 = vadd.f32 1.0, %v2892_v11  ;;  %v1649_v48 = vmul.f32 0.7978846, %v1633_v33 }
 0x221   : > { %v1591_v49 = vmul.f32 0.044715, %v3421_v21  ;;  %v3428_v51 = vadd.f32 %v2748_v43, %v3348_v35  ;;  %v1565_v55 = vpop.f32.mrb[19].mxu0  ;;  %v1705_v58 = vadd.f32 1.0, %v2894_v39  ;;  %v1683_v2 = vmul.f32 1.442695, %v1662_v4  ;;  %v1830_v43 = vpop.permute.xlu0 %1829 }
 0x222   : > { %v1589_v60 = vmul.f32 0.044715, %v3424_v9  ;;  %v3432_v61 = vadd.f32 %v3348_v35, %v1565_v55  ;;  %2901 = vrcp.f32 %v1707_v46  ;;  %v1665_v63 = vmul.f32 2.0, %v1649_v48 }
 0x223   : > { %v2896_v29 = vpop.eup %2895  ;;  %v1607_v53 = vmul.f32 %v1591_v49, %v3421_v21  ;;  %v1592_v10 = vmul.f32 0.044715, %v3428_v51  ;;  %2903 = vrcp.f32 %v1705_v58  ;;  %v1650_v0 = vmul.f32 0.7978846, %v1634_v40 }
 0x224   : > { %v2898_v8 = vpop.eup %2897  ;;  %v1605_v54 = vmul.f32 %v1589_v60, %v3424_v9  ;;  %v1590_v41 = vmul.f32 0.044715, %v3432_v61  ;;  %v1706_v50 = vadd.f32 1.0, %v2896_v29  ;;  %v1689_v6 = vmul.f32 1.442695, %v1665_v63 }
 0x225   : > { %v1623_v62 = vmul.f32 %v1607_v53, %v3421_v21  ;;  %v1608_v35 = vmul.f32 %v1592_v10, %v3428_v51  ;;  %v1708_v7 = vadd.f32 1.0, %v2898_v8  ;;  %v1666_v12 = vmul.f32 2.0, %v1650_v0 }
 0x226   : > { %v1621_v15 = vmul.f32 %v1605_v54, %v3424_v9  ;;  %v1606_v42 = vmul.f32 %v1590_v41, %v3432_v61  ;;  %2905 = vrcp.f32 %v1706_v50  ;;  %v1667_v23 = vmul.f32 2.0, %v1651_v44 }
 0x227   : > { %v1624_v16 = vmul.f32 %v1608_v35, %v3428_v51  ;;  %2907 = vrcp.f32 %v1708_v7  ;;  %v1691_v24 = vmul.f32 1.442695, %v1666_v12  ;;  %v1639_v14 = vadd.f32 %v1623_v62, %v3421_v21 }
 0x228   : > { %v1637_v18 = vadd.f32 %v1621_v15, %v3424_v9  ;;  %v1622_v20 = vmul.f32 %v1606_v42, %v3432_v61  ;;  %2909 = vpow2.f32 %v1689_v6  ;;  %v3452_v26 = vmul.f32 0.5, %v3384_v59 }
 0x229   : > { %2911 = vpow2.f32 %v1691_v24  ;;  %v1663_v28 = vmul.f32 2.0, %v1647_v5  ;;  %v3455_v33 = vadd.f32 %v1624_v16, %v3428_v51  ;;  %v1693_v30 = vmul.f32 1.442695, %v1667_v23  ;;  %v2900_v38 = vpop.eup %2899 }
 0x22a   : > { %2913 = vpow2.f32 %v1683_v2  ;;  %v1652_v36 = vmul.f32 0.7978846, %v1636_v52  ;;  %v1638_v56 = vadd.f32 %v1622_v20, %v3432_v61  ;;  %v3459_v11 = vmul.f32 0.5, %v3356_v57 }
 0x22b   : > { %v1685_v4 = vmul.f32 1.442695, %v1663_v28  ;;  %v1648_v13 = vmul.f32 0.7978846, %v3406_v45  ;;  %v1709_v39 = vadd.f32 1.0, %v2900_v38  ;;  %2915 = vpow2.f32 %v1693_v30 }
 0x22c   : > { %v2902_v44 = vpop.eup %2901  ;;  %v1668_v59 = vmul.f32 2.0, %v1652_v36  ;;  %v1653_v5 = vmul.f32 0.7978846, %v1637_v18  ;;  %v3463_v52 = vmul.f32 0.5, %v3394_v3  ;;  %v3466_v45 = vmul.f32 0.5, %v3367_v31  ;;  %v1837_v31 = vpop.permute.xlu0 %1836 }
 0x22d   : > { %v2904_v40 = vpop.eup %2903  ;;  %v1726_v46 = vmul.f32 2.0, %v2902_v44  ;;  %2917 = vpow2.f32 %v1685_v4  ;;  %v1664_v48 = vmul.f32 2.0, %v1648_v13  ;;  %v1654_v63 = vmul.f32 0.7978846, %v1638_v56 }
 0x22e   : > { %v1722_v49 = vmul.f32 2.0, %v2904_v40  ;;  %2919 = vrcp.f32 %v1709_v39  ;;  %v1695_v55 = vmul.f32 1.442695, %v1668_v59  ;;  %v1669_v57 = vmul.f32 2.0, %v1653_v5 }
 0x22f   : > { %v1755_v58 = vsub.f32 1.0, %v1726_v46  ;;  %v1687_v60 = vmul.f32 1.442695, %v1664_v48  ;;  %v1655_v0 = vmul.f32 0.7978846, %v1639_v14  ;;  %v1670_v41 = vmul.f32 2.0, %v1654_v63 }
 0x230   : > { %v2906_v29 = vpop.eup %2905  ;;  %v1753_v53 = vsub.f32 1.0, %v1722_v49  ;;  %2921 = vpow2.f32 %v1695_v55  ;;  %v1697_v10 = vmul.f32 1.442695, %v1669_v57  ;;  %v3470_v2 = vmul.f32 0.5, %v3424_v9  ;;  %v1844_v48 = vpop.permute.xlu0 %1843 }
 0x231   : > { %v2908_v8 = vpop.eup %2907  ;;  %v1724_v54 = vmul.f32 2.0, %v2906_v29  ;;  %v1787_v3 = vadd.f32 1.0, %v1755_v58  ;;  %2923 = vpow2.f32 %v1687_v60  ;;  %v1671_v35 = vmul.f32 2.0, %v1655_v0 }
 0x232   : > { %v2910_v50 = vpop.eup %2909  ;;  %v1785_v6 = vadd.f32 1.0, %v1753_v53  ;;  %v1728_v62 = vmul.f32 2.0, %v2908_v8  ;;  %2925 = vpow2.f32 %v1697_v10  ;;  %v1699_v23 = vmul.f32 1.442695, %v1670_v41 }
 0x233   : > { %v2912_v7 = vpop.eup %2911  ;;  %v1754_v12 = vsub.f32 1.0, %v1724_v54  ;;  %v1803_v15 = vmul.f32 %v1787_v3, %v3358_v19  ;;  %v1713_v42 = vadd.f32 1.0, %v2910_v50  ;;  %v3474_v19 = vmul.f32 1.442695, %v1671_v35 }
 0x234   : > { %v2914_v16 = vpop.eup %2913  ;;  %v1801_v24 = vmul.f32 %v1785_v6, %v3363_v25  ;;  %v1756_v18 = vsub.f32 1.0, %v1728_v62  ;;  %v1714_v20 = vadd.f32 1.0, %v2912_v7 }
 0x235   : > { %v1786_v14 = vadd.f32 1.0, %v1754_v12  ;;  %v1931_v28 = vmul.f32 %v1837_v31, %v1803_v15  ;;  %2927 = vrcp.f32 %v1713_v42  ;;  %v1710_v30 = vadd.f32 1.0, %v2914_v16  ;;  %v2916_v36 = vpop.eup %2915 }
 0x236   : > { %v1929_v38 = vmul.f32 %v3443_v22, %v1801_v24  ;;  %v1788_v56 = vadd.f32 1.0, %v1756_v18  ;;  %2929 = vrcp.f32 %v1714_v20  ;;  %v1715_v25 = vadd.f32 1.0, %v2916_v36  ;;  %v1851_v18 = vpop.permute.xlu0 %1850 }
 0x237   : > { %v2918_v4 = vpop.eup %2917  ;;  %v1802_v9 = vmul.f32 %v1786_v14, %v3386_v37  ;;  %v1966_v13 = vsel %vm763_vm1, %v1931_v28, 0.0  ;;  %2931 = vrcp.f32 %v1710_v30  ;;  %v3481_v37 = vmul.f32 0.7978846, %v3455_v33 }
 0x238   : > { %v2920_v44 = vpop.eup %2919  ;;  %v1952_v39 = vsel %vm763_vm1, %v1929_v38, 0.0  ;;  %v1967_v59 = vrot.slane %v1966_v13, 4  ;;  %v1804_v5 = vmul.f32 %v1788_v56, %v3378_v27  ;;  %v1711_v40 = vadd.f32 1.0, %v2918_v4  ;;  %v1879_v4 = vpop.permute.xlu1 %1878 }
 0x239   : > { %v1953_v46 = vrot.slane %v1952_v39, 4  ;;  %v1930_v22 = vmul.f32 %v1830_v43, %v1802_v9  ;;  %v1730_v49 = vmul.f32 2.0, %v2920_v44  ;;  %2933 = vrcp.f32 %v1715_v25 }
 0x23a   : > { %v2922_v55 = vpop.eup %2921  ;;  %v1968_v57 = vadd.f32 %v1967_v59, %v1966_v13  ;;  %v1932_v58 = vmul.f32 %v1844_v48, %v1804_v5  ;;  %2935 = vrcp.f32 %v1711_v40 }
 0x23b   : > { %v2924_v60 = vpop.eup %2923  ;;  %v1954_v63 = vadd.f32 %v1953_v46, %v1952_v39  ;;  %v1959_v29 = vsel %vm763_vm1, %v1930_v22, 0.0  ;;  %v1757_v53 = vsub.f32 1.0, %v1730_v49  ;;  %v1716_v10 = vadd.f32 1.0, %v2922_v55 }
 0x23c   : > { %v2926_v27 = vpop.eup %2925  ;;  %v1960_v0 = vrot.slane %v1959_v29, 4  ;;  %v1969_v8 = vrot.slane %v1968_v57, 2  ;;  %v1973_v43 = vsel %vm763_vm1, %v1932_v58, 0.0  ;;  %v1712_v54 = vadd.f32 1.0, %v2924_v60 }
 0x23d   : > { %v1955_v3 = vrot.slane %v1954_v63, 2  ;;  %v1974_v41 = vrot.slane %v1973_v43, 4  ;;  %v1789_v50 = vadd.f32 1.0, %v1757_v53  ;;  %2937 = vrcp.f32 %v1716_v10 }
 0x23e   : > { %v1961_v6 = vadd.f32 %v1960_v0, %v1959_v29  ;;  %v1970_v62 = vadd.f32 %v1969_v8, %v1968_v57  ;;  %2939 = vrcp.f32 %v1712_v54  ;;  %v1717_v33 = vadd.f32 1.0, %v2926_v27 }
 0x23f   : > { %v2928_v35 = vpop.eup %2927  ;;  %v1956_v7 = vadd.f32 %v1955_v3, %v1954_v63  ;;  %v1975_v12 = vadd.f32 %v1974_v41, %v1973_v43  ;;  %v1805_v31 = vmul.f32 %v1789_v50, %v3415_v47  ;;  %2941 = vpow2.f32 %v1699_v23  ;;  %v1886_v50 = vpop.permute.xlu1 %1885 }
 0x240   : > { %v2930_v15 = vpop.eup %2929  ;;  %v1962_v42 = vrot.slane %v1961_v6, 2  ;;  %v1971_v16 = vrot.slane %v1970_v62, 1  ;;  %v1738_v24 = vmul.f32 2.0, %v2928_v35  ;;  %2943 = vrcp.f32 %v1717_v33 }
 0x241   : > { %v2932_v20 = vpop.eup %2931  ;;  %v1957_v14 = vrot.slane %v1956_v7, 1  ;;  %v1976_v28 = vrot.slane %v1975_v12, 2  ;;  %v1933_v30 = vmul.f32 %v1851_v18, %v1805_v31  ;;  %v1740_v36 = vmul.f32 2.0, %v2930_v15 }
 0x242   : > { %v1963_v38 = vadd.f32 %v1962_v42, %v1961_v6  ;;  %v1972_v56 = vadd.f32 %v1971_v16, %v1970_v62  ;;  %v1761_v9 = vsub.f32 1.0, %v1738_v24  ;;  %v1732_v13 = vmul.f32 2.0, %v2932_v20  ;;  %v1858_v42 = vpop.permute.xlu0 %1857 }
 0x243   : > { %v2934_v47 = vpop.eup %2933  ;;  %v1958_v23 = vadd.f32 %v1957_v14, %v1956_v7  ;;  %v1977_v25 = vadd.f32 %v1976_v28, %v1975_v12  ;;  %v1980_v44 = vsel %vm763_vm1, %v1933_v30, 0.0  ;;  %v1762_v39 = vsub.f32 1.0, %v1740_v36 }
 0x244   : > { %v2936_v59 = vpop.eup %2935  ;;  %v1964_v5 = vrot.slane %v1963_v38, 1  ;;  %v2066_v40 = vpack.c.bf16 %v1972_v56, %v1972_v56  ;;  %v1793_v46 = vadd.f32 1.0, %v1761_v9  ;;  %v1981_v22 = vrot.slane %v1980_v44, 4 }
 0x245   : > { %v2064_v48 = vpack.c.bf16 %v1958_v23, %v1958_v23  ;;  %v1978_v49 = vrot.slane %v1977_v25, 1  ;;  %v1794_v55 = vadd.f32 1.0, %v1762_v39  ;;  %v1758_v57 = vsub.f32 1.0, %v1732_v13 }
 0x246   : > { %v1965_v58 = vadd.f32 %v1964_v5, %v1963_v38  ;;  %v2106_v60 = vunpack.c.l.b16 %v2066_v40  ;;  %v1809_v63 = vmul.f32 %v1793_v46, %v3410_v17  ;;  %v1982_v29 = vadd.f32 %v1981_v22, %v1980_v44 }
 0x247   : > { %v2938_v53 = vpop.eup %2937  ;;  %v2104_v10 = vunpack.c.l.b16 %v2064_v48  ;;  %v1979_v27 = vadd.f32 %v1978_v49, %v1977_v25  ;;  %v1810_v0 = vmul.f32 %v1794_v55, %v3417_v32  ;;  %v1790_v8 = vadd.f32 1.0, %v1758_v57  ;;  %v1893_v48 = vpop.permute.xlu1 %1892 }
 0x248   : > { %v2940_v43 = vpop.eup %2939  ;;  %v2065_v54 = vpack.c.bf16 %v1965_v58, %v1965_v58  ;;  %v1937_v3 = vmul.f32 %v1879_v4, %v1809_v63  ;;  %v1983_v41 = vrot.slane %v1982_v29, 2  ;;  %v1742_v6 = vmul.f32 2.0, %v2934_v47  ;;  %v1865_v49 = vpop.permute.xlu0 %1864 }
 0x249   : > { %v3489_v62 = vpop.eup %2941  ;;  %v2067_v33 = vpack.c.bf16 %v1979_v27, %v1979_v27  ;;  %v1938_v35 = vmul.f32 %v1886_v50, %v1810_v0  ;;  %v1806_v17 = vmul.f32 %v1790_v8, %v3446_v34  ;;  %v1734_v7 = vmul.f32 2.0, %v2936_v59 }
 0x24a   : > { %v2944_v12 = vpop.eup %2943  ;;  %v2105_v31 = vunpack.c.l.b16 %v2065_v54  ;;  %v2008_v15 = vsel %vm763_vm1, %v1937_v3, 0.0  ;;  %v1984_v32 = vadd.f32 %v1983_v41, %v1982_v29  ;;  %v1763_v16 = vsub.f32 1.0, %v1742_v6 }
 0x24b   : > { %v2107_v24 = vunpack.c.l.b16 %v2067_v33  ;;  %v2009_v18 = vrot.slane %v2008_v15, 4  ;;  %v2015_v20 = vsel %vm763_vm1, %v1938_v35, 0.0  ;;  %v1934_v14 = vmul.f32 %v1858_v42, %v1806_v17 }
 0x24c   : > { %v2121_v28 = vsel %vm2120_vm3, %v2105_v31, %v2104_v10  ;;  %v1985_v30 = vrot.slane %v1984_v32, 1  ;;  %v2016_v36 = vrot.slane %v2015_v20, 4  ;;  %v1795_v38 = vadd.f32 1.0, %v1763_v16  ;;  %v1872_v42 = vpop.permute.xlu0 %1871 }
 0x24d   : > { %v2123_v34 = vsel %vm2122_vm4, %v2106_v60, %v2121_v28  ;;  %v2010_v56 = vadd.f32 %v2009_v18, %v2008_v15  ;;  %v1987_v4 = vsel %vm763_vm1, %v1934_v14, 0.0  ;;  %v1759_v9 = vsub.f32 1.0, %v1734_v7 }
 0x24e   : > { %v2125_v13 = vsel %vm2124_vm5, %v2107_v24, %v2123_v34  ;;  %v1986_v47 = vadd.f32 %v1985_v30, %v1984_v32  ;;  %v2017_v23 = vadd.f32 %v2016_v36, %v2015_v20  ;;  %v1988_v25 = vrot.slane %v1987_v4, 4  ;;  %v1900_v32 = vpop.permute.xlu1 %1899 }
 0x24f   : > { %v2011_v44 = vrot.slane %v2010_v56, 2  ;;  %v1811_v39 = vmul.f32 %v1795_v38, %v3452_v26  ;;  %v1791_v59 = vadd.f32 1.0, %v1759_v9  ;;  %v1744_v5 = vmul.f32 2.0, %v2938_v53 }
 0x250   : > { %v2068_v40 = vpack.c.bf16 %v1986_v47, %v1986_v47  ;;  %v2018_v46 = vrot.slane %v2017_v23, 2  ;;  %v1989_v22 = vadd.f32 %v1988_v25, %v1987_v4  ;;  %v1736_v55 = vmul.f32 2.0, %v2940_v43 }
 0x251   : > { %v2012_v57 = vadd.f32 %v2011_v44, %v2010_v56  ;;  %v1939_v58 = vmul.f32 %v1893_v48, %v1811_v39  ;;  %v1807_v60 = vmul.f32 %v1791_v59, %v3459_v11  ;;  %v1764_v63 = vsub.f32 1.0, %v1744_v5 }
 0x252   : > { %v2108_v29 = vunpack.c.l.b16 %v2068_v40  ;;  %v2019_v10 = vadd.f32 %v2018_v46, %v2017_v23  ;;  %v1990_v27 = vrot.slane %v1989_v22, 2  ;;  %v1760_v0 = vsub.f32 1.0, %v1736_v55 }
 0x253   : > { %v2013_v8 = vrot.slane %v2012_v57, 1  ;;  %v2022_v26 = vsel %vm763_vm1, %v1939_v58, 0.0  ;;  %v1935_v53 = vmul.f32 %v1865_v49, %v1807_v60  ;;  %v1796_v54 = vadd.f32 1.0, %v1764_v63 }
 0x254   : > { %v2127_v3 = vsel %vm2126_vm6, %v2108_v29, %v2125_v13  ;;  %v2020_v41 = vrot.slane %v2019_v10, 1  ;;  %v1991_v50 = vadd.f32 %v1990_v27, %v1989_v22  ;;  %v2023_v43 = vrot.slane %v2022_v26, 4 }
 0x255   : > { %v2014_v6 = vadd.f32 %v2013_v8, %v2012_v57  ;;  %v1994_v33 = vsel %vm763_vm1, %v1935_v53, 0.0  ;;  %v1812_v11 = vmul.f32 %v1796_v54, %v3463_v52  ;;  %v1792_v35 = vadd.f32 1.0, %v1760_v0  ;;  %v1907_v57 = vpop.permute.xlu1 %1906 }
 0x256   : > { %v2021_v17 = vadd.f32 %v2020_v41, %v2019_v10  ;;  %v1992_v7 = vrot.slane %v1991_v50, 1  ;;  %v2024_v31 = vadd.f32 %v2023_v43, %v2022_v26  ;;  %v1995_v15 = vrot.slane %v1994_v33, 4 }
 0x257   : > { %v2072_v16 = vpack.c.bf16 %v2014_v6, %v2014_v6  ;;  %v1940_v24 = vmul.f32 %v1900_v32, %v1812_v11  ;;  %v1808_v18 = vmul.f32 %v1792_v35, %v3466_v45  ;;  %v1746_v20 = vmul.f32 2.0, %v2944_v12 }
 0x258   : > { %v2073_v14 = vpack.c.bf16 %v2021_v17, %v2021_v17  ;;  %v1993_v28 = vadd.f32 %v1992_v7, %v1991_v50  ;;  %v2025_v30 = vrot.slane %v2024_v31, 2  ;;  %v1996_v36 = vadd.f32 %v1995_v15, %v1994_v33 }
 0x259   : > { %v2112_v38 = vunpack.c.l.b16 %v2072_v16  ;;  %v2029_v34 = vsel %vm763_vm1, %v1940_v24, 0.0  ;;  %v1936_v52 = vmul.f32 %v1872_v42, %v1808_v18  ;;  %v1765_v56 = vsub.f32 1.0, %v1746_v20 }
 0x25a   : > { %v2113_v4 = vunpack.c.l.b16 %v2073_v14  ;;  %v2069_v9 = vpack.c.bf16 %v1993_v28, %v1993_v28  ;;  %v2026_v13 = vadd.f32 %v2025_v30, %v2024_v31  ;;  %v1997_v47 = vrot.slane %v1996_v36, 2 }
 0x25b   : > { %v2030_v23 = vrot.slane %v2029_v34, 4  ;;  %v2001_v25 = vsel %vm763_vm1, %v1936_v52, 0.0  ;;  %v1797_v44 = vadd.f32 1.0, %v1765_v56  ;;  %v1718_v45 = vadd.f32 1.0, %v3489_v62 }
 0x25c   : > { %v2134_v12 = vsel %vm2120_vm3, %v2113_v4, %v2112_v38  ;;  %v2109_v39 = vunpack.c.l.b16 %v2069_v9  ;;  %v2027_v59 = vrot.slane %v2026_v13, 1  ;;  %v1998_v5 = vadd.f32 %v1997_v47, %v1996_v36 }
 0x25d   : > { %v2031_v40 = vadd.f32 %v2030_v23, %v2029_v34  ;;  %v2002_v46 = vrot.slane %v2001_v25, 4  ;;  %v1813_v22 = vmul.f32 %v1797_v44, %v3470_v2  ;;  %2945 = vrcp.f32 %v1718_v45  ;;  %v1914_v44 = vpop.permute.xlu1 %1913 }
 0x25e   : > { %v2129_v48 = vsel %vm2128_vm7, %v2109_v39, %v2127_v3  ;;  %v2028_v49 = vadd.f32 %v2027_v59, %v2026_v13  ;;  %v1999_v55 = vrot.slane %v1998_v5, 1  ;;  %2947 = vpow2.f32 %v3474_v19  ;;  %v2971_v19 = vld [vmem:[%s3153_s30] sm:$0xff] }
 0x25f   : > { %v2032_v58 = vrot.slane %v2031_v40, 2  ;;  %v2003_v62 = vadd.f32 %v2002_v46, %v2001_v25  ;;  %v1941_v60 = vmul.f32 %v1907_v57, %v1813_v22  ;;  %v1672_v63 = vmul.f32 2.0, %v3481_v37  ;;  %v2972_v37 = vld [vmem:[%s3153_s30 + $0x8] sm:$0xff] }
 0x260   : > { %v2074_v29 = vpack.c.bf16 %v2028_v49, %v2028_v49  ;;  %v2000_v10 = vadd.f32 %v1999_v55, %v1998_v5  ;;  %v1946_v3 = vsel %vm1945_vm9, %v2971_v19, 0.0  ;;  %v1949_v43 = vsel %vm1945_vm9, %v2972_v37, 0.0 }
 0x261   : > { %v2033_v2 = vadd.f32 %v2032_v58, %v2031_v40  ;;  %v2004_v27 = vrot.slane %v2003_v62, 2  ;;  %v2036_v0 = vsel %vm763_vm1, %v1941_v60, 0.0  ;;  %v1703_v8 = vmul.f32 1.442695, %v1672_v63  ;;  %1947 = vadd.xlane.f32.xlu0 %v1946_v3  ;;  %1950 = vadd.xlane.f32.xlu1 %v1949_v43  ;;  %v1921_v57 = vpop.permute.xlu1 %1920 }
 0x262   : > { %v2114_v26 = vunpack.c.l.b16 %v2074_v29  ;;  %v2070_v53 = vpack.c.bf16 %v2000_v10, %v2000_v10  ;;  %v2037_v54 = vrot.slane %v2036_v0, 4  ;;  %v1782_v56 = vmul.f32 0.5, %v3432_v61 }
 0x263   : > { %v2034_v41 = vrot.slane %v2033_v2, 1  ;;  %v2005_v50 = vadd.f32 %v2004_v27, %v2003_v62  ;;  %2949 = vpow2.f32 %v1703_v8  ;;  %v1783_v58 = vmul.f32 0.5, %v3421_v21 }
 0x264   : > { %v2135_v6 = vsel %vm2122_vm4, %v2114_v26, %v2134_v12  ;;  %v2110_v33 = vunpack.c.l.b16 %v2070_v53  ;;  %v2038_v11 = vadd.f32 %v2037_v54, %v2036_v0  ;;  %v1784_v8 = vmul.f32 0.5, %v3428_v51 }
 0x265   : > { %v2035_v35 = vadd.f32 %v2034_v41, %v2033_v2  ;;  %v2006_v17 = vrot.slane %v2005_v50, 1  ;;  %v1928_v54 = vpop.permute.xlu1 %1927 }
 0x266   : > { %v2131_v7 = vsel %vm2130_vm8, %v2110_v33, %v2129_v48  ;;  %v2039_v31 = vrot.slane %v2038_v11, 2 }
 0x267   : > { %v2946_v15 = vpop.eup %2945  ;;  %v2075_v32 = vpack.c.bf16 %v2035_v35, %v2035_v35  ;;  %v2007_v42 = vadd.f32 %v2006_v17, %v2005_v50 }
 0x268   : > { %v2948_v16 = vpop.eup %2947  ;;  %v2040_v24 = vadd.f32 %v2039_v31, %v2038_v11  ;;  %v1748_v18 = vmul.f32 2.0, %v2946_v15 }
 0x269   : > { %v2115_v20 = vunpack.c.l.b16 %v2075_v32  ;;  %v2071_v14 = vpack.c.bf16 %v2007_v42, %v2007_v42  ;;  %v1719_v28 = vadd.f32 1.0, %v2948_v16 }
 0x26a   : > { %v2041_v30 = vrot.slane %v2040_v24, 1  ;;  %v1766_v36 = vsub.f32 1.0, %v1748_v18 }
 0x26b   : > { %v2136_v38 = vsel %vm2124_vm5, %v2115_v20, %v2135_v6  ;;  %v2111_v34 = vunpack.c.l.b16 %v2071_v14  ;;  %2951 = vrcp.f32 %v1719_v28 }
 0x26c   : > { %v2042_v52 = vadd.f32 %v2041_v30, %v2040_v24  ;;  %v1798_v4 = vadd.f32 1.0, %v1766_v36  ;;  %v2634_v30 = vld [vmem:[%s3634_s10] ss:$0 sm:$0xff] }
 0x26d   : > { %v2950_v9 = vpop.eup %2949  ;;  %v2133_v13 = vsel %vm2132_vm10, %v2111_v34, %v2131_v7 }
 0x26e   : > { %v2076_v47 = vpack.c.bf16 %v2042_v52, %v2042_v52  ;;  %v1814_v23 = vmul.f32 %v1798_v4, %v1782_v56  ;;  %v1720_v25 = vadd.f32 1.0, %v2950_v9 }
 0x270   : > { %v2116_v45 = vunpack.c.l.b16 %v2076_v47  ;;  %v1942_v12 = vmul.f32 %v1914_v44, %v1814_v23  ;;  %2953 = vrcp.f32 %v1720_v25 }
 0x272   : > { %v2137_v39 = vsel %vm2126_vm6, %v2116_v45, %v2136_v38  ;;  %v2043_v59 = vsel %vm763_vm1, %v1942_v12, 0.0  ;;  %v2973_v45 = vld [vmem:[%s3120_s22] sm:$0xff] }
 0x273   : > { %v2044_v5 = vrot.slane %v2043_v59, 4 }
 0x275   : > { %v2952_v40 = vpop.eup %2951  ;;  %v2045_v46 = vadd.f32 %v2044_v5, %v2043_v59  ;;  %v2974_v59 = vld [vmem:[%s3120_s22 + $0x8] sm:$0xff] }
 0x276   : > { %v1750_v22 = vmul.f32 2.0, %v2952_v40 }
 0x277   : > { %v2046_v61 = vrot.slane %v2045_v46, 2 }
 0x278   : > { %v1767_v48 = vsub.f32 1.0, %v1750_v22 }
 0x279   : > { %v2047_v49 = vadd.f32 %v2046_v61, %v2045_v46 }
 0x27a   : > { %v2954_v55 = vpop.eup %2953  ;;  %v1799_v62 = vadd.f32 1.0, %v1767_v48 }
 0x27b   : > { %v2048_v60 = vrot.slane %v2047_v49, 1  ;;  %v1752_v63 = vmul.f32 2.0, %v2954_v55 }
 0x27c   : > { %v1815_v29 = vmul.f32 %v1799_v62, %v1783_v58 }
 0x27d   : > { %v2049_v10 = vadd.f32 %v2048_v60, %v2047_v49  ;;  %v1768_v2 = vsub.f32 1.0, %v1752_v63  ;;  %v2817_v63 = vld [vmem:[%s3637_s13] sm:$0xff]  }
 0x27e   : > { %v1943_v27 = vmul.f32 %v1921_v57, %v1815_v29  ;;  %v2818_v29 = vld [vmem:[%s3637_s13 + $0x8] sm:$0xff]  }
 0x27f   : > { %v2077_v0 = vpack.c.bf16 %v2049_v10, %v2049_v10  ;;  %v1800_v26 = vadd.f32 1.0, %v1768_v2 }
 0x280   : > { %v2050_v53 = vsel %vm763_vm1, %v1943_v27, 0.0 }
 0x281   : > { %v2117_v19 = vunpack.c.l.b16 %v2077_v0  ;;  %v2051_v3 = vrot.slane %v2050_v53, 4  ;;  %v1816_v41 = vmul.f32 %v1800_v26, %v1784_v8 }
 0x283   : > { %v2138_v50 = vsel %vm2128_vm7, %v2117_v19, %v2137_v39  ;;  %v2052_v21 = vadd.f32 %v2051_v3, %v2050_v53  ;;  %v1944_v37 = vmul.f32 %v1928_v54, %v1816_v41  ;;  %v2638_v19 = vld [vmem:[%s3635_s11] ss:$0 sm:$0xff] }
 0x285   : > { %v2053_v43 = vrot.slane %v2052_v21, 2  ;;  %v2057_v6 = vsel %vm763_vm1, %v1944_v37, 0.0 }
 0x286   : > { %v2058_v33 = vrot.slane %v2057_v6, 4 }
 0x287   : > { %v2054_v11 = vadd.f32 %v2053_v43, %v2052_v21  ;;  %v2639_v21 = vld [vmem:[%s3636_s12] ss:$0 sm:$0xff] }
 0x288   : > { %v2059_v35 = vadd.f32 %v2058_v33, %v2057_v6 }
 0x289   : > { %v2055_v17 = vrot.slane %v2054_v11, 1 }
 0x28a   : > { %v2060_v7 = vrot.slane %v2059_v35, 2 }
 0x28b   : > { %v2056_v51 = vadd.f32 %v2055_v17, %v2054_v11  ;;  %v2819_v11 = vld [vmem:[%s3639_s15] sm:$0xff]   ;;  %v2821_v17 = vld [vmem:[%s3639_s15 + $0x10] sm:$0xff]  }
 0x28c   : > { %v2061_v31 = vadd.f32 %v2060_v7, %v2059_v35  ;;  %2766 = vmatpush3.bf16.msra.mxu0 %v2819_v11  ;;  %v2820_v35 = vld [vmem:[%s3639_s15 + $0x8] sm:$0xff]   ;;  %v2822_v7 = vld [vmem:[%s3639_s15 + $0x18] sm:$0xff]  }
 0x28d   : > { %v2078_v15 = vpack.c.bf16 %v2056_v51, %v2056_v51  ;;  %2767 = vmatprep.subr.bf16.mxu0 %v2983_v1  ;;  %v2823_v51 = vld [vmem:[%s3639_s15 + $0x20] sm:$0xff]  }
 0x28e   : > { %v2062_v32 = vrot.slane %v2061_v31, 1 }
 0x28f   : > { %v2118_v42 = vunpack.c.l.b16 %v2078_v15  ;;  %v2825_v15 = vld [vmem:[%s3639_s15 + $0x30] sm:$0xff]  }
 0x290   : > { %v2063_v16 = vadd.f32 %v2062_v32, %v2061_v31  ;;  %2768 = vmatpush3.bf16.msra.mxu0 %v2820_v35  ;;  %v2824_v31 = vld [vmem:[%s3639_s15 + $0x28] sm:$0xff]   ;;  %v2826_v32 = vld [vmem:[%s3639_s15 + $0x38] sm:$0xff]  }
 0x291   : > { %v2139_v24 = vsel %vm2130_vm8, %v2118_v42, %v2138_v50  ;;  %2769 = vmatprep.subr.bf16.mxu0 %v2983_v1  ;;  %v2640_v42 = vld [vmem:[%s3638_s14] ss:$0 sm:$0xff] }
 0x292   : > { %v2079_v18 = vpack.c.bf16 %v2063_v16, %v2063_v16 }
 0x294   : > { %v2119_v20 = vunpack.c.l.b16 %v2079_v18  ;;  %2770 = vmatpush3.bf16.msra.mxu0 %v2821_v17 }
 0x295   : > { %2771 = vmatprep.subr.bf16.mxu0 %v2983_v1 }
 0x296   : > { %v2140_v14 = vsel %vm2132_vm10, %v2119_v20, %v2139_v24 }
 0x297   : > { %v2141_v28 = vpack.c.b16 %v2140_v14, %v2133_v13 }
 0x298   : > { %2772 = vmatpush3.bf16.msra.mxu0 %v2822_v7 }
 0x299   : > { %2754 = vmatmul.mubr.msk.bf16.vlgmr.msra.gmra.mrb[16].mxu1 %vm763_vm1, %v2141_v28  ;;  %2773 = vmatprep.subr.bf16.mxu0 %v2983_v1 }
 0x29a   : > { %2761 = vmatprep.mubr.msk.bf16.mxu1 %vm2984_vm0, %v2983_v1  ;;  %2758 = vmatpush3.bf16.msra.mxu1 %v2817_v63 }
 0x29b   : > { %2759 = vmatprep.subr.bf16.mxu1 %v2983_v1 }
 0x29c   : > { %2774 = vmatpush3.bf16.msra.mxu0 %v2823_v51  ;;  %v693_v51 = vld [vmem:[%s664_s3] sm:$0xff] }
 0x29d   : > { %2775 = vmatprep.subr.bf16.mxu0 %v2983_v1 }
 0x29e   : > { %2760 = vmatpush3.bf16.msra.mxu1 %v2818_v29  ;;  %v2644_v29 = vld [vmem:[%s3640_s16] ss:$0 sm:$0xff] }
 0x2a0   : > { %2776 = vmatpush3.bf16.msra.mxu0 %v2824_v31  ;;  %v694_v31 = vld [vmem:[%s664_s3 + $0x8] sm:$0xff] }
 0x2a1   : > { %2777 = vmatprep.subr.bf16.mxu0 %v2983_v1 }
 0x2a4   : > { %2778 = vmatpush3.bf16.msra.mxu0 %v2825_v15 }
 0x2a5   : > { %2779 = vmatprep.subr.bf16.mxu0 %v2983_v1 }
 0x2a8   : > { %2780 = vmatpush3.bf16.msra.mxu0 %v2826_v32 }
 0x2ee   : > { %v1948_v36 = vpop.xlane.xlu0 %1947  ;;  %v1951_v38 = vpop.xlane.xlu1 %1950 }
 0x2ef   : > { %v2086_v34 = vmul.f32 %v2634_v30, %v1948_v36  ;;  %v2087_v52 = vmul.f32 %v2634_v30, %v1951_v38 }
 0x36c   : > { %v2191_v56 = vpop.f32.mrb[16].mxu1 }
 0x36d   : > { %v2192_v4 = vadd.f32 %v2191_v56, %v2086_v34  ;;  %v2755_v9 = vpop.f32.mrb[17].mxu1 }
 0x36e   : > { %v2194_v47 = vpop.f32.mrb[18].mxu1 }
 0x36f   : > { %v2198_v13 = vmul.f32 0.033333335, %v2192_v4  ;;  %v2195_v23 = vadd.f32 %v2194_v47, %v2087_v52  ;;  %v2756_v25 = vpop.f32.mrb[19].mxu1 }
 0x371   : > { %v2199_v44 = vmul.f32 0.033333335, %v2195_v23  ;;  %v2200_v12 = vadd.f32 %v2973_v45, %v2198_v13 }
 0x373   : > { %v2202_v39 = vsel %vm763_vm1, %v2200_v12, 0.0  ;;  %v2201_v5 = vadd.f32 %v2974_v59, %v2199_v44 }
 0x374   : > { %2203 = vadd.xlane.f32.xlu0 %v2202_v39 }
 0x375   : > { %v2205_v40 = vsel %vm763_vm1, %v2201_v5, 0.0 }
 0x378   : > { %2206 = vadd.xlane.f32.xlu0 %v2205_v40 }
 0x401   : > { %v2204_v46 = vpop.xlane.xlu0 %2203 }
 0x402   : > { %v2209_v22 = vmul.f32 0.03125, %v2204_v46 }
 0x404   : > { %v2211_v61 = vsub.f32 %v2200_v12, %v2209_v22 }
 0x405   : > { %v2207_v48 = vpop.xlane.xlu0 %2206 }
 0x406   : > { %v2210_v49 = vmul.f32 0.03125, %v2207_v48  ;;  %v2213_v55 = vmul.f32 %v2211_v61, %v2211_v61 }
 0x408   : > { %v2212_v57 = vsub.f32 %v2201_v5, %v2210_v49  ;;  %v2215_v58 = vsel %vm763_vm1, %v2213_v55, 0.0 }
 0x409   : > { %2216 = vadd.xlane.f32.xlu1 %v2215_v58 }
 0x40a   : > { %v2214_v62 = vmul.f32 %v2212_v57, %v2212_v57 }
 0x40c   : > { %v2218_v60 = vsel %vm763_vm1, %v2214_v62, 0.0 }
 0x40d   : > { %2219 = vadd.xlane.f32.xlu0 %v2218_v60 }
 0x496   : > { %v2217_v10 = vpop.xlane.xlu1 %2216 }
 0x497   : > { %v2221_v2 = vmul.f32 0.03125, %v2217_v10 }
 0x499   : > { %v2223_v27 = vadd.f32 1e-05, %v2221_v2 }
 0x49a   : > { %v2220_v0 = vpop.xlane.xlu0 %2219 }
 0x49b   : > { %2955 = vrsqrt.f32 %v2223_v27  ;;  %v2222_v8 = vmul.f32 0.03125, %v2220_v0 }
 0x49d   : > { %v2224_v26 = vadd.f32 1e-05, %v2222_v8 }
 0x49f   : > { %2957 = vrsqrt.f32 %v2224_v26 }
 0x4a5   : > { %v2956_v53 = vpop.eup %2955 }
 0x4a6   : > { %v2227_v54 = vmul.f32 %v2956_v53, %v2211_v61 }
 0x4a8   : > { %v2235_v41 = vmul.f32 %v2638_v19, %v2227_v54 }
 0x4a9   : > { %v2958_v3 = vpop.eup %2957 }
 0x4aa   : > { %v2228_v50 = vmul.f32 %v2958_v3, %v2212_v57  ;;  %v3555_v43 = vadd.f32 %v2639_v21, %v2235_v41  ;;  %v2986_v41 = vmov 0  }
 0x4ab   : > { %2797 = vset.pattern.permute.xlu1 %v2986_v41  ;;  %2798 = vset.pattern.permute.xlu0 %v2986_v41 }
 0x4ac   : > { %v2236_v37 = vmul.f32 %v2638_v19, %v2228_v50 }
 0x4ae   : > { %v3557_v6 = vadd.f32 %v2639_v21, %v2236_v37 }
 0x4b0   : > { %v2245_v33 = vpack.c.bf16 %v3557_v6, %v3555_v43 }
 0x4b2   : > { %2762 = vmatmul.mubr.msk.bf16.vlgmr.msra.gmra.mrb[20].mxu1 %vm763_vm1, %v2245_v33 }
 0x585   : > { %v2301_v16 = vpop.f32.mrb[20].mxu1 }
 0x586   : > { %v2302_v24 = vadd.f32 %v2640_v42, %v2301_v16  ;;  %v2763_v18 = vpop.f32.mrb[21].mxu1 }
 0x587   : > { %v2304_v20 = vpop.f32.mrb[22].mxu1 }
 0x588   : > { %v2308_v14 = vmul.f32 0.044715, %v2302_v24  ;;  %v2305_v28 = vadd.f32 %v2640_v42, %v2304_v20  ;;  %v2764_v30 = vpop.f32.mrb[23].mxu1  ;;  %v2332_v55 = vmul.f32 0.5, %v2302_v24 }
 0x58a   : > { %v2310_v36 = vmul.f32 %v2308_v14, %v2302_v24  ;;  %v2309_v38 = vmul.f32 0.044715, %v2305_v28  ;;  %v2333_v57 = vmul.f32 0.5, %v2305_v28  ;;  %v2653_v14 = vld [vmem:[%s3641_s17] ss:$0 sm:$0xff] }
 0x58c   : > { %v2312_v34 = vmul.f32 %v2310_v36, %v2302_v24  ;;  %v2311_v52 = vmul.f32 %v2309_v38, %v2305_v28  ;;  %v2654_v36 = vld [vmem:[%s3642_s18] ss:$0 sm:$0xff] }
 0x58e   : > { %v2314_v56 = vadd.f32 %v2312_v34, %v2302_v24  ;;  %v2313_v4 = vmul.f32 %v2311_v52, %v2305_v28 }
 0x590   : > { %v2316_v9 = vmul.f32 0.7978846, %v2314_v56  ;;  %v2315_v1 = vadd.f32 %v2313_v4, %v2305_v28 }
 0x592   : > { %v2318_v47 = vmul.f32 2.0, %v2316_v9  ;;  %v2317_v13 = vmul.f32 0.7978846, %v2315_v1 }
 0x594   : > { %v2320_v23 = vmul.f32 1.442695, %v2318_v47  ;;  %v2319_v25 = vmul.f32 2.0, %v2317_v13 }
 0x596   : > { %2959 = vpow2.f32 %v2320_v23  ;;  %v2322_v44 = vmul.f32 1.442695, %v2319_v25 }
 0x598   : > { %2961 = vpow2.f32 %v2322_v44 }
 0x5a0   : > { %v2960_v45 = vpop.eup %2959 }
 0x5a1   : > { %v2324_v12 = vadd.f32 1.0, %v2960_v45 }
 0x5a2   : > { %v2962_v39 = vpop.eup %2961 }
 0x5a3   : > { %2963 = vrcp.f32 %v2324_v12  ;;  %v2325_v59 = vadd.f32 1.0, %v2962_v39 }
 0x5a5   : > { %2965 = vrcp.f32 %v2325_v59 }
 0x5ad   : > { %v2964_v5 = vpop.eup %2963 }
 0x5ae   : > { %v2327_v40 = vmul.f32 2.0, %v2964_v5 }
 0x5af   : > { %v2966_v46 = vpop.eup %2965 }
 0x5b0   : > { %v2329_v22 = vmul.f32 2.0, %v2966_v46  ;;  %v2330_v61 = vsub.f32 1.0, %v2327_v40 }
 0x5b2   : > { %v2331_v48 = vsub.f32 1.0, %v2329_v22  ;;  %v2334_v49 = vadd.f32 1.0, %v2330_v61 }
 0x5b4   : > { %v2335_v58 = vadd.f32 1.0, %v2331_v48  ;;  %v2336_v62 = vmul.f32 %v2334_v49, %v2332_v55 }
 0x5b6   : > { %v2337_v60 = vmul.f32 %v2335_v58, %v2333_v57 }
 0x5b8   : > { %v2338_v63 = vpack.c.bf16 %v2337_v60, %v2336_v62 }
 0x5ba   : > { %2782 = vmatmul.mubr.bf16.vlgmr.msra.gmra.mrb[20].mxu0 %v2338_v63 }
 0x68d   : > { %v2427_v10 = vpop.f32.mrb[20].mxu0 }
 0x68e   : > { %v2428_v2 = vadd.f32 %v2644_v29, %v2427_v10  ;;  %v2783_v27 = vpop.f32.mrb[21].mxu0 }
 0x68f   : > { %v2430_v0 = vpop.f32.mrb[22].mxu0 }
 0x690   : > { %v2431_v8 = vadd.f32 %v2644_v29, %v2430_v0  ;;  %v2784_v26 = vpop.f32.mrb[23].mxu0  ;;  %v2434_v53 = vadd.f32 %v2428_v2, %v3555_v43 }
 0x692   : > { %v2436_v54 = vsel %vm763_vm1, %v2434_v53, 0.0  ;;  %v2435_v19 = vadd.f32 %v2431_v8, %v3557_v6 }
 0x693   : > { %2437 = vadd.xlane.f32.xlu1 %v2436_v54 }
 0x694   : > { %v2439_v3 = vsel %vm763_vm1, %v2435_v19, 0.0 }
 0x695   : > { %2440 = vadd.xlane.f32.xlu0 %v2439_v3 }
 0x720   : > { %v2438_v50 = vpop.xlane.xlu1 %2437 }
 0x721   : > { %v2442_v21 = vmul.f32 0.03125, %v2438_v50 }
 0x722   : > { %v2441_v37 = vpop.xlane.xlu0 %2440 }
 0x723   : > { %v2444_v33 = vsub.f32 %v2434_v53, %v2442_v21  ;;  %v2443_v11 = vmul.f32 0.03125, %v2441_v37 }
 0x725   : > { %v2445_v35 = vsub.f32 %v2435_v19, %v2443_v11  ;;  %v2446_v17 = vmul.f32 %v2444_v33, %v2444_v33 }
 0x727   : > { %v2448_v43 = vsel %vm763_vm1, %v2446_v17, 0.0  ;;  %v2447_v7 = vmul.f32 %v2445_v35, %v2445_v35 }
 0x728   : > { %2449 = vadd.xlane.f32.xlu1 %v2448_v43 }
 0x729   : > { %v2451_v6 = vsel %vm763_vm1, %v2447_v7, 0.0 }
 0x72a   : > { %2452 = vadd.xlane.f32.xlu0 %v2451_v6 }
 0x739   : > { %2480 = vperm.xlu1 %2797, %v693_v51  }
 0x740   : > { %2485 = vperm.xlu0 %2798, %v694_v31  }
 0x7b5   : > { %v2450_v15 = vpop.xlane.xlu1 %2449 }
 0x7b6   : > { %v2454_v32 = vmul.f32 0.03125, %v2450_v15 }
 0x7b7   : > { %v2453_v42 = vpop.xlane.xlu0 %2452 }
 0x7b8   : > { %v2456_v16 = vadd.f32 1e-05, %v2454_v32  ;;  %v2455_v24 = vmul.f32 0.03125, %v2453_v42 }
 0x7b9   : > { %v2481_v52 = vpop.permute.xlu1 %2480 }
 0x7ba   : > { %2967 = vrsqrt.f32 %v2456_v16  ;;  %v2457_v18 = vadd.f32 1e-05, %v2455_v24 }
 0x7bc   : > { %2969 = vrsqrt.f32 %v2457_v18 }
 0x7bf   : > { %v2486_v9 = vpop.permute.xlu0 %2485 }
 0x7c4   : > { %v2968_v20 = vpop.eup %2967 }
 0x7c5   : > { %v2460_v28 = vmul.f32 %v2968_v20, %v2444_v33 }
 0x7c6   : > { %v2970_v30 = vpop.eup %2969 }
 0x7c7   : > { %v2468_v38 = vmul.f32 %v2653_v14, %v2460_v28  ;;  %v2461_v34 = vmul.f32 %v2970_v30, %v2445_v35 }
 0x7c9   : > { %v2476_v56 = vadd.f32 %v2654_v36, %v2468_v38  ;;  %v2469_v4 = vmul.f32 %v2653_v14, %v2461_v34 }
 0x7cb   : > { %v2488_v1 = vmul.f32 %v2481_v52, %v2476_v56  ;;  %v2477_v47 = vadd.f32 %v2654_v36, %v2469_v4 }
 0x7cd   : > { %2490 = vst.msk [vmem:[%s670_s2] sm:$0xff] %vm763_vm1, %v2488_v1  ;;  %v2489_v13 = vmul.f32 %v2486_v9, %v2477_v47 }
 0x7cf   : > { %2491 = vst.msk [vmem:[%s670_s2 + $0x8] sm:$0xff] %vm763_vm1, %v2489_v13 }
 0x7d0 PF: > { %s29_s0 = sadd.s32 1, %s2981_s0  }
 0x7d1   : > { %p26_p5 = scmp.ge.s32.totalorder %s29_s0, 6  }
 0x7d3   :  { %28 = sbr.rel (!%p26_p5) target bundleno = 5 (0x5), region = 135 }

// kernel: protein_mpnn_forward.13
= control target key start
LH: loop header
LB: loop body
LE: loop exit
PB: predicated region body
PF: predicated region fallthrough
CT: control target
= control target key end

     0   :  { %s2590_s17 = smov 0   ;;  %s3261_s0 = inlined_call_operand.vmem [shape: f32[64,32], index: 0, kind: input, shape index: {}]   ;;  %s3262_s1 = inlined_call_operand.vmem [shape: bf16[512,64], index: 1, kind: input, shape index: {}]   ;;  %s3263_s2 = inlined_call_operand.vmem [shape: bf16[32,32], index: 2, kind: input, shape index: {}]   ;;  %s3264_s3 = inlined_call_operand.vmem [shape: bf16[64,32], index: 3, kind: input, shape index: {}]   ;;  %s3265_s4 = inlined_call_operand.vmem [shape: f32[1,32], index: 4, kind: input, shape index: {}]   ;;  %s3266_s5 = inlined_call_operand.vmem [shape: bf16[32,32], index: 5, kind: input, shape index: {}]   ;;  %s3267_s6 = inlined_call_operand.vmem [shape: f32[1,32], index: 6, kind: input, shape index: {}]   ;;  %s3268_s7 = inlined_call_operand.vmem [shape: bf16[32,32], index: 7, kind: input, shape index: {}]   ;;  %s3269_s8 = inlined_call_operand.vmem [shape: f32[1,32], index: 8, kind: input, shape index: {}]   ;;  %s3270_s9 = inlined_call_operand.vmem [shape: f32[1,32], index: 9, kind: input, shape index: {}]   ;;  %s3271_s10 = inlined_call_operand.vmem [shape: f32[1,32], index: 10, kind: input, shape index: {}]   ;;  %s3272_s11 = inlined_call_operand.vmem [shape: bf16[512,32], index: 11, kind: output, shape index: {}]  }
   0x1 LB: > { %s2110_s18 = sadd.s32 4294967295, %s2525_s17   ;;  %p2114_p0 = scmp.ge.s32.totalorder %s2525_s17, 1  ;;  %s2525_s17 = sphi %s2590_s17, %s21_s17  }
   0x2   : > { %p349_p1 = scmp.lt.s32.totalorder %s2525_s17, 5 }
   0x4   : > { %p350_p2 = pnand %p2114_p0, %p349_p1 }
   0x5   : > { %v2325_v0 = vld [vmem:[%s3263_s2] sm:$0xff] (!%p350_p2)   ;;  %v2527_v1 = vmov (!%p350_p2), 0.0   ;;  %v2327_v3 = vld [vmem:[%s3263_s2 + $0x8] sm:$0xff] (!%p350_p2)   ;;  %vm2528_vm0 = vmmov (!%p350_p2), 0   ;;  %s2115_s25 = sshll.u32 (!%p350_p2), %s2110_s18, 1  ;;  %v2329_v5 = vld [vmem:[%s3264_s3 + $0x10] sm:$0xff] (!%p350_p2)   ;;  %v728_v22 = vlaneseq (!%p350_p2) }
   0x6   : > { %353 = sbr.rel (%p350_p2) target bundleno = 1140 (0x474), region = 64  ;;  %2238 = vmatprep.subr.bf16.mxu0 (!%p350_p2), %v2527_v1  ;;  %v2326_v2 = vld [vmem:[%s3264_s3] sm:$0xff] (!%p350_p2)   ;;  %2242 = vmatprep.mubr.msk.bf16.mxu0 (!%p350_p2), %vm2528_vm0, %v2527_v1  ;;  %v2328_v4 = vld [vmem:[%s3264_s3 + $0x8] sm:$0xff] (!%p350_p2)   ;;  %p395_p3 = scmp.lt.s32.totalorder (!%p350_p2), %s2115_s25, 7  ;;  %v2330_v6 = vld [vmem:[%s3264_s3 + $0x18] sm:$0xff] (!%p350_p2)   ;;  %vm491_vm1 = vcmask (!%p350_p2), 261120  }
   0x7   : > { %2239 = vmatpush3.bf16.msra.mxu0 (!%p350_p2), %v2325_v0  ;;  %2246 = vmatprep.subr.bf16.mxu1 (!%p350_p2), %v2326_v2  ;;  %s2117_s30 = sshll.u32 (!%p350_p2), %s2110_s18, 4  ;;  %vm600_vm2 = vcmask (!%p350_p2), 523264   ;;  %v2339_v18 = vld [vmem:[%s3266_s5] sm:$0xff] (!%p350_p2)   ;;  %v2340_v19 = vld [vmem:[%s3266_s5 + $0x8] sm:$0xff] (!%p350_p2)   ;;  %v2529_v20 = vmov (!%p350_p2), 1966171168  }
   0x8   : > { %2240 = vmatprep.subr.bf16.mxu0 (!%p350_p2), %v2527_v1  ;;  %2247 = vmatpush3.bf16.msra.mxu1 (!%p350_p2), %v2326_v2  ;;  %p401_p4 = scmp.lt.s32.totalorder (!%p350_p2), %s2117_s30, 63  ;;  %v726_v21 = vunpack.c.l.s4 (!%p350_p2), %v2529_v20  ;;  %v729_v24 = vshrl.u32 (!%p350_p2), %v728_v22, 7  ;;  %v2121_v25 = vld [vmem:[%s3265_s4] ss:$0 sm:$0xff] (!%p350_p2)  ;;  %vm2025_vm3 = vcmask (!%p350_p2), 257024  }
   0x9   : > { %2248 = vmatprep.subr.bf16.mxu1 (!%p350_p2), %v2328_v4 }
   0xa   : > { %v727_v23 = vunpack.c.0.s8 (!%p350_p2), %v726_v21  ;;  %v2658_v33 = vsub.s32 (!%p350_p2), 0, %v729_v24 }
   0xb   : > { %2241 = vmatpush3.bf16.msra.mxu0 (!%p350_p2), %v2327_v3 }
   0xc   : > { %2249 = vmatpush3.bf16.msra.mxu1 (!%p350_p2), %v2328_v4  ;;  %2270 = vmatprep.subr.bf16.mxu0 (!%p350_p2), %v2339_v18  ;;  %v2655_v26 = vsub.s32 (!%p350_p2), %v727_v23, %v729_v24 }
   0xd   : > { %s3274_s25 = smov (!%p395_p3, %s2115_s25), 7  ;;  %2250 = vmatprep.subr.bf16.mxu1 %v2329_v5  ;;  %s3276_s30 = smov (!%p401_p4, %s2117_s30), 63 }
   0xe   : > { %s2116_s12 = sshll.u32 %s3274_s25, 3  ;;  %s2118_s18 = sshll.u32 %s3276_s30, 2 }
   0xf   : > { %s398_s19 = scalar_lea.vmem %s3261_s0, %s2116_s12  ;;  %s2628_s22 = scalar_lea.vmem %s3262_s1, %s2118_s18 }
  0x10   : > { %v413_v7 = vld [vmem:[%s398_s19] sm:$0xff]  ;;  %v414_v8 = vld [vmem:[%s398_s19 + $0x8] sm:$0xff]  ;;  %2251 = vmatpush3.bf16.msra.mxu1 %v2329_v5  ;;  %v419_v12 = vld [vmem:[%s2628_s22 + $0x10] sm:$0xff]   ;;  %s3180_s27 = scalar_lea.vmem %s3272_s11, %s2118_s18 }
  0x11   : > { %v472_v9 = vpack.c.bf16 %v414_v8, %v413_v7  ;;  %2252 = vmatprep.subr.bf16.mxu1 %v2330_v6  ;;  %v415_v10 = vld [vmem:[%s2628_s22] sm:$0xff]   ;;  %v417_v11 = vld [vmem:[%s2628_s22 + $0x8] sm:$0xff]   ;;  %v421_v13 = vld [vmem:[%s2628_s22 + $0x18] sm:$0xff]  }
  0x12   : > { %2254 = vmatprep.mubr.msk.bf16.mxu1 %vm600_vm2, %v415_v10  ;;  %v423_v14 = vld [vmem:[%s2628_s22 + $0x20] sm:$0xff]   ;;  %v425_v15 = vld [vmem:[%s2628_s22 + $0x28] sm:$0xff]   ;;  %v427_v16 = vld [vmem:[%s2628_s22 + $0x30] sm:$0xff]  }
  0x13   : > { %2243 = vmatmul.mubr.msk.bf16.vlgmr.msra.gmra.mrb[0].mxu0 %vm491_vm1, %v472_v9  ;;  %v429_v17 = vld [vmem:[%s2628_s22 + $0x38] sm:$0xff]  }
  0x14   : > { %2253 = vmatpush3.bf16.msra.mxu1 %v2330_v6  ;;  %2271 = vmatpush3.bf16.msra.mxu0 %v2339_v18 }
  0x15   : > { %2310 = vmatprep.subr.bf16.mxu1 %v2339_v18  ;;  %2272 = vmatprep.subr.bf16.mxu0 %v2340_v19 }
  0x17   : > { %2255 = vmatmul.mubr.msk.bf16.vlgmr.msra.gmra.mrb[0].mxu1 %vm600_vm2, %v417_v11 }
  0x18   : > { %2258 = vmatprep.mubr.msk.bf16.mxu1 %vm600_vm2, %v419_v12  ;;  %2312 = vmatpush3.bf16.msra.mxu1 %v2339_v18 }
  0x19   : > { %2311 = vmatprep.subr.bf16.mxu1 %v2340_v19  ;;  %2273 = vmatpush3.bf16.msra.mxu0 %v2340_v19 }
  0x1c   : > { %2313 = vmatpush3.bf16.msra.mxu1 %v2340_v19 }
  0x1f   : > { %2259 = vmatmul.mubr.msk.bf16.gmra.mrb[4].mxu1 %vm600_vm2, %v421_v13 }
  0x20   : > { %2262 = vmatprep.mubr.msk.bf16.mxu1 %vm600_vm2, %v423_v14 }
  0x27   : > { %2263 = vmatmul.mubr.msk.bf16.gmra.mrb[8].mxu1 %vm600_vm2, %v425_v15 }
  0x28   : > { %2266 = vmatprep.mubr.msk.bf16.mxu1 %vm600_vm2, %v427_v16 }
  0x2f   : > { %2267 = vmatmul.mubr.msk.bf16.gmra.mrb[12].mxu1 %vm600_vm2, %v429_v17 }
  0xe6   : > { %v529_v27 = vpop.f32.mrb[0].mxu0 }
  0xe7   : > { %v530_v28 = vadd.f32 %v2121_v25, %v529_v27  ;;  %v2244_v29 = vpop.f32.mrb[1].mxu0 }
  0xe8   : > { %v532_v30 = vpop.f32.mrb[2].mxu0 }
  0xe9   : > { %v724_v31 = vcombine.high %v530_v28, %v530_v28  ;;  %v731_v32 = vrot.slane %v530_v28, %v2655_v26  ;;  %v533_v34 = vadd.f32 %v2121_v25, %v532_v30  ;;  %v2245_v35 = vpop.f32.mrb[3].mxu0 }
  0xea   : > { %v2256_v42 = vpop.f32.mrb[0].mxu1 }
  0xeb   : > { %v738_v36 = vrot.slane %v724_v31, %v2655_v26  ;;  %v739_v37 = vcombine.high %v731_v32, %v731_v32  ;;  %v747_v38 = vrot.slane %v731_v32, %v2655_v26  ;;  %v773_v39 = vcombine.high %v533_v34, %v533_v34  ;;  %v659_v47 = vpop.f32.mrb[1].mxu1 }
  0xec   : > { %v780_v40 = vrot.slane %v533_v34, %v2655_v26  ;;  %v2257_v52 = vpop.f32.mrb[2].mxu1 }
  0xed   : > { %v740_v41 = vcombine.high %v738_v36, %v738_v36  ;;  %v769_v43 = vcombine.high %v747_v38, %v747_v38  ;;  %v825_v44 = vrot.slane %v747_v38, %v2658_v33  ;;  %v2665_v45 = vrot.slane %v773_v39, %v2655_v26  ;;  %v662_v55 = vpop.f32.mrb[3].mxu1 }
  0xee   : > { %v2668_v46 = vrot.slane %v780_v40, %v2655_v26  ;;  %v761_v48 = vrot.slane %v739_v37, %v2655_v26  ;;  %v754_v49 = vrot.slane %v738_v36, %v2655_v26  ;;  %v788_v58 = vcombine.high %v780_v40, %v780_v40 }
  0xef   : > { %v833_v50 = vrot.slane %v769_v43, %v2658_v33  ;;  %v2673_v51 = vadd.f32 %v825_v44, %v659_v47  ;;  %v768_v53 = vrot.slane %v740_v41, %v2655_v26  ;;  %v789_v62 = vcombine.high %v2665_v45, %v2665_v45 }
  0xf0   : > { %v771_v54 = vcombine.high %v761_v48, %v761_v48  ;;  %v829_v56 = vrot.slane %v761_v48, %v2658_v33  ;;  %v770_v57 = vcombine.high %v754_v49, %v754_v49  ;;  %v818_v1 = vcombine.high %v2668_v46, %v2668_v46 }
  0xf1   : > { %v2677_v59 = vadd.f32 %v2256_v42, %v833_v50  ;;  %v918_v60 = vmul.f32 0.044715, %v2673_v51  ;;  %v772_v61 = vcombine.high %v768_v53, %v768_v53  ;;  %v841_v4 = vrot.slane %v754_v49, %v2658_v33 }
  0xf2   : > { %v837_v63 = vrot.slane %v771_v54, %v2658_v33  ;;  %v2683_v0 = vadd.f32 %v829_v56, %v662_v55  ;;  %v845_v5 = vrot.slane %v768_v53, %v2658_v33  ;;  %v849_v8 = vrot.slane %v770_v57, %v2658_v33  ;;  %v2260_v12 = vpop.f32.mrb[4].mxu1 }
  0xf3   : > { %v920_v2 = vmul.f32 0.044715, %v2677_v59  ;;  %v934_v3 = vmul.f32 %v918_v60, %v2673_v51  ;;  %v853_v9 = vrot.slane %v772_v61, %v2658_v33  ;;  %v865_v13 = vrot.slane %v818_v1, %v2658_v33  ;;  %v675_v18 = vpop.f32.mrb[5].mxu1 }
  0xf4   : > { %v2691_v6 = vadd.f32 %v2257_v52, %v837_v63  ;;  %v919_v7 = vmul.f32 0.044715, %v2683_v0  ;;  %v2700_v14 = vrot.slane %v788_v58, %v2655_v26  ;;  %v2704_v17 = vadd.f32 %v2260_v12, %v849_v8  ;;  %v2261_v23 = vpop.f32.mrb[6].mxu1 }
  0xf5   : > { %v936_v10 = vmul.f32 %v920_v2, %v2677_v59  ;;  %v950_v11 = vmul.f32 %v934_v3, %v2673_v51  ;;  %v857_v19 = vrot.slane %v2668_v46, %v2658_v33  ;;  %v2710_v22 = vadd.f32 %v841_v4, %v675_v18  ;;  %v678_v30 = vpop.f32.mrb[7].mxu1 }
  0xf6   : > { %v921_v15 = vmul.f32 0.044715, %v2691_v6  ;;  %v935_v16 = vmul.f32 %v919_v7, %v2683_v0  ;;  %v820_v24 = vcombine.high %v2700_v14, %v2700_v14  ;;  %v924_v28 = vmul.f32 0.044715, %v2704_v17 }
  0xf7   : > { %v952_v20 = vmul.f32 %v936_v10, %v2677_v59  ;;  %v966_v21 = vadd.f32 %v950_v11, %v2673_v51  ;;  %v2717_v29 = vadd.f32 %v2261_v23, %v853_v9  ;;  %v922_v34 = vmul.f32 0.044715, %v2710_v22 }
  0xf8   : > { %v937_v25 = vmul.f32 %v921_v15, %v2691_v6  ;;  %v951_v27 = vmul.f32 %v935_v16, %v2683_v0  ;;  %v2721_v35 = vadd.f32 %v845_v5, %v678_v30  ;;  %v940_v38 = vmul.f32 %v924_v28, %v2704_v17 }
  0xf9   : > { %v968_v31 = vadd.f32 %v952_v20, %v2677_v59  ;;  %v982_v32 = vmul.f32 0.7978846, %v966_v21  ;;  %v925_v39 = vmul.f32 0.044715, %v2717_v29  ;;  %v938_v42 = vmul.f32 %v922_v34, %v2710_v22 }
  0xfa   : > { %v953_v36 = vmul.f32 %v937_v25, %v2691_v6  ;;  %v967_v37 = vadd.f32 %v951_v27, %v2683_v0  ;;  %v923_v43 = vmul.f32 0.044715, %v2721_v35  ;;  %v956_v47 = vmul.f32 %v940_v38, %v2704_v17  ;;  %v2264_v54 = vpop.f32.mrb[8].mxu1 }
  0xfb   : > { %v984_v40 = vmul.f32 0.7978846, %v968_v31  ;;  %v998_v41 = vmul.f32 2.0, %v982_v32  ;;  %v941_v48 = vmul.f32 %v925_v39, %v2717_v29  ;;  %v954_v52 = vmul.f32 %v938_v42, %v2710_v22  ;;  %v691_v60 = vpop.f32.mrb[9].mxu1 }
  0xfc   : > { %v969_v44 = vadd.f32 %v953_v36, %v2691_v6  ;;  %v983_v46 = vmul.f32 0.7978846, %v967_v37  ;;  %v939_v53 = vmul.f32 %v923_v43, %v2721_v35  ;;  %v972_v57 = vadd.f32 %v956_v47, %v2704_v17  ;;  %v2265_v2 = vpop.f32.mrb[10].mxu1 }
  0xfd   : > { %v1000_v49 = vmul.f32 2.0, %v984_v40  ;;  %v1014_v50 = vmul.f32 1.442695, %v998_v41  ;;  %v957_v58 = vmul.f32 %v941_v48, %v2717_v29  ;;  %v970_v63 = vadd.f32 %v954_v52, %v2710_v22  ;;  %v694_v8 = vpop.f32.mrb[11].mxu1 }
  0xfe   : > { %v985_v55 = vmul.f32 0.7978846, %v969_v44  ;;  %v999_v56 = vmul.f32 2.0, %v983_v46  ;;  %v955_v1 = vmul.f32 %v939_v53, %v2721_v35  ;;  %v988_v5 = vmul.f32 0.7978846, %v972_v57 }
  0xff   : > { %v1018_v61 = vmul.f32 1.442695, %v1000_v49  ;;  %2351 = vpow2.f32 %v1014_v50  ;;  %v973_v7 = vadd.f32 %v957_v58, %v2717_v29  ;;  %v986_v9 = vmul.f32 0.7978846, %v970_v63 }
 0x100   : > { %v1001_v3 = vmul.f32 2.0, %v985_v55  ;;  %v1016_v4 = vmul.f32 1.442695, %v999_v56  ;;  %v971_v10 = vadd.f32 %v955_v1, %v2721_v35  ;;  %v2740_v11 = vadd.f32 %v2264_v54, %v865_v13 }
 0x101   : > { %2353 = vpow2.f32 %v1018_v61  ;;  %v1004_v15 = vmul.f32 2.0, %v988_v5  ;;  %v989_v16 = vmul.f32 0.7978846, %v973_v7  ;;  %v803_v18 = vrot.slane %v2665_v45, %v2655_v26 }
 0x102   : > { %v1020_v12 = vmul.f32 1.442695, %v1001_v3  ;;  %2355 = vpow2.f32 %v1016_v4  ;;  %v1002_v20 = vmul.f32 2.0, %v986_v9  ;;  %v987_v21 = vmul.f32 0.7978846, %v971_v10  ;;  %v2268_v34 = vpop.f32.mrb[12].mxu1 }
 0x103   : > { %v928_v23 = vmul.f32 0.044715, %v2740_v11  ;;  %v1026_v25 = vmul.f32 1.442695, %v1004_v15  ;;  %v1005_v27 = vmul.f32 2.0, %v989_v16  ;;  %v2745_v28 = vadd.f32 %v857_v19, %v691_v60  ;;  %v707_v39 = vpop.f32.mrb[13].mxu1 }
 0x104   : > { %2357 = vpow2.f32 %v1020_v12  ;;  %v1022_v30 = vmul.f32 1.442695, %v1002_v20  ;;  %v1003_v31 = vmul.f32 2.0, %v987_v21  ;;  %v869_v32 = vrot.slane %v820_v24, %v2658_v33  ;;  %v2269_v42 = vpop.f32.mrb[14].mxu1 }
 0x105   : > { %v944_v13 = vmul.f32 %v928_v23, %v2740_v11  ;;  %2359 = vpow2.f32 %v1026_v25  ;;  %v1028_v36 = vmul.f32 1.442695, %v1005_v27  ;;  %v926_v37 = vmul.f32 0.044715, %v2745_v28  ;;  %v710_v46 = vpop.f32.mrb[15].mxu1 }
 0x106   : > { %v861_v38 = vrot.slane %v2700_v14, %v2658_v33  ;;  %2361 = vpow2.f32 %v1022_v30  ;;  %v1024_v40 = vmul.f32 1.442695, %v1003_v31  ;;  %v2753_v41 = vadd.f32 %v2265_v2, %v869_v32 }
 0x107   : > { %v960_v19 = vmul.f32 %v944_v13, %v2740_v11  ;;  %2363 = vpow2.f32 %v1028_v36  ;;  %v942_v43 = vmul.f32 %v926_v37, %v2745_v28  ;;  %v819_v44 = vcombine.high %v803_v18, %v803_v18 }
 0x108   : > { %v2756_v24 = vadd.f32 %v861_v38, %v694_v8  ;;  %2365 = vpow2.f32 %v1024_v40  ;;  %v929_v14 = vmul.f32 0.044715, %v2753_v41  ;;  %v873_v53 = vrot.slane %v803_v18, %v2658_v33 }
 0x109   : > { %v2352_v47 = vpop.eup %2351  ;;  %v976_v48 = vadd.f32 %v960_v19, %v2740_v11  ;;  %v958_v49 = vmul.f32 %v942_v43, %v2745_v28  ;;  %v881_v52 = vrot.slane %v819_v44, %v2658_v33  ;;  %v817_v57 = vrot.slane %v789_v62, %v2655_v26 }
 0x10a   : > { %v927_v50 = vmul.f32 0.044715, %v2756_v24  ;;  %v945_v56 = vmul.f32 %v929_v14, %v2753_v41  ;;  %v1046_v58 = vadd.f32 1.0, %v2352_v47  ;;  %v2774_v5 = vadd.f32 %v873_v53, %v707_v39 }
 0x10b   : > { %v2354_v54 = vpop.eup %2353  ;;  %v992_v55 = vmul.f32 0.7978846, %v976_v48  ;;  %v974_v61 = vadd.f32 %v958_v49, %v2745_v28  ;;  %v2771_v1 = vadd.f32 %v2268_v34, %v881_v52  ;;  %v821_v7 = vcombine.high %v817_v57, %v817_v57 }
 0x10c   : > { %v1048_v60 = vadd.f32 1.0, %v2354_v54  ;;  %v943_v63 = vmul.f32 %v927_v50, %v2756_v24  ;;  %v2356_v2 = vpop.eup %2355  ;;  %v961_v4 = vmul.f32 %v945_v56, %v2753_v41  ;;  %v930_v15 = vmul.f32 0.044715, %v2774_v5 }
 0x10d   : > { %v1008_v3 = vmul.f32 2.0, %v992_v55  ;;  %v990_v9 = vmul.f32 0.7978846, %v974_v61  ;;  %v932_v45 = vmul.f32 0.044715, %v2771_v1  ;;  %v885_v23 = vrot.slane %v821_v7, %v2658_v33 }
 0x10e   : > { %v2358_v8 = vpop.eup %2357  ;;  %2367 = vrcp.f32 %v1048_v60  ;;  %v959_v26 = vmul.f32 %v943_v63, %v2756_v24  ;;  %v977_v12 = vadd.f32 %v961_v4, %v2753_v41  ;;  %v946_v30 = vmul.f32 %v930_v15, %v2774_v5 }
 0x10f   : > { %v1049_v62 = vadd.f32 1.0, %v2358_v8  ;;  %v1034_v10 = vmul.f32 1.442695, %v1008_v3  ;;  %v2360_v16 = vpop.eup %2359  ;;  %v1006_v18 = vmul.f32 2.0, %v990_v9  ;;  %v948_v21 = vmul.f32 %v932_v45, %v2771_v1 }
 0x110   : > { %v975_v20 = vadd.f32 %v959_v26, %v2756_v24  ;;  %v2362_v25 = vpop.eup %2361  ;;  %v993_v27 = vmul.f32 0.7978846, %v977_v12  ;;  %v877_v31 = vrot.slane %v817_v57, %v2658_v33  ;;  %v962_v39 = vmul.f32 %v946_v30, %v2774_v5 }
 0x111   : > { %2369 = vrcp.f32 %v1049_v62  ;;  %v2364_v13 = vpop.eup %2363  ;;  %v1030_v32 = vmul.f32 1.442695, %v1006_v18  ;;  %v964_v36 = vmul.f32 %v948_v21, %v2771_v1  ;;  %v2787_v40 = vadd.f32 %v2269_v42, %v885_v23 }
 0x112   : > { %2371 = vpow2.f32 %v1034_v10  ;;  %v991_v34 = vmul.f32 0.7978846, %v975_v20  ;;  %v2366_v37 = vpop.eup %2365  ;;  %v1009_v38 = vmul.f32 2.0, %v993_v27  ;;  %v2789_v19 = vadd.f32 %v877_v31, %v710_v46 }
 0x113   : > { %2373 = vpow2.f32 %v1030_v32  ;;  %v980_v44 = vadd.f32 %v964_v36, %v2771_v1  ;;  %v1047_v47 = vadd.f32 1.0, %v2356_v2  ;;  %v978_v48 = vadd.f32 %v962_v39, %v2774_v5 }
 0x114   : > { %v1007_v43 = vmul.f32 2.0, %v991_v34  ;;  %v1036_v33 = vmul.f32 1.442695, %v1009_v38  ;;  %v933_v14 = vmul.f32 0.044715, %v2787_v40  ;;  %2375 = vrcp.f32 %v1046_v58 }
 0x115   : > { %v931_v49 = vmul.f32 0.044715, %v2789_v19  ;;  %v996_v52 = vmul.f32 0.7978846, %v980_v44  ;;  %v994_v42 = vmul.f32 0.7978846, %v978_v48 }
 0x116   : > { %v1032_v50 = vmul.f32 1.442695, %v1007_v43  ;;  %2377 = vpow2.f32 %v1036_v33  ;;  %v949_v46 = vmul.f32 %v933_v14, %v2787_v40  ;;  %v1050_v56 = vadd.f32 1.0, %v2362_v25 }
 0x117   : > { %v947_v53 = vmul.f32 %v931_v49, %v2789_v19  ;;  %v1012_v55 = vmul.f32 2.0, %v996_v52  ;;  %v1010_v57 = vmul.f32 2.0, %v994_v42  ;;  %v1051_v3 = vadd.f32 1.0, %v2366_v37 }
 0x118   : > { %v2368_v54 = vpop.eup %2367  ;;  %2379 = vpow2.f32 %v1032_v50  ;;  %v965_v60 = vmul.f32 %v949_v46, %v2787_v40  ;;  %v1052_v21 = vadd.f32 1.0, %v2360_v16  ;;  %v1053_v27 = vadd.f32 1.0, %v2364_v13 }
 0x119   : > { %v963_v61 = vmul.f32 %v947_v53, %v2789_v19  ;;  %2381 = vrcp.f32 %v1047_v47  ;;  %v1042_v63 = vmul.f32 1.442695, %v1012_v55  ;;  %v1067_v2 = vmul.f32 2.0, %v2368_v54 }
 0x11a   : > { %2383 = vrcp.f32 %v1050_v56  ;;  %v1038_v4 = vmul.f32 1.442695, %v1010_v57  ;;  %v981_v7 = vadd.f32 %v965_v60, %v2787_v40  ;;  %v1112_v31 = vmul.f32 0.5, %v2677_v59 }
 0x11b   : > { %v2370_v58 = vpop.eup %2369  ;;  %v979_v8 = vadd.f32 %v963_v61, %v2789_v19  ;;  %2385 = vpow2.f32 %v1042_v63  ;;  %v1096_v45 = vsub.f32 1.0, %v1067_v2  ;;  %v1113_v32 = vmul.f32 0.5, %v2691_v6 }
 0x11c   : > { %v2372_v9 = vpop.eup %2371  ;;  %v1069_v26 = vmul.f32 2.0, %v2370_v58  ;;  %2387 = vpow2.f32 %v1038_v4  ;;  %v997_v10 = vmul.f32 0.7978846, %v981_v7  ;;  %v1110_v57 = vmul.f32 0.5, %v2673_v51 }
 0x11d   : > { %v1056_v62 = vadd.f32 1.0, %v2372_v9  ;;  %v995_v12 = vmul.f32 0.7978846, %v979_v8  ;;  %v2374_v15 = vpop.eup %2373  ;;  %v1128_v20 = vadd.f32 1.0, %v1096_v45  ;;  %2389 = vrcp.f32 %v1051_v3 }
 0x11e   : > { %v1097_v18 = vsub.f32 1.0, %v1069_v26  ;;  %v1013_v23 = vmul.f32 2.0, %v997_v10  ;;  %v2376_v30 = vpop.eup %2375  ;;  %v1054_v33 = vadd.f32 1.0, %v2374_v15  ;;  %v1111_v60 = vmul.f32 0.5, %v2683_v0 }
 0x11f   : > { %2391 = vrcp.f32 %v1056_v62  ;;  %v1011_v25 = vmul.f32 2.0, %v995_v12  ;;  %v1063_v39 = vmul.f32 2.0, %v2376_v30  ;;  %v1144_v47 = vmul.f32 %v1128_v20, %v1112_v31 }
 0x120   : > { %v1129_v34 = vadd.f32 1.0, %v1097_v18  ;;  %2393 = vrcp.f32 %v1052_v21  ;;  %v2378_v36 = vpop.eup %2377  ;;  %v1044_v37 = vmul.f32 1.442695, %v1013_v23  ;;  %v1114_v12 = vmul.f32 0.5, %v2710_v22 }
 0x121   : > { %v1040_v38 = vmul.f32 1.442695, %v1011_v25  ;;  %2395 = vrcp.f32 %v1053_v27  ;;  %v1057_v44 = vadd.f32 1.0, %v2378_v36  ;;  %v1094_v13 = vsub.f32 1.0, %v1063_v39 }
 0x122   : > { %v2380_v43 = vpop.eup %2379  ;;  %v1145_v16 = vmul.f32 %v1129_v34, %v1113_v32  ;;  %2397 = vpow2.f32 %v1044_v37  ;;  %v1115_v18 = vmul.f32 0.5, %v2721_v35  ;;  %v1116_v27 = vmul.f32 0.5, %v2704_v17 }
 0x123   : > { %v2382_v48 = vpop.eup %2381  ;;  %v1055_v14 = vadd.f32 1.0, %v2380_v43  ;;  %2399 = vrcp.f32 %v1057_v44  ;;  %v1126_v46 = vadd.f32 1.0, %v1094_v13 }
 0x124   : > { %v2384_v49 = vpop.eup %2383  ;;  %v1065_v59 = vmul.f32 2.0, %v2382_v48  ;;  %v1159_v6 = vpack.c.bf16 %v1145_v16, %v1144_v47  ;;  %2401 = vpow2.f32 %v1040_v38  ;;  %v1117_v38 = vmul.f32 0.5, %v2717_v29 }
 0x125   : > { %v1071_v50 = vmul.f32 2.0, %v2384_v49  ;;  %v2386_v52 = vpop.eup %2385  ;;  %2403 = vrcp.f32 %v1054_v33  ;;  %v1142_v7 = vmul.f32 %v1126_v46, %v1110_v57  ;;  %v1120_v49 = vmul.f32 0.5, %v2740_v11 }
 0x126   : > { %v1095_v42 = vsub.f32 1.0, %v1065_v59  ;;  %v2388_v53 = vpop.eup %2387  ;;  %2405 = vrcp.f32 %v1055_v14  ;;  %v1060_v55 = vadd.f32 1.0, %v2386_v52  ;;  %v1121_v59 = vmul.f32 0.5, %v2753_v41 }
 0x127   : > { %v1098_v54 = vsub.f32 1.0, %v1071_v50  ;;  %v2390_v56 = vpop.eup %2389  ;;  %v1058_v63 = vadd.f32 1.0, %v2388_v53  ;;  %v1119_v57 = vmul.f32 0.5, %v2756_v24 }
 0x128   : > { %v1127_v61 = vadd.f32 1.0, %v1095_v42  ;;  %v1073_v3 = vmul.f32 2.0, %v2390_v56  ;;  %2407 = vrcp.f32 %v1060_v55  ;;  %v1118_v56 = vmul.f32 0.5, %v2745_v28 }
 0x129   : > { %v2392_v2 = vpop.eup %2391  ;;  %2409 = vrcp.f32 %v1058_v63  ;;  %v1130_v45 = vadd.f32 1.0, %v1098_v54 }
 0x12a   : > { %v2394_v58 = vpop.eup %2393  ;;  %v1083_v4 = vmul.f32 2.0, %v2392_v2  ;;  %v1143_v8 = vmul.f32 %v1127_v61, %v1111_v60  ;;  %v1099_v26 = vsub.f32 1.0, %v1073_v3 }
 0x12b   : > { %v2396_v9 = vpop.eup %2395  ;;  %v1075_v62 = vmul.f32 2.0, %v2394_v58  ;;  %v1146_v34 = vmul.f32 %v1130_v45, %v1114_v12 }
 0x12c   : > { %v1158_v10 = vpack.c.bf16 %v1143_v8, %v1142_v7  ;;  %v1077_v51 = vmul.f32 2.0, %v2396_v9  ;;  %v2398_v15 = vpop.eup %2397  ;;  %v1104_v0 = vsub.f32 1.0, %v1083_v4  ;;  %v1131_v20 = vadd.f32 1.0, %v1099_v26 }
 0x12d   : > { %v1100_v21 = vsub.f32 1.0, %v1075_v62  ;;  %v2400_v23 = vpop.eup %2399  ;;  %v1061_v30 = vadd.f32 1.0, %v2398_v15  ;;  %v1124_v26 = vmul.f32 0.5, %v2771_v1  ;;  %v1123_v15 = vmul.f32 0.5, %v2789_v19  ;;  %v2341_v1 = vld [vmem:[%s3268_s7] sm:$0xff]  }
 0x12e   : > { %2274 = vmatprep.mubr.msk.bf16.mxu0 %vm491_vm1, %v1158_v10  ;;  %v1101_v25 = vsub.f32 1.0, %v1077_v51  ;;  %v2402_v31 = vpop.eup %2401  ;;  %v1085_v32 = vmul.f32 2.0, %v2400_v23  ;;  %v1147_v22 = vmul.f32 %v1131_v20, %v1115_v18  ;;  %v1136_v44 = vadd.f32 1.0, %v1104_v0  ;;  %2290 = vmatprep.subr.bf16.mxu0 %v2341_v1 }
 0x12f   : > { %2275 = vmatmul.mubr.msk.bf16.vlgmr.msra.gmra.mrb[4].mxu0 %vm491_vm1, %v1159_v6  ;;  %v1132_v36 = vadd.f32 1.0, %v1100_v21  ;;  %v2404_v37 = vpop.eup %2403  ;;  %v1059_v39 = vadd.f32 1.0, %v2402_v31  ;;  %2411 = vrcp.f32 %v1061_v30  ;;  %v1125_v10 = vmul.f32 0.5, %v2787_v40  ;;  %v2834_v40 = vld [vmem:[%s3267_s6] ss:$0 sm:$0xff] }
 0x130   : > { %v1133_v35 = vadd.f32 1.0, %v1101_v25  ;;  %v2406_v43 = vpop.eup %2405  ;;  %v1105_v47 = vsub.f32 1.0, %v1085_v32  ;;  %v1160_v16 = vpack.c.bf16 %v1147_v22, %v1146_v34  ;;  %v1079_v33 = vmul.f32 2.0, %v2404_v37  ;;  %2291 = vmatpush3.bf16.msra.mxu0 %v2341_v1 }
 0x131   : > { %v1148_v17 = vmul.f32 %v1132_v36, %v1116_v27  ;;  %v1081_v13 = vmul.f32 2.0, %v2406_v43  ;;  %2413 = vrcp.f32 %v1059_v39  ;;  %v1152_v46 = vmul.f32 %v1136_v44, %v1120_v49 }
 0x132   : > { %v1149_v48 = vmul.f32 %v1133_v35, %v1117_v38  ;;  %v2408_v14 = vpop.eup %2407  ;;  %v1137_v6 = vadd.f32 1.0, %v1105_v47  ;;  %2278 = vmatprep.mubr.msk.bf16.mxu0 %vm491_vm1, %v1160_v16  ;;  %v1102_v29 = vsub.f32 1.0, %v1079_v33  ;;  %v1122_v51 = vmul.f32 0.5, %v2774_v5  ;;  %v2342_v5 = vld [vmem:[%s3268_s7 + $0x8] sm:$0xff]  }
 0x133   : > { %v2410_v50 = vpop.eup %2409  ;;  %v1103_v42 = vsub.f32 1.0, %v1081_v13  ;;  %v1091_v55 = vmul.f32 2.0, %v2408_v14  ;;  %2292 = vmatprep.subr.bf16.mxu0 %v2342_v5 }
 0x134   : > { %v1161_v52 = vpack.c.bf16 %v1149_v48, %v1148_v17  ;;  %v1153_v53 = vmul.f32 %v1137_v6, %v1121_v59  ;;  %v1134_v54 = vadd.f32 1.0, %v1102_v29  ;;  %v1087_v11 = vmul.f32 2.0, %v2410_v50  ;;  %2293 = vmatpush3.bf16.msra.mxu0 %v2342_v5 }
 0x135   : > { %v1135_v60 = vadd.f32 1.0, %v1103_v42  ;;  %v1108_v2 = vsub.f32 1.0, %v1091_v55 }
 0x136   : > { %v1163_v61 = vpack.c.bf16 %v1153_v53, %v1152_v46  ;;  %v1150_v41 = vmul.f32 %v1134_v54, %v1118_v56  ;;  %v1106_v4 = vsub.f32 1.0, %v1087_v11 }
 0x137   : > { %2279 = vmatmul.mubr.msk.bf16.gmra.mrb[8].mxu0 %vm491_vm1, %v1161_v52  ;;  %v1151_v63 = vmul.f32 %v1135_v60, %v1119_v57  ;;  %v1140_v24 = vadd.f32 1.0, %v1108_v2 }
 0x138   : > { %v1138_v62 = vadd.f32 1.0, %v1106_v4 }
 0x139   : > { %v2412_v3 = vpop.eup %2411  ;;  %v1162_v58 = vpack.c.bf16 %v1151_v63, %v1150_v41  ;;  %v1156_v18 = vmul.f32 %v1140_v24, %v1124_v26 }
 0x13a   : > { %v1093_v7 = vmul.f32 2.0, %v2412_v3  ;;  %v1154_v21 = vmul.f32 %v1138_v62, %v1122_v51 }
 0x13b   : > { %v2414_v8 = vpop.eup %2413  ;;  %2282 = vmatprep.mubr.msk.bf16.mxu1 %vm491_vm1, %v1162_v58 }
 0x13c   : > { %2283 = vmatmul.mubr.msk.bf16.vlgmr.msra.gmra.mrb[16].mxu1 %vm491_vm1, %v1163_v61  ;;  %v1089_v28 = vmul.f32 2.0, %v2414_v8  ;;  %v1109_v9 = vsub.f32 1.0, %v1093_v7 }
 0x13e   : > { %v1107_v45 = vsub.f32 1.0, %v1089_v28  ;;  %v1141_v12 = vadd.f32 1.0, %v1109_v9 }
 0x140   : > { %v1139_v0 = vadd.f32 1.0, %v1107_v45  ;;  %v1157_v20 = vmul.f32 %v1141_v12, %v1125_v10 }
 0x142   : > { %v1155_v23 = vmul.f32 %v1139_v0, %v1123_v15  ;;  %v1165_v25 = vpack.c.bf16 %v1157_v20, %v1156_v18 }
 0x144   : > { %v1164_v27 = vpack.c.bf16 %v1155_v23, %v1154_v21 }
 0x146   : > { %2286 = vmatprep.mubr.msk.bf16.mxu1 %vm491_vm1, %v1164_v27 }
 0x147   : > { %2287 = vmatmul.mubr.msk.bf16.gmra.mrb[20].mxu1 %vm491_vm1, %v1165_v25 }
 0x202   : > { %v2276_v19 = vpop.f32.mrb[4].mxu0 }
 0x203   : > { %v2837_v30 = vadd.f32 %v2276_v19, %v2834_v40  ;;  %v1242_v31 = vpop.f32.mrb[5].mxu0 }
 0x204   : > { %v2840_v32 = vadd.f32 %v2834_v40, %v1242_v31  ;;  %v2277_v34 = vpop.f32.mrb[6].mxu0 }
 0x205   : > { %v1307_v22 = vmul.f32 0.044715, %v2837_v30  ;;  %v2844_v36 = vadd.f32 %v2277_v34, %v2834_v40  ;;  %v1245_v37 = vpop.f32.mrb[7].mxu0 }
 0x206   : > { %v1305_v38 = vmul.f32 0.044715, %v2840_v32  ;;  %v2848_v35 = vadd.f32 %v2834_v40, %v1245_v37 }
 0x207   : > { %v1323_v39 = vmul.f32 %v1307_v22, %v2837_v30  ;;  %v1308_v43 = vmul.f32 0.044715, %v2844_v36 }
 0x208   : > { %v1321_v44 = vmul.f32 %v1305_v38, %v2840_v32  ;;  %v1306_v47 = vmul.f32 0.044715, %v2848_v35 }
 0x209   : > { %v1339_v16 = vmul.f32 %v1323_v39, %v2837_v30  ;;  %v1324_v33 = vmul.f32 %v1308_v43, %v2844_v36 }
 0x20a   : > { %v1337_v17 = vmul.f32 %v1321_v44, %v2840_v32  ;;  %v1322_v48 = vmul.f32 %v1306_v47, %v2848_v35  ;;  %v2280_v13 = vpop.f32.mrb[8].mxu0 }
 0x20b   : > { %v1355_v14 = vadd.f32 %v1339_v16, %v2837_v30  ;;  %v1340_v49 = vmul.f32 %v1324_v33, %v2844_v36  ;;  %v2861_v59 = vadd.f32 %v2280_v13, %v2834_v40  ;;  %v1258_v6 = vpop.f32.mrb[9].mxu0 }
 0x20c   : > { %v1353_v29 = vadd.f32 %v1337_v17, %v2840_v32  ;;  %v1338_v50 = vmul.f32 %v1322_v48, %v2848_v35  ;;  %v2866_v52 = vadd.f32 %v2834_v40, %v1258_v6  ;;  %v2281_v42 = vpop.f32.mrb[10].mxu0 }
 0x20d   : > { %v1371_v46 = vmul.f32 0.7978846, %v1355_v14  ;;  %v1356_v53 = vadd.f32 %v1340_v49, %v2844_v36  ;;  %v1311_v54 = vmul.f32 0.044715, %v2861_v59  ;;  %v2871_v55 = vadd.f32 %v2281_v42, %v2834_v40  ;;  %v1261_v56 = vpop.f32.mrb[11].mxu0 }
 0x20e   : > { %v1369_v57 = vmul.f32 0.7978846, %v1353_v29  ;;  %v1354_v60 = vadd.f32 %v1338_v50, %v2848_v35  ;;  %v1309_v61 = vmul.f32 0.044715, %v2866_v52  ;;  %v2876_v11 = vadd.f32 %v2834_v40, %v1261_v56 }
 0x20f   : > { %v1387_v41 = vmul.f32 2.0, %v1371_v46  ;;  %v1372_v63 = vmul.f32 0.7978846, %v1356_v53  ;;  %v1327_v2 = vmul.f32 %v1311_v54, %v2861_v59  ;;  %v1312_v3 = vmul.f32 0.044715, %v2871_v55  ;;  %v2284_v28 = vpop.f32.mrb[16].mxu1 }
 0x210   : > { %v1385_v58 = vmul.f32 2.0, %v1369_v57  ;;  %v1370_v4 = vmul.f32 0.7978846, %v1354_v60  ;;  %v1325_v7 = vmul.f32 %v1309_v61, %v2866_v52  ;;  %v1310_v8 = vmul.f32 0.044715, %v2876_v11  ;;  %v1274_v62 = vpop.f32.mrb[17].mxu1 }
 0x211   : > { %v1405_v9 = vmul.f32 1.442695, %v1387_v41  ;;  %v1388_v24 = vmul.f32 2.0, %v1372_v63  ;;  %v1343_v26 = vmul.f32 %v1327_v2, %v2861_v59  ;;  %v1328_v45 = vmul.f32 %v1312_v3, %v2871_v55  ;;  %v2285_v0 = vpop.f32.mrb[18].mxu1 }
 0x212   : > { %v1401_v10 = vmul.f32 1.442695, %v1385_v58  ;;  %v1386_v12 = vmul.f32 2.0, %v1370_v4  ;;  %v1341_v51 = vmul.f32 %v1325_v7, %v2866_v52  ;;  %v1326_v15 = vmul.f32 %v1310_v8, %v2876_v11  ;;  %v1277_v23 = vpop.f32.mrb[19].mxu1 }
 0x213   : > { %2415 = vpow2.f32 %v1405_v9  ;;  %v1407_v18 = vmul.f32 1.442695, %v1388_v24  ;;  %v1359_v20 = vadd.f32 %v1343_v26, %v2861_v59  ;;  %v1344_v21 = vmul.f32 %v1328_v45, %v2871_v55 }
 0x214   : > { %2417 = vpow2.f32 %v1401_v10  ;;  %v1403_v25 = vmul.f32 1.442695, %v1386_v12  ;;  %v1357_v27 = vadd.f32 %v1341_v51, %v2866_v52  ;;  %v1342_v1 = vmul.f32 %v1326_v15, %v2876_v11 }
 0x215   : > { %2419 = vpow2.f32 %v1407_v18  ;;  %v1375_v5 = vmul.f32 0.7978846, %v1359_v20  ;;  %v1360_v19 = vadd.f32 %v1344_v21, %v2871_v55  ;;  %v2892_v31 = vadd.f32 %v2284_v28, %v2834_v40 }
 0x216   : > { %2421 = vpow2.f32 %v1403_v25  ;;  %v1373_v34 = vmul.f32 0.7978846, %v1357_v27  ;;  %v1358_v22 = vadd.f32 %v1342_v1, %v2876_v11  ;;  %v2896_v37 = vadd.f32 %v2834_v40, %v1274_v62 }
 0x217   : > { %v1391_v38 = vmul.f32 2.0, %v1375_v5  ;;  %v1376_v39 = vmul.f32 0.7978846, %v1360_v19  ;;  %v1315_v43 = vmul.f32 0.044715, %v2892_v31  ;;  %v2900_v44 = vadd.f32 %v2285_v0, %v2834_v40 }
 0x218   : > { %v1389_v47 = vmul.f32 2.0, %v1373_v34  ;;  %v1374_v16 = vmul.f32 0.7978846, %v1358_v22  ;;  %v1313_v33 = vmul.f32 0.044715, %v2896_v37  ;;  %v2904_v17 = vadd.f32 %v2834_v40, %v1277_v23 }
 0x219   : > { %v1413_v48 = vmul.f32 1.442695, %v1391_v38  ;;  %v1392_v13 = vmul.f32 2.0, %v1376_v39  ;;  %v1331_v14 = vmul.f32 %v1315_v43, %v2892_v31  ;;  %v1316_v49 = vmul.f32 0.044715, %v2900_v44 }
 0x21a   : > { %v1409_v6 = vmul.f32 1.442695, %v1389_v47  ;;  %v1390_v29 = vmul.f32 2.0, %v1374_v16  ;;  %v1329_v50 = vmul.f32 %v1313_v33, %v2896_v37  ;;  %v1314_v42 = vmul.f32 0.044715, %v2904_v17  ;;  %v2288_v56 = vpop.f32.mrb[20].mxu1 }
 0x21b   : > { %2423 = vpow2.f32 %v1413_v48  ;;  %v1415_v46 = vmul.f32 1.442695, %v1392_v13  ;;  %v1347_v53 = vmul.f32 %v1331_v14, %v2892_v31  ;;  %v1332_v54 = vmul.f32 %v1316_v49, %v2900_v44  ;;  %v1290_v41 = vpop.f32.mrb[21].mxu1 }
 0x21c   : > { %2425 = vpow2.f32 %v1409_v6  ;;  %v1411_v57 = vmul.f32 1.442695, %v1390_v29  ;;  %v1345_v60 = vmul.f32 %v1329_v50, %v2896_v37  ;;  %v1330_v61 = vmul.f32 %v1314_v42, %v2904_v17  ;;  %v2289_v4 = vpop.f32.mrb[22].mxu1 }
 0x21d   : > { %v2416_v63 = vpop.eup %2415  ;;  %2427 = vpow2.f32 %v1415_v46  ;;  %v1363_v2 = vadd.f32 %v1347_v53, %v2892_v31  ;;  %v1348_v3 = vmul.f32 %v1332_v54, %v2900_v44  ;;  %v2917_v58 = vadd.f32 %v2288_v56, %v2834_v40  ;;  %v1293_v24 = vpop.f32.mrb[23].mxu1 }
 0x21e   : > { %v2418_v7 = vpop.eup %2417  ;;  %v1435_v8 = vadd.f32 1.0, %v2416_v63  ;;  %2429 = vpow2.f32 %v1411_v57  ;;  %v1361_v28 = vadd.f32 %v1345_v60, %v2896_v37  ;;  %v1346_v9 = vmul.f32 %v1330_v61, %v2904_v17 }
 0x21f   : > { %v2420_v26 = vpop.eup %2419  ;;  %v1379_v45 = vmul.f32 0.7978846, %v1363_v2  ;;  %v1364_v62 = vadd.f32 %v1348_v3, %v2900_v44  ;;  %v1319_v10 = vmul.f32 0.044715, %v2917_v58  ;;  %v2924_v12 = vadd.f32 %v2834_v40, %v1290_v41 }
 0x220   : > { %v2422_v51 = vpop.eup %2421  ;;  %2431 = vrcp.f32 %v1435_v8  ;;  %v1436_v15 = vadd.f32 1.0, %v2420_v26  ;;  %v1377_v0 = vmul.f32 0.7978846, %v1361_v28  ;;  %v1362_v18 = vadd.f32 %v1346_v9, %v2904_v17 }
 0x221   : > { %v1395_v20 = vmul.f32 2.0, %v1379_v45  ;;  %v1380_v21 = vmul.f32 0.7978846, %v1364_v62  ;;  %v1335_v23 = vmul.f32 %v1319_v10, %v2917_v58  ;;  %v1317_v25 = vmul.f32 0.044715, %v2924_v12 }
 0x222   : > { %2433 = vrcp.f32 %v1436_v15  ;;  %v1393_v27 = vmul.f32 2.0, %v1377_v0  ;;  %v1378_v1 = vmul.f32 0.7978846, %v1362_v18  ;;  %v2930_v5 = vadd.f32 %v2289_v4, %v2834_v40 }
 0x223   : > { %v1421_v19 = vmul.f32 1.442695, %v1395_v20  ;;  %v1396_v34 = vmul.f32 2.0, %v1380_v21  ;;  %v1351_v22 = vmul.f32 %v1335_v23, %v2917_v58  ;;  %v1333_v38 = vmul.f32 %v1317_v25, %v2924_v12 }
 0x224   : > { %v1417_v39 = vmul.f32 1.442695, %v1393_v27  ;;  %v1394_v43 = vmul.f32 2.0, %v1378_v1  ;;  %v1320_v47 = vmul.f32 0.044715, %v2930_v5  ;;  %v2936_v16 = vadd.f32 %v2834_v40, %v1293_v24 }
 0x225   : > { %v2424_v33 = vpop.eup %2423  ;;  %2435 = vpow2.f32 %v1421_v19  ;;  %v1423_v48 = vmul.f32 1.442695, %v1396_v34  ;;  %v1367_v13 = vadd.f32 %v1351_v22, %v2917_v58  ;;  %v1349_v14 = vmul.f32 %v1333_v38, %v2924_v12 }
 0x226   : > { %v2426_v49 = vpop.eup %2425  ;;  %2437 = vpow2.f32 %v1417_v39  ;;  %v1419_v6 = vmul.f32 1.442695, %v1394_v43  ;;  %v1336_v29 = vmul.f32 %v1320_v47, %v2930_v5  ;;  %v1318_v50 = vmul.f32 0.044715, %v2936_v16 }
 0x227   : > { %v2428_v42 = vpop.eup %2427  ;;  %2439 = vpow2.f32 %v1423_v48  ;;  %v1383_v46 = vmul.f32 0.7978846, %v1367_v13  ;;  %v1365_v40 = vadd.f32 %v1349_v14, %v2924_v12  ;;  %v1433_v53 = vadd.f32 1.0, %v2418_v7 }
 0x228   : > { %v2430_v54 = vpop.eup %2429  ;;  %2441 = vpow2.f32 %v1419_v6  ;;  %v1352_v56 = vmul.f32 %v1336_v29, %v2930_v5  ;;  %v1334_v57 = vmul.f32 %v1318_v50, %v2936_v16  ;;  %v1434_v60 = vadd.f32 1.0, %v2422_v51 }
 0x229   : > { %v1399_v61 = vmul.f32 2.0, %v1383_v46  ;;  %v1381_v41 = vmul.f32 0.7978846, %v1365_v40  ;;  %2443 = vrcp.f32 %v1433_v53  ;;  %v1437_v63 = vadd.f32 1.0, %v2426_v49 }
 0x22a   : > { %v2432_v2 = vpop.eup %2431  ;;  %v1368_v3 = vadd.f32 %v1352_v56, %v2930_v5  ;;  %v1350_v4 = vmul.f32 %v1334_v57, %v2936_v16  ;;  %2445 = vrcp.f32 %v1434_v60  ;;  %v1438_v8 = vadd.f32 1.0, %v2430_v54 }
 0x22b   : > { %v1454_v28 = vmul.f32 2.0, %v2432_v2  ;;  %v1429_v7 = vmul.f32 1.442695, %v1399_v61  ;;  %v1397_v9 = vmul.f32 2.0, %v1381_v41  ;;  %2447 = vrcp.f32 %v1437_v63 }
 0x22c   : > { %v2434_v24 = vpop.eup %2433  ;;  %v1384_v26 = vmul.f32 0.7978846, %v1368_v3  ;;  %v1366_v45 = vadd.f32 %v1350_v4, %v2936_v16  ;;  %2449 = vrcp.f32 %v1438_v8  ;;  %v1439_v18 = vadd.f32 1.0, %v2424_v33 }
 0x22d   : > { %v1483_v62 = vsub.f32 1.0, %v1454_v28  ;;  %v1456_v10 = vmul.f32 2.0, %v2434_v24  ;;  %2451 = vpow2.f32 %v1429_v7  ;;  %v1425_v51 = vmul.f32 1.442695, %v1397_v9 }
 0x22e   : > { %v1400_v15 = vmul.f32 2.0, %v1384_v26  ;;  %v1382_v0 = vmul.f32 0.7978846, %v1366_v45  ;;  %v1440_v25 = vadd.f32 1.0, %v2428_v42  ;;  %v1499_v22 = vmul.f32 0.5, %v2837_v30 }
 0x22f   : > { %v2436_v20 = vpop.eup %2435  ;;  %v1515_v21 = vadd.f32 1.0, %v1483_v62  ;;  %v1484_v23 = vsub.f32 1.0, %v1456_v10  ;;  %2453 = vpow2.f32 %v1425_v51  ;;  %v1500_v38 = vmul.f32 0.5, %v2844_v36 }
 0x230   : > { %v2438_v27 = vpop.eup %2437  ;;  %v1431_v1 = vmul.f32 1.442695, %v1400_v15  ;;  %v1398_v19 = vmul.f32 2.0, %v1382_v0  ;;  %2455 = vrcp.f32 %v1439_v18  ;;  %v1443_v6 = vadd.f32 1.0, %v2436_v20 }
 0x231   : > { %v2440_v34 = vpop.eup %2439  ;;  %v1516_v39 = vadd.f32 1.0, %v1484_v23  ;;  %2457 = vrcp.f32 %v1440_v25  ;;  %v1441_v33 = vadd.f32 1.0, %v2438_v27  ;;  %v1531_v13 = vmul.f32 %v1515_v21, %v1499_v22 }
 0x232   : > { %v2442_v43 = vpop.eup %2441  ;;  %2459 = vpow2.f32 %v1431_v1  ;;  %v1427_v47 = vmul.f32 1.442695, %v1398_v19  ;;  %v1444_v42 = vadd.f32 1.0, %v2440_v34  ;;  %v1497_v60 = vmul.f32 0.5, %v2840_v32 }
 0x233   : > { %v2444_v48 = vpop.eup %2443  ;;  %v1532_v14 = vmul.f32 %v1516_v39, %v1500_v38  ;;  %v1442_v49 = vadd.f32 1.0, %v2442_v43  ;;  %v1498_v4 = vmul.f32 0.5, %v2848_v35  ;;  %v1501_v7 = vmul.f32 0.5, %v2866_v52 }
 0x234   : > { %v2446_v29 = vpop.eup %2445  ;;  %2461 = vpow2.f32 %v1427_v47  ;;  %v1450_v50 = vmul.f32 2.0, %v2444_v48  ;;  %v1502_v24 = vmul.f32 0.5, %v2876_v11  ;;  %v1503_v38 = vmul.f32 0.5, %v2861_v59 }
 0x235   : > { %v2448_v46 = vpop.eup %2447  ;;  %v1546_v40 = vpack.c.bf16 %v1532_v14, %v1531_v13  ;;  %v1452_v30 = vmul.f32 2.0, %v2446_v29  ;;  %2463 = vrcp.f32 %v1441_v33  ;;  %v1504_v39 = vmul.f32 0.5, %v2871_v55 }
 0x236   : > { %v2450_v36 = vpop.eup %2449  ;;  %v1481_v53 = vsub.f32 1.0, %v1450_v50  ;;  %v1458_v54 = vmul.f32 2.0, %v2448_v46  ;;  %2465 = vrcp.f32 %v1442_v49  ;;  %v1505_v59 = vmul.f32 0.5, %v2896_v37 }
 0x237   : > { %v2452_v56 = vpop.eup %2451  ;;  %v1482_v57 = vsub.f32 1.0, %v1452_v30  ;;  %v1460_v61 = vmul.f32 2.0, %v2450_v36  ;;  %2467 = vrcp.f32 %v1443_v6  ;;  %v1506_v36 = vmul.f32 0.5, %v2904_v17 }
 0x238   : > { %v1513_v41 = vadd.f32 1.0, %v1481_v53  ;;  %v1485_v63 = vsub.f32 1.0, %v1458_v54  ;;  %2469 = vrcp.f32 %v1444_v42  ;;  %v1447_v2 = vadd.f32 1.0, %v2452_v56 }
 0x239   : > { %v2454_v3 = vpop.eup %2453  ;;  %v1514_v8 = vadd.f32 1.0, %v1482_v57  ;;  %v1486_v28 = vsub.f32 1.0, %v1460_v61  ;;  %v1508_v61 = vmul.f32 0.5, %v2900_v44 }
 0x23a   : > { %v2456_v9 = vpop.eup %2455  ;;  %v1517_v26 = vadd.f32 1.0, %v1485_v63  ;;  %v1445_v45 = vadd.f32 1.0, %v2454_v3  ;;  %2471 = vrcp.f32 %v1447_v2  ;;  %v1529_v62 = vmul.f32 %v1513_v41, %v1497_v60 }
 0x23b   : > { %v2458_v32 = vpop.eup %2457  ;;  %v1530_v10 = vmul.f32 %v1514_v8, %v1498_v4  ;;  %v1518_v51 = vadd.f32 1.0, %v1486_v28  ;;  %v1462_v15 = vmul.f32 2.0, %v2456_v9  ;;  %v1507_v60 = vmul.f32 0.5, %v2892_v31 }
 0x23c   : > { %v2460_v0 = vpop.eup %2459  ;;  %v1533_v18 = vmul.f32 %v1517_v26, %v1501_v7  ;;  %v1464_v20 = vmul.f32 2.0, %v2458_v32  ;;  %2473 = vrcp.f32 %v1445_v45 }
 0x23d   : > { %v1545_v35 = vpack.c.bf16 %v1530_v10, %v1529_v62  ;;  %v1534_v21 = vmul.f32 %v1518_v51, %v1502_v24  ;;  %v1487_v23 = vsub.f32 1.0, %v1462_v15  ;;  %v1448_v25 = vadd.f32 1.0, %v2460_v0 }
 0x23e   : > { %v2462_v52 = vpop.eup %2461  ;;  %v1488_v27 = vsub.f32 1.0, %v1464_v20  ;;  %v1511_v62 = vmul.f32 0.5, %v2917_v58  ;;  %v1512_v15 = vmul.f32 0.5, %v2930_v5  ;;  %v1510_v20 = vmul.f32 0.5, %v2936_v16  ;;  %v2975_v5 = vld [vmem:[%s3269_s8] ss:$0 sm:$0xff] }
 0x23f   : > { %v2464_v1 = vpop.eup %2463  ;;  %2294 = vmatprep.mubr.msk.bf16.mxu0 %vm491_vm1, %v1545_v35  ;;  %v1547_v11 = vpack.c.bf16 %v1534_v21, %v1533_v18  ;;  %v1519_v19 = vadd.f32 1.0, %v1487_v23  ;;  %v1446_v34 = vadd.f32 1.0, %v2462_v52  ;;  %2475 = vrcp.f32 %v1448_v25 }
 0x240   : > { %v2466_v22 = vpop.eup %2465  ;;  %2295 = vmatmul.mubr.msk.bf16.vlgmr.msra.gmra.mrb[12].mxu0 %vm491_vm1, %v1546_v40  ;;  %v1520_v43 = vadd.f32 1.0, %v1488_v27  ;;  %v1466_v47 = vmul.f32 2.0, %v2464_v1  ;;  %v1509_v18 = vmul.f32 0.5, %v2924_v12  ;;  %v2511_v12 = vld [vmem:[%s2628_s22 + $0x8] sm:$0xff]  }
 0x241   : > { %v2468_v33 = vpop.eup %2467  ;;  %2298 = vmatprep.mubr.msk.bf16.mxu0 %vm491_vm1, %v1547_v11  ;;  %v1468_v48 = vmul.f32 2.0, %v2466_v22  ;;  %2477 = vrcp.f32 %v1446_v34  ;;  %v1535_v14 = vmul.f32 %v1519_v19, %v1503_v38  ;;  %v458_v1 = vunpack.c.l.bf16 %v2511_v12  ;;  %v2512_v11 = vld [vmem:[%s2628_s22] sm:$0xff]  }
 0x242   : > { %v2470_v13 = vpop.eup %2469  ;;  %v1536_v49 = vmul.f32 %v1520_v43, %v1504_v39  ;;  %v1489_v6 = vsub.f32 1.0, %v1466_v47  ;;  %v1470_v29 = vmul.f32 2.0, %v2468_v33  ;;  %v456_v16 = vunpack.c.l.bf16 %v2512_v11 }
 0x243   : > { %v1490_v50 = vsub.f32 1.0, %v1468_v48  ;;  %v1472_v42 = vmul.f32 2.0, %v2470_v13  ;;  %v459_v38 = vunpack.c.h.bf16 %v2511_v12  ;;  %v457_v39 = vunpack.c.h.bf16 %v2512_v11  ;;  %v2517_v11 = vld [vmem:[%s2628_s22 + $0x30] sm:$0xff]  }
 0x244   : > { %v2472_v46 = vpop.eup %2471  ;;  %v1548_v40 = vpack.c.bf16 %v1536_v49, %v1535_v14  ;;  %v1521_v30 = vadd.f32 1.0, %v1489_v6  ;;  %v1491_v55 = vsub.f32 1.0, %v1470_v29 }
 0x245   : > { %v1522_v53 = vadd.f32 1.0, %v1490_v50  ;;  %v1492_v54 = vsub.f32 1.0, %v1472_v42  ;;  %v1478_v56 = vmul.f32 2.0, %v2472_v46  ;;  %v2513_v46 = vld [vmem:[%s2628_s22 + $0x18] sm:$0xff]  }
 0x246   : > { %v2474_v57 = vpop.eup %2473  ;;  %v1523_v41 = vadd.f32 1.0, %v1491_v55  ;;  %v1537_v63 = vmul.f32 %v1521_v30, %v1505_v59 }
 0x247   : > { %v1538_v2 = vmul.f32 %v1522_v53, %v1506_v36  ;;  %v1524_v3 = vadd.f32 1.0, %v1492_v54  ;;  %v1474_v4 = vmul.f32 2.0, %v2474_v57  ;;  %v1495_v37 = vsub.f32 1.0, %v1478_v56 }
 0x248   : > { %2299 = vmatmul.mubr.msk.bf16.gmra.mrb[16].mxu0 %vm491_vm1, %v1548_v40  ;;  %v1539_v7 = vmul.f32 %v1523_v41, %v1507_v60  ;;  %v462_v40 = vunpack.c.l.bf16 %v2513_v46  ;;  %v463_v53 = vunpack.c.h.bf16 %v2513_v46  ;;  %v2514_v60 = vld [vmem:[%s2628_s22 + $0x10] sm:$0xff]  }
 0x249   : > { %v2476_v8 = vpop.eup %2475  ;;  %v1549_v28 = vpack.c.bf16 %v1538_v2, %v1537_v63  ;;  %v1540_v17 = vmul.f32 %v1524_v3, %v1508_v61  ;;  %v1493_v9 = vsub.f32 1.0, %v1474_v4  ;;  %v1527_v32 = vadd.f32 1.0, %v1495_v37 }
 0x24a   : > { %v1480_v24 = vmul.f32 2.0, %v2476_v8  ;;  %v460_v61 = vunpack.c.l.bf16 %v2514_v60  ;;  %v461_v3 = vunpack.c.h.bf16 %v2514_v60 }
 0x24b   : > { %v2478_v26 = vpop.eup %2477  ;;  %2302 = vmatprep.mubr.msk.bf16.mxu0 %vm491_vm1, %v1549_v28  ;;  %v1550_v31 = vpack.c.bf16 %v1540_v17, %v1539_v7  ;;  %v1525_v51 = vadd.f32 1.0, %v1493_v9  ;;  %v1543_v21 = vmul.f32 %v1527_v32, %v1511_v62  ;;  %v2515_v9 = vld [vmem:[%s2628_s22 + $0x28] sm:$0xff]  }
 0x24c   : > { %v1476_v45 = vmul.f32 2.0, %v2478_v26  ;;  %v1496_v44 = vsub.f32 1.0, %v1480_v24  ;;  %v466_v24 = vunpack.c.l.bf16 %v2515_v9 }
 0x24d   : > { %v1541_v25 = vmul.f32 %v1525_v51, %v1509_v18  ;;  %v2516_v51 = vld [vmem:[%s2628_s22 + $0x20] sm:$0xff]  }
 0x24e   : > { %v1494_v10 = vsub.f32 1.0, %v1476_v45  ;;  %v1528_v0 = vadd.f32 1.0, %v1496_v44  ;;  %v467_v44 = vunpack.c.h.bf16 %v2515_v9 }
 0x250   : > { %2303 = vmatmul.mubr.msk.bf16.gmra.mrb[20].mxu0 %vm491_vm1, %v1550_v31  ;;  %v1526_v35 = vadd.f32 1.0, %v1494_v10  ;;  %v1544_v23 = vmul.f32 %v1528_v0, %v1512_v15  ;;  %v464_v15 = vunpack.c.l.bf16 %v2516_v51 }
 0x252   : > { %v1542_v52 = vmul.f32 %v1526_v35, %v1510_v20  ;;  %v1552_v27 = vpack.c.bf16 %v1544_v23, %v1543_v21  ;;  %v465_v21 = vunpack.c.h.bf16 %v2516_v51 }
 0x254   : > { %v1551_v58 = vpack.c.bf16 %v1542_v52, %v1541_v25 }
 0x256   : > { %2306 = vmatprep.mubr.msk.bf16.mxu0 %vm491_vm1, %v1551_v58 }
 0x258   : > { %2307 = vmatmul.mubr.msk.bf16.gmra.mrb[24].mxu0 %vm491_vm1, %v1552_v27 }
 0x313   : > { %v2296_v19 = vpop.f32.mrb[12].mxu0 }
 0x314   : > { %v1638_v34 = vadd.f32 %v2296_v19, %v2975_v5  ;;  %v1629_v22 = vpop.f32.mrb[13].mxu0 }
 0x315   : > { %v1630_v43 = vadd.f32 %v2975_v5, %v1629_v22  ;;  %v2297_v47 = vpop.f32.mrb[14].mxu0 }
 0x316   : > { %v1641_v33 = vadd.f32 %v2297_v47, %v2975_v5  ;;  %v1632_v48 = vpop.f32.mrb[15].mxu0  ;;  %v2982_v13 = vadd.f32 %v1638_v34, %v458_v1  ;;  %v469_v34 = vunpack.c.h.bf16 %v2517_v11  ;;  %v2518_v47 = vld [vmem:[%s2628_s22 + $0x38] sm:$0xff]  }
 0x317   : > { %v1633_v14 = vadd.f32 %v2975_v5, %v1632_v48  ;;  %v2985_v49 = vadd.f32 %v1630_v43, %v456_v16  ;;  %v468_v16 = vunpack.c.l.bf16 %v2517_v11 }
 0x318   : > { %v1714_v6 = vsel %vm491_vm1, %v2982_v13, 0.0  ;;  %v2989_v29 = vadd.f32 %v1641_v33, %v459_v38  ;;  %v470_v33 = vunpack.c.l.bf16 %v2518_v47 }
 0x319   : > { %1715 = vadd.xlane.f32.xlu1 %v1714_v6  ;;  %v1708_v50 = vsel %vm491_vm1, %v2985_v49, 0.0  ;;  %v2993_v42 = vadd.f32 %v1633_v14, %v457_v39 }
 0x31a   : > { %1709 = vadd.xlane.f32.xlu0 %v1708_v50  ;;  %v1717_v36 = vsel %vm491_vm1, %v2989_v29, 0.0 }
 0x31b   : > { %v2300_v59 = vpop.f32.mrb[16].mxu0  ;;  %v1711_v57 = vsel %vm491_vm1, %v2993_v42, 0.0 }
 0x31c   : > { %v1654_v30 = vadd.f32 %v2300_v59, %v2975_v5  ;;  %v1645_v55 = vpop.f32.mrb[17].mxu0 }
 0x31d   : > { %v1646_v54 = vadd.f32 %v2975_v5, %v1645_v55  ;;  %1718 = vadd.xlane.f32.xlu1 %v1717_v36  ;;  %v2301_v56 = vpop.f32.mrb[18].mxu0 }
 0x31e   : > { %v1657_v41 = vadd.f32 %v2301_v56, %v2975_v5  ;;  %v1648_v63 = vpop.f32.mrb[19].mxu0  ;;  %1712 = vadd.xlane.f32.xlu0 %v1711_v57  ;;  %v3004_v2 = vadd.f32 %v1654_v30, %v462_v40  ;;  %v471_v40 = vunpack.c.h.bf16 %v2518_v47 }
 0x31f   : > { %v1649_v4 = vadd.f32 %v2975_v5, %v1648_v63  ;;  %v3011_v28 = vadd.f32 %v1646_v54, %v460_v61 }
 0x320   : > { %v1726_v37 = vsel %vm491_vm1, %v3004_v2, 0.0  ;;  %v3009_v8 = vadd.f32 %v1657_v41, %v463_v53 }
 0x321   : > { %v3015_v17 = vadd.f32 %v1649_v4, %v461_v3  ;;  %v1720_v10 = vsel %vm491_vm1, %v3011_v28, 0.0 }
 0x322   : > { %1727 = vadd.xlane.f32.xlu0 %v1726_v37  ;;  %v1729_v7 = vsel %vm491_vm1, %v3009_v8, 0.0 }
 0x323   : > { %1730 = vadd.xlane.f32.xlu1 %v1729_v7  ;;  %v2304_v26 = vpop.f32.mrb[20].mxu0  ;;  %v1723_v20 = vsel %vm491_vm1, %v3015_v17, 0.0 }
 0x324   : > { %v1670_v31 = vadd.f32 %v2304_v26, %v2975_v5  ;;  %v1661_v45 = vpop.f32.mrb[21].mxu0 }
 0x325   : > { %v1662_v32 = vadd.f32 %v2975_v5, %v1661_v45  ;;  %v2305_v62 = vpop.f32.mrb[22].mxu0 }
 0x326   : > { %v1673_v0 = vadd.f32 %v2305_v62, %v2975_v5  ;;  %v1664_v18 = vpop.f32.mrb[23].mxu0  ;;  %1721 = vadd.xlane.f32.xlu0 %v1720_v10  ;;  %v3026_v35 = vadd.f32 %v1670_v31, %v466_v24 }
 0x327   : > { %v1665_v23 = vadd.f32 %v2975_v5, %v1664_v18  ;;  %1724 = vadd.xlane.f32.xlu1 %v1723_v20  ;;  %v3033_v27 = vadd.f32 %v1662_v32, %v464_v15 }
 0x328   : > { %v1738_v25 = vsel %vm491_vm1, %v3026_v35, 0.0  ;;  %v3031_v52 = vadd.f32 %v1673_v0, %v467_v44 }
 0x329   : > { %v3037_v12 = vadd.f32 %v1665_v23, %v465_v21  ;;  %v1732_v43 = vsel %vm491_vm1, %v3033_v27, 0.0 }
 0x32a   : > { %1739 = vadd.xlane.f32.xlu0 %v1738_v25  ;;  %v1741_v58 = vsel %vm491_vm1, %v3031_v52, 0.0 }
 0x32b   : > { %v2308_v1 = vpop.f32.mrb[24].mxu0  ;;  %1742 = vadd.xlane.f32.xlu1 %v1741_v58  ;;  %v1735_v14 = vsel %vm491_vm1, %v3037_v12, 0.0 }
 0x32c   : > { %v1677_v19 = vpop.f32.mrb[25].mxu0  ;;  %v1686_v22 = vadd.f32 %v2308_v1, %v2975_v5 }
 0x32d   : > { %v1678_v38 = vadd.f32 %v2975_v5, %v1677_v19  ;;  %v2309_v39 = vpop.f32.mrb[26].mxu0 }
 0x32e   : > { %v1680_v48 = vpop.f32.mrb[27].mxu0  ;;  %1733 = vadd.xlane.f32.xlu0 %v1732_v43  ;;  %v1689_v6 = vadd.f32 %v2309_v39, %v2975_v5  ;;  %v3055_v55 = vadd.f32 %v1686_v22, %v470_v33 }
 0x32f   : > { %v1681_v50 = vadd.f32 %v2975_v5, %v1680_v48  ;;  %1736 = vadd.xlane.f32.xlu1 %v1735_v14  ;;  %v3049_v46 = vadd.f32 %v1678_v38, %v468_v16 }
 0x330   : > { %v3059_v53 = vadd.f32 %v1689_v6, %v471_v40  ;;  %v1750_v5 = vsel %vm491_vm1, %v3055_v55, 0.0 }
 0x331   : > { %v1744_v59 = vsel %vm491_vm1, %v3049_v46, 0.0  ;;  %v3053_v30 = vadd.f32 %v1681_v50, %v469_v34 }
 0x332   : > { %1745 = vadd.xlane.f32.xlu0 %v1744_v59  ;;  %v1753_v54 = vsel %vm491_vm1, %v3059_v53, 0.0 }
 0x333   : > { %v1747_v36 = vsel %vm491_vm1, %v3053_v30, 0.0 }
 0x334   : > { %1748 = vadd.xlane.f32.xlu1 %v1747_v36 }
 0x336   : > { %1751 = vadd.xlane.f32.xlu0 %v1750_v5 }
 0x338   : > { %1754 = vadd.xlane.f32.xlu1 %v1753_v54 }
 0x3a6   : > { %v1716_v56 = vpop.xlane.xlu1 %1715 }
 0x3a7   : > { %v1759_v57 = vmul.f32 0.03125, %v1716_v56  ;;  %v1710_v60 = vpop.xlane.xlu0 %1709 }
 0x3a8   : > { %v1757_v61 = vmul.f32 0.03125, %v1710_v60 }
 0x3a9   : > { %v3066_v41 = vsub.f32 %v2982_v13, %v1759_v57 }
 0x3aa   : > { %v3069_v63 = vsub.f32 %v2985_v49, %v1757_v61  ;;  %v1719_v3 = vpop.xlane.xlu1 %1718 }
 0x3ab   : > { %v1760_v4 = vmul.f32 0.03125, %v1719_v3  ;;  %v1713_v37 = vpop.xlane.xlu0 %1712  ;;  %v1791_v7 = vmul.f32 %v3066_v41, %v3066_v41 }
 0x3ac   : > { %v1758_v9 = vmul.f32 0.03125, %v1713_v37  ;;  %v1789_v31 = vmul.f32 %v3069_v63, %v3069_v63 }
 0x3ad   : > { %v3074_v24 = vsub.f32 %v2989_v29, %v1760_v4  ;;  %v1811_v26 = vsel %vm491_vm1, %v1791_v7, 0.0 }
 0x3ae   : > { %v3080_v13 = vsub.f32 %v2993_v42, %v1758_v9  ;;  %1812 = vadd.xlane.f32.xlu0 %v1811_v26  ;;  %v1805_v29 = vsel %vm491_vm1, %v1789_v31, 0.0 }
 0x3af   : > { %v1728_v49 = vpop.xlane.xlu0 %1727  ;;  %v1792_v45 = vmul.f32 %v3074_v24, %v3074_v24 }
 0x3b0   : > { %v1763_v44 = vmul.f32 0.03125, %v1728_v49  ;;  %v1731_v32 = vpop.xlane.xlu1 %1730  ;;  %v1790_v51 = vmul.f32 %v3080_v13, %v3080_v13 }
 0x3b1   : > { %v1764_v62 = vmul.f32 0.03125, %v1731_v32  ;;  %v1814_v10 = vsel %vm491_vm1, %v1792_v45, 0.0 }
 0x3b2   : > { %v3089_v15 = vsub.f32 %v3004_v2, %v1763_v44  ;;  %1815 = vadd.xlane.f32.xlu1 %v1814_v10  ;;  %1806 = vadd.xlane.f32.xlu0 %v1805_v29  ;;  %v1808_v25 = vsel %vm491_vm1, %v1790_v51, 0.0 }
 0x3b3   : > { %v3092_v42 = vsub.f32 %v3009_v8, %v1764_v62  ;;  %v1722_v0 = vpop.xlane.xlu0 %1721 }
 0x3b4   : > { %v1761_v18 = vmul.f32 0.03125, %v1722_v0  ;;  %v1725_v20 = vpop.xlane.xlu1 %1724  ;;  %v1795_v21 = vmul.f32 %v3089_v15, %v3089_v15 }
 0x3b5   : > { %v1762_v23 = vmul.f32 0.03125, %v1725_v20  ;;  %v1796_v58 = vmul.f32 %v3092_v42, %v3092_v42 }
 0x3b6   : > { %v3100_v2 = vsub.f32 %v3011_v28, %v1761_v18  ;;  %1809 = vadd.xlane.f32.xlu1 %v1808_v25  ;;  %v1823_v1 = vsel %vm491_vm1, %v1795_v21, 0.0 }
 0x3b7   : > { %v3104_v8 = vsub.f32 %v3015_v17, %v1762_v23  ;;  %1824 = vadd.xlane.f32.xlu0 %v1823_v1  ;;  %v1740_v11 = vpop.xlane.xlu0 %1739  ;;  %v1826_v38 = vsel %vm491_vm1, %v1796_v58, 0.0 }
 0x3b8   : > { %v1767_v16 = vmul.f32 0.03125, %v1740_v11  ;;  %v1743_v19 = vpop.xlane.xlu1 %1742  ;;  %v1793_v34 = vmul.f32 %v3100_v2, %v3100_v2 }
 0x3b9   : > { %v1768_v22 = vmul.f32 0.03125, %v1743_v19  ;;  %v1794_v28 = vmul.f32 %v3104_v8, %v3104_v8 }
 0x3ba   : > { %v3112_v39 = vsub.f32 %v3026_v35, %v1767_v16  ;;  %1827 = vadd.xlane.f32.xlu1 %v1826_v38  ;;  %v1817_v17 = vsel %vm491_vm1, %v1793_v34, 0.0 }
 0x3bb   : > { %v3116_v43 = vsub.f32 %v3031_v52, %v1768_v22  ;;  %1818 = vadd.xlane.f32.xlu0 %v1817_v17  ;;  %v1734_v47 = vpop.xlane.xlu0 %1733  ;;  %v1820_v50 = vsel %vm491_vm1, %v1794_v28, 0.0 }
 0x3bc   : > { %v1765_v33 = vmul.f32 0.03125, %v1734_v47  ;;  %v1737_v48 = vpop.xlane.xlu1 %1736  ;;  %v1799_v14 = vmul.f32 %v3112_v39, %v3112_v39 }
 0x3bd   : > { %v1766_v6 = vmul.f32 0.03125, %v1737_v48  ;;  %v1800_v35 = vmul.f32 %v3116_v43, %v3116_v43 }
 0x3be   : > { %v3124_v40 = vsub.f32 %v3033_v27, %v1765_v33  ;;  %1821 = vadd.xlane.f32.xlu1 %v1820_v50  ;;  %v1835_v52 = vsel %vm491_vm1, %v1799_v14, 0.0  ;;  %v3164_v33 = vld [vmem:[%s3270_s9] ss:$0 sm:$0xff] }
 0x3bf   : > { %v3128_v59 = vsub.f32 %v3037_v12, %v1766_v6  ;;  %1836 = vadd.xlane.f32.xlu0 %v1835_v52  ;;  %v1746_v36 = vpop.xlane.xlu0 %1745  ;;  %v1838_v57 = vsel %vm491_vm1, %v1800_v35, 0.0  ;;  %v3170_v35 = vld [vmem:[%s3271_s10] ss:$0 sm:$0xff] }
 0x3c0   : > { %v1769_v5 = vmul.f32 0.03125, %v1746_v36  ;;  %v1797_v54 = vmul.f32 %v3124_v40, %v3124_v40 }
 0x3c1   : > { %v1749_v56 = vpop.xlane.xlu1 %1748  ;;  %v1798_v60 = vmul.f32 %v3128_v59, %v3128_v59 }
 0x3c2   : > { %v3136_v27 = vsub.f32 %v3049_v46, %v1769_v5  ;;  %v1770_v61 = vmul.f32 0.03125, %v1749_v56  ;;  %1839 = vadd.xlane.f32.xlu1 %v1838_v57  ;;  %v1829_v12 = vsel %vm491_vm1, %v1797_v54, 0.0 }
 0x3c3   : > { %1830 = vadd.xlane.f32.xlu0 %v1829_v12  ;;  %v1752_v3 = vpop.xlane.xlu0 %1751  ;;  %v1832_v26 = vsel %vm491_vm1, %v1798_v60, 0.0 }
 0x3c4   : > { %v3140_v4 = vsub.f32 %v3053_v30, %v1770_v61  ;;  %v1771_v37 = vmul.f32 0.03125, %v1752_v3  ;;  %v1801_v7 = vmul.f32 %v3136_v27, %v3136_v27 }
 0x3c5   : > { %v1755_v9 = vpop.xlane.xlu1 %1754 }
 0x3c6   : > { %v3146_v31 = vsub.f32 %v3055_v55, %v1771_v37  ;;  %v1772_v46 = vmul.f32 0.03125, %v1755_v9  ;;  %1833 = vadd.xlane.f32.xlu1 %v1832_v26  ;;  %v1841_v49 = vsel %vm491_vm1, %v1801_v7, 0.0  ;;  %v1802_v45 = vmul.f32 %v3140_v4, %v3140_v4 }
 0x3c7   : > { %1842 = vadd.xlane.f32.xlu0 %v1841_v49 }
 0x3c8   : > { %v3152_v30 = vsub.f32 %v3059_v53, %v1772_v46  ;;  %v1844_v44 = vsel %vm491_vm1, %v1802_v45, 0.0  ;;  %v1803_v32 = vmul.f32 %v3146_v31, %v3146_v31 }
 0x3ca   : > { %1845 = vadd.xlane.f32.xlu1 %v1844_v44  ;;  %v1847_v55 = vsel %vm491_vm1, %v1803_v32, 0.0  ;;  %v1804_v62 = vmul.f32 %v3152_v30, %v3152_v30 }
 0x3cb   : > { %1848 = vadd.xlane.f32.xlu0 %v1847_v55 }
 0x3cc   : > { %v1850_v10 = vsel %vm491_vm1, %v1804_v62, 0.0 }
 0x3ce   : > { %1851 = vadd.xlane.f32.xlu1 %v1850_v10 }
 0x43b   : > { %v1813_v29 = vpop.xlane.xlu0 %1812 }
 0x43c   : > { %v1855_v51 = vmul.f32 0.03125, %v1813_v29 }
 0x43e   : > { %v1871_v0 = vadd.f32 1e-05, %v1855_v51 }
 0x43f   : > { %v1816_v53 = vpop.xlane.xlu1 %1815  ;;  %v1807_v18 = vpop.xlane.xlu0 %1806 }
 0x440   : > { %2479 = vrsqrt.f32 %v1871_v0  ;;  %v1856_v20 = vmul.f32 0.03125, %v1816_v53  ;;  %v1853_v21 = vmul.f32 0.03125, %v1807_v18 }
 0x442   : > { %v1872_v23 = vadd.f32 1e-05, %v1856_v20  ;;  %v1869_v25 = vadd.f32 1e-05, %v1853_v21 }
 0x443   : > { %v1810_v58 = vpop.xlane.xlu1 %1809 }
 0x444   : > { %2481 = vrsqrt.f32 %v1872_v23  ;;  %v1854_v1 = vmul.f32 0.03125, %v1810_v58  ;;  %v1825_v11 = vpop.xlane.xlu0 %1824 }
 0x445   : > { %2483 = vrsqrt.f32 %v1869_v25  ;;  %v1859_v16 = vmul.f32 0.03125, %v1825_v11 }
 0x446   : > { %v1870_v19 = vadd.f32 1e-05, %v1854_v1 }
 0x447   : > { %v1875_v34 = vadd.f32 1e-05, %v1859_v16  ;;  %v1828_v22 = vpop.xlane.xlu1 %1827 }
 0x448   : > { %2485 = vrsqrt.f32 %v1870_v19  ;;  %v1860_v38 = vmul.f32 0.03125, %v1828_v22  ;;  %v1819_v28 = vpop.xlane.xlu0 %1818 }
 0x449   : > { %2487 = vrsqrt.f32 %v1875_v34  ;;  %v1857_v17 = vmul.f32 0.03125, %v1819_v28 }
 0x44a   : > { %v2480_v47 = vpop.eup %2479  ;;  %v1876_v48 = vadd.f32 1e-05, %v1860_v38 }
 0x44b   : > { %v1903_v14 = vmul.f32 %v2480_v47, %v3066_v41  ;;  %v1873_v6 = vadd.f32 1e-05, %v1857_v17  ;;  %v1822_v50 = vpop.xlane.xlu1 %1821 }
 0x44c   : > { %2489 = vrsqrt.f32 %v1876_v48  ;;  %v1858_v52 = vmul.f32 0.03125, %v1822_v50  ;;  %v1837_v36 = vpop.xlane.xlu0 %1836 }
 0x44d   : > { %v1925_v5 = vmul.f32 %v3164_v33, %v1903_v14  ;;  %2491 = vrsqrt.f32 %v1873_v6  ;;  %v1863_v54 = vmul.f32 0.03125, %v1837_v36 }
 0x44e   : > { %v2482_v56 = vpop.eup %2481  ;;  %v1874_v57 = vadd.f32 1e-05, %v1858_v52 }
 0x44f   : > { %v2484_v60 = vpop.eup %2483  ;;  %v1947_v41 = vadd.f32 %v3170_v35, %v1925_v5  ;;  %v1904_v61 = vmul.f32 %v2482_v56, %v3074_v24  ;;  %v1879_v12 = vadd.f32 1e-05, %v1863_v54  ;;  %v1840_v3 = vpop.xlane.xlu1 %1839 }
 0x450   : > { %v1901_v37 = vmul.f32 %v2484_v60, %v3069_v63  ;;  %2493 = vrsqrt.f32 %v1874_v57  ;;  %v1864_v7 = vmul.f32 0.03125, %v1840_v3  ;;  %v1831_v9 = vpop.xlane.xlu0 %1830 }
 0x451   : > { %v2189_v26 = vpack.c.bf16 %v1947_v41, %v1947_v41  ;;  %v1926_v46 = vmul.f32 %v3164_v33, %v1904_v61  ;;  %2495 = vrsqrt.f32 %v1879_v12  ;;  %v1861_v24 = vmul.f32 0.03125, %v1831_v9 }
 0x452   : > { %v2486_v49 = vpop.eup %2485  ;;  %v1923_v45 = vmul.f32 %v3164_v33, %v1901_v37  ;;  %v1880_v44 = vadd.f32 1e-05, %v1864_v7 }
 0x453   : > { %v2488_v32 = vpop.eup %2487  ;;  %2028 = vst.msk [vmem:[%s3180_s27 + $0x8] sm:$0xf] %vm2025_vm3, %v2189_v26  ;;  %v1948_v55 = vadd.f32 %v3170_v35, %v1926_v46  ;;  %v1902_v62 = vmul.f32 %v2486_v49, %v3080_v13  ;;  %v1877_v63 = vadd.f32 1e-05, %v1861_v24  ;;  %v1834_v10 = vpop.xlane.xlu1 %1833 }
 0x454   : > { %v1945_v29 = vadd.f32 %v3170_v35, %v1923_v45  ;;  %v1907_v51 = vmul.f32 %v2488_v32, %v3089_v15  ;;  %2497 = vrsqrt.f32 %v1880_v44  ;;  %v1862_v0 = vmul.f32 0.03125, %v1834_v10  ;;  %v1843_v53 = vpop.xlane.xlu0 %1842 }
 0x455   : > { %v2190_v18 = vpack.c.bf16 %v1948_v55, %v1948_v55  ;;  %v1924_v20 = vmul.f32 %v3164_v33, %v1902_v62  ;;  %2499 = vrsqrt.f32 %v1877_v63  ;;  %v1865_v21 = vmul.f32 0.03125, %v1843_v53 }
 0x456   : > { %v2490_v23 = vpop.eup %2489  ;;  %v2187_v25 = vpack.c.bf16 %v1945_v29, %v1945_v29  ;;  %v1929_v13 = vmul.f32 %v3164_v33, %v1907_v51  ;;  %v1878_v58 = vadd.f32 1e-05, %v1862_v0 }
 0x457   : > { %v2492_v1 = vpop.eup %2491  ;;  %2029 = vst.msk [vmem:[%s3180_s27 + $0xc] sm:$0xf] %vm2025_vm3, %v2190_v18  ;;  %v1946_v11 = vadd.f32 %v3170_v35, %v1924_v20  ;;  %v1908_v15 = vmul.f32 %v2490_v23, %v3092_v42  ;;  %v1881_v16 = vadd.f32 1e-05, %v1865_v21  ;;  %v1846_v19 = vpop.xlane.xlu1 %1845 }
 0x458   : > { %2026 = vst.msk [vmem:[%s3180_s27] sm:$0xf] %vm2025_vm3, %v2187_v25  ;;  %v1951_v34 = vadd.f32 %v3170_v35, %v1929_v13  ;;  %v1905_v22 = vmul.f32 %v2492_v1, %v3100_v2  ;;  %2501 = vrsqrt.f32 %v1878_v58  ;;  %v1866_v38 = vmul.f32 0.03125, %v1846_v19  ;;  %v1849_v28 = vpop.xlane.xlu0 %1848 }
 0x459   : > { %v2188_v17 = vpack.c.bf16 %v1946_v11, %v1946_v11  ;;  %v1930_v47 = vmul.f32 %v3164_v33, %v1908_v15  ;;  %2503 = vrsqrt.f32 %v1881_v16  ;;  %v1867_v48 = vmul.f32 0.03125, %v1849_v28 }
 0x45a   : > { %v2494_v14 = vpop.eup %2493  ;;  %v2193_v42 = vpack.c.bf16 %v1951_v34, %v1951_v34  ;;  %v1927_v6 = vmul.f32 %v3164_v33, %v1905_v22  ;;  %v1882_v50 = vadd.f32 1e-05, %v1866_v38 }
 0x45b   : > { %v2496_v52 = vpop.eup %2495  ;;  %2027 = vst.msk [vmem:[%s3180_s27 + $0x4] sm:$0xf] %vm2025_vm3, %v2188_v17  ;;  %v1952_v36 = vadd.f32 %v3170_v35, %v1930_v47  ;;  %v1906_v2 = vmul.f32 %v2494_v14, %v3104_v8  ;;  %v1883_v5 = vadd.f32 1e-05, %v1867_v48  ;;  %v1852_v54 = vpop.xlane.xlu1 %1851 }
 0x45c   : > { %2032 = vst.msk [vmem:[%s3180_s27 + $0x18] sm:$0xf] %vm2025_vm3, %v2193_v42  ;;  %v1949_v56 = vadd.f32 %v3170_v35, %v1927_v6  ;;  %v1911_v57 = vmul.f32 %v2496_v52, %v3112_v39  ;;  %2505 = vrsqrt.f32 %v1882_v50  ;;  %v1868_v60 = vmul.f32 0.03125, %v1852_v54 }
 0x45d   : > { %v2194_v41 = vpack.c.bf16 %v1952_v36, %v1952_v36  ;;  %v1928_v61 = vmul.f32 %v3164_v33, %v1906_v2  ;;  %2507 = vrsqrt.f32 %v1883_v5 }
 0x45e   : > { %v2498_v12 = vpop.eup %2497  ;;  %v2191_v3 = vpack.c.bf16 %v1949_v56, %v1949_v56  ;;  %v1933_v8 = vmul.f32 %v3164_v33, %v1911_v57  ;;  %v1884_v37 = vadd.f32 1e-05, %v1868_v60 }
 0x45f   : > { %v2500_v7 = vpop.eup %2499  ;;  %2033 = vst.msk [vmem:[%s3180_s27 + $0x1c] sm:$0xf] %vm2025_vm3, %v2194_v41  ;;  %v1950_v9 = vadd.f32 %v3170_v35, %v1928_v61  ;;  %v1912_v39 = vmul.f32 %v2498_v12, %v3116_v43 }
 0x460   : > { %2030 = vst.msk [vmem:[%s3180_s27 + $0x10] sm:$0xf] %vm2025_vm3, %v2191_v3  ;;  %v1955_v26 = vadd.f32 %v3170_v35, %v1933_v8  ;;  %v1909_v46 = vmul.f32 %v2500_v7, %v3124_v40  ;;  %2509 = vrsqrt.f32 %v1884_v37 }
 0x461   : > { %v2192_v24 = vpack.c.bf16 %v1950_v9, %v1950_v9  ;;  %v1934_v49 = vmul.f32 %v3164_v33, %v1912_v39 }
 0x462   : > { %v2502_v45 = vpop.eup %2501  ;;  %v2197_v44 = vpack.c.bf16 %v1955_v26, %v1955_v26  ;;  %v1931_v32 = vmul.f32 %v3164_v33, %v1909_v46 }
 0x463   : > { %v2504_v55 = vpop.eup %2503  ;;  %2031 = vst.msk [vmem:[%s3180_s27 + $0x14] sm:$0xf] %vm2025_vm3, %v2192_v24  ;;  %v1956_v43 = vadd.f32 %v3170_v35, %v1934_v49  ;;  %v1910_v62 = vmul.f32 %v2502_v45, %v3128_v59 }
 0x464   : > { %2036 = vst.msk [vmem:[%s3180_s27 + $0x28] sm:$0xf] %vm2025_vm3, %v2197_v44  ;;  %v1953_v40 = vadd.f32 %v3170_v35, %v1931_v32  ;;  %v1913_v63 = vmul.f32 %v2504_v55, %v3136_v27 }
 0x465   : > { %v2198_v10 = vpack.c.bf16 %v1956_v43, %v1956_v43  ;;  %v1932_v29 = vmul.f32 %v3164_v33, %v1910_v62 }
 0x466   : > { %v2506_v51 = vpop.eup %2505  ;;  %v2195_v0 = vpack.c.bf16 %v1953_v40, %v1953_v40  ;;  %v1935_v53 = vmul.f32 %v3164_v33, %v1913_v63 }
 0x467   : > { %v2508_v18 = vpop.eup %2507  ;;  %2037 = vst.msk [vmem:[%s3180_s27 + $0x2c] sm:$0xf] %vm2025_vm3, %v2198_v10  ;;  %v1954_v59 = vadd.f32 %v3170_v35, %v1932_v29  ;;  %v1914_v20 = vmul.f32 %v2506_v51, %v3140_v4 }
 0x468   : > { %2034 = vst.msk [vmem:[%s3180_s27 + $0x20] sm:$0xf] %vm2025_vm3, %v2195_v0  ;;  %v1957_v27 = vadd.f32 %v3170_v35, %v1935_v53  ;;  %v1915_v21 = vmul.f32 %v2508_v18, %v3146_v31 }
 0x469   : > { %v2196_v23 = vpack.c.bf16 %v1954_v59, %v1954_v59  ;;  %v1936_v25 = vmul.f32 %v3164_v33, %v1914_v20 }
 0x46a   : > { %v2510_v13 = vpop.eup %2509  ;;  %v2199_v58 = vpack.c.bf16 %v1957_v27, %v1957_v27  ;;  %v1937_v1 = vmul.f32 %v3164_v33, %v1915_v21 }
 0x46b   : > { %2035 = vst.msk [vmem:[%s3180_s27 + $0x24] sm:$0xf] %vm2025_vm3, %v2196_v23  ;;  %v1958_v4 = vadd.f32 %v3170_v35, %v1936_v25  ;;  %v1916_v11 = vmul.f32 %v2510_v13, %v3152_v30 }
 0x46c   : > { %2038 = vst.msk [vmem:[%s3180_s27 + $0x30] sm:$0xf] %vm2025_vm3, %v2199_v58  ;;  %v1959_v15 = vadd.f32 %v3170_v35, %v1937_v1 }
 0x46d   : > { %v2200_v31 = vpack.c.bf16 %v1958_v4, %v1958_v4  ;;  %v1938_v16 = vmul.f32 %v3164_v33, %v1916_v11 }
 0x46e   : > { %v2201_v19 = vpack.c.bf16 %v1959_v15, %v1959_v15 }
 0x46f   : > { %2039 = vst.msk [vmem:[%s3180_s27 + $0x34] sm:$0xf] %vm2025_vm3, %v2200_v31  ;;  %v1960_v34 = vadd.f32 %v3170_v35, %v1938_v16 }
 0x470   : > { %2040 = vst.msk [vmem:[%s3180_s27 + $0x38] sm:$0xf] %vm2025_vm3, %v2201_v19 }
 0x471   : > { %v2202_v22 = vpack.c.bf16 %v1960_v34, %v1960_v34 }
 0x473   : > { %2041 = vst.msk [vmem:[%s3180_s27 + $0x3c] sm:$0xf] %vm2025_vm3, %v2202_v22 }
 0x474 PF: > { %s21_s17 = sadd.s32 1, %s2525_s17  }
 0x475   : > { %p18_p5 = scmp.ge.s32.totalorder %s21_s17, 6  }
 0x477   :  { %20 = sbr.rel (!%p18_p5) target bundleno = 1 (0x1), region = 97 }

// kernel: protein_mpnn_forward.21
= control target key start
LH: loop header
LB: loop body
LE: loop exit
PB: predicated region body
PF: predicated region fallthrough
CT: control target
= control target key end

     0   :  { %s403_s12 = smov 0   ;;  %s442_s0 = inlined_call_operand.vmem [shape: f32[64,32], index: 0, kind: input, shape index: {}]   ;;  %s443_s1 = inlined_call_operand.vmem [shape: bf16[32,21], index: 1, kind: input, shape index: {}]   ;;  %s444_s2 = inlined_call_operand.vmem [shape: f32[1,21], index: 2, kind: input, shape index: {}]   ;;  %s445_s3 = inlined_call_operand.vmem [shape: f32[64,21], index: 3, kind: output, shape index: {}]  }
   0x1 LB: > { %s327_s13 = sadd.s32 4294967295, %s379_s12   ;;  %p331_p0 = scmp.ge.s32.totalorder %s379_s12, 1  ;;  %s379_s12 = sphi %s403_s12, %s13_s12  }
   0x2   : > { %p138_p1 = scmp.lt.s32.totalorder %s379_s12, 5 }
   0x4   : > { %p139_p2 = pnand %p331_p0, %p138_p1 }
   0x5   : > { %v363_v0 = vld [vmem:[%s443_s1] sm:$0xff] (!%p139_p2)   ;;  %v381_v1 = vmov (!%p139_p2), 0.0   ;;  %v364_v2 = vld [vmem:[%s443_s1 + $0x8] sm:$0xff] (!%p139_p2)   ;;  %vm382_vm0 = vmmov (!%p139_p2), 0   ;;  %s332_s18 = sshll.u32 (!%p139_p2), %s327_s13, 1  ;;  %vm201_vm1 = vcmask (!%p139_p2), 261120  }
   0x6   : > { %142 = sbr.rel (%p139_p2) target bundleno = 552 (0x228), region = 32  ;;  %345 = vmatprep.subr.bf16.mxu0 (!%p139_p2), %v381_v1  ;;  %349 = vmatprep.mubr.msk.bf16.mxu0 (!%p139_p2), %vm382_vm0, %v381_v1  ;;  %p163_p3 = scmp.lt.s32.totalorder (!%p139_p2), %s332_s18, 7  ;;  %v336_v6 = vld [vmem:[%s444_s2] ss:$0 sm:$0xff] (!%p139_p2)  ;;  %vm246_vm2 = vcmask (!%p139_p2), 171008  }
   0x7   : > { %346 = vmatpush3.bf16.msra.mxu0 (!%p139_p2), %v363_v0 }
   0x8   : > { %347 = vmatprep.subr.bf16.mxu0 (!%p139_p2), %v381_v1 }
   0xb   : > { %348 = vmatpush3.bf16.msra.mxu0 (!%p139_p2), %v364_v2 }
   0xd   : > { %s447_s18 = smov (!%p163_p3, %s332_s18), 7 }
   0xe   : > { %s333_s19 = sshll.u32 %s447_s18, 3 }
   0xf   : > { %s166_s22 = scalar_lea.vmem %s442_s0, %s333_s19  ;;  %s172_s27 = scalar_lea.vmem %s445_s3, %s333_s19 }
  0x10   : > { %v175_v3 = vld [vmem:[%s166_s22] sm:$0xff]  ;;  %v176_v4 = vld [vmem:[%s166_s22 + $0x8] sm:$0xff] }
  0x11   : > { %v182_v5 = vpack.c.bf16 %v176_v4, %v175_v3 }
  0x13   : > { %350 = vmatmul.mubr.msk.bf16.vlgmr.msra.gmra.mrb[0].mxu0 %vm201_vm1, %v182_v5 }
  0xe6   : > { %v239_v7 = vpop.f32.mrb[0].mxu0 }
  0xe7   : > { %v240_v8 = vadd.f32 %v336_v6, %v239_v7  ;;  %v351_v9 = vpop.f32.mrb[1].mxu0 }
  0xe8   : > { %v242_v10 = vpop.f32.mrb[2].mxu0 }
  0xe9   : > { %v243_v11 = vadd.f32 %v336_v6, %v242_v10  ;;  %v352_v12 = vpop.f32.mrb[3].mxu0  ;;  %v247_v13 = vsel %vm246_vm2, %v240_v8, -inf }
  0xea   : > { %248 = vmax.xlane.f32.xlu0 %v247_v13 }
  0xeb   : > { %v250_v14 = vsel %vm246_vm2, %v243_v11, -inf }
  0xee   : > { %251 = vmax.xlane.f32.xlu0 %v250_v14 }
 0x177   : > { %v249_v15 = vpop.xlane.xlu0 %248 }
 0x178   : > { %v253_v16 = vsub.f32 %v240_v8, %v249_v15 }
 0x17a   : > { %v255_v17 = vmul.f32 1.442695, %v253_v16 }
 0x17b   : > { %v252_v18 = vpop.xlane.xlu0 %251 }
 0x17c   : > { %365 = vpow2.f32 %v255_v17  ;;  %v254_v19 = vsub.f32 %v243_v11, %v252_v18 }
 0x17e   : > { %v257_v20 = vmul.f32 1.442695, %v254_v19 }
 0x180   : > { %367 = vpow2.f32 %v257_v20 }
 0x186   : > { %v366_v21 = vpop.eup %365 }
 0x187   : > { %v259_v22 = vsel %vm246_vm2, %v366_v21, 0.0 }
 0x188   : > { %260 = vadd.xlane.f32.xlu1 %v259_v22 }
 0x18a   : > { %v368_v23 = vpop.eup %367 }
 0x18b   : > { %v262_v24 = vsel %vm246_vm2, %v368_v23, 0.0 }
 0x18c   : > { %263 = vadd.xlane.f32.xlu1 %v262_v24 }
 0x215   : > { %v261_v25 = vpop.xlane.xlu1 %260 }
 0x216   : > { %369 = vrcp.f32 %v261_v25 }
 0x219   : > { %v264_v26 = vpop.xlane.xlu1 %263 }
 0x21a   : > { %371 = vrcp.f32 %v264_v26 }
 0x220   : > { %v370_v27 = vpop.eup %369 }
 0x221   : > { %v266_v28 = vmul.f32 %v370_v27, %v366_v21 }
 0x223   : > { %269 = vst.msk [vmem:[%s172_s27] sm:$0xff] %vm246_vm2, %v266_v28 }
 0x224   : > { %v372_v29 = vpop.eup %371 }
 0x225   : > { %v268_v30 = vmul.f32 %v372_v29, %v368_v23 }
 0x227   : > { %270 = vst.msk [vmem:[%s172_s27 + $0x8] sm:$0xff] %vm246_vm2, %v268_v30 }
 0x228 PF: > { %s13_s12 = sadd.s32 1, %s379_s12  }
 0x229   : > { %p10_p4 = scmp.ge.s32.totalorder %s13_s12, 6  }
 0x22b   :  { %12 = sbr.rel (!%p10_p4) target bundleno = 1 (0x1), region = 62 }

// kernel: protein_mpnn_forward.18
= control target key start
LH: loop header
LB: loop body
LE: loop exit
PB: predicated region body
PF: predicated region fallthrough
CT: control target
= control target key end

     0   :  { %s3666_s0 = inlined_call_operand.vmem [shape: f32[64,32], index: 0, kind: input, shape index: {}]   ;;  %s3667_s1 = inlined_call_operand.vmem [shape: bf16[512,96], index: 1, kind: input, shape index: {}]   ;;  %s3668_s2 = inlined_call_operand.vmem [shape: f32[64,8], index: 2, kind: input, shape index: {}]   ;;  %s3669_s3 = inlined_call_operand.vmem [shape: f32[64,1], index: 3, kind: input, shape index: {}]   ;;  %s3670_s4 = inlined_call_operand.vmem [shape: bf16[32,32], index: 4, kind: input, shape index: {}]   ;;  %s3671_s5 = inlined_call_operand.vmem [shape: bf16[96,32], index: 5, kind: input, shape index: {}]   ;;  %s3672_s6 = inlined_call_operand.vmem [shape: f32[1,32], index: 6, kind: input, shape index: {}]   ;;  %s3673_s7 = inlined_call_operand.vmem [shape: bf16[32,32], index: 7, kind: input, shape index: {}]   ;;  %s3674_s8 = inlined_call_operand.vmem [shape: f32[1,32], index: 8, kind: input, shape index: {}]   ;;  %s3675_s9 = inlined_call_operand.vmem [shape: bf16[32,32], index: 9, kind: input, shape index: {}]   ;;  %s3676_s10 = inlined_call_operand.vmem [shape: f32[1,32], index: 10, kind: input, shape index: {}]   ;;  %s3677_s11 = inlined_call_operand.vmem [shape: f32[1,32], index: 11, kind: input, shape index: {}]   ;;  %s3678_s12 = inlined_call_operand.vmem [shape: f32[1,32], index: 12, kind: input, shape index: {}]   ;;  %s3679_s13 = inlined_call_operand.vmem [shape: bf16[32,128], index: 13, kind: input, shape index: {}]   ;;  %s3680_s14 = inlined_call_operand.vmem [shape: f32[1,128], index: 14, kind: input, shape index: {}]   ;;  %s3681_s15 = inlined_call_operand.vmem [shape: bf16[128,32], index: 15, kind: input, shape index: {}]   ;;  %s3682_s16 = inlined_call_operand.vmem [shape: f32[1,32], index: 16, kind: input, shape index: {}]   ;;  %s3683_s17 = inlined_call_operand.vmem [shape: f32[1,32], index: 17, kind: input, shape index: {}]   ;;  %s3684_s18 = inlined_call_operand.vmem [shape: f32[1,32], index: 18, kind: input, shape index: {}]   ;;  %s3685_s19 = inlined_call_operand.vmem [shape: f32[64,32], index: 19, kind: output, shape index: {}]  }
   0x1   :  { %3686 = sst [smem:[#allocation2_spill]] %s3666_s0  ;;  %s3113_s0 = smov 0  }
   0x2   :  { %3687 = sst [smem:[#allocation3_spill]] %s3667_s1 }
   0x3   :  { %3688 = sst [smem:[#allocation4_spill]] %s3668_s2 }
   0x4   :  { %3689 = sst [smem:[#allocation5_spill]] %s3669_s3 }
   0x5 LB: > { %s2600_s30 = sadd.s32 4294967295, %s3007_s0   ;;  %p2604_p0 = scmp.ge.s32.totalorder %s3007_s0, 1  ;;  %s3007_s0 = sphi %s3113_s0, %s29_s0  }
   0x6   : > { %p571_p1 = scmp.lt.s32.totalorder %s3007_s0, 5 }
   0x8   : > { %p572_p2 = pnand %p2604_p0, %p571_p1 }
   0x9   : > { %v2823_v0 = vld [vmem:[%s3671_s5] sm:$0xff] (!%p572_p2)   ;;  %v2824_v1 = vld [vmem:[%s3671_s5 + $0x8] sm:$0xff] (!%p572_p2)   ;;  %v3009_v2 = vmov (!%p572_p2), 0.0   ;;  %vm3010_vm0 = vmmov (!%p572_p2), 0   ;;  %s2605_s24 = sshll.u32 (!%p572_p2), %s2600_s30, 1  ;;  %v2826_v4 = vld [vmem:[%s3671_s5 + $0x10] sm:$0xff] (!%p572_p2)   ;;  %v1016_v22 = vlaneseq (!%p572_p2) }
   0xa   : > { %575 = sbr.rel (%p572_p2) target bundleno = 2003 (0x7d3), region = 96  ;;  %2717 = vmatprep.subr.bf16.mxu0 (!%p572_p2), %v3009_v2  ;;  %2725 = vmatprep.subr.bf16.mxu1 (!%p572_p2), %v2823_v0  ;;  %v2825_v3 = vld [vmem:[%s3670_s4] sm:$0xff] (!%p572_p2)   ;;  %p643_p3 = scmp.lt.s32.totalorder (!%p572_p2), %s2605_s24, 7  ;;  %v2827_v5 = vld [vmem:[%s3670_s4 + $0x8] sm:$0xff] (!%p572_p2)   ;;  %v2828_v6 = vld [vmem:[%s3671_s5 + $0x18] sm:$0xff] (!%p572_p2)   ;;  %vm767_vm1 = vcmask (!%p572_p2), 261120  }
   0xb   : > { %2721 = vmatprep.mubr.msk.bf16.mxu0 (!%p572_p2), %vm3010_vm0, %v3009_v2  ;;  %2726 = vmatpush3.bf16.msra.mxu1 (!%p572_p2), %v2823_v0  ;;  %s2607_s28 = sshll.u32 (!%p572_p2), %s2600_s30, 4  ;;  %s3690_s2 = sld [smem:[#allocation2_spill]] (!%p572_p2)  ;;  %v2829_v10 = vld [vmem:[%s3671_s5 + $0x20] sm:$0xff] (!%p572_p2)   ;;  %vm888_vm2 = vcmask (!%p572_p2), 785408   ;;  %v2830_v12 = vld [vmem:[%s3671_s5 + $0x28] sm:$0xff] (!%p572_p2)   ;;  %v1017_v23 = vshrl.u32 (!%p572_p2), %v1016_v22, 7 }
   0xc   : > { %2727 = vmatprep.subr.bf16.mxu1 (!%p572_p2), %v2824_v1  ;;  %2718 = vmatpush3.bf16.msra.mxu0 (!%p572_p2), %v2825_v3  ;;  %p649_p4 = scmp.lt.s32.totalorder (!%p572_p2), %s2607_s28, 63  ;;  %s3691_s27 = sld [smem:[#allocation3_spill]] (!%p572_p2)  ;;  %v2839_v20 = vld [vmem:[%s3673_s7] sm:$0xff] (!%p572_p2)   ;;  %v2840_v21 = vld [vmem:[%s3673_s7 + $0x8] sm:$0xff] (!%p572_p2)   ;;  %v3011_v44 = vmov (!%p572_p2), 1966171168  }
   0xd   : > { %2719 = vmatprep.subr.bf16.mxu0 (!%p572_p2), %v3009_v2  ;;  %s3692_s3 = sld [smem:[#allocation4_spill]] (!%p572_p2)  ;;  %v3189_v26 = vsub.s32 (!%p572_p2), 0, %v1017_v23  ;;  %v1842_v28 = vsub.s32 (!%p572_p2), 1, %v1017_v23  ;;  %v1849_v31 = vsub.s32 (!%p572_p2), 2, %v1017_v23  ;;  %v1856_v34 = vsub.s32 (!%p572_p2), 3, %v1017_v23 }
   0xe   : > { %v1863_v37 = vsub.s32 (!%p572_p2), 4, %v1017_v23  ;;  %v1870_v40 = vsub.s32 (!%p572_p2), 5, %v1017_v23  ;;  %v1877_v43 = vsub.s32 (!%p572_p2), 6, %v1017_v23  ;;  %v1014_v45 = vunpack.c.l.s4 (!%p572_p2), %v3011_v44  ;;  %v2615_v51 = vld [vmem:[%s3672_s6] ss:$0 sm:$0xff] (!%p572_p2) }
   0xf   : > { %2728 = vmatpush3.bf16.msra.mxu1 (!%p572_p2), %v2824_v1  ;;  %v1884_v48 = vsub.s32 (!%p572_p2), 7, %v1017_v23  ;;  %vm2136_vm3 = vcmask (!%p572_p2), 1041409   ;;  %vm2138_vm4 = vcmask (!%p572_p2), 1042434   ;;  %vm2140_vm5 = vcmask (!%p572_p2), 1043459  }
  0x10   : > { %2729 = vmatprep.subr.bf16.mxu1 (!%p572_p2), %v2826_v4  ;;  %2720 = vmatpush3.bf16.msra.mxu0 (!%p572_p2), %v2827_v5  ;;  %v1015_v49 = vunpack.c.0.s8 (!%p572_p2), %v1014_v45  ;;  %vm2142_vm6 = vcmask (!%p572_p2), 1044484   ;;  %vm2144_vm7 = vcmask (!%p572_p2), 1045509   ;;  %vm2146_vm8 = vcmask (!%p572_p2), 1046534  }
  0x11   : > { %s3695_s24 = smov (!%p643_p3, %s2605_s24), 7  ;;  %s3697_s28 = smov (!%p649_p4, %s2607_s28), 63  ;;  %2753 = vmatprep.subr.bf16.mxu0 %v2839_v20  ;;  %vm1961_vm9 = vcmask 64512   ;;  %vm2148_vm10 = vcmask 1047559  }
  0x12   : > { %s3140_s29 = sshll.u32 %s3695_s24, 3  ;;  %s2608_s25 = sshll.u32 %s3697_s28, 2  ;;  %v1018_v53 = vsub.s32 %v1015_v49, %v1017_v23 }
  0x13   : > { %s3149_s23 = scalar_lea.vmem %s3690_s2, %s3140_s29  ;;  %2730 = vmatpush3.bf16.msra.mxu1 %v2826_v4  ;;  %s652_s20 = scalar_lea.vmem %s3691_s27, %s2608_s25 }
  0x14   : > { %v673_v7 = vld [vmem:[%s3149_s23] sm:$0xff]  ;;  %v674_v8 = vld [vmem:[%s3149_s23 + $0x8] sm:$0xff]  ;;  %2731 = vmatprep.subr.bf16.mxu1 %v2828_v6  ;;  %v2833_v14 = vld [vmem:[%s652_s20 + $0x10] sm:$0xff]   ;;  %s3185_s26 = scalar_lea.vmem %s3692_s3, %s3140_s29  ;;  %s670_s25 = scalar_lea.vmem %s3685_s19, %s3140_s29 }
  0x15   : > { %v748_v9 = vpack.c.bf16 %v674_v8, %v673_v7  ;;  %v2831_v11 = vld [vmem:[%s652_s20] sm:$0xff]   ;;  %v2832_v13 = vld [vmem:[%s652_s20 + $0x8] sm:$0xff]   ;;  %v2834_v15 = vld [vmem:[%s652_s20 + $0x18] sm:$0xff]  }
  0x16   : > { %2737 = vmatprep.mubr.msk.bf16.mxu1 %vm888_vm2, %v2831_v11  ;;  %v2835_v16 = vld [vmem:[%s652_s20 + $0x20] sm:$0xff]   ;;  %v2836_v17 = vld [vmem:[%s652_s20 + $0x28] sm:$0xff]   ;;  %v2837_v18 = vld [vmem:[%s652_s20 + $0x30] sm:$0xff]  }
  0x17   : > { %2722 = vmatmul.mubr.msk.bf16.vlgmr.msra.gmra.mrb[0].mxu0 %vm767_vm1, %v748_v9  ;;  %2732 = vmatpush3.bf16.msra.mxu1 %v2828_v6  ;;  %v2838_v19 = vld [vmem:[%s652_s20 + $0x38] sm:$0xff]   ;;  %v691_v24 = vld [vmem:[%s3185_s26] sm:$0xff]  ;;  %v692_v25 = vld [vmem:[%s3185_s26 + $0x8] sm:$0xff]  ;;  %s3693_s20 = sld [smem:[#allocation5_spill]] }
  0x18   : > { %2733 = vmatprep.subr.bf16.mxu1 %v2829_v10  ;;  %2754 = vmatpush3.bf16.msra.mxu0 %v2839_v20  ;;  %v1836_v27 = vrot.slane %v691_v24, %v3189_v26  ;;  %v1892_v29 = vrot.slane %v692_v25, %v3189_v26  ;;  %v1843_v30 = vrot.slane %v691_v24, %v1842_v28 }
  0x19   : > { %2755 = vmatprep.subr.bf16.mxu0 %v2840_v21  ;;  %v1899_v32 = vrot.slane %v692_v25, %v1842_v28  ;;  %v1850_v33 = vrot.slane %v691_v24, %v1849_v31  ;;  %v1906_v35 = vrot.slane %v692_v25, %v1849_v31  ;;  %v1857_v36 = vrot.slane %v691_v24, %v1856_v34 }
  0x1a   : > { %1838 = vbcast.lane.b32.xlu0 %v1836_v27, 256  ;;  %1894 = vbcast.lane.b32.xlu1 %v1892_v29, 256  ;;  %v1913_v38 = vrot.slane %v692_v25, %v1856_v34  ;;  %v1864_v39 = vrot.slane %v691_v24, %v1863_v37  ;;  %v1920_v41 = vrot.slane %v692_v25, %v1863_v37 }
  0x1b   : > { %2734 = vmatpush3.bf16.msra.mxu1 %v2829_v10  ;;  %v1871_v42 = vrot.slane %v691_v24, %v1870_v40  ;;  %v1927_v46 = vrot.slane %v692_v25, %v1870_v40  ;;  %v1878_v47 = vrot.slane %v691_v24, %v1877_v43  ;;  %v1934_v50 = vrot.slane %v692_v25, %v1877_v43 }
  0x1c   : > { %2735 = vmatprep.subr.bf16.mxu1 %v2830_v12  ;;  %2756 = vmatpush3.bf16.msra.mxu0 %v2840_v21  ;;  %v1885_v52 = vrot.slane %v691_v24, %v1884_v48  ;;  %v1941_v54 = vrot.slane %v692_v25, %v1884_v48 }
  0x1d   : > { %2773 = vmatprep.subr.bf16.mxu0 %v3009_v2  ;;  %s664_s21 = scalar_lea.vmem %s3693_s20, %s3140_s29 }
  0x1e   : > { %1845 = vbcast.lane.b32.xlu0 %v1843_v30, 256  ;;  %1901 = vbcast.lane.b32.xlu1 %v1899_v32, 256 }
  0x1f   : > { %2736 = vmatpush3.bf16.msra.mxu1 %v2830_v12 }
  0x20   : > { %2789 = vmatprep.subr.bf16.mxu1 %v3009_v2 }
  0x22   : > { %2738 = vmatmul.mubr.msk.bf16.vlgmr.msra.gmra.mrb[0].mxu1 %vm888_vm2, %v2832_v13  ;;  %1852 = vbcast.lane.b32.xlu0 %v1850_v33, 256 }
  0x23   : > { %2741 = vmatprep.mubr.msk.bf16.mxu1 %vm888_vm2, %v2833_v14  ;;  %1908 = vbcast.lane.b32.xlu1 %v1906_v35, 256 }
  0x26   : > { %1859 = vbcast.lane.b32.xlu0 %v1857_v36, 256 }
  0x27   : > { %1915 = vbcast.lane.b32.xlu1 %v1913_v38, 256 }
  0x2a   : > { %2742 = vmatmul.mubr.msk.bf16.gmra.mrb[4].mxu1 %vm888_vm2, %v2834_v15  ;;  %1866 = vbcast.lane.b32.xlu0 %v1864_v39, 256 }
  0x2b   : > { %2745 = vmatprep.mubr.msk.bf16.mxu1 %vm888_vm2, %v2835_v16  ;;  %1922 = vbcast.lane.b32.xlu1 %v1920_v41, 256 }
  0x2e   : > { %1873 = vbcast.lane.b32.xlu0 %v1871_v42, 256 }
  0x2f   : > { %1929 = vbcast.lane.b32.xlu1 %v1927_v46, 256 }
  0x32   : > { %2746 = vmatmul.mubr.msk.bf16.gmra.mrb[8].mxu1 %vm888_vm2, %v2836_v17  ;;  %1880 = vbcast.lane.b32.xlu0 %v1878_v47, 256 }
  0x33   : > { %2749 = vmatprep.mubr.msk.bf16.mxu1 %vm888_vm2, %v2837_v18  ;;  %1936 = vbcast.lane.b32.xlu1 %v1934_v50, 256 }
  0x36   : > { %1887 = vbcast.lane.b32.xlu0 %v1885_v52, 256 }
  0x37   : > { %1943 = vbcast.lane.b32.xlu1 %v1941_v54, 256 }
  0x3a   : > { %2750 = vmatmul.mubr.msk.bf16.gmra.mrb[12].mxu1 %vm888_vm2, %v2838_v19 }
  0x3b   : > { %2805 = vmatprep.mubr.msk.bf16.mxu1 %vm3010_vm0, %v3009_v2 }
  0xea   : > { %v805_v55 = vpop.f32.mrb[0].mxu0 }
  0xeb   : > { %v806_v56 = vadd.f32 %v2615_v51, %v805_v55  ;;  %v2723_v57 = vpop.f32.mrb[1].mxu0 }
  0xec   : > { %v808_v58 = vpop.f32.mrb[2].mxu0 }
  0xed   : > { %v1012_v59 = vcombine.high %v806_v56, %v806_v56  ;;  %v1019_v60 = vrot.slane %v806_v56, %v1018_v53  ;;  %v809_v61 = vadd.f32 %v2615_v51, %v808_v58  ;;  %v2724_v62 = vpop.f32.mrb[3].mxu0 }
  0xef   : > { %v1027_v63 = vcombine.high %v1019_v60, %v1019_v60  ;;  %v1035_v0 = vrot.slane %v1019_v60, %v1018_v53  ;;  %v1061_v1 = vcombine.high %v809_v61, %v809_v61  ;;  %v1068_v3 = vrot.slane %v809_v61, %v1018_v53 }
  0xf0   : > { %v1026_v4 = vrot.slane %v1012_v59, %v1018_v53 }
  0xf1   : > { %v1075_v5 = vrot.slane %v1061_v1, %v1018_v53  ;;  %v1057_v6 = vcombine.high %v1035_v0, %v1035_v0  ;;  %v1076_v7 = vcombine.high %v1068_v3, %v1068_v3  ;;  %v3196_v8 = vrot.slane %v1068_v3, %v1018_v53 }
  0xf2   : > { %v1049_v9 = vrot.slane %v1027_v63, %v1018_v53  ;;  %v1028_v13 = vcombine.high %v1026_v4, %v1026_v4  ;;  %v1113_v17 = vrot.slane %v1035_v0, %v3189_v26  ;;  %v1042_v18 = vrot.slane %v1026_v4, %v1018_v53 }
  0xf3   : > { %v1077_v10 = vcombine.high %v1075_v5, %v1075_v5  ;;  %v3198_v11 = vrot.slane %v1075_v5, %v1018_v53  ;;  %v1121_v14 = vrot.slane %v1057_v6, %v3189_v26  ;;  %v1106_v15 = vcombine.high %v3196_v8, %v3196_v8 }
  0xf4   : > { %v1059_v12 = vcombine.high %v1049_v9, %v1049_v9  ;;  %v1145_v16 = vrot.slane %v3196_v8, %v3189_v26  ;;  %v3206_v19 = vrot.slane %v1076_v7, %v1018_v53  ;;  %v1117_v27 = vrot.slane %v1049_v9, %v3189_v26 }
  0xf5   : > { %v1107_v20 = vcombine.high %v3198_v11, %v3198_v11  ;;  %v3212_v22 = vrot.slane %v1106_v15, %v3189_v26  ;;  %v1161_v23 = vrot.slane %v3198_v11, %v3189_v26  ;;  %v3216_v24 = vrot.slane %v1077_v10, %v1018_v53  ;;  %v2739_v25 = vpop.f32.mrb[0].mxu1 }
  0xf6   : > { %v1125_v21 = vrot.slane %v1059_v12, %v3189_v26  ;;  %v1108_v28 = vcombine.high %v3206_v19, %v3206_v19  ;;  %v1149_v29 = vrot.slane %v3206_v19, %v3189_v26  ;;  %v3226_v31 = vadd.f32 %v2739_v25, %v1121_v14  ;;  %v947_v32 = vpop.f32.mrb[1].mxu1 }
  0xf7   : > { %v3224_v30 = vrot.slane %v1107_v20, %v3189_v26  ;;  %v1056_v33 = vrot.slane %v1028_v13, %v1018_v53  ;;  %v1109_v34 = vcombine.high %v3216_v24, %v3216_v24  ;;  %v1165_v35 = vrot.slane %v3216_v24, %v3189_v26  ;;  %v2740_v37 = vpop.f32.mrb[2].mxu1 }
  0xf8   : > { %v3232_v36 = vadd.f32 %v1113_v17, %v947_v32  ;;  %v3235_v38 = vrot.slane %v1108_v28, %v3189_v26  ;;  %v1208_v39 = vmul.f32 0.044715, %v3226_v31  ;;  %v3238_v40 = vadd.f32 %v2740_v37, %v1125_v21  ;;  %v950_v41 = vpop.f32.mrb[3].mxu1 }
  0xf9   : > { %v1058_v42 = vcombine.high %v1042_v18, %v1042_v18  ;;  %v3241_v43 = vrot.slane %v1109_v34, %v3189_v26  ;;  %v3244_v45 = vadd.f32 %v1117_v27, %v950_v41  ;;  %v1060_v48 = vcombine.high %v1056_v33, %v1056_v33 }
  0xfa   : > { %v1206_v44 = vmul.f32 0.044715, %v3232_v36  ;;  %v1224_v46 = vmul.f32 %v1208_v39, %v3226_v31  ;;  %v1209_v47 = vmul.f32 0.044715, %v3238_v40  ;;  %v1129_v57 = vrot.slane %v1042_v18, %v3189_v26 }
  0xfb   : > { %v1207_v50 = vmul.f32 0.044715, %v3244_v45  ;;  %v1137_v53 = vrot.slane %v1058_v42, %v3189_v26  ;;  %v1141_v62 = vrot.slane %v1060_v48, %v3189_v26  ;;  %v1133_v4 = vrot.slane %v1056_v33, %v3189_v26 }
  0xfc   : > { %v1222_v49 = vmul.f32 %v1206_v44, %v3232_v36  ;;  %v1240_v51 = vmul.f32 %v1224_v46, %v3226_v31  ;;  %v1225_v52 = vmul.f32 %v1209_v47, %v3238_v40 }
  0xfd   : > { %v1223_v55 = vmul.f32 %v1207_v50, %v3244_v45  ;;  %v2743_v56 = vpop.f32.mrb[4].mxu1 }
  0xfe   : > { %v1238_v54 = vmul.f32 %v1222_v49, %v3232_v36  ;;  %v1256_v58 = vadd.f32 %v1240_v51, %v3226_v31  ;;  %v1241_v59 = vmul.f32 %v1225_v52, %v3238_v40  ;;  %v3258_v60 = vadd.f32 %v2743_v56, %v1137_v53  ;;  %v963_v61 = vpop.f32.mrb[5].mxu1 }
  0xff   : > { %v1239_v0 = vmul.f32 %v1223_v55, %v3244_v45  ;;  %v3263_v1 = vadd.f32 %v1129_v57, %v963_v61  ;;  %v2744_v3 = vpop.f32.mrb[6].mxu1 }
 0x100   : > { %v1254_v63 = vadd.f32 %v1238_v54, %v3232_v36  ;;  %v1272_v5 = vmul.f32 0.7978846, %v1256_v58  ;;  %v1257_v6 = vadd.f32 %v1241_v59, %v3238_v40  ;;  %v1212_v7 = vmul.f32 0.044715, %v3258_v60  ;;  %v966_v10 = vpop.f32.mrb[7].mxu1 }
 0x101   : > { %v3268_v9 = vadd.f32 %v2744_v3, %v1141_v62  ;;  %v1255_v13 = vadd.f32 %v1239_v0, %v3244_v45  ;;  %v1210_v14 = vmul.f32 0.044715, %v3263_v1  ;;  %v3272_v15 = vadd.f32 %v1133_v4, %v966_v10 }
 0x102   : > { %v1270_v12 = vmul.f32 0.7978846, %v1254_v63  ;;  %v1288_v17 = vmul.f32 2.0, %v1272_v5  ;;  %v1273_v18 = vmul.f32 0.7978846, %v1257_v6  ;;  %v1228_v20 = vmul.f32 %v1212_v7, %v3258_v60 }
 0x103   : > { %v1213_v21 = vmul.f32 0.044715, %v3268_v9  ;;  %v1271_v27 = vmul.f32 0.7978846, %v1255_v13  ;;  %v1226_v28 = vmul.f32 %v1210_v14, %v3263_v1  ;;  %v1211_v32 = vmul.f32 0.044715, %v3272_v15 }
 0x104   : > { %v1286_v25 = vmul.f32 2.0, %v1270_v12  ;;  %v1306_v33 = vmul.f32 1.442695, %v1288_v17  ;;  %v1289_v34 = vmul.f32 2.0, %v1273_v18  ;;  %v1244_v37 = vmul.f32 %v1228_v20, %v3258_v60 }
 0x105   : > { %v1229_v39 = vmul.f32 %v1213_v21, %v3268_v9  ;;  %v1287_v42 = vmul.f32 2.0, %v1271_v27  ;;  %v1242_v44 = vmul.f32 %v1226_v28, %v3263_v1  ;;  %v1227_v46 = vmul.f32 %v1211_v32, %v3272_v15  ;;  %v2747_v47 = vpop.f32.mrb[8].mxu1 }
 0x106   : > { %v1302_v41 = vmul.f32 1.442695, %v1286_v25  ;;  %2853 = vpow2.f32 %v1306_v33  ;;  %v1308_v48 = vmul.f32 1.442695, %v1289_v34  ;;  %v1260_v49 = vadd.f32 %v1244_v37, %v3258_v60  ;;  %v979_v51 = vpop.f32.mrb[9].mxu1 }
 0x107   : > { %v1245_v50 = vmul.f32 %v1229_v39, %v3268_v9  ;;  %v1304_v52 = vmul.f32 1.442695, %v1287_v42  ;;  %v1258_v53 = vadd.f32 %v1242_v44, %v3263_v1  ;;  %v1243_v54 = vmul.f32 %v1227_v46, %v3272_v15  ;;  %v2748_v55 = vpop.f32.mrb[10].mxu1 }
 0x108   : > { %2855 = vpow2.f32 %v1302_v41  ;;  %v1276_v56 = vmul.f32 0.7978846, %v1260_v49  ;;  %v3288_v58 = vadd.f32 %v2747_v47, %v3212_v22  ;;  %v982_v59 = vpop.f32.mrb[11].mxu1  ;;  %v3294_v63 = vadd.f32 %v1145_v16, %v979_v51 }
 0x109   : > { %2857 = vpow2.f32 %v1308_v48  ;;  %v1261_v57 = vadd.f32 %v1245_v50, %v3268_v9  ;;  %v1274_v61 = vmul.f32 0.7978846, %v1258_v53  ;;  %v1259_v62 = vadd.f32 %v1243_v54, %v3272_v15 }
 0x10a   : > { %2859 = vpow2.f32 %v1304_v52  ;;  %v1292_v0 = vmul.f32 2.0, %v1276_v56  ;;  %v1216_v4 = vmul.f32 0.044715, %v3288_v58  ;;  %v3298_v5 = vadd.f32 %v2748_v55, %v3235_v38 }
 0x10b   : > { %v1277_v3 = vmul.f32 0.7978846, %v1261_v57  ;;  %v1290_v6 = vmul.f32 2.0, %v1274_v61  ;;  %v1275_v22 = vmul.f32 0.7978846, %v1259_v62  ;;  %v3304_v10 = vadd.f32 %v1149_v29, %v982_v59 }
 0x10c   : > { %v1214_v7 = vmul.f32 0.044715, %v3294_v63  ;;  %v1314_v12 = vmul.f32 1.442695, %v1292_v0  ;;  %v1232_v16 = vmul.f32 %v1216_v4, %v3288_v58  ;;  %v1217_v13 = vmul.f32 0.044715, %v3298_v5 }
 0x10d   : > { %v1293_v8 = vmul.f32 2.0, %v1277_v3  ;;  %v1310_v14 = vmul.f32 1.442695, %v1290_v6  ;;  %v1291_v17 = vmul.f32 2.0, %v1275_v22  ;;  %v1215_v18 = vmul.f32 0.044715, %v3304_v10 }
 0x10e   : > { %v1230_v38 = vmul.f32 %v1214_v7, %v3294_v63  ;;  %v2751_v20 = vpop.f32.mrb[12].mxu1  ;;  %2861 = vpow2.f32 %v1314_v12  ;;  %v1248_v25 = vmul.f32 %v1232_v16, %v3288_v58  ;;  %v1233_v19 = vmul.f32 %v1217_v13, %v3298_v5 }
 0x10f   : > { %v1316_v21 = vmul.f32 1.442695, %v1293_v8  ;;  %v995_v29 = vpop.f32.mrb[13].mxu1  ;;  %2863 = vpow2.f32 %v1310_v14  ;;  %v1312_v27 = vmul.f32 1.442695, %v1291_v17  ;;  %v1231_v32 = vmul.f32 %v1215_v18, %v3304_v10 }
 0x110   : > { %v1246_v28 = vmul.f32 %v1230_v38, %v3294_v63  ;;  %v2752_v33 = vpop.f32.mrb[14].mxu1  ;;  %v2854_v34 = vpop.eup %2853  ;;  %v1264_v37 = vadd.f32 %v1248_v25, %v3288_v58  ;;  %v1249_v39 = vmul.f32 %v1233_v19, %v3298_v5  ;;  %v3317_v41 = vadd.f32 %v2751_v20, %v3224_v30 }
 0x111   : > { %2865 = vpow2.f32 %v1316_v21  ;;  %v998_v42 = vpop.f32.mrb[15].mxu1  ;;  %v1336_v46 = vadd.f32 1.0, %v2854_v34  ;;  %v1247_v48 = vmul.f32 %v1231_v32, %v3304_v10  ;;  %v3326_v53 = vadd.f32 %v1161_v23, %v995_v29 }
 0x112   : > { %v2856_v44 = vpop.eup %2855  ;;  %2867 = vpow2.f32 %v1312_v27  ;;  %v1262_v47 = vadd.f32 %v1246_v28, %v3294_v63  ;;  %v1280_v50 = vmul.f32 0.7978846, %v1264_v37  ;;  %v1265_v51 = vadd.f32 %v1249_v39, %v3298_v5 }
 0x113   : > { %v2858_v49 = vpop.eup %2857  ;;  %v1220_v52 = vmul.f32 0.044715, %v3317_v41  ;;  %2869 = vrcp.f32 %v1336_v46  ;;  %v1263_v56 = vadd.f32 %v1247_v48, %v3304_v10  ;;  %v1218_v62 = vmul.f32 0.044715, %v3326_v53 }
 0x114   : > { %v2860_v30 = vpop.eup %2859  ;;  %v1337_v54 = vadd.f32 1.0, %v2858_v49  ;;  %v1278_v55 = vmul.f32 0.7978846, %v1262_v47  ;;  %v1296_v57 = vmul.f32 2.0, %v1280_v50  ;;  %v1281_v59 = vmul.f32 0.7978846, %v1265_v51 }
 0x115   : > { %v1236_v61 = vmul.f32 %v1220_v52, %v3317_v41  ;;  %v1279_v3 = vmul.f32 0.7978846, %v1263_v56  ;;  %v3332_v4 = vadd.f32 %v2752_v33, %v3241_v43  ;;  %v1234_v22 = vmul.f32 %v1218_v62, %v3326_v53 }
 0x116   : > { %2871 = vrcp.f32 %v1337_v54  ;;  %v1294_v0 = vmul.f32 2.0, %v1278_v55  ;;  %v1322_v11 = vmul.f32 1.442695, %v1296_v57  ;;  %v1297_v23 = vmul.f32 2.0, %v1281_v59 }
 0x117   : > { %v1252_v6 = vmul.f32 %v1236_v61, %v3317_v41  ;;  %v1295_v12 = vmul.f32 2.0, %v1279_v3  ;;  %v1221_v8 = vmul.f32 0.044715, %v3332_v4  ;;  %v3340_v16 = vadd.f32 %v1165_v35, %v998_v42 }
 0x118   : > { %v1318_v7 = vmul.f32 1.442695, %v1294_v0  ;;  %v2862_v13 = vpop.eup %2861  ;;  %2873 = vpow2.f32 %v1322_v11  ;;  %v1324_v14 = vmul.f32 1.442695, %v1297_v23  ;;  %v1250_v17 = vmul.f32 %v1234_v22, %v3326_v53 }
 0x119   : > { %v1268_v43 = vadd.f32 %v1252_v6, %v3317_v41  ;;  %v2864_v38 = vpop.eup %2863  ;;  %v1320_v18 = vmul.f32 1.442695, %v1295_v12  ;;  %v1237_v20 = vmul.f32 %v1221_v8, %v3332_v4  ;;  %v1219_v21 = vmul.f32 0.044715, %v3340_v16 }
 0x11a   : > { %2875 = vpow2.f32 %v1318_v7  ;;  %v1266_v26 = vadd.f32 %v1250_v17, %v3326_v53  ;;  %v1334_v24 = vadd.f32 1.0, %v2856_v44  ;;  %v1335_v28 = vadd.f32 1.0, %v2860_v30 }
 0x11b   : > { %v2866_v25 = vpop.eup %2865  ;;  %2877 = vpow2.f32 %v1324_v14  ;;  %v1284_v19 = vmul.f32 0.7978846, %v1268_v43  ;;  %v1253_v29 = vmul.f32 %v1237_v20, %v3332_v4  ;;  %v1235_v27 = vmul.f32 %v1219_v21, %v3340_v16 }
 0x11c   : > { %v2868_v35 = vpop.eup %2867  ;;  %2879 = vpow2.f32 %v1320_v18  ;;  %v1282_v33 = vmul.f32 0.7978846, %v1266_v26  ;;  %v1338_v34 = vadd.f32 1.0, %v2864_v38  ;;  %v1340_v57 = vadd.f32 1.0, %v2862_v13 }
 0x11d   : > { %v1300_v32 = vmul.f32 2.0, %v1284_v19  ;;  %2881 = vrcp.f32 %v1334_v24  ;;  %v2870_v37 = vpop.eup %2869  ;;  %v1269_v39 = vadd.f32 %v1253_v29, %v3332_v4  ;;  %v1251_v42 = vmul.f32 %v1235_v27, %v3340_v16 }
 0x11e   : > { %2883 = vrcp.f32 %v1335_v28  ;;  %v1339_v46 = vadd.f32 1.0, %v2868_v35  ;;  %v1298_v44 = vmul.f32 2.0, %v1282_v33  ;;  %v1355_v48 = vmul.f32 2.0, %v2870_v37 }
 0x11f   : > { %v1330_v47 = vmul.f32 1.442695, %v1300_v32  ;;  %2885 = vrcp.f32 %v1338_v34  ;;  %v1285_v50 = vmul.f32 0.7978846, %v1269_v39  ;;  %v1267_v51 = vadd.f32 %v1251_v42, %v3340_v16 }
 0x120   : > { %v2872_v49 = vpop.eup %2871  ;;  %2887 = vrcp.f32 %v1339_v46  ;;  %v1326_v52 = vmul.f32 1.442695, %v1298_v44  ;;  %v1384_v54 = vsub.f32 1.0, %v1355_v48  ;;  %v1341_v0 = vadd.f32 1.0, %v2866_v25 }
 0x121   : > { %2889 = vpow2.f32 %v1330_v47  ;;  %v1357_v30 = vmul.f32 2.0, %v2872_v49  ;;  %v1301_v55 = vmul.f32 2.0, %v1285_v50  ;;  %v1283_v56 = vmul.f32 0.7978846, %v1267_v51 }
 0x122   : > { %v2874_v59 = vpop.eup %2873  ;;  %2891 = vpow2.f32 %v1326_v52  ;;  %v1416_v62 = vadd.f32 1.0, %v1384_v54  ;;  %v1400_v22 = vmul.f32 0.5, %v3226_v31  ;;  %v1401_v7 = vmul.f32 0.5, %v3238_v40 }
 0x123   : > { %v1385_v61 = vsub.f32 1.0, %v1357_v30  ;;  %v1332_v11 = vmul.f32 1.442695, %v1301_v55  ;;  %v1299_v23 = vmul.f32 2.0, %v1283_v56  ;;  %2893 = vrcp.f32 %v1340_v57 }
 0x124   : > { %v2876_v3 = vpop.eup %2875  ;;  %2895 = vrcp.f32 %v1341_v0  ;;  %v1432_v17 = vmul.f32 %v1416_v62, %v1400_v22  ;;  %v1344_v20 = vadd.f32 1.0, %v2874_v59  ;;  %v1398_v32 = vmul.f32 0.5, %v3232_v36 }
 0x125   : > { %v2878_v6 = vpop.eup %2877  ;;  %v1417_v12 = vadd.f32 1.0, %v1385_v61  ;;  %2897 = vpow2.f32 %v1332_v11  ;;  %v1328_v14 = vmul.f32 1.442695, %v1299_v23  ;;  %v1342_v13 = vadd.f32 1.0, %v2876_v3 }
 0x126   : > { %v2880_v8 = vpop.eup %2879  ;;  %v1345_v19 = vadd.f32 1.0, %v2878_v6  ;;  %v1399_v46 = vmul.f32 0.5, %v3244_v45  ;;  %v1402_v48 = vmul.f32 0.5, %v3263_v1  ;;  %v1403_v50 = vmul.f32 0.5, %v3272_v15 }
 0x127   : > { %v2882_v43 = vpop.eup %2881  ;;  %v1433_v38 = vmul.f32 %v1417_v12, %v1401_v7  ;;  %v1343_v18 = vadd.f32 1.0, %v2880_v8  ;;  %2899 = vpow2.f32 %v1328_v14  ;;  %v1404_v12 = vmul.f32 0.5, %v3258_v60 }
 0x128   : > { %v2884_v21 = vpop.eup %2883  ;;  %v1351_v25 = vmul.f32 2.0, %v2882_v43  ;;  %2901 = vrcp.f32 %v1342_v13  ;;  %v1405_v8 = vmul.f32 0.5, %v3268_v9  ;;  %v1406_v60 = vmul.f32 0.5, %v3294_v63 }
 0x129   : > { %v2886_v26 = vpop.eup %2885  ;;  %v1353_v24 = vmul.f32 2.0, %v2884_v21  ;;  %v1447_v31 = vpack.c.bf16 %v1433_v38, %v1432_v17  ;;  %2903 = vrcp.f32 %v1343_v18 }
 0x12a   : > { %v2888_v40 = vpop.eup %2887  ;;  %v1382_v35 = vsub.f32 1.0, %v1351_v25  ;;  %v1359_v29 = vmul.f32 2.0, %v2886_v26  ;;  %2905 = vrcp.f32 %v1344_v20 }
 0x12b   : > { %v2890_v27 = vpop.eup %2889  ;;  %v1383_v28 = vsub.f32 1.0, %v1353_v24  ;;  %v1361_v33 = vmul.f32 2.0, %v2888_v40  ;;  %2907 = vrcp.f32 %v1345_v19 }
 0x12c   : > { %v1414_v34 = vadd.f32 1.0, %v1382_v35  ;;  %v1386_v37 = vsub.f32 1.0, %v1359_v29  ;;  %v1348_v39 = vadd.f32 1.0, %v2890_v27  ;;  %v2892_v42 = vpop.eup %2891  ;;  %v1407_v35 = vmul.f32 0.5, %v3304_v10 }
 0x12d   : > { %v1415_v47 = vadd.f32 1.0, %v1383_v28  ;;  %v1387_v44 = vsub.f32 1.0, %v1361_v33  ;;  %v2894_v49 = vpop.eup %2893  ;;  %v1346_v52 = vadd.f32 1.0, %v2892_v42  ;;  %v1408_v33 = vmul.f32 0.5, %v3288_v58 }
 0x12e   : > { %v1418_v51 = vadd.f32 1.0, %v1386_v37  ;;  %2909 = vrcp.f32 %v1348_v39  ;;  %v2896_v36 = vpop.eup %2895  ;;  %v1430_v30 = vmul.f32 %v1414_v34, %v1398_v32  ;;  %v1363_v56 = vmul.f32 2.0, %v2894_v49 }
 0x12f   : > { %v1431_v54 = vmul.f32 %v1415_v47, %v1399_v46  ;;  %v1419_v55 = vadd.f32 1.0, %v1387_v44  ;;  %v2898_v57 = vpop.eup %2897  ;;  %v1365_v61 = vmul.f32 2.0, %v2896_v36  ;;  %2911 = vrcp.f32 %v1346_v52 }
 0x130   : > { %v1434_v59 = vmul.f32 %v1418_v51, %v1402_v48  ;;  %v1388_v0 = vsub.f32 1.0, %v1363_v56  ;;  %v1349_v3 = vadd.f32 1.0, %v2898_v57  ;;  %v1409_v34 = vmul.f32 0.5, %v3298_v5 }
 0x131   : > { %v1446_v45 = vpack.c.bf16 %v1431_v54, %v1430_v30  ;;  %v1435_v62 = vmul.f32 %v1419_v55, %v1403_v50  ;;  %v2900_v1 = vpop.eup %2899  ;;  %v1389_v11 = vsub.f32 1.0, %v1365_v61  ;;  %v1412_v54 = vmul.f32 0.5, %v3317_v41  ;;  %v2841_v41 = vld [vmem:[%s3675_s9] sm:$0xff]  }
 0x132   : > { %v2902_v23 = vpop.eup %2901  ;;  %v1420_v6 = vadd.f32 1.0, %v1388_v0  ;;  %v1347_v22 = vadd.f32 1.0, %v2900_v1  ;;  %2913 = vrcp.f32 %v1349_v3  ;;  %v1413_v57 = vmul.f32 0.5, %v3332_v4 }
 0x133   : > { %2757 = vmatprep.mubr.msk.bf16.mxu0 %vm767_vm1, %v1446_v45  ;;  %v1448_v15 = vpack.c.bf16 %v1435_v62, %v1434_v59  ;;  %v2904_v7 = vpop.eup %2903  ;;  %v1421_v14 = vadd.f32 1.0, %v1389_v11  ;;  %v1367_v13 = vmul.f32 2.0, %v2902_v23  ;;  %v1410_v61 = vmul.f32 0.5, %v3326_v53  ;;  %v3384_v53 = vld [vmem:[%s3674_s8] ss:$0 sm:$0xff] }
 0x134   : > { %2758 = vmatmul.mubr.msk.bf16.vlgmr.msra.gmra.mrb[4].mxu0 %vm767_vm1, %v1447_v31  ;;  %v2906_v43 = vpop.eup %2905  ;;  %v1369_v17 = vmul.f32 2.0, %v2904_v7  ;;  %2915 = vrcp.f32 %v1347_v22  ;;  %v1436_v18 = vmul.f32 %v1420_v6, %v1404_v12  ;;  %v1411_v45 = vmul.f32 0.5, %v3340_v16 }
 0x135   : > { %2761 = vmatprep.mubr.msk.bf16.mxu0 %vm767_vm1, %v1448_v15  ;;  %v2908_v38 = vpop.eup %2907  ;;  %v1437_v20 = vmul.f32 %v1421_v14, %v1405_v8  ;;  %v1390_v21 = vsub.f32 1.0, %v1367_v13  ;;  %v1371_v25 = vmul.f32 2.0, %v2906_v43  ;;  %2774 = vmatpush3.bf16.msra.mxu0 %v2841_v41 }
 0x136   : > { %v1391_v19 = vsub.f32 1.0, %v1369_v17  ;;  %v1373_v26 = vmul.f32 2.0, %v2908_v38  ;;  %2775 = vmatprep.subr.bf16.mxu0 %v3009_v2 }
 0x137   : > { %v1449_v31 = vpack.c.bf16 %v1437_v20, %v1436_v18  ;;  %v1422_v40 = vadd.f32 1.0, %v1390_v21  ;;  %v1392_v9 = vsub.f32 1.0, %v1371_v25 }
 0x138   : > { %v2910_v24 = vpop.eup %2909  ;;  %v1423_v29 = vadd.f32 1.0, %v1391_v19  ;;  %v1393_v27 = vsub.f32 1.0, %v1373_v26 }
 0x139   : > { %v1379_v28 = vmul.f32 2.0, %v2910_v24  ;;  %v2912_v32 = vpop.eup %2911  ;;  %v1424_v37 = vadd.f32 1.0, %v1392_v9  ;;  %v1438_v39 = vmul.f32 %v1422_v40, %v1406_v60 }
 0x13a   : > { %v1439_v42 = vmul.f32 %v1423_v29, %v1407_v35  ;;  %v1425_v46 = vadd.f32 1.0, %v1393_v27  ;;  %v1375_v47 = vmul.f32 2.0, %v2912_v32 }
 0x13b   : > { %v1396_v63 = vsub.f32 1.0, %v1379_v28  ;;  %v1440_v49 = vmul.f32 %v1424_v37, %v1408_v33 }
 0x13c   : > { %2762 = vmatmul.mubr.msk.bf16.gmra.mrb[8].mxu0 %vm767_vm1, %v1449_v31  ;;  %v2914_v44 = vpop.eup %2913  ;;  %v1450_v48 = vpack.c.bf16 %v1439_v42, %v1438_v39  ;;  %v1441_v10 = vmul.f32 %v1425_v46, %v1409_v34  ;;  %v1394_v50 = vsub.f32 1.0, %v1375_v47 }
 0x13d   : > { %v1381_v51 = vmul.f32 2.0, %v2914_v44  ;;  %v1428_v30 = vadd.f32 1.0, %v1396_v63 }
 0x13e   : > { %v2916_v52 = vpop.eup %2915  ;;  %2765 = vmatprep.mubr.msk.bf16.mxu0 %vm767_vm1, %v1450_v48  ;;  %v1451_v58 = vpack.c.bf16 %v1441_v10, %v1440_v49  ;;  %v1426_v56 = vadd.f32 1.0, %v1394_v50 }
 0x13f   : > { %v1377_v36 = vmul.f32 2.0, %v2916_v52  ;;  %v1397_v5 = vsub.f32 1.0, %v1381_v51  ;;  %v1444_v0 = vmul.f32 %v1428_v30, %v1412_v54 }
 0x140   : > { %v1442_v1 = vmul.f32 %v1426_v56, %v1410_v61 }
 0x141   : > { %v1395_v55 = vsub.f32 1.0, %v1377_v36  ;;  %v1429_v59 = vadd.f32 1.0, %v1397_v5 }
 0x143   : > { %v1427_v62 = vadd.f32 1.0, %v1395_v55  ;;  %v1445_v3 = vmul.f32 %v1429_v59, %v1413_v57 }
 0x144   : > { %2766 = vmatmul.mubr.msk.bf16.gmra.mrb[12].mxu0 %vm767_vm1, %v1451_v58 }
 0x145   : > { %v1443_v11 = vmul.f32 %v1427_v62, %v1411_v45  ;;  %v1453_v23 = vpack.c.bf16 %v1445_v3, %v1444_v0 }
 0x147   : > { %v1452_v15 = vpack.c.bf16 %v1443_v11, %v1442_v1 }
 0x149   : > { %2769 = vmatprep.mubr.msk.bf16.mxu0 %vm767_vm1, %v1452_v15 }
 0x14c   : > { %2770 = vmatmul.mubr.msk.bf16.gmra.mrb[16].mxu0 %vm767_vm1, %v1453_v23 }
 0x14d   : > { %2777 = vmatprep.mubr.msk.bf16.mxu0 %vm3010_vm0, %v3009_v2 }
 0x207   : > { %v2759_v4 = vpop.f32.mrb[4].mxu0 }
 0x208   : > { %v1539_v16 = vadd.f32 %v2759_v4, %v3384_v53  ;;  %v1530_v6 = vpop.f32.mrb[5].mxu0 }
 0x209   : > { %v1531_v22 = vadd.f32 %v3384_v53, %v1530_v6  ;;  %v2760_v7 = vpop.f32.mrb[6].mxu0 }
 0x20a   : > { %v1595_v12 = vmul.f32 0.044715, %v1539_v16  ;;  %v1542_v8 = vadd.f32 %v2760_v7, %v3384_v53  ;;  %v1533_v14 = vpop.f32.mrb[7].mxu0  ;;  %v3394_v35 = vmul.f32 0.5, %v1539_v16 }
 0x20b   : > { %v1593_v13 = vmul.f32 0.044715, %v1531_v22  ;;  %v1534_v43 = vadd.f32 %v3384_v53, %v1533_v14  ;;  %v3399_v33 = vmul.f32 0.5, %v1531_v22 }
 0x20c   : > { %v1611_v17 = vmul.f32 %v1595_v12, %v1539_v16  ;;  %v1596_v38 = vmul.f32 0.044715, %v1542_v8  ;;  %v3414_v56 = vmul.f32 0.5, %v1542_v8 }
 0x20d   : > { %v1609_v18 = vmul.f32 %v1593_v13, %v1531_v22  ;;  %v1594_v20 = vmul.f32 0.044715, %v1534_v43  ;;  %v3422_v11 = vmul.f32 0.5, %v1534_v43 }
 0x20e   : > { %v1627_v21 = vmul.f32 %v1611_v17, %v1539_v16  ;;  %v1612_v25 = vmul.f32 %v1596_v38, %v1542_v8 }
 0x20f   : > { %v1625_v19 = vmul.f32 %v1609_v18, %v1531_v22  ;;  %v1610_v26 = vmul.f32 %v1594_v20, %v1534_v43  ;;  %v2763_v24 = vpop.f32.mrb[8].mxu0 }
 0x210   : > { %v1643_v31 = vadd.f32 %v1627_v21, %v1539_v16  ;;  %v1628_v60 = vmul.f32 %v1612_v25, %v1542_v8  ;;  %v3392_v40 = vadd.f32 %v2763_v24, %v3384_v53  ;;  %v1546_v9 = vpop.f32.mrb[9].mxu0 }
 0x211   : > { %v1641_v29 = vadd.f32 %v1625_v19, %v1531_v22  ;;  %v1626_v27 = vmul.f32 %v1610_v26, %v1534_v43  ;;  %v3397_v28 = vadd.f32 %v3384_v53, %v1546_v9  ;;  %v2764_v32 = vpop.f32.mrb[10].mxu0 }
 0x212   : > { %v1644_v34 = vadd.f32 %v1628_v60, %v1542_v8  ;;  %v1599_v37 = vmul.f32 0.044715, %v3392_v40  ;;  %v3403_v39 = vadd.f32 %v2764_v32, %v3384_v53  ;;  %v1549_v42 = vpop.f32.mrb[11].mxu0  ;;  %v1659_v46 = vmul.f32 0.7978846, %v1643_v31  ;;  %v2842_v8 = vld [vmem:[%s3675_s9 + $0x8] sm:$0xff]  }
 0x213   : > { %v1642_v47 = vadd.f32 %v1626_v27, %v1534_v43  ;;  %v1597_v63 = vmul.f32 0.044715, %v3397_v28  ;;  %v3407_v44 = vadd.f32 %v3384_v53, %v1549_v42  ;;  %v1657_v48 = vmul.f32 0.7978846, %v1641_v29  ;;  %2776 = vmatpush3.bf16.msra.mxu0 %v2842_v8 }
 0x214   : > { %v1615_v49 = vmul.f32 %v1599_v37, %v3392_v40  ;;  %v1600_v10 = vmul.f32 0.044715, %v3403_v39  ;;  %v1675_v50 = vmul.f32 2.0, %v1659_v46  ;;  %v1660_v51 = vmul.f32 0.7978846, %v1644_v34  ;;  %2781 = vmatprep.subr.bf16.mxu0 %v3009_v2 }
 0x215   : > { %v1613_v52 = vmul.f32 %v1597_v63, %v3397_v28  ;;  %v1598_v58 = vmul.f32 0.044715, %v3407_v44  ;;  %v1673_v36 = vmul.f32 2.0, %v1657_v48  ;;  %v1658_v5 = vmul.f32 0.7978846, %v1642_v47 }
 0x216   : > { %v1616_v30 = vmul.f32 %v1600_v10, %v3403_v39  ;;  %v1693_v54 = vmul.f32 1.442695, %v1675_v50  ;;  %v1676_v55 = vmul.f32 2.0, %v1660_v51  ;;  %v1631_v0 = vmul.f32 %v1615_v49, %v3392_v40 }
 0x217   : > { %v1629_v57 = vmul.f32 %v1613_v52, %v3397_v28  ;;  %v1614_v59 = vmul.f32 %v1598_v58, %v3407_v44  ;;  %v2767_v61 = vpop.f32.mrb[12].mxu0  ;;  %v1689_v45 = vmul.f32 1.442695, %v1673_v36  ;;  %v1674_v62 = vmul.f32 2.0, %v1658_v5 }
 0x218   : > { %v3420_v3 = vadd.f32 %v2767_v61, %v3384_v53  ;;  %v1562_v1 = vpop.f32.mrb[13].mxu0  ;;  %2917 = vpow2.f32 %v1693_v54  ;;  %v1632_v16 = vmul.f32 %v1616_v30, %v3403_v39  ;;  %v1695_v17 = vmul.f32 1.442695, %v1676_v55 }
 0x219   : > { %v1645_v23 = vadd.f32 %v1629_v57, %v3397_v28  ;;  %v1630_v15 = vmul.f32 %v1614_v59, %v3407_v44  ;;  %v1563_v41 = vadd.f32 %v3384_v53, %v1562_v1  ;;  %v2768_v4 = vpop.f32.mrb[14].mxu0  ;;  %2919 = vpow2.f32 %v1689_v45 }
 0x21a   : > { %v1603_v6 = vmul.f32 0.044715, %v3420_v3  ;;  %v3430_v22 = vadd.f32 %v2768_v4, %v3384_v53  ;;  %v1565_v7 = vpop.f32.mrb[15].mxu0  ;;  %v1691_v12 = vmul.f32 1.442695, %v1674_v62  ;;  %v3438_v38 = vadd.f32 %v1631_v0, %v3392_v40 }
 0x21b   : > { %v1646_v14 = vadd.f32 %v1630_v15, %v3407_v44  ;;  %v1601_v13 = vmul.f32 0.044715, %v1563_v41  ;;  %v1566_v43 = vadd.f32 %v3384_v53, %v1565_v7  ;;  %v1661_v19 = vmul.f32 0.7978846, %v1645_v23 }
 0x21c   : > { %v1619_v18 = vmul.f32 %v1603_v6, %v3420_v3  ;;  %v1604_v20 = vmul.f32 0.044715, %v3430_v22  ;;  %2921 = vpow2.f32 %v1691_v12  ;;  %v3444_v26 = vadd.f32 %v1632_v16, %v3403_v39 }
 0x21d   : > { %v1617_v21 = vmul.f32 %v1601_v13, %v1563_v41  ;;  %v1602_v25 = vmul.f32 0.044715, %v1566_v43  ;;  %2923 = vpow2.f32 %v1695_v17  ;;  %v3448_v60 = vmul.f32 0.5, %v1563_v41 }
 0x21e   : > { %v1635_v24 = vmul.f32 %v1619_v18, %v3420_v3  ;;  %v1620_v31 = vmul.f32 %v1604_v20, %v3430_v22  ;;  %v1677_v32 = vmul.f32 2.0, %v1661_v19  ;;  %v1662_v34 = vmul.f32 0.7978846, %v1646_v14 }
 0x21f   : > { %v1633_v9 = vmul.f32 %v1617_v21, %v1563_v41  ;;  %v1618_v29 = vmul.f32 %v1602_v25, %v1566_v43  ;;  %v2771_v27 = vpop.f32.mrb[16].mxu0  ;;  %v3455_v47 = vmul.f32 0.5, %v3397_v28  ;;  %v3457_v63 = vmul.f32 0.5, %v1566_v43 }
 0x220   : > { %v1651_v37 = vadd.f32 %v1635_v24, %v3420_v3  ;;  %v3452_v42 = vadd.f32 %v2771_v27, %v3384_v53  ;;  %v1578_v46 = vpop.f32.mrb[17].mxu0  ;;  %v1636_v49 = vmul.f32 %v1620_v31, %v3430_v22  ;;  %v1697_v30 = vmul.f32 1.442695, %v1677_v32  ;;  %v3486_v24 = vpop.permute.xlu0 %1838 }
 0x221   : > { %v1649_v48 = vadd.f32 %v1633_v9, %v1563_v41  ;;  %v1634_v10 = vmul.f32 %v1618_v29, %v1566_v43  ;;  %v3461_v50 = vadd.f32 %v3384_v53, %v1578_v46  ;;  %v2772_v51 = vpop.f32.mrb[18].mxu0  ;;  %v1678_v28 = vmul.f32 2.0, %v1662_v34 }
 0x222   : > { %v2918_v52 = vpop.eup %2917  ;;  %v1607_v58 = vmul.f32 0.044715, %v3452_v42  ;;  %v3465_v36 = vadd.f32 %v2772_v51, %v3384_v53  ;;  %v1581_v5 = vpop.f32.mrb[19].mxu0  ;;  %v3481_v18 = vmul.f32 0.5, %v3407_v44  ;;  %v1652_v20 = vadd.f32 %v1636_v49, %v3430_v22 }
 0x223   : > { %v2920_v54 = vpop.eup %2919  ;;  %v1650_v55 = vadd.f32 %v1634_v10, %v1566_v43  ;;  %v1605_v57 = vmul.f32 0.044715, %v3461_v50  ;;  %v3469_v59 = vadd.f32 %v3384_v53, %v1581_v5  ;;  %v1723_v61 = vadd.f32 1.0, %v2918_v52 }
 0x224   : > { %v1623_v45 = vmul.f32 %v1607_v58, %v3452_v42  ;;  %v1608_v62 = vmul.f32 0.044715, %v3465_v36  ;;  %v1721_v0 = vadd.f32 1.0, %v2920_v54  ;;  %v1665_v1 = vmul.f32 0.7978846, %v1649_v48 }
 0x225   : > { %v1621_v23 = vmul.f32 %v1605_v57, %v3461_v50  ;;  %v1606_v15 = vmul.f32 0.044715, %v3469_v59  ;;  %2925 = vrcp.f32 %v1723_v61  ;;  %v1666_v41 = vmul.f32 0.7978846, %v1650_v55  ;;  %v1846_v57 = vpop.permute.xlu0 %1845 }
 0x226   : > { %v2922_v4 = vpop.eup %2921  ;;  %v1639_v16 = vmul.f32 %v1623_v45, %v3452_v42  ;;  %v1624_v6 = vmul.f32 %v1608_v62, %v3465_v36  ;;  %2927 = vrcp.f32 %v1721_v0  ;;  %v1681_v53 = vmul.f32 2.0, %v1665_v1 }
 0x227   : > { %v2924_v7 = vpop.eup %2923  ;;  %v1637_v12 = vmul.f32 %v1621_v23, %v3461_v50  ;;  %v1622_v8 = vmul.f32 %v1606_v15, %v3469_v59  ;;  %v1722_v14 = vadd.f32 1.0, %v2922_v4  ;;  %2929 = vpow2.f32 %v1697_v30 }
 0x228   : > { %v1640_v13 = vmul.f32 %v1624_v6, %v3465_v36  ;;  %v1724_v43 = vadd.f32 1.0, %v2924_v7  ;;  %v1705_v17 = vmul.f32 1.442695, %v1681_v53  ;;  %v1682_v25 = vmul.f32 2.0, %v1666_v41 }
 0x229   : > { %v1638_v21 = vmul.f32 %v1622_v8, %v3469_v59  ;;  %2931 = vrcp.f32 %v1722_v14  ;;  %v1653_v19 = vadd.f32 %v1637_v12, %v3461_v50  ;;  %v1699_v31 = vmul.f32 1.442695, %v1678_v28 }
 0x22a   : > { %2933 = vrcp.f32 %v1724_v43  ;;  %v1667_v9 = vmul.f32 0.7978846, %v1651_v37  ;;  %v1655_v29 = vadd.f32 %v1639_v16, %v3452_v42  ;;  %v1707_v44 = vmul.f32 1.442695, %v1682_v25  ;;  %v1853_v25 = vpop.permute.xlu0 %1852 }
 0x22b   : > { %v1654_v27 = vadd.f32 %v1638_v21, %v3469_v59  ;;  %2935 = vpow2.f32 %v1705_v17  ;;  %v3491_v32 = vadd.f32 %v1640_v13, %v3465_v36  ;;  %v1663_v46 = vmul.f32 0.7978846, %v3438_v38 }
 0x22c   : > { %2937 = vpow2.f32 %v1699_v31  ;;  %v1683_v34 = vmul.f32 2.0, %v1667_v9  ;;  %v3495_v48 = vmul.f32 0.5, %v3420_v3  ;;  %v1668_v49 = vmul.f32 0.7978846, %v1652_v20 }
 0x22d   : > { %2939 = vpow2.f32 %v1707_v44  ;;  %v1664_v37 = vmul.f32 0.7978846, %v3444_v26  ;;  %v1679_v51 = vmul.f32 2.0, %v1663_v46  ;;  %v3499_v52 = vmul.f32 0.5, %v3392_v40 }
 0x22e   : > { %v1709_v10 = vmul.f32 1.442695, %v1683_v34  ;;  %v1669_v58 = vmul.f32 0.7978846, %v1653_v19  ;;  %v1684_v30 = vmul.f32 2.0, %v1668_v49  ;;  %v3502_v28 = vmul.f32 0.5, %v3430_v22 }
 0x22f   : > { %v2926_v5 = vpop.eup %2925  ;;  %v1680_v54 = vmul.f32 2.0, %v1664_v37  ;;  %v1670_v38 = vmul.f32 0.7978846, %v1654_v27  ;;  %v1701_v61 = vmul.f32 1.442695, %v1679_v51  ;;  %v3505_v16 = vmul.f32 0.5, %v3403_v39 }
 0x230   : > { %v2928_v55 = vpop.eup %2927  ;;  %v1742_v3 = vmul.f32 2.0, %v2926_v5  ;;  %2941 = vpow2.f32 %v1709_v10  ;;  %v1685_v45 = vmul.f32 2.0, %v1669_v58  ;;  %v1711_v0 = vmul.f32 1.442695, %v1684_v30 }
 0x231   : > { %v2930_v26 = vpop.eup %2929  ;;  %v1738_v62 = vmul.f32 2.0, %v2928_v55  ;;  %v1703_v1 = vmul.f32 1.442695, %v1680_v54  ;;  %v1686_v40 = vmul.f32 2.0, %v1670_v38  ;;  %2943 = vpow2.f32 %v1701_v61 }
 0x232   : > { %v1771_v23 = vsub.f32 1.0, %v1742_v3  ;;  %v1725_v15 = vadd.f32 1.0, %v2930_v26  ;;  %v1713_v41 = vmul.f32 1.442695, %v1685_v45  ;;  %2945 = vpow2.f32 %v1711_v0  ;;  %v1860_v3 = vpop.permute.xlu0 %1859 }
 0x233   : > { %v2932_v4 = vpop.eup %2931  ;;  %v1769_v22 = vsub.f32 1.0, %v1738_v62  ;;  %v1715_v6 = vmul.f32 1.442695, %v1686_v40  ;;  %v3508_v8 = vmul.f32 0.5, %v3461_v50  ;;  %v1671_v17 = vmul.f32 0.7978846, %v1655_v29 }
 0x234   : > { %v2934_v53 = vpop.eup %2933  ;;  %v1740_v7 = vmul.f32 2.0, %v2932_v4  ;;  %v1803_v12 = vadd.f32 1.0, %v1771_v23  ;;  %2947 = vrcp.f32 %v1725_v15 }
 0x235   : > { %v2936_v14 = vpop.eup %2935  ;;  %v1801_v13 = vadd.f32 1.0, %v1769_v22  ;;  %v1744_v43 = vmul.f32 2.0, %v2934_v53  ;;  %2949 = vpow2.f32 %v1703_v1  ;;  %v1687_v37 = vmul.f32 2.0, %v1671_v17 }
 0x236   : > { %v2938_v20 = vpop.eup %2937  ;;  %v1770_v21 = vsub.f32 1.0, %v1740_v7  ;;  %v1819_v19 = vmul.f32 %v1803_v12, %v3394_v35  ;;  %v1729_v39 = vadd.f32 1.0, %v2936_v14  ;;  %2951 = vpow2.f32 %v1713_v41 }
 0x237   : > { %v2940_v31 = vpop.eup %2939  ;;  %v1817_v9 = vmul.f32 %v1801_v13, %v3399_v33  ;;  %v1772_v27 = vsub.f32 1.0, %v1744_v43  ;;  %v1726_v44 = vadd.f32 1.0, %v2938_v20  ;;  %2953 = vpow2.f32 %v1715_v6 }
 0x238   : > { %v1802_v50 = vadd.f32 1.0, %v1770_v21  ;;  %v1947_v34 = vmul.f32 %v1853_v25, %v1819_v19  ;;  %2955 = vrcp.f32 %v1729_v39  ;;  %v1730_v46 = vadd.f32 1.0, %v2940_v31 }
 0x239   : > { %v1945_v49 = vmul.f32 %v3486_v24, %v1817_v9  ;;  %v1804_v29 = vadd.f32 1.0, %v1772_v27  ;;  %2957 = vrcp.f32 %v1726_v44  ;;  %v1672_v33 = vmul.f32 0.7978846, %v3491_v32 }
 0x23a   : > { %v2942_v10 = vpop.eup %2941  ;;  %v1818_v35 = vmul.f32 %v1802_v50, %v3422_v11  ;;  %v1982_v51 = vsel %vm767_vm1, %v1947_v34, 0.0  ;;  %2959 = vrcp.f32 %v1730_v46  ;;  %v1717_v61 = vmul.f32 1.442695, %v1687_v37 }
 0x23b   : > { %v1968_v58 = vsel %vm767_vm1, %v1945_v49, 0.0  ;;  %v1983_v5 = vrot.slane %v1982_v51, 4  ;;  %v1820_v30 = vmul.f32 %v1804_v29, %v3414_v56  ;;  %v1731_v54 = vadd.f32 1.0, %v2942_v10  ;;  %v2944_v38 = vpop.eup %2943 }
 0x23c   : > { %v1969_v55 = vrot.slane %v1968_v58, 4  ;;  %v1946_v24 = vmul.f32 %v1846_v57, %v1818_v35  ;;  %v3518_v45 = vmul.f32 2.0, %v1672_v33  ;;  %v2946_v26 = vpop.eup %2945  ;;  %v1727_v0 = vadd.f32 1.0, %v2944_v38  ;;  %v1895_v33 = vpop.permute.xlu1 %1894 }
 0x23d   : > { %v1984_v11 = vadd.f32 %v1983_v5, %v1982_v51  ;;  %v1948_v62 = vmul.f32 %v1860_v3, %v1820_v30  ;;  %2961 = vrcp.f32 %v1731_v54  ;;  %v1732_v23 = vadd.f32 1.0, %v2946_v26 }
 0x23e   : > { %v2948_v1 = vpop.eup %2947  ;;  %v1970_v32 = vadd.f32 %v1969_v55, %v1968_v58  ;;  %v1975_v40 = vsel %vm767_vm1, %v1946_v24, 0.0  ;;  %2963 = vpow2.f32 %v1717_v61  ;;  %v1867_v58 = vpop.permute.xlu0 %1866 }
 0x23f   : > { %v2950_v56 = vpop.eup %2949  ;;  %v1976_v15 = vrot.slane %v1975_v40, 4  ;;  %v1985_v41 = vrot.slane %v1984_v11, 2  ;;  %v1989_v57 = vsel %vm767_vm1, %v1948_v62, 0.0  ;;  %v1746_v4 = vmul.f32 2.0, %v2948_v1 }
 0x240   : > { %v2952_v22 = vpop.eup %2951  ;;  %v1971_v6 = vrot.slane %v1970_v32, 2  ;;  %v1990_v53 = vrot.slane %v1989_v57, 4  ;;  %2965 = vrcp.f32 %v1727_v0  ;;  %v1728_v7 = vadd.f32 1.0, %v2950_v56 }
 0x241   : > { %v3522_v12 = vpop.eup %2953  ;;  %v1977_v14 = vadd.f32 %v1976_v15, %v1975_v40  ;;  %v1986_v13 = vadd.f32 %v1985_v41, %v1984_v11  ;;  %v1773_v43 = vsub.f32 1.0, %v1746_v4  ;;  %2967 = vrcp.f32 %v1732_v23 }
 0x242   : > { %v2956_v17 = vpop.eup %2955  ;;  %v1972_v20 = vadd.f32 %v1971_v6, %v1970_v32  ;;  %v1991_v21 = vadd.f32 %v1990_v53, %v1989_v57  ;;  %2969 = vrcp.f32 %v1728_v7  ;;  %v1733_v25 = vadd.f32 1.0, %v2952_v22 }
 0x243   : > { %v2958_v19 = vpop.eup %2957  ;;  %v1978_v39 = vrot.slane %v1977_v14, 2  ;;  %v1987_v31 = vrot.slane %v1986_v13, 1  ;;  %v1754_v9 = vmul.f32 2.0, %v2956_v17  ;;  %v1805_v27 = vadd.f32 1.0, %v1773_v43  ;;  %v1902_v17 = vpop.permute.xlu1 %1901 }
 0x244   : > { %v2960_v44 = vpop.eup %2959  ;;  %v1973_v50 = vrot.slane %v1972_v20, 1  ;;  %v1992_v34 = vrot.slane %v1991_v21, 2  ;;  %v1748_v46 = vmul.f32 2.0, %v2958_v19  ;;  %2971 = vrcp.f32 %v1733_v25 }
 0x245   : > { %v1979_v49 = vadd.f32 %v1978_v39, %v1977_v14  ;;  %v1988_v29 = vadd.f32 %v1987_v31, %v1986_v13  ;;  %v1777_v37 = vsub.f32 1.0, %v1754_v9  ;;  %v1821_v10 = vmul.f32 %v1805_v27, %v3455_v47 }
 0x246   : > { %v1974_v35 = vadd.f32 %v1973_v50, %v1972_v20  ;;  %v1993_v51 = vadd.f32 %v1992_v34, %v1991_v21  ;;  %v1756_v5 = vmul.f32 2.0, %v2960_v44  ;;  %v1774_v30 = vsub.f32 1.0, %v1748_v46 }
 0x247   : > { %v2962_v54 = vpop.eup %2961  ;;  %v1980_v38 = vrot.slane %v1979_v49, 1  ;;  %v2082_v55 = vpack.c.bf16 %v1988_v29, %v1988_v29  ;;  %v1809_v24 = vadd.f32 1.0, %v1777_v37  ;;  %v1949_v3 = vmul.f32 %v1867_v58, %v1821_v10 }
 0x248   : > { %v3525_v61 = vpop.eup %2963  ;;  %v2080_v26 = vpack.c.bf16 %v1974_v35, %v1974_v35  ;;  %v1994_v11 = vrot.slane %v1993_v51, 1  ;;  %v1778_v62 = vsub.f32 1.0, %v1756_v5  ;;  %v1806_v0 = vadd.f32 1.0, %v1774_v30 }
 0x249   : > { %v1981_v1 = vadd.f32 %v1980_v38, %v1979_v49  ;;  %v2122_v47 = vunpack.c.l.b16 %v2082_v55  ;;  %v1825_v32 = vmul.f32 %v1809_v24, %v3448_v60  ;;  %v1996_v40 = vsel %vm767_vm1, %v1949_v3, 0.0  ;;  %v1874_v60 = vpop.permute.xlu0 %1873  ;;  %v1909_v38 = vpop.permute.xlu1 %1908 }
 0x24a   : > { %v2966_v23 = vpop.eup %2965  ;;  %v2120_v56 = vunpack.c.l.b16 %v2080_v26  ;;  %v1995_v15 = vadd.f32 %v1994_v11, %v1993_v51  ;;  %v1997_v41 = vrot.slane %v1996_v40, 4  ;;  %v1810_v57 = vadd.f32 1.0, %v1778_v62 }
 0x24b   : > { %v2968_v4 = vpop.eup %2967  ;;  %v2081_v22 = vpack.c.bf16 %v1981_v1, %v1981_v1  ;;  %v1953_v6 = vmul.f32 %v1895_v33, %v1825_v32  ;;  %v1822_v53 = vmul.f32 %v1806_v0, %v3481_v18  ;;  %v1758_v7 = vmul.f32 2.0, %v2962_v54 }
 0x24c   : > { %v2970_v14 = vpop.eup %2969  ;;  %v2083_v13 = vpack.c.bf16 %v1995_v15, %v1995_v15  ;;  %v1998_v43 = vadd.f32 %v1997_v41, %v1996_v40  ;;  %v1826_v20 = vmul.f32 %v1810_v57, %v3457_v63  ;;  %v1750_v21 = vmul.f32 2.0, %v2966_v23 }
 0x24d   : > { %v2121_v25 = vunpack.c.l.b16 %v2081_v22  ;;  %v2024_v19 = vsel %vm767_vm1, %v1953_v6, 0.0  ;;  %v1950_v39 = vmul.f32 %v1874_v60, %v1822_v53  ;;  %v1779_v31 = vsub.f32 1.0, %v1758_v7  ;;  %v1881_v62 = vpop.permute.xlu0 %1880 }
 0x24e   : > { %v3532_v9 = vpop.eup %2971  ;;  %v2123_v27 = vunpack.c.l.b16 %v2083_v13  ;;  %v2025_v44 = vrot.slane %v2024_v19, 4  ;;  %v1999_v50 = vrot.slane %v1998_v43, 2  ;;  %v1954_v18 = vmul.f32 %v1902_v17, %v1826_v20 }
 0x24f   : > { %v2137_v34 = vsel %vm2136_vm3, %v2121_v25, %v2120_v56  ;;  %v2003_v46 = vsel %vm767_vm1, %v1950_v39, 0.0  ;;  %v1811_v49 = vadd.f32 1.0, %v1779_v31  ;;  %v1775_v63 = vsub.f32 1.0, %v1750_v21 }
 0x250   : > { %v2139_v29 = vsel %vm2138_vm4, %v2122_v47, %v2137_v34  ;;  %v2026_v37 = vadd.f32 %v2025_v44, %v2024_v19  ;;  %v2000_v10 = vadd.f32 %v1999_v50, %v1998_v43  ;;  %v2031_v35 = vsel %vm767_vm1, %v1954_v18, 0.0  ;;  %v1916_v44 = vpop.permute.xlu1 %1915 }
 0x251   : > { %v2141_v51 = vsel %vm2140_vm5, %v2123_v27, %v2139_v29  ;;  %v2032_v33 = vrot.slane %v2031_v35, 4  ;;  %v2004_v58 = vrot.slane %v2003_v46, 4  ;;  %v1827_v5 = vmul.f32 %v1811_v49, %v3495_v48  ;;  %v1888_v19 = vpop.permute.xlu0 %1887 }
 0x252   : > { %v2027_v30 = vrot.slane %v2026_v37, 2  ;;  %v2001_v54 = vrot.slane %v2000_v10, 1  ;;  %v1807_v55 = vadd.f32 1.0, %v1775_v63  ;;  %v1760_v24 = vmul.f32 2.0, %v2968_v4 }
 0x253   : > { %v2033_v3 = vadd.f32 %v2032_v33, %v2031_v35  ;;  %v2005_v26 = vadd.f32 %v2004_v58, %v2003_v46  ;;  %v1955_v11 = vmul.f32 %v1909_v38, %v1827_v5  ;;  %v1752_v0 = vmul.f32 2.0, %v2970_v14 }
 0x254   : > { %v2028_v1 = vadd.f32 %v2027_v30, %v2026_v37  ;;  %v2002_v47 = vadd.f32 %v2001_v54, %v2000_v10  ;;  %v1823_v32 = vmul.f32 %v1807_v55, %v3499_v52  ;;  %v1780_v40 = vsub.f32 1.0, %v1760_v24 }
 0x255   : > { %v2034_v23 = vrot.slane %v2033_v3, 2  ;;  %v2006_v56 = vrot.slane %v2005_v26, 2  ;;  %v2038_v15 = vsel %vm767_vm1, %v1955_v11, 0.0  ;;  %v1776_v48 = vsub.f32 1.0, %v1752_v0 }
 0x256   : > { %v2029_v41 = vrot.slane %v2028_v1, 1  ;;  %v2084_v57 = vpack.c.bf16 %v2002_v47, %v2002_v47  ;;  %v2039_v22 = vrot.slane %v2038_v15, 4  ;;  %v1951_v4 = vmul.f32 %v1881_v62, %v1823_v32 }
 0x257   : > { %v2035_v6 = vadd.f32 %v2034_v23, %v2033_v3  ;;  %v2007_v53 = vadd.f32 %v2006_v56, %v2005_v26  ;;  %v1812_v7 = vadd.f32 1.0, %v1780_v40  ;;  %v1808_v13 = vadd.f32 1.0, %v1776_v48  ;;  %v1923_v48 = vpop.permute.xlu1 %1922 }
 0x258   : > { %v2030_v14 = vadd.f32 %v2029_v41, %v2028_v1  ;;  %v2124_v43 = vunpack.c.l.b16 %v2084_v57  ;;  %v2040_v17 = vadd.f32 %v2039_v22, %v2038_v15  ;;  %v2010_v52 = vsel %vm767_vm1, %v1951_v4, 0.0 }
 0x259   : > { %v2036_v20 = vrot.slane %v2035_v6, 1  ;;  %v2008_v60 = vrot.slane %v2007_v53, 1  ;;  %v2011_v21 = vrot.slane %v2010_v52, 4  ;;  %v1828_v25 = vmul.f32 %v1812_v7, %v3502_v28 }
 0x25a   : > { %v2088_v39 = vpack.c.bf16 %v2030_v14, %v2030_v14  ;;  %v2143_v31 = vsel %vm2142_vm6, %v2124_v43, %v2141_v51  ;;  %v2041_v27 = vrot.slane %v2040_v17, 2  ;;  %v1824_v50 = vmul.f32 %v1808_v13, %v3505_v16 }
 0x25b   : > { %v2037_v18 = vadd.f32 %v2036_v20, %v2035_v6  ;;  %v2009_v34 = vadd.f32 %v2008_v60, %v2007_v53  ;;  %v2012_v46 = vadd.f32 %v2011_v21, %v2010_v52  ;;  %v1956_v49 = vmul.f32 %v1916_v44, %v1828_v25  ;;  %v2998_v20 = vld [vmem:[%s3185_s26 + $0x8] sm:$0xff] }
 0x25c   : > { %v2128_v63 = vunpack.c.l.b16 %v2088_v39  ;;  %v2042_v29 = vadd.f32 %v2041_v27, %v2040_v17  ;;  %v1952_v37 = vmul.f32 %v1888_v19, %v1824_v50  ;;  %v1762_v10 = vmul.f32 2.0, %v3532_v9 }
 0x25d   : > { %v2089_v35 = vpack.c.bf16 %v2037_v18, %v2037_v18  ;;  %v2085_v33 = vpack.c.bf16 %v2009_v34, %v2009_v34  ;;  %v2013_v28 = vrot.slane %v2012_v46, 2  ;;  %v2045_v58 = vsel %vm767_vm1, %v1956_v49, 0.0 }
 0x25e   : > { %v2043_v5 = vrot.slane %v2042_v29, 1  ;;  %v2046_v51 = vrot.slane %v2045_v58, 4  ;;  %v2017_v30 = vsel %vm767_vm1, %v1952_v37, 0.0  ;;  %v1781_v54 = vsub.f32 1.0, %v1762_v10 }
 0x25f   : > { %v2129_v16 = vunpack.c.l.b16 %v2089_v35  ;;  %v2125_v38 = vunpack.c.l.b16 %v2085_v33  ;;  %v2014_v55 = vadd.f32 %v2013_v28, %v2012_v46  ;;  %v2018_v24 = vrot.slane %v2017_v30, 4 }
 0x260   : > { %v2044_v3 = vadd.f32 %v2043_v5, %v2042_v29  ;;  %v2047_v26 = vadd.f32 %v2046_v51, %v2045_v58  ;;  %v1813_v11 = vadd.f32 1.0, %v1781_v54  ;;  %v1734_v62 = vadd.f32 1.0, %v3522_v12  ;;  %v1930_v58 = vpop.permute.xlu1 %1929 }
 0x261   : > { %v2150_v9 = vsel %vm2136_vm3, %v2129_v16, %v2128_v63  ;;  %v2145_v0 = vsel %vm2144_vm7, %v2125_v38, %v2143_v31  ;;  %v2015_v1 = vrot.slane %v2014_v55, 1  ;;  %v2019_v47 = vadd.f32 %v2018_v24, %v2017_v30 }
 0x262   : > { %v2090_v32 = vpack.c.bf16 %v2044_v3, %v2044_v3  ;;  %v2048_v40 = vrot.slane %v2047_v26, 2  ;;  %v1829_v23 = vmul.f32 %v1813_v11, %v3508_v8  ;;  %2973 = vrcp.f32 %v1734_v62 }
 0x263   : > { %v2016_v56 = vadd.f32 %v2015_v1, %v2014_v55  ;;  %v2020_v15 = vrot.slane %v2019_v47, 2  ;;  %v1735_v41 = vadd.f32 1.0, %v3525_v61  ;;  %v1719_v57 = vmul.f32 1.442695, %v3518_v45  ;;  %v2997_v45 = vld [vmem:[%s3185_s26] sm:$0xff] }
 0x264   : > { %v2130_v12 = vunpack.c.l.b16 %v2090_v32  ;;  %v2049_v22 = vadd.f32 %v2048_v40, %v2047_v26  ;;  %v1957_v4 = vmul.f32 %v1923_v48, %v1829_v23  ;;  %v1962_v17 = vsel %vm1961_vm9, %v2997_v45, 0.0 }
 0x265   : > { %v2086_v6 = vpack.c.bf16 %v2016_v56, %v2016_v56  ;;  %v2021_v53 = vadd.f32 %v2020_v15, %v2019_v47  ;;  %2975 = vrcp.f32 %v1735_v41  ;;  %1963 = vadd.xlane.f32.xlu0 %v1962_v17  ;;  %v1965_v60 = vsel %vm1961_vm9, %v2998_v20, 0.0 }
 0x266   : > { %v2151_v8 = vsel %vm2138_vm4, %v2130_v12, %v2150_v9  ;;  %v2050_v7 = vrot.slane %v2049_v22, 1  ;;  %v2052_v13 = vsel %vm767_vm1, %v1957_v4, 0.0  ;;  %2977 = vpow2.f32 %v1719_v57  ;;  %1966 = vadd.xlane.f32.xlu1 %v1965_v60 }
 0x267   : > { %v2126_v14 = vunpack.c.l.b16 %v2086_v6  ;;  %v2022_v61 = vrot.slane %v2021_v53, 1  ;;  %v2053_v43 = vrot.slane %v2052_v13, 4  ;;  %v1798_v5 = vmul.f32 0.5, %v3469_v59 }
 0x268   : > { %v2051_v52 = vadd.f32 %v2050_v7, %v2049_v22  ;;  %v1799_v55 = vmul.f32 0.5, %v3452_v42  ;;  %v1800_v6 = vmul.f32 0.5, %v3465_v36 }
 0x269   : > { %v2147_v21 = vsel %vm2146_vm8, %v2126_v14, %v2145_v0  ;;  %v2023_v25 = vadd.f32 %v2022_v61, %v2021_v53  ;;  %v2054_v19 = vadd.f32 %v2053_v43, %v2052_v13  ;;  %v1937_v0 = vpop.permute.xlu1 %1936 }
 0x26a   : > { %v2091_v39 = vpack.c.bf16 %v2051_v52, %v2051_v52 }
 0x26b   : > { %v2087_v31 = vpack.c.bf16 %v2023_v25, %v2023_v25  ;;  %v2055_v27 = vrot.slane %v2054_v19, 2 }
 0x26c   : > { %v2974_v44 = vpop.eup %2973  ;;  %v2131_v50 = vunpack.c.l.b16 %v2091_v39 }
 0x26d   : > { %v2127_v18 = vunpack.c.l.b16 %v2087_v31  ;;  %v2056_v34 = vadd.f32 %v2055_v27, %v2054_v19  ;;  %v1764_v46 = vmul.f32 2.0, %v2974_v44  ;;  %v1944_v7 = vpop.permute.xlu1 %1943 }
 0x26e   : > { %v2152_v49 = vsel %vm2140_vm5, %v2131_v50, %v2151_v8 }
 0x26f   : > { %v2976_v63 = vpop.eup %2975  ;;  %v2149_v29 = vsel %vm2148_vm10, %v2127_v18, %v2147_v21  ;;  %v2057_v37 = vrot.slane %v2056_v34, 1  ;;  %v1782_v10 = vsub.f32 1.0, %v1764_v46  ;;  %v2652_v46 = vld [vmem:[%s3676_s10] ss:$0 sm:$0xff] }
 0x270   : > { %v2978_v35 = vpop.eup %2977  ;;  %v1766_v33 = vmul.f32 2.0, %v2976_v63 }
 0x271   : > { %v2058_v28 = vadd.f32 %v2057_v37, %v2056_v34  ;;  %v1814_v51 = vadd.f32 1.0, %v1782_v10  ;;  %v1736_v30 = vadd.f32 1.0, %v2978_v35 }
 0x272   : > { %v1783_v54 = vsub.f32 1.0, %v1766_v33 }
 0x273   : > { %v2092_v16 = vpack.c.bf16 %v2058_v28, %v2058_v28  ;;  %v1830_v38 = vmul.f32 %v1814_v51, %v1798_v5  ;;  %2979 = vrcp.f32 %v1736_v30 }
 0x274   : > { %v1815_v24 = vadd.f32 1.0, %v1783_v54  ;;  %v2999_v54 = vld [vmem:[%s3149_s23] sm:$0xff] }
 0x275   : > { %v2132_v3 = vunpack.c.l.b16 %v2092_v16  ;;  %v1958_v26 = vmul.f32 %v1930_v58, %v1830_v38 }
 0x276   : > { %v1831_v11 = vmul.f32 %v1815_v24, %v1799_v55  ;;  %v3000_v55 = vld [vmem:[%s3149_s23 + $0x8] sm:$0xff] }
 0x277   : > { %v2153_v62 = vsel %vm2142_vm6, %v2132_v3, %v2152_v49  ;;  %v2059_v9 = vsel %vm767_vm1, %v1958_v26, 0.0 }
 0x278   : > { %v2060_v1 = vrot.slane %v2059_v9, 4  ;;  %v1959_v47 = vmul.f32 %v1937_v0, %v1831_v11 }
 0x27a   : > { %v2061_v59 = vadd.f32 %v2060_v1, %v2059_v9  ;;  %v2066_v32 = vsel %vm767_vm1, %v1959_v47, 0.0 }
 0x27b   : > { %v2067_v40 = vrot.slane %v2066_v32, 4 }
 0x27c   : > { %v2062_v23 = vrot.slane %v2061_v59, 2 }
 0x27d   : > { %v2980_v56 = vpop.eup %2979  ;;  %v2068_v15 = vadd.f32 %v2067_v40, %v2066_v32 }
 0x27e   : > { %v2063_v48 = vadd.f32 %v2062_v23, %v2061_v59  ;;  %v1768_v42 = vmul.f32 2.0, %v2980_v56  ;;  %v2843_v23 = vld [vmem:[%s3679_s13] sm:$0xff]   ;;  %v2844_v56 = vld [vmem:[%s3679_s13 + $0x8] sm:$0xff]  }
 0x27f   : > { %v2069_v41 = vrot.slane %v2068_v15, 2 }
 0x280   : > { %v2064_v57 = vrot.slane %v2063_v48, 1  ;;  %v1784_v12 = vsub.f32 1.0, %v1768_v42 }
 0x281   : > { %v2070_v22 = vadd.f32 %v2069_v41, %v2068_v15 }
 0x282   : > { %v2065_v4 = vadd.f32 %v2064_v57, %v2063_v48  ;;  %v1816_v53 = vadd.f32 1.0, %v1784_v12 }
 0x283   : > { %v2071_v8 = vrot.slane %v2070_v22, 1 }
 0x284   : > { %v2093_v13 = vpack.c.bf16 %v2065_v4, %v2065_v4  ;;  %v1832_v14 = vmul.f32 %v1816_v53, %v1800_v6  ;;  %v2656_v6 = vld [vmem:[%s3677_s11] ss:$0 sm:$0xff] }
 0x285   : > { %v2072_v61 = vadd.f32 %v2071_v8, %v2070_v22 }
 0x286   : > { %v2133_v43 = vunpack.c.l.b16 %v2093_v13  ;;  %v1960_v45 = vmul.f32 %v1944_v7, %v1832_v14  ;;  %v2657_v13 = vld [vmem:[%s3678_s12] ss:$0 sm:$0xff] }
 0x287   : > { %v2094_v17 = vpack.c.bf16 %v2072_v61, %v2072_v61 }
 0x288   : > { %v2154_v52 = vsel %vm2144_vm7, %v2133_v43, %v2153_v62  ;;  %v2073_v20 = vsel %vm767_vm1, %v1960_v45, 0.0 }
 0x289   : > { %v2134_v60 = vunpack.c.l.b16 %v2094_v17  ;;  %v2074_v21 = vrot.slane %v2073_v20, 4  ;;  %v2845_v17 = vld [vmem:[%s3681_s15] sm:$0xff]  }
 0x28a   : > { %2790 = vmatpush3.bf16.msra.mxu1 %v2845_v17 }
 0x28b   : > { %v2155_v25 = vsel %vm2146_vm8, %v2134_v60, %v2154_v52  ;;  %v2075_v19 = vadd.f32 %v2074_v21, %v2073_v20  ;;  %v2846_v52 = vld [vmem:[%s3681_s15 + $0x8] sm:$0xff]   ;;  %2791 = vmatprep.subr.bf16.mxu1 %v3009_v2  ;;  %v2847_v20 = vld [vmem:[%s3681_s15 + $0x10] sm:$0xff]   ;;  %v2848_v60 = vld [vmem:[%s3681_s15 + $0x18] sm:$0xff]  }
 0x28c   : > { %v2849_v21 = vld [vmem:[%s3681_s15 + $0x20] sm:$0xff]  }
 0x28d   : > { %v2076_v39 = vrot.slane %v2075_v19, 2 }
 0x28e   : > { %2792 = vmatpush3.bf16.msra.mxu1 %v2846_v52 }
 0x28f   : > { %v2077_v36 = vadd.f32 %v2076_v39, %v2075_v19  ;;  %2793 = vmatprep.subr.bf16.mxu1 %v3009_v2  ;;  %v2851_v19 = vld [vmem:[%s3681_s15 + $0x30] sm:$0xff]   ;;  %v2852_v39 = vld [vmem:[%s3681_s15 + $0x38] sm:$0xff]  }
 0x291   : > { %v2078_v31 = vrot.slane %v2077_v36, 1 }
 0x292   : > { %2794 = vmatpush3.bf16.msra.mxu1 %v2847_v20 }
 0x293   : > { %v2079_v27 = vadd.f32 %v2078_v31, %v2077_v36  ;;  %2795 = vmatprep.subr.bf16.mxu1 %v3009_v2  ;;  %v2658_v36 = vld [vmem:[%s3680_s14] ss:$0 sm:$0xff] }
 0x295   : > { %v2095_v44 = vpack.c.bf16 %v2079_v27, %v2079_v27 }
 0x296   : > { %2796 = vmatpush3.bf16.msra.mxu1 %v2848_v60 }
 0x297   : > { %v2135_v50 = vunpack.c.l.b16 %v2095_v44  ;;  %2797 = vmatprep.subr.bf16.mxu1 %v3009_v2 }
 0x299   : > { %v2156_v18 = vsel %vm2148_vm10, %v2135_v50, %v2155_v25  ;;  %v2850_v25 = vld [vmem:[%s3681_s15 + $0x28] sm:$0xff]  }
 0x29a   : > { %v2157_v34 = vpack.c.b16 %v2156_v18, %v2149_v29  ;;  %2798 = vmatpush3.bf16.msra.mxu1 %v2849_v21  ;;  %v693_v21 = vld [vmem:[%s664_s21] sm:$0xff] }
 0x29b   : > { %2799 = vmatprep.subr.bf16.mxu1 %v3009_v2 }
 0x29c   : > { %2778 = vmatmul.mubr.msk.bf16.vlgmr.msra.gmra.mrb[20].mxu0 %vm767_vm1, %v2157_v34 }
 0x29d   : > { %2785 = vmatprep.mubr.msk.bf16.mxu0 %vm3010_vm0, %v3009_v2  ;;  %2782 = vmatpush3.bf16.msra.mxu0 %v2843_v23 }
 0x29e   : > { %2783 = vmatprep.subr.bf16.mxu0 %v3009_v2  ;;  %2800 = vmatpush3.bf16.msra.mxu1 %v2850_v25  ;;  %v694_v25 = vld [vmem:[%s664_s21 + $0x8] sm:$0xff] }
 0x29f   : > { %2801 = vmatprep.subr.bf16.mxu1 %v3009_v2 }
 0x2a1   : > { %2784 = vmatpush3.bf16.msra.mxu0 %v2844_v56  ;;  %v2662_v56 = vld [vmem:[%s3682_s16] ss:$0 sm:$0xff] }
 0x2a2   : > { %2802 = vmatpush3.bf16.msra.mxu1 %v2851_v19 }
 0x2a3   : > { %2803 = vmatprep.subr.bf16.mxu1 %v3009_v2 }
 0x2a6   : > { %2804 = vmatpush3.bf16.msra.mxu1 %v2852_v39 }
 0x2f2   : > { %v1964_v49 = vpop.xlane.xlu0 %1963 }
 0x2f3   : > { %v1967_v63 = vpop.xlane.xlu1 %1966  ;;  %v2102_v37 = vmul.f32 %v2652_v46, %v1964_v49 }
 0x2f4   : > { %v2103_v10 = vmul.f32 %v2652_v46, %v1967_v63 }
 0x36f   : > { %v2207_v35 = vpop.f32.mrb[20].mxu0 }
 0x370   : > { %v2208_v33 = vadd.f32 %v2207_v35, %v2102_v37  ;;  %v2779_v28 = vpop.f32.mrb[21].mxu0 }
 0x371   : > { %v2210_v58 = vpop.f32.mrb[22].mxu0 }
 0x372   : > { %v2214_v29 = vmul.f32 0.033333335, %v2208_v33  ;;  %v2211_v5 = vadd.f32 %v2210_v58, %v2103_v10  ;;  %v2780_v51 = vpop.f32.mrb[23].mxu0 }
 0x374   : > { %v2215_v30 = vmul.f32 0.033333335, %v2211_v5  ;;  %v2216_v16 = vadd.f32 %v2999_v54, %v2214_v29 }
 0x376   : > { %v2218_v38 = vsel %vm767_vm1, %v2216_v16, 0.0  ;;  %v2217_v24 = vadd.f32 %v3000_v55, %v2215_v30 }
 0x377   : > { %2219 = vadd.xlane.f32.xlu0 %v2218_v38 }
 0x378   : > { %v2221_v3 = vsel %vm767_vm1, %v2217_v24, 0.0 }
 0x37b   : > { %2222 = vadd.xlane.f32.xlu0 %v2221_v3 }
 0x404   : > { %v2220_v26 = vpop.xlane.xlu0 %2219 }
 0x405   : > { %v2225_v11 = vmul.f32 0.03125, %v2220_v26 }
 0x407   : > { %v2227_v62 = vsub.f32 %v2216_v16, %v2225_v11 }
 0x408   : > { %v2223_v9 = vpop.xlane.xlu0 %2222 }
 0x409   : > { %v2226_v0 = vmul.f32 0.03125, %v2223_v9  ;;  %v2229_v1 = vmul.f32 %v2227_v62, %v2227_v62 }
 0x40b   : > { %v2228_v47 = vsub.f32 %v2217_v24, %v2226_v0  ;;  %v2231_v59 = vsel %vm767_vm1, %v2229_v1, 0.0 }
 0x40c   : > { %2232 = vadd.xlane.f32.xlu1 %v2231_v59 }
 0x40d   : > { %v2230_v32 = vmul.f32 %v2228_v47, %v2228_v47 }
 0x40f   : > { %v2234_v40 = vsel %vm767_vm1, %v2230_v32, 0.0 }
 0x410   : > { %2235 = vadd.xlane.f32.xlu0 %v2234_v40 }
 0x499   : > { %v2233_v15 = vpop.xlane.xlu1 %2232 }
 0x49a   : > { %v2237_v48 = vmul.f32 0.03125, %v2233_v15 }
 0x49c   : > { %v2239_v42 = vadd.f32 1e-05, %v2237_v48 }
 0x49d   : > { %v2236_v41 = vpop.xlane.xlu0 %2235 }
 0x49e   : > { %2981 = vrsqrt.f32 %v2239_v42  ;;  %v2238_v57 = vmul.f32 0.03125, %v2236_v41 }
 0x4a0   : > { %v2240_v12 = vadd.f32 1e-05, %v2238_v57 }
 0x4a2   : > { %2983 = vrsqrt.f32 %v2240_v12 }
 0x4a8   : > { %v2982_v22 = vpop.eup %2981 }
 0x4a9   : > { %v2243_v4 = vmul.f32 %v2982_v22, %v2227_v62 }
 0x4ab   : > { %v2251_v8 = vmul.f32 %v2656_v6, %v2243_v4 }
 0x4ac   : > { %v2984_v53 = vpop.eup %2983 }
 0x4ad   : > { %v2244_v7 = vmul.f32 %v2984_v53, %v2228_v47  ;;  %v3597_v61 = vadd.f32 %v2657_v13, %v2251_v8  ;;  %v3012_v8 = vmov 0  }
 0x4ae   : > { %2821 = vset.pattern.permute.xlu1 %v3012_v8  ;;  %2822 = vset.pattern.permute.xlu0 %v3012_v8 }
 0x4af   : > { %v2252_v14 = vmul.f32 %v2656_v6, %v2244_v7 }
 0x4b1   : > { %v3599_v43 = vadd.f32 %v2657_v13, %v2252_v14 }
 0x4b3   : > { %v2261_v45 = vpack.c.bf16 %v3599_v43, %v3597_v61 }
 0x4b5   : > { %2786 = vmatmul.mubr.msk.bf16.vlgmr.msra.gmra.mrb[24].mxu0 %vm767_vm1, %v2261_v45 }
 0x588   : > { %v2317_v31 = vpop.f32.mrb[24].mxu0 }
 0x589   : > { %v2318_v27 = vadd.f32 %v2658_v36, %v2317_v31  ;;  %v2787_v44 = vpop.f32.mrb[25].mxu0 }
 0x58a   : > { %v2320_v50 = vpop.f32.mrb[26].mxu0 }
 0x58b   : > { %v2324_v18 = vmul.f32 0.044715, %v2318_v27  ;;  %v2321_v34 = vadd.f32 %v2658_v36, %v2320_v50  ;;  %v2788_v46 = vpop.f32.mrb[27].mxu0  ;;  %v2348_v1 = vmul.f32 0.5, %v2318_v27 }
 0x58d   : > { %v2326_v49 = vmul.f32 %v2324_v18, %v2318_v27  ;;  %v2325_v63 = vmul.f32 0.044715, %v2321_v34  ;;  %v2349_v47 = vmul.f32 0.5, %v2321_v34  ;;  %v2671_v18 = vld [vmem:[%s3683_s17] ss:$0 sm:$0xff] }
 0x58f   : > { %v2328_v37 = vmul.f32 %v2326_v49, %v2318_v27  ;;  %v2327_v10 = vmul.f32 %v2325_v63, %v2321_v34  ;;  %v2672_v49 = vld [vmem:[%s3684_s18] ss:$0 sm:$0xff] }
 0x591   : > { %v2330_v35 = vadd.f32 %v2328_v37, %v2318_v27  ;;  %v2329_v33 = vmul.f32 %v2327_v10, %v2321_v34 }
 0x593   : > { %v2332_v28 = vmul.f32 0.7978846, %v2330_v35  ;;  %v2331_v2 = vadd.f32 %v2329_v33, %v2321_v34 }
 0x595   : > { %v2334_v58 = vmul.f32 2.0, %v2332_v28  ;;  %v2333_v29 = vmul.f32 0.7978846, %v2331_v2 }
 0x597   : > { %v2336_v5 = vmul.f32 1.442695, %v2334_v58  ;;  %v2335_v51 = vmul.f32 2.0, %v2333_v29 }
 0x599   : > { %2985 = vpow2.f32 %v2336_v5  ;;  %v2338_v30 = vmul.f32 1.442695, %v2335_v51 }
 0x59b   : > { %2987 = vpow2.f32 %v2338_v30 }
 0x5a3   : > { %v2986_v54 = vpop.eup %2985 }
 0x5a4   : > { %v2340_v16 = vadd.f32 1.0, %v2986_v54 }
 0x5a5   : > { %v2988_v38 = vpop.eup %2987 }
 0x5a6   : > { %2989 = vrcp.f32 %v2340_v16  ;;  %v2341_v55 = vadd.f32 1.0, %v2988_v38 }
 0x5a8   : > { %2991 = vrcp.f32 %v2341_v55 }
 0x5b0   : > { %v2990_v24 = vpop.eup %2989 }
 0x5b1   : > { %v2343_v3 = vmul.f32 2.0, %v2990_v24 }
 0x5b2   : > { %v2992_v26 = vpop.eup %2991 }
 0x5b3   : > { %v2345_v11 = vmul.f32 2.0, %v2992_v26  ;;  %v2346_v62 = vsub.f32 1.0, %v2343_v3 }
 0x5b5   : > { %v2347_v9 = vsub.f32 1.0, %v2345_v11  ;;  %v2350_v0 = vadd.f32 1.0, %v2346_v62 }
 0x5b7   : > { %v2351_v59 = vadd.f32 1.0, %v2347_v9  ;;  %v2352_v32 = vmul.f32 %v2350_v0, %v2348_v1 }
 0x5b9   : > { %v2353_v40 = vmul.f32 %v2351_v59, %v2349_v47 }
 0x5bb   : > { %v2354_v23 = vpack.c.bf16 %v2353_v40, %v2352_v32 }
 0x5bd   : > { %2806 = vmatmul.mubr.bf16.vlgmr.msra.gmra.mrb[16].mxu1 %v2354_v23 }
 0x690   : > { %v2443_v15 = vpop.f32.mrb[16].mxu1 }
 0x691   : > { %v2444_v48 = vadd.f32 %v2662_v56, %v2443_v15  ;;  %v2807_v42 = vpop.f32.mrb[17].mxu1 }
 0x692   : > { %v2446_v41 = vpop.f32.mrb[18].mxu1 }
 0x693   : > { %v2447_v57 = vadd.f32 %v2662_v56, %v2446_v41  ;;  %v2808_v12 = vpop.f32.mrb[19].mxu1  ;;  %v2450_v22 = vadd.f32 %v2444_v48, %v3597_v61 }
 0x695   : > { %v2452_v4 = vsel %vm767_vm1, %v2450_v22, 0.0  ;;  %v2451_v6 = vadd.f32 %v2447_v57, %v3599_v43 }
 0x696   : > { %2453 = vadd.xlane.f32.xlu1 %v2452_v4 }
 0x697   : > { %v2455_v53 = vsel %vm767_vm1, %v2451_v6, 0.0 }
 0x698   : > { %2456 = vadd.xlane.f32.xlu0 %v2455_v53 }
 0x723   : > { %v2454_v7 = vpop.xlane.xlu1 %2453 }
 0x724   : > { %v2458_v13 = vmul.f32 0.03125, %v2454_v7 }
 0x725   : > { %v2457_v14 = vpop.xlane.xlu0 %2456 }
 0x726   : > { %v2460_v45 = vsub.f32 %v2450_v22, %v2458_v13  ;;  %v2459_v17 = vmul.f32 0.03125, %v2457_v14 }
 0x728   : > { %v2461_v52 = vsub.f32 %v2451_v6, %v2459_v17  ;;  %v2462_v20 = vmul.f32 %v2460_v45, %v2460_v45 }
 0x72a   : > { %v2464_v61 = vsel %vm767_vm1, %v2462_v20, 0.0  ;;  %v2463_v60 = vmul.f32 %v2461_v52, %v2461_v52 }
 0x72b   : > { %2465 = vadd.xlane.f32.xlu1 %v2464_v61 }
 0x72c   : > { %v2467_v43 = vsel %vm767_vm1, %v2463_v60, 0.0 }
 0x72d   : > { %2468 = vadd.xlane.f32.xlu0 %v2467_v43 }
 0x73c   : > { %2496 = vperm.xlu1 %2821, %v693_v21  }
 0x743   : > { %2501 = vperm.xlu0 %2822, %v694_v25  }
 0x7b8   : > { %v2466_v19 = vpop.xlane.xlu1 %2465 }
 0x7b9   : > { %v2470_v39 = vmul.f32 0.03125, %v2466_v19 }
 0x7ba   : > { %v2469_v36 = vpop.xlane.xlu0 %2468 }
 0x7bb   : > { %v2472_v31 = vadd.f32 1e-05, %v2470_v39  ;;  %v2471_v27 = vmul.f32 0.03125, %v2469_v36 }
 0x7bc   : > { %v2497_v10 = vpop.permute.xlu1 %2496 }
 0x7bd   : > { %2993 = vrsqrt.f32 %v2472_v31  ;;  %v2473_v44 = vadd.f32 1e-05, %v2471_v27 }
 0x7bf   : > { %2995 = vrsqrt.f32 %v2473_v44 }
 0x7c2   : > { %v2502_v28 = vpop.permute.xlu0 %2501 }
 0x7c7   : > { %v2994_v50 = vpop.eup %2993 }
 0x7c8   : > { %v2476_v34 = vmul.f32 %v2994_v50, %v2460_v45 }
 0x7c9   : > { %v2996_v46 = vpop.eup %2995 }
 0x7ca   : > { %v2484_v63 = vmul.f32 %v2671_v18, %v2476_v34  ;;  %v2477_v37 = vmul.f32 %v2996_v46, %v2461_v52 }
 0x7cc   : > { %v2492_v35 = vadd.f32 %v2672_v49, %v2484_v63  ;;  %v2485_v33 = vmul.f32 %v2671_v18, %v2477_v37 }
 0x7ce   : > { %v2504_v2 = vmul.f32 %v2497_v10, %v2492_v35  ;;  %v2493_v58 = vadd.f32 %v2672_v49, %v2485_v33 }
 0x7d0   : > { %2506 = vst.msk [vmem:[%s670_s25] sm:$0xff] %vm767_vm1, %v2504_v2  ;;  %v2505_v29 = vmul.f32 %v2502_v28, %v2493_v58 }
 0x7d2   : > { %2507 = vst.msk [vmem:[%s670_s25 + $0x8] sm:$0xff] %vm767_vm1, %v2505_v29 }
 0x7d3 PF: > { %s29_s0 = sadd.s32 1, %s3007_s0  }
 0x7d4   : > { %p26_p5 = scmp.ge.s32.totalorder %s29_s0, 6  }
 0x7d6   :  { %28 = sbr.rel (!%p26_p5) target bundleno = 5 (0x5), region = 135 }

</bundles_post_ra>
